<compile_context>
chip_gen: v5e
topology: v5e:2x2
jax: 0.10.0
libtpu: 0.0.40
codegen_flags: <defaults>
</compile_context>

<pallas_src>
import jax
import jax.numpy as jnp
from jax.experimental import pallas as pl
from jax.experimental.pallas import tpu as pltpu

# ----------------------- model hyper-parameters (small) ---------------------
PATCH = 14            # dinov2_*14 patch size
BACKBONE_DIM = 128    # stands in for self.model.embed_dim (768 for vitb14)
HIDDEN = 512          # projection1 output / LayerNorm width (hard-coded)
EMBED_DIM = 512       # embedding_dim (projection2 output)
LN_EPS = 1e-5

PATCH_DIM = 3 * PATCH * PATCH                     # 588


def _round_up(v, mult):
    return -(-v // mult) * mult


def _budgets():
    """(max token tile, vmem_limit_bytes) tuned per TPU generation."""
    try:
        vmem_cap = int(pltpu.get_tpu_info().vmem_capacity_bytes)
    except Exception:
        vmem_cap = 64 * 1024 * 1024            # assume the small-VMEM generation
    if vmem_cap >= 96 * 1024 * 1024:           # v5e / v6e: 128 MiB VMEM
        return 2048, 64 * 1024 * 1024
    return 1024, 40 * 1024 * 1024              # v7x: 64 MiB VMEM


def _pick_token_tile(m, max_tile):
    """Token tile: multiple of 16 (bf16), >= 2 grid steps when possible."""
    m16 = _round_up(m, 16)
    if m16 <= 256:
        return m16                              # single small tile
    half = _round_up((m16 + 1) // 2, 16)        # >= 2 steps -> v7x megacore
    return min(max_tile, half)


# ----------------------------- Pallas kernel --------------------------------
def _fused_kernel(xp_ref, wpe_ref, bpe_ref, w1_ref, b1_ref, g_ref, beta_ref,
                  w2_ref, b2_ref, o_ref):
    """patch-embed -> projection1 -> LayerNorm -> projection2 on a token tile.

    Matmul operands are bf16, accumulation is f32 (preferred_element_type);
    LayerNorm statistics are f32.  Output is written in bf16.
    """
    # patch-embed: (TM, 588) bf16 @ (588, E) bf16 -> f32.  K=588 is the full
    # array dim; Mosaic masks the ragged tail of the contraction.
    p = jnp.dot(xp_ref[...], wpe_ref[...], preferred_element_type=jnp.float32)
    p = p + bpe_ref[...]

    # projection1
    h = jnp.dot(p.astype(jnp.bfloat16), w1_ref[...],
                preferred_element_type=jnp.float32)
    h = h + b1_ref[...]

    # LayerNorm over HIDDEN, one-pass statistics (f32)
    mu = jnp.mean(h, axis=-1, keepdims=True)
    ms = jnp.mean(h * h, axis=-1, keepdims=True)
    var = ms - mu * mu
    hn = (h - mu) * jax.lax.rsqrt(var + LN_EPS)
    hn = hn * g_ref[...] + beta_ref[...]

    # projection2
    out = jnp.dot(hn.astype(jnp.bfloat16), w2_ref[...],
                  preferred_element_type=jnp.float32)
    o_ref[...] = (out + b2_ref[...]).astype(o_ref.dtype)


# ------------------------------- wrapper -------------------------------------
def _fused_head(xp, wpe, bpe, w1, b1, gamma, beta, w2, b2, *, tm, vmem_limit):
    m, kdim = xp.shape
    grid = (m // tm,)

    flops = 2 * m * (kdim * BACKBONE_DIM + BACKBONE_DIM * HIDDEN
                     + HIDDEN * EMBED_DIM)
    bytes_accessed = (
        m * kdim * 2                      # xp (bf16) read
        + m * EMBED_DIM * 2               # out (bf16) write
        + sum(int(a.size) * a.dtype.itemsize
              for a in (wpe, bpe, w1, b1, gamma, beta, w2, b2)))

    return pl.pallas_call(
        _fused_kernel,
        out_shape=jax.ShapeDtypeStruct((m, EMBED_DIM), jnp.bfloat16),
        grid_spec=pltpu.PrefetchScalarGridSpec(
            num_scalar_prefetch=0,
            grid=grid,
            in_specs=[
                pl.BlockSpec((tm, kdim), lambda i: (i, 0)),
                pl.BlockSpec((kdim, BACKBONE_DIM), lambda i: (0, 0)),
                pl.BlockSpec((1, BACKBONE_DIM), lambda i: (0, 0)),
                pl.BlockSpec((BACKBONE_DIM, HIDDEN), lambda i: (0, 0)),
                pl.BlockSpec((1, HIDDEN), lambda i: (0, 0)),
                pl.BlockSpec((1, HIDDEN), lambda i: (0, 0)),
                pl.BlockSpec((1, HIDDEN), lambda i: (0, 0)),
                pl.BlockSpec((HIDDEN, EMBED_DIM), lambda i: (0, 0)),
                pl.BlockSpec((1, EMBED_DIM), lambda i: (0, 0)),
            ],
            out_specs=pl.BlockSpec((tm, EMBED_DIM), lambda i: (i, 0)),
        ),
        compiler_params=pltpu.CompilerParams(
            dimension_semantics=("parallel",),
            vmem_limit_bytes=vmem_limit,
        ),
        cost_estimate=pl.CostEstimate(
            flops=flops, transcendentals=m, bytes_accessed=bytes_accessed),
    )(xp, wpe, bpe, w1, b1, gamma, beta, w2, b2)


def init_params(key):
    ks = jax.random.split(key, 4)
    return {
        # patch-embed conv weight, (ph, pw, C)-major rows -> (PATCH_DIM, E).
        # (A real DINOv2 conv weight (E, C, ph, pw) would be permuted to match.)
        "w_pe": jax.random.normal(ks[0], (PATCH_DIM, BACKBONE_DIM), jnp.float32) * 0.02,
        "b_pe": jnp.zeros((1, BACKBONE_DIM), jnp.float32),
        # projection1: Linear(BACKBONE_DIM, 512)
        "w1": jax.random.normal(ks[1], (BACKBONE_DIM, HIDDEN), jnp.float32) * 0.02,
        "b1": jax.random.normal(ks[2], (1, HIDDEN), jnp.float32) * 0.02,
        # LayerNorm(512): torch default init
        "gamma": jnp.ones((1, HIDDEN), jnp.float32),
        "beta": jnp.zeros((1, HIDDEN), jnp.float32),
        # projection2: Linear(512, EMBED_DIM)
        "w2": jax.random.normal(ks[3], (HIDDEN, EMBED_DIM), jnp.float32) * 0.02,
        "b2": jnp.zeros((1, EMBED_DIM), jnp.float32),
    }


@jax.jit
def vit_embedder_forward(x, params):
    """x: (B, 3, H, W) NCHW image batch -> (B, Nv, EMBED_DIM) bf16."""
    # shape normalization from the torch forward (squeeze(0) is a no-op unless
    # the leading dim is 1, matching torch semantics)
    if x.ndim == 5 and x.shape[0] == 1:
        x = jnp.squeeze(x, axis=0)
    if x.ndim == 3:
        x = x[None, ...]
    b, c, h, w = x.shape
    gh, gw = h // PATCH, w // PATCH
    n_tok = gh * gw
    patch_dim = c * PATCH * PATCH

    # Cast to bf16 BEFORE any layout-changing copy (halves bytes moved), then
    # NCHW -> NHWC and unfold with (ph, pw, C)-major patch features so the
    # contiguous channel axis stays last (lane friendly).  No K padding.
    xb = x.astype(jnp.bfloat16)
    xh = jnp.transpose(xb, (0, 2, 3, 1))                      # (B, H, W, C)
    xp = xh.reshape(b, gh, PATCH, gw, PATCH, c)
    xp = xp.transpose(0, 1, 3, 2, 4, 5).reshape(b * n_tok, patch_dim)

    m = b * n_tok
    max_tile, vmem_limit = _budgets()
    tm = _pick_token_tile(m, max_tile)
    m_pad = _round_up(m, tm)
    if m_pad != m:
        # zero-pad the token axis only when needed; padded rows are inert in
        # the dots, finite through LayerNorm, and sliced off below.
        xp = jnp.pad(xp, ((0, m_pad - m), (0, 0)))

    feats = _fused_head(
        xp,
        params["w_pe"].astype(jnp.bfloat16), params["b_pe"],
        params["w1"].astype(jnp.bfloat16), params["b1"],
        params["gamma"], params["beta"],
        params["w2"].astype(jnp.bfloat16), params["b2"],
        tm=tm, vmem_limit=vmem_limit)
    return feats[:m].reshape(b, n_tok, EMBED_DIM)


def _reference_forward(x, params):
    """Plain-JAX reference with the same bf16/f32 precision policy (f32 out)."""
    b, c, h, w = x.shape
    gh, gw = h // PATCH, w // PATCH
    patch_dim = c * PATCH * PATCH
    xh = jnp.transpose(x.astype(jnp.bfloat16), (0, 2, 3, 1))
    xp = xh.reshape(b, gh, PATCH, gw, PATCH, c)
    xp = xp.transpose(0, 1, 3, 2, 4, 5).reshape(b * gh * gw, patch_dim)

    p = jnp.dot(xp, params["w_pe"].astype(jnp.bfloat16),
                preferred_element_type=jnp.float32) + params["b_pe"]
    hdn = jnp.dot(p.astype(jnp.bfloat16), params["w1"].astype(jnp.bfloat16),
                  preferred_element_type=jnp.float32) + params["b1"]
    mu = jnp.mean(hdn, axis=-1, keepdims=True)
    var = jnp.mean((hdn - mu) ** 2, axis=-1, keepdims=True)
    hn = (hdn - mu) * jax.lax.rsqrt(var + LN_EPS) * params["gamma"] + params["beta"]
    out = jnp.dot(hn.astype(jnp.bfloat16), params["w2"].astype(jnp.bfloat16),
                  preferred_element_type=jnp.float32) + params["b2"]
    return out.reshape(b, gh * gw, EMBED_DIM)


if __name__ == "__main__":
    key = jax.random.PRNGKey(0)
    k_img, k_par = jax.random.split(key)
    # B=2 images at the canonical ViT resolution: 224x224 -> 16x16 = 256
    # patches per image, 512 tokens total -> >= 2 token tiles (multi-step grid,
    # megacore-shardable).
    x = jax.random.normal(k_img, (2, 3, 224, 224), jnp.float32)
    params = init_params(k_par)

    out = vit_embedder_forward(x, params)
    out = jax.block_until_ready(out)

    ref = _reference_forward(x, params)
    assert out.shape == (2, 256, EMBED_DIM), out.shape
    err = float(jnp.max(jnp.abs(out.astype(jnp.float32) - ref)))
    assert err < 3e-2, err

    print("KERNEL_OK")
</pallas_src>

<mosaic_0001>
module attributes {stable_mosaic.version = 11 : i64} {
  func.func @_fused_kernel(%arg0: i32, %arg1: memref<256x588xbf16, #tpu.memory_space<vmem>>, %arg2: memref<588x128xbf16, #tpu.memory_space<vmem>>, %arg3: memref<1x128xf32, #tpu.memory_space<vmem>>, %arg4: memref<128x512xbf16, #tpu.memory_space<vmem>>, %arg5: memref<1x512xf32, #tpu.memory_space<vmem>>, %arg6: memref<1x512xf32, #tpu.memory_space<vmem>>, %arg7: memref<1x512xf32, #tpu.memory_space<vmem>>, %arg8: memref<512x512xbf16, #tpu.memory_space<vmem>>, %arg9: memref<1x512xf32, #tpu.memory_space<vmem>>, %arg10: memref<256x512xbf16, #tpu.memory_space<vmem>>) attributes {dimension_semantics = [#tpu.dimension_semantics<parallel>], iteration_bounds = array<i64: 2>, scalar_prefetch = 0 : i64, scratch_operands = 0 : i64, tpu.core_type = #tpu.core_type<tc>, window_params = [{transform_indices = @transform_0, window_bounds = array<i64: 256, 588>}, {pipeline_mode = #tpu.pipeline_mode<synchronous>, transform_indices = @transform_1, window_bounds = array<i64: 588, 128>}, {pipeline_mode = #tpu.pipeline_mode<synchronous>, transform_indices = @transform_2, window_bounds = array<i64: 1, 128>}, {pipeline_mode = #tpu.pipeline_mode<synchronous>, transform_indices = @transform_3, window_bounds = array<i64: 128, 512>}, {pipeline_mode = #tpu.pipeline_mode<synchronous>, transform_indices = @transform_4, window_bounds = array<i64: 1, 512>}, {pipeline_mode = #tpu.pipeline_mode<synchronous>, transform_indices = @transform_5, window_bounds = array<i64: 1, 512>}, {pipeline_mode = #tpu.pipeline_mode<synchronous>, transform_indices = @transform_6, window_bounds = array<i64: 1, 512>}, {pipeline_mode = #tpu.pipeline_mode<synchronous>, transform_indices = @transform_7, window_bounds = array<i64: 512, 512>}, {pipeline_mode = #tpu.pipeline_mode<synchronous>, transform_indices = @transform_8, window_bounds = array<i64: 1, 512>}, {transform_indices = @transform_9, window_bounds = array<i64: 256, 512>}]} {
    %c0 = arith.constant 0 : index
    %c0_0 = arith.constant 0 : index
    %0 = vector.load %arg1[%c0, %c0_0] : memref<256x588xbf16, #tpu.memory_space<vmem>>, vector<256x588xbf16>
    %c0_1 = arith.constant 0 : index
    %c0_2 = arith.constant 0 : index
    %1 = vector.load %arg2[%c0_1, %c0_2] : memref<588x128xbf16, #tpu.memory_space<vmem>>, vector<588x128xbf16>
    %cst = arith.constant dense<0.000000e+00> : vector<256x128xf32>
    %2 = tpu.matmul %0, %1, %cst {dimension_numbers = #tpu.dot_dimension_numbers<[1], [0], [0], [1], [0, 0, 1, 1], [], []>} : vector<256x588xbf16>, vector<588x128xbf16>, vector<256x128xf32> -> vector<256x128xf32>
    %c0_3 = arith.constant 0 : index
    %c0_4 = arith.constant 0 : index
    %3 = vector.load %arg3[%c0_3, %c0_4] : memref<1x128xf32, #tpu.memory_space<vmem>>, vector<1x128xf32>
    %4 = vector.broadcast %3 : vector<1x128xf32> to vector<256x128xf32>
    %5 = arith.addf %2, %4 : vector<256x128xf32>
    %6 = arith.truncf %5 : vector<256x128xf32> to vector<256x128xbf16>
    %c0_5 = arith.constant 0 : index
    %c0_6 = arith.constant 0 : index
    %7 = vector.load %arg4[%c0_5, %c0_6] : memref<128x512xbf16, #tpu.memory_space<vmem>>, vector<128x512xbf16>
    %cst_7 = arith.constant dense<0.000000e+00> : vector<256x512xf32>
    %8 = tpu.matmul %6, %7, %cst_7 {dimension_numbers = #tpu.dot_dimension_numbers<[1], [0], [0], [1], [0, 0, 1, 1], [], []>} : vector<256x128xbf16>, vector<128x512xbf16>, vector<256x512xf32> -> vector<256x512xf32>
    %c0_8 = arith.constant 0 : index
    %c0_9 = arith.constant 0 : index
    %9 = vector.load %arg5[%c0_8, %c0_9] : memref<1x512xf32, #tpu.memory_space<vmem>>, vector<1x512xf32>
    %10 = vector.broadcast %9 : vector<1x512xf32> to vector<256x512xf32>
    %11 = arith.addf %8, %10 : vector<256x512xf32>
    %cst_10 = arith.constant dense<0.000000e+00> : vector<256xf32>
    %12 = vector.multi_reduction <add>, %11, %cst_10 [1] : vector<256x512xf32> to vector<256xf32>
    %13 = vector.shape_cast %12 : vector<256xf32> to vector<256x1xf32>
    %cst_11 = arith.constant 5.120000e+02 : f32
    %14 = vector.broadcast %cst_11 : f32 to vector<256x1xf32>
    %15 = arith.divf %13, %14 : vector<256x1xf32>
    %16 = arith.mulf %11, %11 : vector<256x512xf32>
    %cst_12 = arith.constant dense<0.000000e+00> : vector<256xf32>
    %17 = vector.multi_reduction <add>, %16, %cst_12 [1] : vector<256x512xf32> to vector<256xf32>
    %18 = vector.shape_cast %17 : vector<256xf32> to vector<256x1xf32>
    %cst_13 = arith.constant 5.120000e+02 : f32
    %19 = vector.broadcast %cst_13 : f32 to vector<256x1xf32>
    %20 = arith.divf %18, %19 : vector<256x1xf32>
    %21 = arith.mulf %15, %15 : vector<256x1xf32>
    %22 = arith.subf %20, %21 : vector<256x1xf32>
    %23 = vector.broadcast %15 : vector<256x1xf32> to vector<256x512xf32>
    %24 = arith.subf %11, %23 : vector<256x512xf32>
    %cst_14 = arith.constant 9.99999974E-6 : f32
    %25 = vector.broadcast %cst_14 : f32 to vector<256x1xf32>
    %26 = arith.addf %22, %25 : vector<256x1xf32>
    %27 = math.rsqrt %26 : vector<256x1xf32>
    %28 = vector.broadcast %27 : vector<256x1xf32> to vector<256x512xf32>
    %29 = arith.mulf %24, %28 : vector<256x512xf32>
    %c0_15 = arith.constant 0 : index
    %c0_16 = arith.constant 0 : index
    %30 = vector.load %arg6[%c0_15, %c0_16] : memref<1x512xf32, #tpu.memory_space<vmem>>, vector<1x512xf32>
    %31 = vector.broadcast %30 : vector<1x512xf32> to vector<256x512xf32>
    %32 = arith.mulf %29, %31 : vector<256x512xf32>
    %c0_17 = arith.constant 0 : index
    %c0_18 = arith.constant 0 : index
    %33 = vector.load %arg7[%c0_17, %c0_18] : memref<1x512xf32, #tpu.memory_space<vmem>>, vector<1x512xf32>
    %34 = vector.broadcast %33 : vector<1x512xf32> to vector<256x512xf32>
    %35 = arith.addf %32, %34 : vector<256x512xf32>
    %36 = arith.truncf %35 : vector<256x512xf32> to vector<256x512xbf16>
    %c0_19 = arith.constant 0 : index
    %c0_20 = arith.constant 0 : index
    %37 = vector.load %arg8[%c0_19, %c0_20] : memref<512x512xbf16, #tpu.memory_space<vmem>>, vector<512x512xbf16>
    %cst_21 = arith.constant dense<0.000000e+00> : vector<256x512xf32>
    %38 = tpu.matmul %36, %37, %cst_21 {dimension_numbers = #tpu.dot_dimension_numbers<[1], [0], [0], [1], [0, 0, 1, 1], [], []>} : vector<256x512xbf16>, vector<512x512xbf16>, vector<256x512xf32> -> vector<256x512xf32>
    %c0_22 = arith.constant 0 : index
    %c0_23 = arith.constant 0 : index
    %39 = vector.load %arg9[%c0_22, %c0_23] : memref<1x512xf32, #tpu.memory_space<vmem>>, vector<1x512xf32>
    %40 = vector.broadcast %39 : vector<1x512xf32> to vector<256x512xf32>
    %41 = arith.addf %38, %40 : vector<256x512xf32>
    %42 = arith.truncf %41 : vector<256x512xf32> to vector<256x512xbf16>
    %c0_24 = arith.constant 0 : index
    %c0_25 = arith.constant 0 : index
    %43 = vector.load %arg10[%c0_24, %c0_25] : memref<256x512xbf16, #tpu.memory_space<vmem>>, vector<256x512xbf16>
    tpu.vector_store %arg10[%c0_24, %c0_25], %42 {strides = array<i32>} : memref<256x512xbf16, #tpu.memory_space<vmem>>, vector<256x512xbf16>,
    return
  }
  func.func @transform_0(%arg0: i32) -> (i32, i32) {
    %c0_i32 = arith.constant 0 : i32
    %c0_i32_0 = arith.constant 0 : i32
    return %arg0, %c0_i32 : i32, i32
  }
  func.func @transform_1(%arg0: i32) -> (i32, i32) {
    %c0_i32 = arith.constant 0 : i32
    %c0_i32_0 = arith.constant 0 : i32
    %c0_i32_1 = arith.constant 0 : i32
    return %c0_i32, %c0_i32_0 : i32, i32
  }
  func.func @transform_2(%arg0: i32) -> (i32, i32) {
    %c0_i32 = arith.constant 0 : i32
    %c0_i32_0 = arith.constant 0 : i32
    %c0_i32_1 = arith.constant 0 : i32
    return %c0_i32, %c0_i32_0 : i32, i32
  }
  func.func @transform_3(%arg0: i32) -> (i32, i32) {
    %c0_i32 = arith.constant 0 : i32
    %c0_i32_0 = arith.constant 0 : i32
    %c0_i32_1 = arith.constant 0 : i32
    return %c0_i32, %c0_i32_0 : i32, i32
  }
  func.func @transform_4(%arg0: i32) -> (i32, i32) {
    %c0_i32 = arith.constant 0 : i32
    %c0_i32_0 = arith.constant 0 : i32
    %c0_i32_1 = arith.constant 0 : i32
    return %c0_i32, %c0_i32_0 : i32, i32
  }
  func.func @transform_5(%arg0: i32) -> (i32, i32) {
    %c0_i32 = arith.constant 0 : i32
    %c0_i32_0 = arith.constant 0 : i32
    %c0_i32_1 = arith.constant 0 : i32
    return %c0_i32, %c0_i32_0 : i32, i32
  }
  func.func @transform_6(%arg0: i32) -> (i32, i32) {
    %c0_i32 = arith.constant 0 : i32
    %c0_i32_0 = arith.constant 0 : i32
    %c0_i32_1 = arith.constant 0 : i32
    return %c0_i32, %c0_i32_0 : i32, i32
  }
  func.func @transform_7(%arg0: i32) -> (i32, i32) {
    %c0_i32 = arith.constant 0 : i32
    %c0_i32_0 = arith.constant 0 : i32
    %c0_i32_1 = arith.constant 0 : i32
    return %c0_i32, %c0_i32_0 : i32, i32
  }
  func.func @transform_8(%arg0: i32) -> (i32, i32) {
    %c0_i32 = arith.constant 0 : i32
    %c0_i32_0 = arith.constant 0 : i32
    %c0_i32_1 = arith.constant 0 : i32
    return %c0_i32, %c0_i32_0 : i32, i32
  }
  func.func @transform_9(%arg0: i32) -> (i32, i32) {
    %c0_i32 = arith.constant 0 : i32
    %c0_i32_0 = arith.constant 0 : i32
    return %arg0, %c0_i32 : i32, i32
  }
}

</mosaic_0001>

<bundles_post_ra>
// kernel: vit_embedder_forward.1
= control target key start
LH: loop header
LB: loop body
LE: loop exit
PB: predicated region body
PF: predicated region fallthrough
CT: control target
= control target key end

     0   :  { %14 = vsyncpa [#allocation3], 0  ;;  %s12528_s0 = inlined_call_operand.vmem [shape: bf16[512,588], index: 0, kind: input, shape index: {}]   ;;  %s12529_s1 = inlined_call_operand.vmem [shape: bf16[588,128], index: 1, kind: input, shape index: {}]   ;;  %s12530_s2 = inlined_call_operand.vmem [shape: f32[1,128], index: 2, kind: input, shape index: {}]   ;;  %s12531_s3 = inlined_call_operand.vmem [shape: bf16[128,512], index: 3, kind: input, shape index: {}]   ;;  %s12532_s4 = inlined_call_operand.vmem [shape: f32[1,512], index: 4, kind: input, shape index: {}]   ;;  %s12533_s5 = inlined_call_operand.vmem [shape: f32[1,512], index: 5, kind: input, shape index: {}]   ;;  %s12534_s6 = inlined_call_operand.vmem [shape: f32[1,512], index: 6, kind: input, shape index: {}]   ;;  %s12535_s7 = inlined_call_operand.vmem [shape: bf16[512,512], index: 7, kind: input, shape index: {}]   ;;  %s12536_s8 = inlined_call_operand.vmem [shape: f32[1,512], index: 8, kind: input, shape index: {}]   ;;  %s12537_s9 = inlined_call_operand.hbm [shape: bf16[512,512], index: 9, kind: output, shape index: {}]  }
   0x1   :  { %16 = vsyncpa [#allocation3 + $0x1], 0  ;;  %s7814_s30 = smov 0   ;;  %s7816_s10 = smov 0  }
   0x2   :  { %s7818_s11 = smov 0   ;;  %s7820_s12 = smov 0  }
   0x3 LB: > { %s7835_s13 = sadd.s32 4294967295, %s7759_s12   ;;  %s6145_s14 = sadd.s32 4294967294, %s7759_s12   ;;  %s7759_s12 = sphi %s7820_s12, %s13293_s12   ;;  %s7755_s11 = sphi %s7818_s11, %s13292_s11   ;;  %s7751_s10 = sphi %s7816_s10, %s13291_s10   ;;  %s7747_s30 = sphi %s7814_s30, %s13290_s30  }
   0x4   : > { %s7839_s15 = sadd.s32 1, %s7759_s12   ;;  %s223_s16 = sadd.s32 1, %s7755_s11 }
   0x5   : > { %s220_s17 = ssub.s32 %s7759_s12, %s7839_s15  ;;  %p233_p0 = scmp.ne.s32.totalorder %s7755_s11, %s7751_s10 }
   0x6   : > { %p221_p1 = scmp.eq.s32.totalorder %s220_s17, 0  ;;  %p234_p2 = scmp.eq.s32.totalorder %s7835_s13, 1 }
   0x7   : > { %p239_p3 = scmp.ne.s32.totalorder %s7751_s10, %s7747_s30  ;;  %p240_p4 = scmp.eq.s32.totalorder %s6145_s14, 1 }
   0x8   : > { %s7850_s18 = scalar_select %p221_p1, %s7755_s11, %s223_s16  }
   0x9   : > { %p7852_p5 = por %p234_p2, %p233_p0  ;;  %p7856_p6 = por %p240_p4, %p239_p3 }
   0xa   : > { %p6148_p7 = scmp.ge.s32.totalorder %s7759_s12, 1  ;;  %p292_p8 = scmp.lt.s32.totalorder %s7759_s12, 3 }
   0xc   : > { %p293_p9 = pnand %p6148_p7, %p292_p8 }
   0xe   : > { %296 = sbr.rel (%p293_p9) target bundleno = 1894 (0x766), region = 56 }
  0x13   : > { %v7369_v0 = vld [vmem:[%s12529_s1 + $0x38] sm:$0xff]  ;;  %v7368_v1 = vld [vmem:[%s12529_s1 + $0x30] sm:$0xff]  ;;  %v7367_v2 = vld [vmem:[%s12529_s1 + $0x28] sm:$0xff]  ;;  %s6150_s27 = sshll.u32 %s7835_s13, 5  ;;  %vm1182_vm0 = vcmask 1045504   ;;  %vm1133_vm1 = vcmask 621568  }
  0x14   : > { %1186 = vmatpush.bf16.msra.mxu0 %v7369_v0  ;;  %7561 = vmatpush.bf16.msra.mxu1 %v7369_v0  ;;  %v7366_v3 = vld [vmem:[%s12529_s1 + $0x20] sm:$0xff]  ;;  %p330_p10 = scmp.lt.s32.totalorder %s6150_s27, 63  ;;  %v7365_v4 = vld [vmem:[%s12529_s1 + $0x18] sm:$0xff]  ;;  %v7364_v5 = vld [vmem:[%s12529_s1 + $0x10] sm:$0xff]  ;;  %s326_s16 = sand.u32 1, %s7751_s10  }
  0x15   : > { %7562 = vmatpush.bf16.msra.mxu2 %v7369_v0  ;;  %7563 = vmatpush.bf16.msra.mxu3 %v7369_v0  ;;  %v7363_v6 = vld [vmem:[%s12529_s1 + $0x8] sm:$0xff]  ;;  %v7362_v7 = vld [vmem:[%s12529_s1] sm:$0xff]  ;;  %v7385_v18 = vld [vmem:[%s12529_s1 + $0xb8] sm:$0xff]  ;;  %s6149_s25 = sshll.u32 %s326_s16, 9  ;;  %s7560_s14 = sshll.u32 %s7835_s13, 9 }
  0x16   : > { %s13295_s27 = smov (!%p330_p10, %s6150_s27), 63  ;;  %v6618_v8 = vld [vmem:[%s12529_s1 + $0x120] sm:$0xf]  ;;  %v7398_v11 = vld [vmem:[%s12529_s1 + $0x120] sm:$0x30]  ;;  %v7393_v19 = vld [vmem:[%s12529_s1 + $0xf8] sm:$0xff]  ;;  %s6079_s21 = scalar_lea.hbm %s12537_s9, %s7560_s14 }
  0x17   : > { %s7585_s22 = smul.u32 20, %s13295_s27  ;;  %v6619_v20 = vor.u32 %v7398_v11, %v6618_v8  ;;  %v7377_v25 = vld [vmem:[%s12529_s1 + $0x78] sm:$0xff]  ;;  %v7384_v26 = vld [vmem:[%s12529_s1 + $0xb0] sm:$0xff]  ;;  %v7383_v31 = vld [vmem:[%s12529_s1 + $0xa8] sm:$0xff]  ;;  %s11759_s29 = scalar_lea.vmem [#allocation2], %s6149_s25 }
  0x18   : > { %1187 = vmatpush.bf16.msra.mxu0 %v7368_v1  ;;  %7564 = vmatpush.bf16.msra.mxu1 %v7368_v1  ;;  %v7392_v27 = vld [vmem:[%s12529_s1 + $0xf0] sm:$0xff]  ;;  %v7397_v30 = vld [vmem:[%s12529_s1 + $0x118] sm:$0xff]  ;;  %v7391_v32 = vld [vmem:[%s12529_s1 + $0xe8] sm:$0xff]  ;;  %s6082_s23 = sshll.u32 %s6079_s21, 4  ;;  %s6067_s13 = scalar_lea.sflag [#allocation3], %s326_s16  ;;  %s6083_s23 = int_to_ptr.hbm [resolvable:$true] %s6082_s23 }
  0x19   : > { %7565 = vmatpush.bf16.msra.mxu2 %v7368_v1  ;;  %7566 = vmatpush.bf16.msra.mxu3 %v7368_v1  ;;  %s7887_s28 = scalar_lea.vmem %s12528_s0, %s7585_s22  ;;  %v1184_v28 = vsel %vm1182_vm0, %v6619_v20, 0  ;;  %v7376_v29 = vld [vmem:[%s12529_s1 + $0x70] sm:$0xff]  ;;  %v7375_v33 = vld [vmem:[%s12529_s1 + $0x68] sm:$0xff]  ;;  %v7382_v35 = vld [vmem:[%s12529_s1 + $0xa0] sm:$0xff]  ;;  %s6080_s22 = sshll.u32 %s11759_s29, 4  ;;  %s6081_s22 = int_to_ptr.vmem [resolvable:$true] %s6080_s22 }
  0x1a   : > { %v6154_v9 = vld [vmem:[%s7887_s28] sm:$0xf]  ;;  %v7284_v10 = vld [vmem:[%s7887_s28 + $0x10] sm:$0xf0]  ;;  %v6174_v37 = vld [vmem:[%s7887_s28 + $0x28] sm:$0xf] }
  0x1b   : > { %v6234_v12 = vld [vmem:[%s7887_s28 + $0xa0] sm:$0xf]  ;;  %v7304_v13 = vld [vmem:[%s7887_s28 + $0xb0] sm:$0xf0]  ;;  %v6155_v21 = vor.u32 %v7284_v10, %v6154_v9  ;;  %v7289_v38 = vld [vmem:[%s7887_s28 + $0x38] sm:$0xf0] }
  0x1c   : > { %1188 = vmatpush.bf16.msra.mxu0 %v7367_v2  ;;  %7567 = vmatpush.bf16.msra.mxu1 %v7367_v2  ;;  %v6314_v14 = vld [vmem:[%s7887_s28 + $0x140] sm:$0xf]  ;;  %v7324_v15 = vld [vmem:[%s7887_s28 + $0x150] sm:$0xf0]  ;;  %v6235_v22 = vor.u32 %v7304_v13, %v6234_v12  ;;  %v6254_v39 = vld [vmem:[%s7887_s28 + $0xc8] sm:$0xf]  ;;  %v6175_v48 = vor.u32 %v7289_v38, %v6174_v37 }
  0x1d   : > { %7568 = vmatpush.bf16.msra.mxu2 %v7367_v2  ;;  %7569 = vmatpush.bf16.msra.mxu3 %v7367_v2  ;;  %v6394_v16 = vld [vmem:[%s7887_s28 + $0x1e0] sm:$0xf]  ;;  %v7344_v17 = vld [vmem:[%s7887_s28 + $0x1f0] sm:$0xf0]  ;;  %v6315_v23 = vor.u32 %v7324_v15, %v6314_v14  ;;  %v7309_v40 = vld [vmem:[%s7887_s28 + $0xd8] sm:$0xf0] }
  0x1e   : > { %v6395_v24 = vor.u32 %v7344_v17, %v6394_v16  ;;  %v7396_v34 = vld [vmem:[%s12529_s1 + $0x110] sm:$0xff]  ;;  %v7390_v36 = vld [vmem:[%s12529_s1 + $0xe0] sm:$0xff]  ;;  %v6334_v41 = vld [vmem:[%s7887_s28 + $0x168] sm:$0xf]  ;;  %v6255_v49 = vor.u32 %v7309_v40, %v6254_v39  ;;  %s7711_s24 = sshra.s32 %s6083_s23, 4  ;;  %s7717_s14 = scalar_lea.hbm %s12537_s9, 1024  ;;  %s7712_s24 = int_to_ptr.hbm [resolvable:$true] %s7711_s24 }
  0x1f   : > { %v7329_v42 = vld [vmem:[%s7887_s28 + $0x178] sm:$0xf0]  ;;  %v6414_v43 = vld [vmem:[%s7887_s28 + $0x208] sm:$0xf]  ;;  %v7374_v45 = vld [vmem:[%s12529_s1 + $0x60] sm:$0xff]  ;;  %s7713_s25 = scalar_lea.hbm %s7712_s24, 512  ;;  %p7718_p0 = scmp.lt.s32.totalorder %s7712_s24, %s12537_s9 }
  0x20   : > { %1189 = vmatpush.bf16.msra.mxu0 %v7366_v3  ;;  %7570 = vmatpush.bf16.msra.mxu1 %v7366_v3  ;;  %v7349_v44 = vld [vmem:[%s7887_s28 + $0x218] sm:$0xf0]  ;;  %v6335_v50 = vor.u32 %v7329_v42, %v6334_v41  ;;  %v7380_v53 = vld [vmem:[%s12529_s1 + $0x90] sm:$0xff]  ;;  %v7395_v55 = vld [vmem:[%s12529_s1 + $0x108] sm:$0xff]  ;;  %p7714_p11 = scmp.ne.s32.totalorder %s7712_s24, %s7713_s25  ;;  %p7719_p1 = scmp.lt.s32.totalorder %s7717_s14, %s7713_s25 }
  0x21   : > { %7571 = vmatpush.bf16.msra.mxu2 %v7366_v3  ;;  %7572 = vmatpush.bf16.msra.mxu3 %v7366_v3  ;;  %v7381_v46 = vld [vmem:[%s12529_s1 + $0x98] sm:$0xff]  ;;  %v6415_v51 = vor.u32 %v7349_v44, %v6414_v43  ;;  %v7388_v54 = vld [vmem:[%s12529_s1 + $0xd0] sm:$0xff]  ;;  %v7379_v57 = vld [vmem:[%s12529_s1 + $0x88] sm:$0xff] }
  0x22   : > { %v7389_v47 = vld [vmem:[%s12529_s1 + $0xd8] sm:$0xff]  ;;  %v7372_v56 = vld [vmem:[%s12529_s1 + $0x50] sm:$0xff]  ;;  %v7387_v58 = vld [vmem:[%s12529_s1 + $0xc8] sm:$0xff]  ;;  %p7715_p12 = pnand %p7714_p11, %p7852_p5  ;;  %p7720_p2 = por %p7719_p1, %p7718_p0 }
  0x23   : > { %v7373_v52 = vld [vmem:[%s12529_s1 + $0x58] sm:$0xff]  ;;  %v7394_v59 = vld [vmem:[%s12529_s1 + $0x100] sm:$0xff]  ;;  %v7371_v60 = vld [vmem:[%s12529_s1 + $0x48] sm:$0xff] }
  0x24   : > { %1190 = vmatpush.bf16.msra.mxu0 %v7365_v4  ;;  %7573 = vmatpush.bf16.msra.mxu1 %v7365_v4  ;;  %v7378_v61 = vld [vmem:[%s12529_s1 + $0x80] sm:$0xff]  ;;  %v6194_v63 = vld [vmem:[%s7887_s28 + $0x50] sm:$0xf]  ;;  %v6752_v13 = vld [vmem:[%s12531_s3 + $0xf0] sm:$0xf0]  ;;  %p7716_p13 = pneg %p7715_p12 }
  0x25   : > { %7574 = vmatpush.bf16.msra.mxu2 %v7365_v4  ;;  %7575 = vmatpush.bf16.msra.mxu3 %v7365_v4  ;;  %v7386_v62 = vld [vmem:[%s12529_s1 + $0xc0] sm:$0xff]  ;;  %v6274_v1 = vld [vmem:[%s7887_s28 + $0xf0] sm:$0xf]  ;;  %v6758_v14 = vld [vmem:[%s12531_s3 + $0xe8] sm:$0xf] }
  0x26   : > { %v7294_v0 = vld [vmem:[%s7887_s28 + $0x60] sm:$0xf0]  ;;  %v6354_v3 = vld [vmem:[%s7887_s28 + $0x190] sm:$0xf]  ;;  %v7430_v16 = vld [vmem:[%s12531_s3 + $0xf4] sm:$0xf0]  ;;  %p7721_p3 = pnand %p7720_p2, %p7716_p13 }
  0x27   : > { %v7314_v2 = vld [vmem:[%s7887_s28 + $0x100] sm:$0xf0]  ;;  %v6195_v8 = vor.u32 %v7294_v0, %v6194_v63  ;;  %v6750_v17 = vld [vmem:[%s12531_s3 + $0xe0] sm:$0xf]  ;;  %v6156_v37 = vld [vmem:[%s7887_s28 + $0x14] sm:$0xf0] }
  0x28   : > { %1191 = vmatpush.bf16.msra.mxu0 %v7364_v5  ;;  %7576 = vmatpush.bf16.msra.mxu1 %v7364_v5  ;;  %v7334_v4 = vld [vmem:[%s7887_s28 + $0x1a0] sm:$0xf0]  ;;  %v6275_v9 = vor.u32 %v7314_v2, %v6274_v1  ;;  %v6162_v38 = vld [vmem:[%s7887_s28 + $0x8] sm:$0xf]  ;;  %v6170_v39 = vld [vmem:[%s7887_s28 + $0x10] sm:$0xf] }
  0x29   : > { %7577 = vmatpush.bf16.msra.mxu2 %v7364_v5  ;;  %7578 = vmatpush.bf16.msra.mxu3 %v7364_v5  ;;  %v6434_v5 = vld [vmem:[%s7887_s28 + $0x230] sm:$0xf]  ;;  %v6355_v10 = vor.u32 %v7334_v4, %v6354_v3  ;;  %v7427_v12 = vld [vmem:[%s12531_s3 + $0xe4] sm:$0xf]  ;;  %v7285_v41 = vld [vmem:[%s7887_s28 + $0x18] sm:$0xf0] }
  0x2a   : > { %v6755_v15 = vor.u32 %v7427_v12, %v6752_v13  ;;  %v7286_v40 = vld [vmem:[%s7887_s28 + $0x20] sm:$0xf0]  ;;  %v7283_v42 = vld [vmem:[%s7887_s28 + $0xc] sm:$0xf]  ;;  %v6164_v43 = vld [vmem:[%s7887_s28 + $0x1c] sm:$0xf0] }
  0x2b   : > { %v6190_v63 = vld [vmem:[%s7887_s28 + $0x38] sm:$0xf]  ;;  %v7291_v0 = vld [vmem:[%s7887_s28 + $0x48] sm:$0xf0]  ;;  %v7290_v1 = vld [vmem:[%s7887_s28 + $0x40] sm:$0xf0] }
  0x2c   : > { %1192 = vmatpush.bf16.msra.mxu0 %v7363_v6  ;;  %7579 = vmatpush.bf16.msra.mxu1 %v7363_v6  ;;  %v7288_v2 = vld [vmem:[%s7887_s28 + $0x34] sm:$0xf]  ;;  %v6184_v3 = vld [vmem:[%s7887_s28 + $0x44] sm:$0xf0]  ;;  %v7295_v13 = vld [vmem:[%s7887_s28 + $0x68] sm:$0xf0] }
  0x2d   : > { %7580 = vmatpush.bf16.msra.mxu2 %v7363_v6  ;;  %7581 = vmatpush.bf16.msra.mxu3 %v7363_v6  ;;  %v7354_v6 = vld [vmem:[%s7887_s28 + $0x240] sm:$0xf0]  ;;  %v7296_v12 = vld [vmem:[%s7887_s28 + $0x70] sm:$0xf0] }
  0x2e   : > { %v6435_v11 = vor.u32 %v7354_v6, %v6434_v5  ;;  %v6191_v5 = vor.u32 %v7291_v0, %v6190_v63  ;;  %v7418_v0 = vld [vmem:[%s12531_s3 + $0x94] sm:$0xf0] }
  0x30   : > { %1193 = vmatpush.bf16.msra.mxu0 %v7362_v7  ;;  %7582 = vmatpush.bf16.msra.mxu1 %v7362_v7 }
  0x31   : > { %7583 = vmatpush.bf16.msra.mxu2 %v7362_v7  ;;  %7584 = vmatpush.bf16.msra.mxu3 %v7362_v7  ;;  %v7370_v7 = vld [vmem:[%s12529_s1 + $0x40] sm:$0xff] }
  0x33   : > { %1194 = vmatmul.bf16.vlgmr.msra.gmra.mxu0 %v6155_v21  ;;  %1214 = vmatmul.bf16.vlgmr.msra.gmra.mxu1 %v6235_v22  ;;  %v7428_v21 = vld [vmem:[%s12531_s3 + $0xec] sm:$0xf]  ;;  %v6760_v22 = vld [vmem:[%s12531_s3 + $0xf8] sm:$0xf0] }
  0x34   : > { %1234 = vmatmul.bf16.vlgmr.msra.gmra.mxu2 %v6315_v23  ;;  %1254 = vmatmul.bf16.vlgmr.msra.gmra.mxu3 %v6395_v24  ;;  %v6763_v23 = vor.u32 %v7428_v21, %v6760_v22  ;;  %v6214_v24 = vld [vmem:[%s7887_s28 + $0x78] sm:$0xf]  ;;  %v6720_v21 = vld [vmem:[%s12531_s3 + $0xb0] sm:$0xf0]  ;;  %v6726_v22 = vld [vmem:[%s12531_s3 + $0xa8] sm:$0xf] }
  0x35   : > { %1364 = vmatpush.bf16.msrb.mxu2 %v7385_v18  ;;  %1453 = vmatpush.bf16.msrb.mxu3 %v7393_v19  ;;  %v7429_v18 = vld [vmem:[%s12531_s3 + $0xec] sm:$0xf0]  ;;  %v6759_v19 = vor.u32 %v7430_v16, %v6758_v14  ;;  %v7293_v14 = vld [vmem:[%s7887_s28 + $0x5c] sm:$0xf] }
  0x36   : > { %1275 = vmatpush.bf16.msrb.mxu1 %v7377_v25  ;;  %1545 = vmatpush.bf16.msrb.mxu0 %v1184_v28  ;;  %v6751_v20 = vor.u32 %v7429_v18, %v6750_v17  ;;  %v7299_v25 = vld [vmem:[%s7887_s28 + $0x88] sm:$0xf0]  ;;  %v6374_v28 = vld [vmem:[%s7887_s28 + $0x1b8] sm:$0xf] }
  0x39   : > { %1365 = vmatpush.bf16.msrb.mxu2 %v7384_v26  ;;  %1454 = vmatpush.bf16.msrb.mxu3 %v7392_v27  ;;  %v6294_v26 = vld [vmem:[%s7887_s28 + $0x118] sm:$0xf]  ;;  %v7319_v27 = vld [vmem:[%s7887_s28 + $0x128] sm:$0xf0] }
  0x3a   : > { %1276 = vmatpush.bf16.msrb.mxu1 %v7376_v29  ;;  %1546 = vmatpush.bf16.msrb.mxu0 %v7397_v30  ;;  %v7339_v29 = vld [vmem:[%s7887_s28 + $0x1c8] sm:$0xf0]  ;;  %v6454_v30 = vld [vmem:[%s7887_s28 + $0x258] sm:$0xf] }
  0x3d   : > { %1366 = vmatpush.bf16.msrb.mxu2 %v7383_v31  ;;  %1455 = vmatpush.bf16.msrb.mxu3 %v7391_v32  ;;  %v7359_v31 = vld [vmem:[%s7887_s28 + $0x268] sm:$0xf0]  ;;  %v6215_v32 = vor.u32 %v7299_v25, %v6214_v24  ;;  %v7422_v24 = vld [vmem:[%s12531_s3 + $0xb4] sm:$0xf0] }
  0x3e   : > { %1277 = vmatpush.bf16.msrb.mxu1 %v7375_v33  ;;  %1547 = vmatpush.bf16.msrb.mxu0 %v7396_v34  ;;  %v6295_v33 = vor.u32 %v7319_v27, %v6294_v26  ;;  %v6375_v34 = vor.u32 %v7339_v29, %v6374_v28  ;;  %v6727_v25 = vor.u32 %v7422_v24, %v6726_v22  ;;  %v6718_v26 = vld [vmem:[%s12531_s3 + $0xa0] sm:$0xf]  ;;  %v7421_v27 = vld [vmem:[%s12531_s3 + $0xac] sm:$0xf0]  ;;  %v7420_v28 = vld [vmem:[%s12531_s3 + $0xac] sm:$0xf] }
  0x3f   : > { %v6719_v29 = vor.u32 %v7421_v27, %v6718_v26  ;;  %v6264_v22 = vld [vmem:[%s7887_s28 + $0xe4] sm:$0xf0] }
  0x41   : > { %1367 = vmatpush.bf16.msrb.mxu2 %v7382_v35  ;;  %1456 = vmatpush.bf16.msrb.mxu3 %v7390_v36  ;;  %v6455_v35 = vor.u32 %v7359_v31, %v6454_v30  ;;  %v7282_v36 = vld [vmem:[%s7887_s28 + $0x4] sm:$0xf]  ;;  %v6728_v30 = vld [vmem:[%s12531_s3 + $0xb8] sm:$0xf0] }
  0x42   : > { %1278 = vmatpush.bf16.msrb.mxu1 %v7374_v45  ;;  %1548 = vmatpush.bf16.msrb.mxu0 %v7395_v55  ;;  %v6159_v44 = vor.u32 %v7282_v36, %v6156_v37  ;;  %v6171_v45 = vor.u32 %v7286_v40, %v6170_v39  ;;  %v7297_v31 = vld [vmem:[%s7887_s28 + $0x7c] sm:$0xf]  ;;  %v7300_v37 = vld [vmem:[%s7887_s28 + $0x90] sm:$0xf0]  ;;  %v6224_v39 = vld [vmem:[%s7887_s28 + $0x94] sm:$0xf0] }
  0x43   : > { %1199 = vmatmul.bf16.gmra.mxu0 %v6175_v48  ;;  %1219 = vmatmul.bf16.gmra.mxu1 %v6255_v49  ;;  %v7423_v48 = vld [vmem:[%s12531_s3 + $0xc4] sm:$0xf]  ;;  %v6736_v49 = vld [vmem:[%s12531_s3 + $0xd0] sm:$0xf0]  ;;  %v7301_v36 = vld [vmem:[%s7887_s28 + $0x98] sm:$0xf0] }
  0x44   : > { %1239 = vmatmul.bf16.gmra.mxu2 %v6335_v50  ;;  %1259 = vmatmul.bf16.gmra.mxu3 %v6415_v51  ;;  %v6742_v50 = vld [vmem:[%s12531_s3 + $0xc8] sm:$0xf]  ;;  %v6739_v51 = vor.u32 %v7423_v48, %v6736_v49  ;;  %v6250_v48 = vld [vmem:[%s7887_s28 + $0xb0] sm:$0xf]  ;;  %v7306_v49 = vld [vmem:[%s7887_s28 + $0xc0] sm:$0xf0] }
  0x45   : > { %1368 = vmatpush.bf16.msrb.mxu2 %v7381_v46  ;;  %1457 = vmatpush.bf16.msrb.mxu3 %v7389_v47  ;;  %v6163_v46 = vor.u32 %v7285_v41, %v6162_v38  ;;  %v6167_v47 = vor.u32 %v7283_v42, %v6164_v43  ;;  %v7298_v38 = vld [vmem:[%s7887_s28 + $0x84] sm:$0xf] }
  0x46   : > { %1279 = vmatpush.bf16.msrb.mxu1 %v7373_v52  ;;  %1549 = vmatpush.bf16.msrb.mxu0 %v7394_v59  ;;  %v7426_v52 = vld [vmem:[%s12531_s3 + $0xd4] sm:$0xf0]  ;;  %v6227_v43 = vor.u32 %v7298_v38, %v6224_v39 }
  0x47   : > { %v6743_v55 = vor.u32 %v7426_v52, %v6742_v50  ;;  %v7305_v50 = vld [vmem:[%s7887_s28 + $0xb8] sm:$0xf0]  ;;  %v6244_v52 = vld [vmem:[%s7887_s28 + $0xbc] sm:$0xf0] }
  0x49   : > { %1369 = vmatpush.bf16.msrb.mxu2 %v7380_v53  ;;  %1458 = vmatpush.bf16.msrb.mxu3 %v7388_v54  ;;  %v6734_v53 = vld [vmem:[%s12531_s3 + $0xc0] sm:$0xf]  ;;  %v7425_v54 = vld [vmem:[%s12531_s3 + $0xcc] sm:$0xf0] }
  0x4a   : > { %1280 = vmatpush.bf16.msrb.mxu1 %v7372_v56  ;;  %2116 = vmatpush.bf16.msra.mxu0 %v6763_v23  ;;  %v6735_v56 = vor.u32 %v7425_v54, %v6734_v53  ;;  %v6251_v54 = vor.u32 %v7306_v49, %v6250_v48  ;;  %v7313_v48 = vld [vmem:[%s7887_s28 + $0xfc] sm:$0xf]  ;;  %v6284_v49 = vld [vmem:[%s7887_s28 + $0x10c] sm:$0xf0] }
  0x4d   : > { %1370 = vmatpush.bf16.msrb.mxu2 %v7379_v57  ;;  %1459 = vmatpush.bf16.msrb.mxu3 %v7387_v58  ;;  %v7424_v57 = vld [vmem:[%s12531_s3 + $0xcc] sm:$0xf]  ;;  %v6744_v58 = vld [vmem:[%s12531_s3 + $0xd8] sm:$0xf0] }
  0x4e   : > { %1281 = vmatpush.bf16.msrb.mxu1 %v7371_v60  ;;  %v6747_v59 = vor.u32 %v7424_v57, %v6744_v58  ;;  %v7287_v60 = vld [vmem:[%s7887_s28 + $0x2c] sm:$0xf] }
  0x50   : > { %2117 = vmatpush.bf16.msra.mxu0 %v6747_v59 }
  0x51   : > { %1371 = vmatpush.bf16.msrb.mxu2 %v7378_v61  ;;  %1460 = vmatpush.bf16.msrb.mxu3 %v7386_v62  ;;  %v6176_v61 = vld [vmem:[%s7887_s28 + $0x3c] sm:$0xf0]  ;;  %v6182_v62 = vld [vmem:[%s7887_s28 + $0x30] sm:$0xf] }
  0x52   : > { %1282 = vmatpush.bf16.msrb.mxu1 %v7370_v7  ;;  %v6179_v4 = vor.u32 %v7287_v60, %v6176_v61  ;;  %v6183_v6 = vor.u32 %v7290_v1, %v6182_v62  ;;  %v6187_v7 = vor.u32 %v7288_v2, %v6184_v3  ;;  %v7415_v60 = vld [vmem:[%s12531_s3 + $0x84] sm:$0xf]  ;;  %v6704_v61 = vld [vmem:[%s12531_s3 + $0x90] sm:$0xf0]  ;;  %v6710_v62 = vld [vmem:[%s12531_s3 + $0x88] sm:$0xf] }
  0x53   : > { %1204 = vmatmul.bf16.gmra.mxu0 %v6195_v8  ;;  %1224 = vmatmul.bf16.gmra.mxu1 %v6275_v9  ;;  %v7292_v8 = vld [vmem:[%s7887_s28 + $0x54] sm:$0xf]  ;;  %v6196_v9 = vld [vmem:[%s7887_s28 + $0x64] sm:$0xf0]  ;;  %v6707_v63 = vor.u32 %v7415_v60, %v6704_v61  ;;  %v6711_v1 = vor.u32 %v7418_v0, %v6710_v62  ;;  %v6287_v61 = vor.u32 %v7313_v48, %v6284_v49 }
  0x54   : > { %1244 = vmatmul.bf16.gmra.mxu2 %v6355_v10  ;;  %1264 = vmatmul.bf16.gmra.mxu3 %v6435_v11  ;;  %v6202_v10 = vld [vmem:[%s7887_s28 + $0x58] sm:$0xf]  ;;  %v6210_v11 = vld [vmem:[%s7887_s28 + $0x60] sm:$0xf]  ;;  %v6199_v16 = vor.u32 %v7292_v8, %v6196_v9  ;;  %v6688_v0 = vld [vmem:[%s12531_s3 + $0x70] sm:$0xf0] }
  0x55   : > { %1938 = vmatpush.bf16.msra.mxu2 %v6755_v15  ;;  %2027 = vmatpush.bf16.msra.mxu3 %v6759_v19  ;;  %v6204_v15 = vld [vmem:[%s7887_s28 + $0x6c] sm:$0xf0]  ;;  %v6211_v17 = vor.u32 %v7296_v12, %v6210_v11  ;;  %v6203_v18 = vor.u32 %v7295_v13, %v6202_v10  ;;  %v6702_v9 = vld [vmem:[%s12531_s3 + $0x80] sm:$0xf]  ;;  %v7416_v11 = vld [vmem:[%s12531_s3 + $0x8c] sm:$0xf] }
  0x56   : > { %1849 = vmatpush.bf16.msra.mxu1 %v6751_v20  ;;  %v6207_v19 = vor.u32 %v7293_v14, %v6204_v15  ;;  %v7419_v20 = vld [vmem:[%s12531_s3 + $0xa4] sm:$0xf]  ;;  %v7417_v10 = vld [vmem:[%s12531_s3 + $0x8c] sm:$0xf0]  ;;  %v6712_v13 = vld [vmem:[%s12531_s3 + $0x98] sm:$0xf0] }
  0x57   : > { %v6723_v23 = vor.u32 %v7419_v20, %v6720_v21  ;;  %v6703_v12 = vor.u32 %v7417_v10, %v6702_v9  ;;  %v7307_v14 = vld [vmem:[%s7887_s28 + $0xcc] sm:$0xf]  ;;  %v6256_v15 = vld [vmem:[%s7887_s28 + $0xdc] sm:$0xf0]  ;;  %v7310_v20 = vld [vmem:[%s7887_s28 + $0xe0] sm:$0xf0] }
  0x58   : > { %v7308_v21 = vld [vmem:[%s7887_s28 + $0xd4] sm:$0xf] }
  0x59   : > { %1939 = vmatpush.bf16.msra.mxu2 %v6739_v51  ;;  %2028 = vmatpush.bf16.msra.mxu3 %v6743_v55  ;;  %v7303_v51 = vld [vmem:[%s7887_s28 + $0xac] sm:$0xf] }
  0x5a   : > { %1850 = vmatpush.bf16.msra.mxu1 %v6735_v56  ;;  %v6247_v58 = vor.u32 %v7303_v51, %v6244_v52 }
  0x5d   : > { %1940 = vmatpush.bf16.msra.mxu2 %v6723_v23  ;;  %2029 = vmatpush.bf16.msra.mxu3 %v6727_v25  ;;  %v6259_v25 = vor.u32 %v7307_v14, %v6256_v15 }
  0x5e   : > { %1851 = vmatpush.bf16.msra.mxu1 %v6719_v29 }
  0x61   : > { %1941 = vmatpush.bf16.msra.mxu2 %v6707_v63  ;;  %2030 = vmatpush.bf16.msra.mxu3 %v6711_v1  ;;  %v7411_v63 = vld [vmem:[%s12531_s3 + $0x64] sm:$0xf]  ;;  %v6694_v1 = vld [vmem:[%s12531_s3 + $0x68] sm:$0xf] }
  0x62   : > { %1852 = vmatpush.bf16.msra.mxu1 %v6703_v12 }
  0x63   : > { %1209 = vmatmul.bf16.gmra.mxu0 %v6215_v32  ;;  %1229 = vmatmul.bf16.gmra.mxu1 %v6295_v33  ;;  %v6216_v32 = vld [vmem:[%s7887_s28 + $0x8c] sm:$0xf0]  ;;  %v6731_v33 = vor.u32 %v7420_v28, %v6728_v30 }
  0x64   : > { %1249 = vmatmul.bf16.gmra.mxu2 %v6375_v34  ;;  %1269 = vmatmul.bf16.gmra.mxu3 %v6455_v35  ;;  %v6222_v34 = vld [vmem:[%s7887_s28 + $0x80] sm:$0xf]  ;;  %v6230_v35 = vld [vmem:[%s7887_s28 + $0x88] sm:$0xf]  ;;  %v6219_v40 = vor.u32 %v7297_v31, %v6216_v32  ;;  %v6267_v32 = vor.u32 %v7308_v21, %v6264_v22  ;;  %v7321_v21 = vld [vmem:[%s7887_s28 + $0x138] sm:$0xf0] }
  0x65   : > { %2118 = vmatpush.bf16.msra.mxu0 %v6731_v33  ;;  %v6231_v41 = vor.u32 %v7301_v36, %v6230_v35  ;;  %v6223_v42 = vor.u32 %v7300_v37, %v6222_v34  ;;  %v6686_v22 = vld [vmem:[%s12531_s3 + $0x60] sm:$0xf] }
  0x73   : > { %1283 = vmatmul.bf16.vlgmr.msrb.gmra.mxu1 %v6159_v44  ;;  %6620 = vmatmul.msk.bf16.vlgmr.msrb.gmra.mxu0 %vm1133_vm1, %v6171_v45  ;;  %v8125_v44 = vld [vmem:[%s12530_s2] ss:$0 sm:$0xff]  ;;  %v7302_v45 = vld [vmem:[%s7887_s28 + $0xa4] sm:$0xf] }
  0x74   : > { %1372 = vmatmul.bf16.vlgmr.msrb.gmra.mxu2 %v6163_v46  ;;  %1461 = vmatmul.bf16.vlgmr.msrb.gmra.mxu3 %v6167_v47  ;;  %v6236_v46 = vld [vmem:[%s7887_s28 + $0xb4] sm:$0xf0]  ;;  %v6242_v47 = vld [vmem:[%s7887_s28 + $0xa8] sm:$0xf] }
  0x75   : > { %v6239_v53 = vor.u32 %v7302_v45, %v6236_v46  ;;  %v6243_v57 = vor.u32 %v7305_v50, %v6242_v47  ;;  %v6290_v45 = vld [vmem:[%s7887_s28 + $0x100] sm:$0xf]  ;;  %v7316_v46 = vld [vmem:[%s7887_s28 + $0x110] sm:$0xf0]  ;;  %v7315_v47 = vld [vmem:[%s7887_s28 + $0x108] sm:$0xf0] }
  0x83   : > { %1288 = vmatmul.bf16.gmra.mxu1 %v6179_v4  ;;  %6621 = vmatmul.msk.bf16.gmra.mxu0 %vm1133_vm1, %v6191_v5 }
  0x84   : > { %1377 = vmatmul.bf16.gmra.mxu2 %v6183_v6  ;;  %1466 = vmatmul.bf16.gmra.mxu3 %v6187_v7 }
  0x93   : > { %1293 = vmatmul.bf16.gmra.mxu1 %v6199_v16  ;;  %6622 = vmatmul.msk.bf16.gmra.mxu0 %vm1133_vm1, %v6211_v17  ;;  %v6715_v16 = vor.u32 %v7416_v11, %v6712_v13  ;;  %v6262_v17 = vld [vmem:[%s7887_s28 + $0xd0] sm:$0xf] }
  0x94   : > { %1382 = vmatmul.bf16.gmra.mxu2 %v6203_v18  ;;  %1471 = vmatmul.bf16.gmra.mxu3 %v6207_v19  ;;  %v6270_v18 = vld [vmem:[%s7887_s28 + $0xd8] sm:$0xf]  ;;  %v7311_v19 = vld [vmem:[%s7887_s28 + $0xe8] sm:$0xf0]  ;;  %v6263_v31 = vor.u32 %v7310_v20, %v6262_v17  ;;  %v6296_v17 = vld [vmem:[%s7887_s28 + $0x12c] sm:$0xf0] }
  0x95   : > { %2119 = vmatpush.bf16.msra.mxu0 %v6715_v16  ;;  %v6271_v26 = vor.u32 %v7311_v19, %v6270_v18  ;;  %v7317_v16 = vld [vmem:[%s7887_s28 + $0x11c] sm:$0xf]  ;;  %v6302_v18 = vld [vmem:[%s7887_s28 + $0x120] sm:$0xf]  ;;  %v7320_v19 = vld [vmem:[%s7887_s28 + $0x130] sm:$0xf0] }
  0x96   : > { %v6310_v20 = vld [vmem:[%s7887_s28 + $0x128] sm:$0xf] }
  0xa3   : > { %1298 = vmatmul.bf16.gmra.mxu1 %v6219_v40  ;;  %6623 = vmatmul.msk.bf16.gmra.mxu0 %vm1133_vm1, %v6231_v41  ;;  %v7312_v41 = vld [vmem:[%s7887_s28 + $0xf4] sm:$0xf] }
  0xa4   : > { %1387 = vmatmul.bf16.gmra.mxu2 %v6223_v42  ;;  %1476 = vmatmul.bf16.gmra.mxu3 %v6227_v43  ;;  %v6276_v42 = vld [vmem:[%s7887_s28 + $0x104] sm:$0xf0]  ;;  %v6282_v43 = vld [vmem:[%s7887_s28 + $0xf8] sm:$0xf] }
  0xa5   : > { %v6279_v52 = vor.u32 %v7312_v41, %v6276_v42  ;;  %v6283_v60 = vor.u32 %v7315_v47, %v6282_v43  ;;  %v6311_v41 = vor.u32 %v7321_v21, %v6310_v20  ;;  %v6303_v47 = vor.u32 %v7320_v19, %v6302_v18 }
  0xb0   : > { %v8135_v55 = vpop.f32.mrf.mxu0  ;;  %v1215_v56 = vpop.f32.mrf.mxu1 }
  0xb1   : > { %v8138_v59 = vadd.f32 %v8125_v44, %v1215_v56 }
  0xb3   : > { %1303 = vmatmul.bf16.gmra.mxu1 %v6239_v53  ;;  %6624 = vmatmul.msk.bf16.gmra.mxu0 %vm1133_vm1, %v6251_v54  ;;  %v6291_v53 = vor.u32 %v7316_v46, %v6290_v45 }
  0xb4   : > { %1392 = vmatmul.bf16.gmra.mxu2 %v6243_v57  ;;  %1481 = vmatmul.bf16.gmra.mxu3 %v6247_v58 }
  0xb7   : > { %v1235_v2 = vpop.f32.mrf.mxu2  ;;  %v1255_v3 = vpop.f32.mrf.mxu3 }
  0xb8   : > { %v8154_v4 = vadd.f32 %v8125_v44, %v1235_v2  ;;  %v8157_v5 = vadd.f32 %v8125_v44, %v1255_v3  ;;  %v8159_v6 = vpop.f32.mrf.mxu0  ;;  %v1217_v7 = vpop.f32.mrf.mxu1  ;;  %v6691_v2 = vor.u32 %v7411_v63, %v6688_v0  ;;  %v7414_v3 = vld [vmem:[%s12531_s3 + $0x74] sm:$0xf0]  ;;  %v7322_v63 = vld [vmem:[%s7887_s28 + $0x144] sm:$0xf] }
  0xb9   : > { %v8162_v8 = vadd.f32 %v8125_v44, %v1217_v7  ;;  %v6695_v7 = vor.u32 %v7414_v3, %v6694_v1  ;;  %v6316_v0 = vld [vmem:[%s7887_s28 + $0x154] sm:$0xf0]  ;;  %v6322_v1 = vld [vmem:[%s7887_s28 + $0x148] sm:$0xf]  ;;  %v7326_v3 = vld [vmem:[%s7887_s28 + $0x160] sm:$0xf0] }
  0xba   : > { %1942 = vmatpush.bf16.msra.mxu2 %v6691_v2  ;;  %v6330_v2 = vld [vmem:[%s7887_s28 + $0x150] sm:$0xf]  ;;  %v6319_v18 = vor.u32 %v7322_v63, %v6316_v0  ;;  %v6336_v63 = vld [vmem:[%s7887_s28 + $0x17c] sm:$0xf0] }
  0xbb   : > { %2031 = vmatpush.bf16.msra.mxu3 %v6695_v7  ;;  %v7325_v7 = vld [vmem:[%s7887_s28 + $0x158] sm:$0xf0]  ;;  %v6331_v19 = vor.u32 %v7326_v3, %v6330_v2  ;;  %v6342_v0 = vld [vmem:[%s7887_s28 + $0x170] sm:$0xf]  ;;  %v6350_v2 = vld [vmem:[%s7887_s28 + $0x178] sm:$0xf] }
  0xbc   : > { %v7331_v3 = vld [vmem:[%s7887_s28 + $0x188] sm:$0xf0] }
  0xbf   : > { %v1237_v23 = vpop.f32.mrf.mxu2  ;;  %v1257_v24 = vpop.f32.mrf.mxu3 }
  0xc0   : > { %v8185_v27 = vadd.f32 %v8125_v44, %v1237_v23  ;;  %v8188_v28 = vadd.f32 %v8125_v44, %v1257_v24  ;;  %v8190_v29 = vpop.f32.mrf.mxu0  ;;  %v1220_v30 = vpop.f32.mrf.mxu1  ;;  %v7413_v23 = vld [vmem:[%s12531_s3 + $0x6c] sm:$0xf0]  ;;  %v7412_v24 = vld [vmem:[%s12531_s3 + $0x6c] sm:$0xf] }
  0xc1   : > { %v8193_v33 = vadd.f32 %v8125_v44, %v1220_v30  ;;  %v6687_v30 = vor.u32 %v7413_v23, %v6686_v22 }
  0xc3   : > { %1308 = vmatmul.bf16.gmra.mxu1 %v6259_v25  ;;  %6625 = vmatmul.msk.bf16.gmra.mxu0 %vm1133_vm1, %v6271_v26  ;;  %v7318_v25 = vld [vmem:[%s7887_s28 + $0x124] sm:$0xf]  ;;  %v6304_v26 = vld [vmem:[%s7887_s28 + $0x134] sm:$0xf0] }
  0xc4   : > { %1397 = vmatmul.bf16.gmra.mxu2 %v6263_v31  ;;  %1486 = vmatmul.bf16.gmra.mxu3 %v6267_v32  ;;  %v6696_v31 = vld [vmem:[%s12531_s3 + $0x78] sm:$0xf0]  ;;  %v6307_v48 = vor.u32 %v7318_v25, %v6304_v26 }
  0xc5   : > { %v6699_v32 = vor.u32 %v7412_v24, %v6696_v31  ;;  %1853 = vmatpush.bf16.msra.mxu1 %v6687_v30  ;;  %v6323_v24 = vor.u32 %v7325_v7, %v6322_v1  ;;  %v6672_v30 = vld [vmem:[%s12531_s3 + $0x50] sm:$0xf0]  ;;  %v6678_v31 = vld [vmem:[%s12531_s3 + $0x48] sm:$0xf]  ;;  %v7330_v1 = vld [vmem:[%s7887_s28 + $0x180] sm:$0xf0] }
  0xc7   : > { %v1240_v34 = vpop.f32.mrf.mxu2  ;;  %v1260_v35 = vpop.f32.mrf.mxu3  ;;  %2120 = vmatpush.bf16.msra.mxu0 %v6699_v32  ;;  %v1198_v32 = vadd.f32 %v8125_v44, %v8159_v6  ;;  %v7327_v6 = vld [vmem:[%s7887_s28 + $0x16c] sm:$0xf] }
  0xc8   : > { %v8197_v36 = vadd.f32 %v8125_v44, %v1240_v34  ;;  %v8200_v37 = vadd.f32 %v8125_v44, %v1260_v35  ;;  %v8202_v38 = vpop.f32.mrf.mxu0  ;;  %v1222_v39 = vpop.f32.mrf.mxu1 }
  0xc9   : > { %v8205_v40 = vadd.f32 %v8125_v44, %v1222_v39  ;;  %v6299_v39 = vor.u32 %v7317_v16, %v6296_v17 }
  0xcf   : > { %v1242_v50 = vpop.f32.mrf.mxu2  ;;  %v1262_v51 = vpop.f32.mrf.mxu3 }
  0xd0   : > { %v8216_v54 = vadd.f32 %v8125_v44, %v1242_v50  ;;  %v8219_v56 = vadd.f32 %v8125_v44, %v1262_v51  ;;  %v8221_v57 = vpop.f32.mrf.mxu0  ;;  %v1225_v58 = vpop.f32.mrf.mxu1 }
  0xd1   : > { %v8224_v62 = vadd.f32 %v8125_v44, %v1225_v58 }
  0xd3   : > { %1313 = vmatmul.bf16.gmra.mxu1 %v6279_v52  ;;  %6626 = vmatmul.msk.bf16.gmra.mxu0 %vm1133_vm1, %v6291_v53 }
  0xd4   : > { %1402 = vmatmul.bf16.gmra.mxu2 %v6283_v60  ;;  %1491 = vmatmul.bf16.gmra.mxu3 %v6287_v61 }
  0xd7   : > { %v1245_v9 = vpop.f32.mrf.mxu2  ;;  %v1265_v10 = vpop.f32.mrf.mxu3 }
  0xd8   : > { %v8240_v11 = vadd.f32 %v8125_v44, %v1245_v9  ;;  %v8243_v12 = vadd.f32 %v8125_v44, %v1265_v10  ;;  %v8245_v13 = vpop.f32.mrf.mxu0  ;;  %v1227_v14 = vpop.f32.mrf.mxu1  ;;  %v7323_v9 = vld [vmem:[%s7887_s28 + $0x14c] sm:$0xf]  ;;  %v6324_v10 = vld [vmem:[%s7887_s28 + $0x15c] sm:$0xf0] }
  0xd9   : > { %v8248_v15 = vadd.f32 %v8125_v44, %v1227_v14  ;;  %v1196_v14 = vadd.f32 %v8125_v44, %v8135_v55  ;;  %v6327_v25 = vor.u32 %v7323_v9, %v6324_v10  ;;  %v7407_v55 = vld [vmem:[%s12531_s3 + $0x44] sm:$0xf]  ;;  %v6670_v9 = vld [vmem:[%s12531_s3 + $0x40] sm:$0xf]  ;;  %v7409_v10 = vld [vmem:[%s12531_s3 + $0x4c] sm:$0xf0] }
  0xdf   : > { %v1247_v34 = vpop.f32.mrf.mxu2  ;;  %v1267_v35 = vpop.f32.mrf.mxu3 }
  0xe0   : > { %v8271_v42 = vadd.f32 %v8125_v44, %v1247_v34  ;;  %v8274_v43 = vadd.f32 %v8125_v44, %v1267_v35  ;;  %v8276_v45 = vpop.f32.mrf.mxu0  ;;  %v1230_v46 = vpop.f32.mrf.mxu1 }
  0xe1   : > { %v8279_v49 = vadd.f32 %v8125_v44, %v1230_v46 }
  0xe3   : > { %1318 = vmatmul.bf16.gmra.mxu1 %v6299_v39  ;;  %6627 = vmatmul.msk.bf16.gmra.mxu0 %vm1133_vm1, %v6311_v41  ;;  %v6675_v39 = vor.u32 %v7407_v55, %v6672_v30  ;;  %v7410_v41 = vld [vmem:[%s12531_s3 + $0x54] sm:$0xf0]  ;;  %v6351_v55 = vor.u32 %v7331_v3, %v6350_v2  ;;  %v6356_v2 = vld [vmem:[%s7887_s28 + $0x1a4] sm:$0xf0] }
  0xe4   : > { %1407 = vmatmul.bf16.gmra.mxu2 %v6303_v47  ;;  %1496 = vmatmul.bf16.gmra.mxu3 %v6307_v48 }
  0xe5   : > { %1943 = vmatpush.bf16.msra.mxu2 %v6675_v39 }
  0xe7   : > { %v1250_v50 = vpop.f32.mrf.mxu2  ;;  %v1270_v51 = vpop.f32.mrf.mxu3 }
  0xe8   : > { %v8283_v52 = vadd.f32 %v8125_v44, %v1250_v50  ;;  %v8286_v53 = vadd.f32 %v8125_v44, %v1270_v51  ;;  %v8288_v58 = vpop.f32.mrf.mxu0  ;;  %v1232_v60 = vpop.f32.mrf.mxu1  ;;  %v6679_v50 = vor.u32 %v7410_v41, %v6678_v31 }
  0xe9   : > { %v8291_v61 = vadd.f32 %v8125_v44, %v1232_v60 }
  0xea   : > { %2032 = vmatpush.bf16.msra.mxu3 %v6679_v50 }
  0xef   : > { %v1252_v16 = vpop.f32.mrf.mxu2  ;;  %v1272_v17 = vpop.f32.mrf.mxu3 }
  0xf0   : > { %v8304_v20 = vadd.f32 %v8125_v44, %v1252_v16  ;;  %v8307_v21 = vadd.f32 %v8125_v44, %v1272_v17  ;;  %v1284_v22 = vpop.f32.mrf.mxu1  ;;  %v1551_v23 = vpop.f32.mrf.mxu0  ;;  %v7328_v16 = vld [vmem:[%s7887_s28 + $0x174] sm:$0xf]  ;;  %v6344_v17 = vld [vmem:[%s7887_s28 + $0x184] sm:$0xf0] }
  0xf1   : > { %v1285_v26 = vadd.f32 %v1284_v22, %v1196_v14  ;;  %v7408_v14 = vld [vmem:[%s12531_s3 + $0x4c] sm:$0xf] }
  0xf3   : > { %1323 = vmatmul.bf16.gmra.mxu1 %v6319_v18  ;;  %6628 = vmatmul.msk.bf16.gmra.mxu0 %vm1133_vm1, %v6331_v19  ;;  %v6671_v18 = vor.u32 %v7409_v10, %v6670_v9  ;;  %v6680_v19 = vld [vmem:[%s12531_s3 + $0x58] sm:$0xf0]  ;;  %v6362_v9 = vld [vmem:[%s7887_s28 + $0x198] sm:$0xf]  ;;  %v6370_v10 = vld [vmem:[%s7887_s28 + $0x1a0] sm:$0xf] }
  0xf4   : > { %1412 = vmatmul.bf16.gmra.mxu2 %v6323_v24  ;;  %1501 = vmatmul.bf16.gmra.mxu3 %v6327_v25  ;;  %v6683_v22 = vor.u32 %v7408_v14, %v6680_v19  ;;  %v7336_v14 = vld [vmem:[%s7887_s28 + $0x1b0] sm:$0xf0] }
  0xf5   : > { %1854 = vmatpush.bf16.msra.mxu1 %v6671_v18 }
  0xf6   : > { %2121 = vmatpush.bf16.msra.mxu0 %v6683_v22 }
  0xf7   : > { %v1373_v34 = vpop.f32.mrf.mxu2  ;;  %v1462_v35 = vpop.f32.mrf.mxu3 }
  0xf8   : > { %v1374_v46 = vadd.f32 %v1373_v34, %v1285_v26  ;;  %v1286_v47 = vpop.f32.mrf.mxu1  ;;  %v1553_v48 = vpop.f32.mrf.mxu0  ;;  %v6339_v26 = vor.u32 %v7327_v6, %v6336_v63  ;;  %v6343_v34 = vor.u32 %v7330_v1, %v6342_v0 }
  0xf9   : > { %v1287_v51 = vadd.f32 %v1286_v47, %v1198_v32  ;;  %v1203_v47 = vadd.f32 %v8125_v44, %v8202_v38  ;;  %v1206_v38 = vadd.f32 %v8125_v44, %v8221_v57  ;;  %v7403_v57 = vld [vmem:[%s12531_s3 + $0x24] sm:$0xf] }
  0xfa   : > { %v1463_v60 = vadd.f32 %v1462_v35, %v1374_v46  ;;  %v6347_v35 = vor.u32 %v7328_v16, %v6344_v17  ;;  %v7333_v16 = vld [vmem:[%s7887_s28 + $0x19c] sm:$0xf]  ;;  %v6364_v17 = vld [vmem:[%s7887_s28 + $0x1ac] sm:$0xf0] }
  0xfc   : > { %v1552_v7 = vadd.f32 %v1551_v23, %v1463_v60  ;;  %v1201_v23 = vadd.f32 %v8125_v44, %v8190_v29 }
  0xff   : > { %v1375_v24 = vpop.f32.mrf.mxu2  ;;  %v1464_v25 = vpop.f32.mrf.mxu3 }
 0x100   : > { %v1376_v30 = vadd.f32 %v1375_v24, %v1287_v51  ;;  %v1289_v31 = vpop.f32.mrf.mxu1  ;;  %v1556_v32 = vpop.f32.mrf.mxu0 }
 0x101   : > { %v1290_v39 = vadd.f32 %v1289_v31, %v1201_v23  ;;  %v6371_v23 = vor.u32 %v7336_v14, %v6370_v10  ;;  %v7340_v10 = vld [vmem:[%s7887_s28 + $0x1d0] sm:$0xf0]  ;;  %v6390_v14 = vld [vmem:[%s7887_s28 + $0x1c8] sm:$0xf] }
 0x102   : > { %v1465_v41 = vadd.f32 %v1464_v25, %v1376_v30  ;;  %v6367_v30 = vor.u32 %v7333_v16, %v6364_v17  ;;  %v6654_v17 = vld [vmem:[%s12531_s3 + $0x20] sm:$0xf] }
 0x103   : > { %1328 = vmatmul.bf16.gmra.mxu1 %v6339_v26  ;;  %6629 = vmatmul.msk.bf16.gmra.mxu0 %vm1133_vm1, %v6351_v55 }
 0x104   : > { %v1554_v29 = vadd.f32 %v1553_v48, %v1465_v41  ;;  %1417 = vmatmul.bf16.gmra.mxu2 %v6343_v34  ;;  %1506 = vmatmul.bf16.gmra.mxu3 %v6347_v35  ;;  %v7332_v48 = vld [vmem:[%s7887_s28 + $0x194] sm:$0xf]  ;;  %v6662_v41 = vld [vmem:[%s12531_s3 + $0x28] sm:$0xf] }
 0x105   : > { %v6359_v22 = vor.u32 %v7332_v48, %v6356_v2 }
 0x106   : > { %v8347_v46 = vpack.c.bf16 %v1554_v29, %v1552_v7  ;;  %v7335_v7 = vld [vmem:[%s7887_s28 + $0x1a8] sm:$0xf0]  ;;  %v1208_v29 = vadd.f32 %v8125_v44, %v8245_v13  ;;  %v7337_v13 = vld [vmem:[%s7887_s28 + $0x1bc] sm:$0xf] }
 0x107   : > { %v1378_v50 = vpop.f32.mrf.mxu2  ;;  %v1467_v51 = vpop.f32.mrf.mxu3  ;;  %v6363_v55 = vor.u32 %v7335_v7, %v6362_v9  ;;  %v6382_v9 = vld [vmem:[%s7887_s28 + $0x1c0] sm:$0xf]  ;;  %v7341_v7 = vld [vmem:[%s7887_s28 + $0x1d8] sm:$0xf0] }
 0x108   : > { %v1379_v60 = vadd.f32 %v1378_v50, %v1290_v39  ;;  %v1291_v6 = vpop.f32.mrf.mxu1  ;;  %v1558_v63 = vpop.f32.mrf.mxu0  ;;  %v6656_v39 = vld [vmem:[%s12531_s3 + $0x30] sm:$0xf0] }
 0x109   : > { %v1292_v0 = vadd.f32 %v1291_v6, %v1203_v47 }
 0x10a   : > { %v1468_v1 = vadd.f32 %v1467_v51, %v1379_v60  ;;  %v6659_v51 = vor.u32 %v7403_v57, %v6656_v39  ;;  %v7406_v60 = vld [vmem:[%s12531_s3 + $0x34] sm:$0xf0] }
 0x10c   : > { %v1557_v3 = vadd.f32 %v1556_v32, %v1468_v1  ;;  %v6663_v1 = vor.u32 %v7406_v60, %v6662_v41  ;;  %1944 = vmatpush.bf16.msra.mxu2 %v6659_v51  ;;  %v6383_v41 = vor.u32 %v7340_v10, %v6382_v9  ;;  %v1213_v60 = vadd.f32 %v8125_v44, %v8288_v58  ;;  %v6396_v9 = vld [vmem:[%s7887_s28 + $0x1f4] sm:$0xf0] }
 0x10e   : > { %2033 = vmatpush.bf16.msra.mxu3 %v6663_v1 }
 0x10f   : > { %v1380_v18 = vpop.f32.mrf.mxu2  ;;  %v1469_v19 = vpop.f32.mrf.mxu3 }
 0x110   : > { %v1381_v24 = vadd.f32 %v1380_v18, %v1292_v0  ;;  %v1294_v25 = vpop.f32.mrf.mxu1  ;;  %v1561_v26 = vpop.f32.mrf.mxu0  ;;  %v7404_v18 = vld [vmem:[%s12531_s3 + $0x2c] sm:$0xf] }
 0x111   : > { %v1295_v31 = vadd.f32 %v1294_v25, %v1206_v38  ;;  %v7405_v38 = vld [vmem:[%s12531_s3 + $0x2c] sm:$0xf0] }
 0x112   : > { %v1470_v32 = vadd.f32 %v1469_v19, %v1381_v24  ;;  %v7338_v19 = vld [vmem:[%s7887_s28 + $0x1c4] sm:$0xf]  ;;  %v6664_v24 = vld [vmem:[%s12531_s3 + $0x38] sm:$0xf0] }
 0x113   : > { %1333 = vmatmul.bf16.gmra.mxu1 %v6359_v22  ;;  %6630 = vmatmul.msk.bf16.gmra.mxu0 %vm1133_vm1, %v6371_v23  ;;  %v6384_v22 = vld [vmem:[%s7887_s28 + $0x1d4] sm:$0xf0]  ;;  %v6655_v23 = vor.u32 %v7405_v38, %v6654_v17  ;;  %v6667_v25 = vor.u32 %v7404_v18, %v6664_v24  ;;  %v7346_v17 = vld [vmem:[%s7887_s28 + $0x200] sm:$0xf0]  ;;  %v7343_v38 = vld [vmem:[%s7887_s28 + $0x1ec] sm:$0xf] }
 0x114   : > { %v1559_v34 = vadd.f32 %v1558_v63, %v1470_v32  ;;  %1422 = vmatmul.bf16.gmra.mxu2 %v6363_v55  ;;  %1511 = vmatmul.bf16.gmra.mxu3 %v6367_v30  ;;  %v6391_v32 = vor.u32 %v7341_v7, %v6390_v14  ;;  %v6402_v14 = vld [vmem:[%s7887_s28 + $0x1e8] sm:$0xf]  ;;  %v6410_v7 = vld [vmem:[%s7887_s28 + $0x1f0] sm:$0xf]  ;;  %v6404_v18 = vld [vmem:[%s7887_s28 + $0x1fc] sm:$0xf0] }
 0x115   : > { %1855 = vmatpush.bf16.msra.mxu1 %v6655_v23  ;;  %2122 = vmatpush.bf16.msra.mxu0 %v6667_v25  ;;  %v6411_v58 = vor.u32 %v7346_v17, %v6410_v7  ;;  %v6638_v7 = vld [vmem:[%s12531_s3] sm:$0xf]  ;;  %v7401_v17 = vld [vmem:[%s12531_s3 + $0xc] sm:$0xf0] }
 0x116   : > { %v8362_v35 = vpack.c.bf16 %v1559_v34, %v1557_v3  ;;  %v6376_v3 = vld [vmem:[%s7887_s28 + $0x1cc] sm:$0xf0] }
 0x117   : > { %v1383_v47 = vpop.f32.mrf.mxu2  ;;  %v1472_v50 = vpop.f32.mrf.mxu3 }
 0x118   : > { %v1384_v6 = vadd.f32 %v1383_v47, %v1295_v31  ;;  %v1296_v63 = vpop.f32.mrf.mxu1  ;;  %v1563_v0 = vpop.f32.mrf.mxu0  ;;  %v6379_v31 = vor.u32 %v7337_v13, %v6376_v3 }
 0x119   : > { %v1297_v48 = vadd.f32 %v1296_v63, %v1208_v29  ;;  %v6387_v29 = vor.u32 %v7338_v19, %v6384_v22 }
 0x11a   : > { %v1473_v2 = vadd.f32 %v1472_v50, %v1384_v6 }
 0x11c   : > { %v1562_v16 = vadd.f32 %v1561_v26, %v1473_v2  ;;  %v1211_v26 = vadd.f32 %v8125_v44, %v8276_v45 }
 0x11f   : > { %v1385_v55 = vpop.f32.mrf.mxu2  ;;  %v1474_v30 = vpop.f32.mrf.mxu3 }
 0x120   : > { %v1386_v34 = vadd.f32 %v1385_v55, %v1297_v48  ;;  %v1299_v57 = vpop.f32.mrf.mxu1  ;;  %v1566_v39 = vpop.f32.mrf.mxu0  ;;  %v6407_v55 = vor.u32 %v7343_v38, %v6404_v18  ;;  %v6424_v38 = vld [vmem:[%s7887_s28 + $0x224] sm:$0xf0]  ;;  %v6639_v18 = vor.u32 %v7401_v17, %v6638_v7 }
 0x121   : > { %v1300_v47 = vadd.f32 %v1299_v57, %v1211_v26  ;;  %v7399_v57 = vld [vmem:[%s12531_s3 + $0x4] sm:$0xf] }
 0x122   : > { %v1475_v50 = vadd.f32 %v1474_v30, %v1386_v34  ;;  %1856 = vmatpush.bf16.msra.mxu1 %v6639_v18 }
 0x123   : > { %1338 = vmatmul.bf16.gmra.mxu1 %v6379_v31  ;;  %6631 = vmatmul.msk.bf16.gmra.mxu0 %vm1133_vm1, %v6391_v32 }
 0x124   : > { %v1564_v45 = vadd.f32 %v1563_v0, %v1475_v50  ;;  %1427 = vmatmul.bf16.gmra.mxu2 %v6383_v41  ;;  %1516 = vmatmul.bf16.gmra.mxu3 %v6387_v29  ;;  %v7342_v0 = vld [vmem:[%s7887_s28 + $0x1e4] sm:$0xf]  ;;  %v7402_v50 = vld [vmem:[%s12531_s3 + $0x14] sm:$0xf0] }
 0x125   : > { %v6399_v44 = vor.u32 %v7342_v0, %v6396_v9  ;;  %v7350_v0 = vld [vmem:[%s7887_s28 + $0x220] sm:$0xf0]  ;;  %v6430_v9 = vld [vmem:[%s7887_s28 + $0x218] sm:$0xf] }
 0x126   : > { %v8401_v51 = vpack.c.bf16 %v1564_v45, %v1562_v16  ;;  %v7345_v16 = vld [vmem:[%s7887_s28 + $0x1f8] sm:$0xf0] }
 0x127   : > { %v1388_v6 = vpop.f32.mrf.mxu2  ;;  %v1477_v63 = vpop.f32.mrf.mxu3  ;;  %v6403_v26 = vor.u32 %v7345_v16, %v6402_v14  ;;  %v7348_v16 = vld [vmem:[%s7887_s28 + $0x214] sm:$0xf] }
 0x128   : > { %v1389_v1 = vadd.f32 %v1388_v6, %v1300_v47  ;;  %v1301_v48 = vpop.f32.mrf.mxu1  ;;  %v1568_v2 = vpop.f32.mrf.mxu0 }
 0x129   : > { %v1302_v13 = vadd.f32 %v1301_v48, %v1213_v60 }
 0x12a   : > { %v1478_v3 = vadd.f32 %v1477_v63, %v1389_v1 }
 0x12c   : > { %v1567_v10 = vadd.f32 %v1566_v39, %v1478_v3  ;;  %v6640_v39 = vld [vmem:[%s12531_s3 + $0x10] sm:$0xf0]  ;;  %v6422_v3 = vld [vmem:[%s7887_s28 + $0x210] sm:$0xf] }
 0x12d   : > { %v6643_v47 = vor.u32 %v7399_v57, %v6640_v39 }
 0x12f   : > { %v1390_v19 = vpop.f32.mrf.mxu2  ;;  %v1479_v22 = vpop.f32.mrf.mxu3  ;;  %1945 = vmatpush.bf16.msra.mxu2 %v6643_v47 }
 0x130   : > { %v1391_v23 = vadd.f32 %v1390_v19, %v1302_v13  ;;  %v1304_v24 = vpop.f32.mrf.mxu1  ;;  %v1571_v25 = vpop.f32.mrf.mxu0  ;;  %v6416_v13 = vld [vmem:[%s7887_s28 + $0x21c] sm:$0xf0]  ;;  %v6648_v19 = vld [vmem:[%s12531_s3 + $0x18] sm:$0xf0] }
 0x131   : > { %v1305_v30 = vadd.f32 %v1304_v24, %v8138_v59  ;;  %v6646_v59 = vld [vmem:[%s12531_s3 + $0x8] sm:$0xf] }
 0x132   : > { %v1480_v31 = vadd.f32 %v1479_v22, %v1391_v23  ;;  %v6647_v63 = vor.u32 %v7402_v50, %v6646_v59 }
 0x133   : > { %1343 = vmatmul.bf16.gmra.mxu1 %v6399_v44  ;;  %6632 = vmatmul.msk.bf16.gmra.mxu0 %vm1133_vm1, %v6411_v58 }
 0x134   : > { %v1569_v32 = vadd.f32 %v1568_v2, %v1480_v31  ;;  %1432 = vmatmul.bf16.gmra.mxu2 %v6403_v26  ;;  %1521 = vmatmul.bf16.gmra.mxu3 %v6407_v55  ;;  %v7347_v2 = vld [vmem:[%s7887_s28 + $0x20c] sm:$0xf]  ;;  %v6427_v31 = vor.u32 %v7348_v16, %v6424_v38 }
 0x135   : > { %2034 = vmatpush.bf16.msra.mxu3 %v6647_v63  ;;  %v6419_v23 = vor.u32 %v7347_v2, %v6416_v13  ;;  %v7352_v63 = vld [vmem:[%s7887_s28 + $0x234] sm:$0xf]  ;;  %v6450_v2 = vld [vmem:[%s7887_s28 + $0x240] sm:$0xf] }
 0x136   : > { %v8415_v34 = vpack.c.bf16 %v1569_v32, %v1567_v10  ;;  %v7351_v10 = vld [vmem:[%s7887_s28 + $0x228] sm:$0xf0]  ;;  %v7356_v13 = vld [vmem:[%s7887_s28 + $0x250] sm:$0xf0] }
 0x137   : > { %v1393_v41 = vpop.f32.mrf.mxu2  ;;  %v1482_v29 = vpop.f32.mrf.mxu3  ;;  %v6431_v24 = vor.u32 %v7351_v10, %v6430_v9  ;;  %v6444_v9 = vld [vmem:[%s7887_s28 + $0x24c] sm:$0xf0]  ;;  %v6451_v17 = vor.u32 %v7356_v13, %v6450_v2 }
 0x138   : > { %v1394_v45 = vadd.f32 %v1393_v41, %v1305_v30  ;;  %v1306_v60 = vpop.f32.mrf.mxu1  ;;  %v1573_v6 = vpop.f32.mrf.mxu0  ;;  %v6423_v30 = vor.u32 %v7350_v0, %v6422_v3  ;;  %v7355_v3 = vld [vmem:[%s7887_s28 + $0x248] sm:$0xf0]  ;;  %v7353_v0 = vld [vmem:[%s7887_s28 + $0x23c] sm:$0xf] }
 0x139   : > { %v1307_v1 = vadd.f32 %v1306_v60, %v8162_v8  ;;  %v7400_v8 = vld [vmem:[%s12531_s3 + $0xc] sm:$0xf] }
 0x13a   : > { %v1483_v48 = vadd.f32 %v1482_v29, %v1394_v45  ;;  %v6651_v22 = vor.u32 %v7400_v8, %v6648_v19  ;;  %v6447_v19 = vor.u32 %v7353_v0, %v6444_v9 }
 0x13c   : > { %v1572_v14 = vadd.f32 %v1571_v25, %v1483_v48  ;;  %2123 = vmatpush.bf16.msra.mxu0 %v6651_v22 }
 0x13f   : > { %v1395_v44 = vpop.f32.mrf.mxu2  ;;  %v1484_v58 = vpop.f32.mrf.mxu3 }
 0x140   : > { %v1396_v25 = vadd.f32 %v1395_v44, %v1307_v1  ;;  %v1309_v26 = vpop.f32.mrf.mxu1  ;;  %v1576_v55 = vpop.f32.mrf.mxu0  ;;  %v6436_v1 = vld [vmem:[%s7887_s28 + $0x244] sm:$0xf0] }
 0x141   : > { %v1310_v32 = vadd.f32 %v1309_v26, %v8193_v33  ;;  %v6439_v7 = vor.u32 %v7352_v63, %v6436_v1 }
 0x142   : > { %v1485_v57 = vadd.f32 %v1484_v58, %v1396_v25 }
 0x143   : > { %1348 = vmatmul.bf16.gmra.mxu1 %v6419_v23  ;;  %6633 = vmatmul.msk.bf16.gmra.mxu0 %vm1133_vm1, %v6431_v24 }
 0x144   : > { %v1574_v39 = vadd.f32 %v1573_v6, %v1485_v57  ;;  %1437 = vmatmul.bf16.gmra.mxu2 %v6423_v30  ;;  %1526 = vmatmul.bf16.gmra.mxu3 %v6427_v31  ;;  %v6442_v6 = vld [vmem:[%s7887_s28 + $0x238] sm:$0xf]  ;;  %v7357_v31 = vld [vmem:[%s7887_s28 + $0x25c] sm:$0xf] }
 0x145   : > { %v6443_v18 = vor.u32 %v7355_v3, %v6442_v6 }
 0x146   : > { %v8452_v59 = vpack.c.bf16 %v1574_v39, %v1572_v14  ;;  %v6462_v39 = vld [vmem:[%s7887_s28 + $0x260] sm:$0xf] }
 0x147   : > { %v1398_v41 = vpop.f32.mrf.mxu2  ;;  %v1487_v29 = vpop.f32.mrf.mxu3 }
 0x148   : > { %v1399_v47 = vadd.f32 %v1398_v41, %v1310_v32  ;;  %v1311_v33 = vpop.f32.mrf.mxu1  ;;  %v1578_v50 = vpop.f32.mrf.mxu0  ;;  %v6456_v32 = vld [vmem:[%s7887_s28 + $0x26c] sm:$0xf0]  ;;  %v6470_v41 = vld [vmem:[%s7887_s28 + $0x268] sm:$0xf] }
 0x149   : > { %v1312_v45 = vadd.f32 %v1311_v33, %v8205_v40  ;;  %v7358_v33 = vld [vmem:[%s7887_s28 + $0x264] sm:$0xf]  ;;  %v6459_v63 = vor.u32 %v7357_v31, %v6456_v32 }
 0x14a   : > { %v1488_v60 = vadd.f32 %v1487_v29, %v1399_v47  ;;  %v7361_v29 = vld [vmem:[%s7887_s28 + $0x278] sm:$0xf0]  ;;  %v7360_v47 = vld [vmem:[%s7887_s28 + $0x270] sm:$0xf0] }
 0x14b   : > { %v6471_v1 = vor.u32 %v7361_v29, %v6470_v41  ;;  %v6463_v13 = vor.u32 %v7360_v47, %v6462_v39  ;;  %v7006_v41 = vld [vmem:[%s12535_s7 + $0x1e0] sm:$0xf]  ;;  %v7493_v29 = vld [vmem:[%s12535_s7 + $0x1ec] sm:$0xf0] }
 0x14c   : > { %v1577_v48 = vadd.f32 %v1576_v55, %v1488_v60 }
 0x14f   : > { %v1400_v10 = vpop.f32.mrf.mxu2  ;;  %v1489_v14 = vpop.f32.mrf.mxu3 }
 0x150   : > { %v1401_v8 = vadd.f32 %v1400_v10, %v1312_v45  ;;  %v1314_v16 = vpop.f32.mrf.mxu1  ;;  %v1581_v38 = vpop.f32.mrf.mxu0 }
 0x151   : > { %v1315_v40 = vadd.f32 %v1314_v16, %v8224_v62 }
 0x152   : > { %v1490_v22 = vadd.f32 %v1489_v14, %v1401_v8 }
 0x153   : > { %1353 = vmatmul.bf16.gmra.mxu1 %v6439_v7  ;;  %6634 = vmatmul.msk.bf16.gmra.mxu0 %vm1133_vm1, %v6451_v17 }
 0x154   : > { %v1579_v44 = vadd.f32 %v1578_v50, %v1490_v22  ;;  %1442 = vmatmul.bf16.gmra.mxu2 %v6443_v18  ;;  %1531 = vmatmul.bf16.gmra.mxu3 %v6447_v19  ;;  %v6464_v50 = vld [vmem:[%s7887_s28 + $0x274] sm:$0xf0] }
 0x155   : > { %v6467_v3 = vor.u32 %v7358_v33, %v6464_v50 }
 0x156   : > { %v8465_v58 = vpack.c.bf16 %v1579_v44, %v1577_v48 }
 0x157   : > { %v1403_v23 = vpop.f32.mrf.mxu2  ;;  %v1492_v24 = vpop.f32.mrf.mxu3 }
 0x158   : > { %v1404_v25 = vadd.f32 %v1403_v23, %v1315_v40  ;;  %v1316_v62 = vpop.f32.mrf.mxu1  ;;  %v1583_v26 = vpop.f32.mrf.mxu0 }
 0x159   : > { %v1317_v55 = vadd.f32 %v1316_v62, %v8248_v15 }
 0x15a   : > { %v1493_v30 = vadd.f32 %v1492_v24, %v1404_v25 }
 0x15c   : > { %v1582_v57 = vadd.f32 %v1581_v38, %v1493_v30 }
 0x15f   : > { %v1405_v45 = vpop.f32.mrf.mxu2  ;;  %v1494_v60 = vpop.f32.mrf.mxu3 }
 0x160   : > { %v1406_v48 = vadd.f32 %v1405_v45, %v1317_v55  ;;  %v1319_v6 = vpop.f32.mrf.mxu1  ;;  %v1586_v2 = vpop.f32.mrf.mxu0 }
 0x161   : > { %v1320_v15 = vadd.f32 %v1319_v6, %v8279_v49  ;;  %v7134_v6 = vld [vmem:[%s12535_s7 + $0x2e0] sm:$0xf] }
 0x162   : > { %v1495_v0 = vadd.f32 %v1494_v60, %v1406_v48 }
 0x163   : > { %1358 = vmatmul.bf16.gmra.mxu1 %v6459_v63  ;;  %6635 = vmatmul.msk.bf16.gmra.mxu0 %vm1133_vm1, %v6471_v1 }
 0x164   : > { %v1584_v9 = vadd.f32 %v1583_v26, %v1495_v0  ;;  %1447 = vmatmul.bf16.gmra.mxu2 %v6463_v13  ;;  %1536 = vmatmul.bf16.gmra.mxu3 %v6467_v3 }
 0x166   : > { %v8478_v10 = vpack.c.bf16 %v1584_v9, %v1582_v57 }
 0x167   : > { %v1408_v14 = vpop.f32.mrf.mxu2  ;;  %v1497_v7 = vpop.f32.mrf.mxu3 }
 0x168   : > { %v1409_v17 = vadd.f32 %v1408_v14, %v1320_v15  ;;  %v1321_v8 = vpop.f32.mrf.mxu1  ;;  %v1588_v16 = vpop.f32.mrf.mxu0 }
 0x169   : > { %v1322_v38 = vadd.f32 %v1321_v8, %v8291_v61 }
 0x16a   : > { %v1498_v18 = vadd.f32 %v1497_v7, %v1409_v17 }
 0x16c   : > { %v1587_v19 = vadd.f32 %v1586_v2, %v1498_v18  ;;  %v6878_v2 = vld [vmem:[%s12535_s7 + $0xe0] sm:$0xf]  ;;  %v7557_v18 = vld [vmem:[%s12535_s7 + $0x3ec] sm:$0xf0] }
 0x16f   : > { %v1410_v40 = vpop.f32.mrf.mxu2  ;;  %v1499_v49 = vpop.f32.mrf.mxu3 }
 0x170   : > { %v1411_v22 = vadd.f32 %v1410_v40, %v1322_v38  ;;  %v1324_v44 = vpop.f32.mrf.mxu1  ;;  %v1591_v23 = vpop.f32.mrf.mxu0  ;;  %v7262_v38 = vld [vmem:[%s12535_s7 + $0x3e0] sm:$0xf] }
 0x171   : > { %v1325_v24 = vadd.f32 %v1324_v44, %v8154_v4 }
 0x172   : > { %v1500_v25 = vadd.f32 %v1499_v49, %v1411_v22 }
 0x173   : > { %1857 = vmatmul.bf16.vlgmr.msra.gmra.mxu1 %v8347_v46  ;;  %2124 = vmatmul.bf16.vlgmr.msra.gmra.mxu0 %v8347_v46 }
 0x174   : > { %v1589_v62 = vadd.f32 %v1588_v16, %v1500_v25  ;;  %1946 = vmatmul.bf16.vlgmr.msra.gmra.mxu2 %v8347_v46  ;;  %2035 = vmatmul.bf16.vlgmr.msra.gmra.mxu3 %v8347_v46  ;;  %v7007_v46 = vor.u32 %v7493_v29, %v7006_v41  ;;  %v7489_v41 = vld [vmem:[%s12535_s7 + $0x1cc] sm:$0xf0] }
 0x176   : > { %v8486_v61 = vpack.c.bf16 %v1589_v62, %v1587_v19  ;;  %4603 = vmatpush.bf16.msrb.mxu2 %v7007_v46  ;;  %v7263_v19 = vor.u32 %v7557_v18, %v7262_v38 }
 0x177   : > { %v1413_v26 = vpop.f32.mrf.mxu2  ;;  %v1502_v55 = vpop.f32.mrf.mxu3 }
 0x178   : > { %v1414_v30 = vadd.f32 %v1413_v26, %v1325_v24  ;;  %v1326_v31 = vpop.f32.mrf.mxu1  ;;  %v1593_v32 = vpop.f32.mrf.mxu0  ;;  %4781 = vmatpush.bf16.msrb.mxu0 %v7263_v19 }
 0x179   : > { %v1327_v57 = vadd.f32 %v1326_v31, %v8185_v27 }
 0x17a   : > { %v1503_v4 = vadd.f32 %v1502_v55, %v1414_v30 }
 0x17c   : > { %v1592_v39 = vadd.f32 %v1591_v23, %v1503_v4 }
 0x17f   : > { %v1415_v47 = vpop.f32.mrf.mxu2  ;;  %v1504_v33 = vpop.f32.mrf.mxu3 }
 0x180   : > { %v1416_v50 = vadd.f32 %v1415_v47, %v1327_v57  ;;  %v1329_v45 = vpop.f32.mrf.mxu1  ;;  %v1596_v60 = vpop.f32.mrf.mxu0 }
 0x181   : > { %v1330_v63 = vadd.f32 %v1329_v45, %v8197_v36  ;;  %v7525_v36 = vld [vmem:[%s12535_s7 + $0x2ec] sm:$0xf0] }
 0x182   : > { %v1505_v27 = vadd.f32 %v1504_v33, %v1416_v50  ;;  %v7135_v15 = vor.u32 %v7525_v36, %v7134_v6 }
 0x183   : > { %1862 = vmatmul.bf16.gmra.mxu1 %v8362_v35  ;;  %2129 = vmatmul.bf16.gmra.mxu0 %v8362_v35 }
 0x184   : > { %v1594_v1 = vadd.f32 %v1593_v32, %v1505_v27  ;;  %1951 = vmatmul.bf16.gmra.mxu2 %v8362_v35  ;;  %2040 = vmatmul.bf16.gmra.mxu3 %v8362_v35  ;;  %v7461_v35 = vld [vmem:[%s12535_s7 + $0xec] sm:$0xf0]  ;;  %v7118_v27 = vld [vmem:[%s12535_s7 + $0x2c0] sm:$0xf] }
 0x185   : > { %v6879_v7 = vor.u32 %v7461_v35, %v6878_v2  ;;  %4692 = vmatpush.bf16.msrb.mxu3 %v7135_v15 }
 0x186   : > { %v8500_v48 = vpack.c.bf16 %v1594_v1, %v1592_v39  ;;  %v6990_v39 = vld [vmem:[%s12535_s7 + $0x1c0] sm:$0xf] }
 0x187   : > { %v1418_v13 = vpop.f32.mrf.mxu2  ;;  %v1507_v3 = vpop.f32.mrf.mxu3  ;;  %4514 = vmatpush.bf16.msrb.mxu1 %v6879_v7  ;;  %v6862_v1 = vld [vmem:[%s12535_s7 + $0xc0] sm:$0xf] }
 0x188   : > { %v1419_v0 = vadd.f32 %v1418_v13, %v1330_v63  ;;  %v1331_v9 = vpop.f32.mrf.mxu1  ;;  %v1598_v14 = vpop.f32.mrf.mxu0  ;;  %v7246_v7 = vld [vmem:[%s12535_s7 + $0x3c0] sm:$0xf] }
 0x189   : > { %v1332_v17 = vadd.f32 %v1331_v9, %v8216_v54 }
 0x18a   : > { %v1508_v8 = vadd.f32 %v1507_v3, %v1419_v0 }
 0x18c   : > { %v1597_v16 = vadd.f32 %v1596_v60, %v1508_v8 }
 0x18f   : > { %v1420_v40 = vpop.f32.mrf.mxu2  ;;  %v1509_v49 = vpop.f32.mrf.mxu3 }
 0x190   : > { %v1421_v22 = vadd.f32 %v1420_v40, %v1332_v17  ;;  %v1334_v44 = vpop.f32.mrf.mxu1  ;;  %v1601_v23 = vpop.f32.mrf.mxu0  ;;  %v7553_v17 = vld [vmem:[%s12535_s7 + $0x3cc] sm:$0xf0] }
 0x191   : > { %v1335_v54 = vadd.f32 %v1334_v44, %v8240_v11  ;;  %v7247_v8 = vor.u32 %v7553_v17, %v7246_v7 }
 0x192   : > { %v1510_v24 = vadd.f32 %v1509_v49, %v1421_v22 }
 0x193   : > { %1867 = vmatmul.bf16.gmra.mxu1 %v8401_v51  ;;  %2134 = vmatmul.bf16.gmra.mxu0 %v8401_v51 }
 0x194   : > { %v1599_v25 = vadd.f32 %v1598_v14, %v1510_v24  ;;  %1956 = vmatmul.bf16.gmra.mxu2 %v8401_v51  ;;  %2045 = vmatmul.bf16.gmra.mxu3 %v8401_v51  ;;  %v6991_v51 = vor.u32 %v7489_v41, %v6990_v39 }
 0x195   : > { %4782 = vmatpush.bf16.msrb.mxu0 %v7247_v8 }
 0x196   : > { %v8526_v62 = vpack.c.bf16 %v1599_v25, %v1597_v16  ;;  %4604 = vmatpush.bf16.msrb.mxu2 %v6991_v51 }
 0x197   : > { %v1423_v26 = vpop.f32.mrf.mxu2  ;;  %v1512_v55 = vpop.f32.mrf.mxu3 }
 0x198   : > { %v1424_v30 = vadd.f32 %v1423_v26, %v1335_v54  ;;  %v1336_v31 = vpop.f32.mrf.mxu1  ;;  %v1603_v32 = vpop.f32.mrf.mxu0 }
 0x199   : > { %v1337_v57 = vadd.f32 %v1336_v31, %v8271_v42  ;;  %v6974_v31 = vld [vmem:[%s12535_s7 + $0x1a0] sm:$0xf] }
 0x19a   : > { %v1513_v11 = vadd.f32 %v1512_v55, %v1424_v30 }
 0x19c   : > { %v1602_v4 = vadd.f32 %v1601_v23, %v1513_v11 }
 0x19f   : > { %v1425_v29 = vpop.f32.mrf.mxu2  ;;  %v1514_v46 = vpop.f32.mrf.mxu3 }
 0x1a0   : > { %v1426_v47 = vadd.f32 %v1425_v29, %v1337_v57  ;;  %v1339_v33 = vpop.f32.mrf.mxu1  ;;  %v1606_v50 = vpop.f32.mrf.mxu0 }
 0x1a1   : > { %v1340_v45 = vadd.f32 %v1339_v33, %v8283_v52  ;;  %v7521_v52 = vld [vmem:[%s12535_s7 + $0x2cc] sm:$0xf0]  ;;  %v6846_v33 = vld [vmem:[%s12535_s7 + $0xa0] sm:$0xf] }
 0x1a2   : > { %v1515_v42 = vadd.f32 %v1514_v46, %v1426_v47  ;;  %v7119_v2 = vor.u32 %v7521_v52, %v7118_v27  ;;  %v7102_v47 = vld [vmem:[%s12535_s7 + $0x2a0] sm:$0xf] }
 0x1a3   : > { %1872 = vmatmul.bf16.gmra.mxu1 %v8415_v34  ;;  %2139 = vmatmul.bf16.gmra.mxu0 %v8415_v34 }
 0x1a4   : > { %v1604_v60 = vadd.f32 %v1603_v32, %v1515_v42  ;;  %1961 = vmatmul.bf16.gmra.mxu2 %v8415_v34  ;;  %2050 = vmatmul.bf16.gmra.mxu3 %v8415_v34  ;;  %v7457_v34 = vld [vmem:[%s12535_s7 + $0xcc] sm:$0xf0] }
 0x1a5   : > { %v6863_v35 = vor.u32 %v7457_v34, %v6862_v1  ;;  %4693 = vmatpush.bf16.msrb.mxu3 %v7119_v2  ;;  %v7485_v32 = vld [vmem:[%s12535_s7 + $0x1ac] sm:$0xf0]  ;;  %v7230_v34 = vld [vmem:[%s12535_s7 + $0x3a0] sm:$0xf] }
 0x1a6   : > { %v8540_v63 = vpack.c.bf16 %v1604_v60, %v1602_v4 }
 0x1a7   : > { %v1428_v6 = vpop.f32.mrf.mxu2  ;;  %v1517_v36 = vpop.f32.mrf.mxu3  ;;  %4515 = vmatpush.bf16.msrb.mxu1 %v6863_v35 }
 0x1a8   : > { %v1429_v13 = vadd.f32 %v1428_v6, %v1340_v45  ;;  %v1341_v3 = vpop.f32.mrf.mxu1  ;;  %v1608_v15 = vpop.f32.mrf.mxu0 }
 0x1a9   : > { %v1342_v0 = vadd.f32 %v1341_v3, %v8304_v20 }
 0x1aa   : > { %v1518_v9 = vadd.f32 %v1517_v36, %v1429_v13  ;;  %v7549_v13 = vld [vmem:[%s12535_s7 + $0x3ac] sm:$0xf0] }
 0x1ab   : > { %v7231_v3 = vor.u32 %v7549_v13, %v7230_v34 }
 0x1ac   : > { %v1607_v14 = vadd.f32 %v1606_v50, %v1518_v9 }
 0x1ad   : > { %4783 = vmatpush.bf16.msrb.mxu0 %v7231_v3 }
 0x1af   : > { %v1430_v16 = vpop.f32.mrf.mxu2  ;;  %v1519_v38 = vpop.f32.mrf.mxu3 }
 0x1b0   : > { %v1431_v18 = vadd.f32 %v1430_v16, %v1342_v0  ;;  %v1344_v19 = vpop.f32.mrf.mxu1  ;;  %v1611_v40 = vpop.f32.mrf.mxu0 }
 0x1b1   : > { %v1345_v20 = vadd.f32 %v1344_v19, %v8157_v5 }
 0x1b2   : > { %v1520_v49 = vadd.f32 %v1519_v38, %v1431_v18 }
 0x1b3   : > { %1877 = vmatmul.bf16.gmra.mxu1 %v8452_v59  ;;  %2144 = vmatmul.bf16.gmra.mxu0 %v8452_v59 }
 0x1b4   : > { %v1609_v22 = vadd.f32 %v1608_v15, %v1520_v49  ;;  %1966 = vmatmul.bf16.gmra.mxu2 %v8452_v59  ;;  %2055 = vmatmul.bf16.gmra.mxu3 %v8452_v59  ;;  %v6975_v59 = vor.u32 %v7485_v32, %v6974_v31  ;;  %v6958_v49 = vld [vmem:[%s12535_s7 + $0x180] sm:$0xf]  ;;  %v7513_v31 = vld [vmem:[%s12535_s7 + $0x28c] sm:$0xf0] }
 0x1b6   : > { %v8566_v44 = vpack.c.bf16 %v1609_v22, %v1607_v14  ;;  %4605 = vmatpush.bf16.msrb.mxu2 %v6975_v59  ;;  %v7481_v22 = vld [vmem:[%s12535_s7 + $0x18c] sm:$0xf0]  ;;  %v6830_v59 = vld [vmem:[%s12535_s7 + $0x80] sm:$0xf] }
 0x1b7   : > { %v1433_v23 = vpop.f32.mrf.mxu2  ;;  %v1522_v54 = vpop.f32.mrf.mxu3 }
 0x1b8   : > { %v1434_v24 = vadd.f32 %v1433_v23, %v1345_v20  ;;  %v1346_v25 = vpop.f32.mrf.mxu1  ;;  %v1613_v26 = vpop.f32.mrf.mxu0 }
 0x1b9   : > { %v1347_v55 = vadd.f32 %v1346_v25, %v8188_v28 }
 0x1ba   : > { %v1523_v5 = vadd.f32 %v1522_v54, %v1434_v24 }
 0x1bc   : > { %v1612_v30 = vadd.f32 %v1611_v40, %v1523_v5 }
 0x1bf   : > { %v1435_v57 = vpop.f32.mrf.mxu2  ;;  %v1524_v11 = vpop.f32.mrf.mxu3 }
 0x1c0   : > { %v1436_v4 = vadd.f32 %v1435_v57, %v1347_v55  ;;  %v1349_v39 = vpop.f32.mrf.mxu1  ;;  %v1616_v41 = vpop.f32.mrf.mxu0 }
 0x1c1   : > { %v1350_v51 = vadd.f32 %v1349_v39, %v8200_v37  ;;  %v7517_v37 = vld [vmem:[%s12535_s7 + $0x2ac] sm:$0xf0] }
 0x1c2   : > { %v1525_v28 = vadd.f32 %v1524_v11, %v1436_v4  ;;  %v7103_v42 = vor.u32 %v7517_v37, %v7102_v47 }
 0x1c3   : > { %1882 = vmatmul.bf16.gmra.mxu1 %v8465_v58  ;;  %2149 = vmatmul.bf16.gmra.mxu0 %v8465_v58 }
 0x1c4   : > { %v1614_v29 = vadd.f32 %v1613_v26, %v1525_v28  ;;  %1971 = vmatmul.bf16.gmra.mxu2 %v8465_v58  ;;  %2060 = vmatmul.bf16.gmra.mxu3 %v8465_v58  ;;  %v7453_v58 = vld [vmem:[%s12535_s7 + $0xac] sm:$0xf0] }
 0x1c5   : > { %v6847_v1 = vor.u32 %v7453_v58, %v6846_v33  ;;  %4694 = vmatpush.bf16.msrb.mxu3 %v7103_v42  ;;  %v7214_v33 = vld [vmem:[%s12535_s7 + $0x380] sm:$0xf] }
 0x1c6   : > { %v8580_v46 = vpack.c.bf16 %v1614_v29, %v1612_v30  ;;  %v7086_v30 = vld [vmem:[%s12535_s7 + $0x280] sm:$0xf] }
 0x1c7   : > { %v1438_v50 = vpop.f32.mrf.mxu2  ;;  %v1527_v45 = vpop.f32.mrf.mxu3  ;;  %4516 = vmatpush.bf16.msrb.mxu1 %v6847_v1  ;;  %v7087_v32 = vor.u32 %v7513_v31, %v7086_v30 }
 0x1c8   : > { %v1439_v60 = vadd.f32 %v1438_v50, %v1350_v51  ;;  %v1351_v27 = vpop.f32.mrf.mxu1  ;;  %v1618_v52 = vpop.f32.mrf.mxu0 }
 0x1c9   : > { %v1352_v6 = vadd.f32 %v1351_v27, %v8219_v56  ;;  %4695 = vmatpush.bf16.msrb.mxu3 %v7087_v32 }
 0x1ca   : > { %v1528_v36 = vadd.f32 %v1527_v45, %v1439_v60  ;;  %v1679_v60 = vld [vmem:[%s12532_s4] sm:$0xf] }
 0x1cb   : > { %v8652_v34 = vperm.slane %v1679_v60, 2 }
 0x1cc   : > { %v1617_v2 = vadd.f32 %v1616_v41, %v1528_v36 }
 0x1cf   : > { %v1440_v15 = vpop.f32.mrf.mxu2  ;;  %v1529_v35 = vpop.f32.mrf.mxu3 }
 0x1d0   : > { %v1441_v0 = vadd.f32 %v1440_v15, %v1352_v6  ;;  %v1354_v9 = vpop.f32.mrf.mxu1  ;;  %v1621_v14 = vpop.f32.mrf.mxu0  ;;  %v8644_v6 = vperm.slane %v1679_v60, 0  ;;  %v8659_v15 = vperm.slane %v1679_v60, 3 }
 0x1d1   : > { %v1355_v56 = vadd.f32 %v1354_v9, %v8243_v12 }
 0x1d2   : > { %v1530_v7 = vadd.f32 %v1529_v35, %v1441_v0 }
 0x1d3   : > { %1887 = vmatmul.bf16.gmra.mxu1 %v8478_v10  ;;  %2154 = vmatmul.bf16.gmra.mxu0 %v8478_v10 }
 0x1d4   : > { %v1619_v17 = vadd.f32 %v1618_v52, %v1530_v7  ;;  %1976 = vmatmul.bf16.gmra.mxu2 %v8478_v10  ;;  %2065 = vmatmul.bf16.gmra.mxu3 %v8478_v10  ;;  %v6959_v10 = vor.u32 %v7481_v22, %v6958_v49 }
 0x1d6   : > { %v8606_v8 = vpack.c.bf16 %v1619_v17, %v1617_v2  ;;  %4606 = vmatpush.bf16.msrb.mxu2 %v6959_v10  ;;  %v8650_v2 = vperm.slane %v1679_v60, 1 }
 0x1d7   : > { %v1443_v16 = vpop.f32.mrf.mxu2  ;;  %v1532_v38 = vpop.f32.mrf.mxu3 }
 0x1d8   : > { %v1444_v18 = vadd.f32 %v1443_v16, %v1355_v56  ;;  %v1356_v19 = vpop.f32.mrf.mxu1  ;;  %v1623_v40 = vpop.f32.mrf.mxu0 }
 0x1d9   : > { %v1357_v20 = vadd.f32 %v1356_v19, %v8274_v43  ;;  %v7477_v19 = vld [vmem:[%s12535_s7 + $0x16c] sm:$0xf0] }
 0x1da   : > { %v1533_v12 = vadd.f32 %v1532_v38, %v1444_v18  ;;  %v6942_v18 = vld [vmem:[%s12535_s7 + $0x160] sm:$0xf] }
 0x1db   : > { %v6943_v49 = vor.u32 %v7477_v19, %v6942_v18 }
 0x1dc   : > { %v1622_v23 = vadd.f32 %v1621_v14, %v1533_v12 }
 0x1dd   : > { %4607 = vmatpush.bf16.msrb.mxu2 %v6943_v49 }
 0x1df   : > { %v1445_v54 = vpop.f32.mrf.mxu2  ;;  %v1534_v24 = vpop.f32.mrf.mxu3 }
 0x1e0   : > { %v1446_v25 = vadd.f32 %v1445_v54, %v1357_v20  ;;  %v1359_v26 = vpop.f32.mrf.mxu1  ;;  %v1626_v55 = vpop.f32.mrf.mxu0 }
 0x1e1   : > { %v1360_v5 = vadd.f32 %v1359_v26, %v8286_v53  ;;  %v7449_v53 = vld [vmem:[%s12535_s7 + $0x8c] sm:$0xf0] }
 0x1e2   : > { %v1535_v43 = vadd.f32 %v1534_v24, %v1446_v25  ;;  %v6831_v11 = vor.u32 %v7449_v53, %v6830_v59 }
 0x1e3   : > { %1892 = vmatmul.bf16.gmra.mxu1 %v8486_v61  ;;  %2159 = vmatmul.bf16.gmra.mxu0 %v8486_v61 }
 0x1e4   : > { %v1624_v57 = vadd.f32 %v1623_v40, %v1535_v43  ;;  %1981 = vmatmul.bf16.gmra.mxu2 %v8486_v61  ;;  %2070 = vmatmul.bf16.gmra.mxu3 %v8486_v61  ;;  %v7545_v61 = vld [vmem:[%s12535_s7 + $0x38c] sm:$0xf0] }
 0x1e5   : > { %4517 = vmatpush.bf16.msrb.mxu1 %v6831_v11  ;;  %v7215_v50 = vor.u32 %v7545_v61, %v7214_v33  ;;  %v7509_v11 = vld [vmem:[%s12535_s7 + $0x26c] sm:$0xf0] }
 0x1e6   : > { %v8632_v4 = vpack.c.bf16 %v1624_v57, %v1622_v23  ;;  %v7070_v57 = vld [vmem:[%s12535_s7 + $0x260] sm:$0xf] }
 0x1e7   : > { %v1448_v39 = vpop.f32.mrf.mxu2  ;;  %v1537_v41 = vpop.f32.mrf.mxu3  ;;  %4784 = vmatpush.bf16.msrb.mxu0 %v7215_v50 }
 0x1e8   : > { %v1449_v51 = vadd.f32 %v1448_v39, %v1360_v5  ;;  %v1361_v28 = vpop.f32.mrf.mxu1  ;;  %v1628_v29 = vpop.f32.mrf.mxu0 }
 0x1e9   : > { %v1362_v47 = vadd.f32 %v1361_v28, %v8307_v21  ;;  %v7445_v28 = vld [vmem:[%s12535_s7 + $0x6c] sm:$0xf0] }
 0x1ea   : > { %v1538_v37 = vadd.f32 %v1537_v41, %v1449_v51  ;;  %v7071_v41 = vor.u32 %v7509_v11, %v7070_v57  ;;  %v6814_v51 = vld [vmem:[%s12535_s7 + $0x60] sm:$0xf] }
 0x1ec   : > { %v1627_v45 = vadd.f32 %v1626_v55, %v1538_v37  ;;  %v6815_v37 = vor.u32 %v7445_v28, %v6814_v51  ;;  %4696 = vmatpush.bf16.msrb.mxu3 %v7071_v41 }
 0x1ee   : > { %4518 = vmatpush.bf16.msrb.mxu1 %v6815_v37 }
 0x1ef   : > { %v1450_v42 = vpop.f32.mrf.mxu2  ;;  %v1539_v58 = vpop.f32.mrf.mxu3 }
 0x1f0   : > { %v1451_v27 = vadd.f32 %v1450_v42, %v1362_v47  ;;  %v1858_v21 = vpop.f32.mrf.mxu1  ;;  %v2125_v52 = vpop.f32.mrf.mxu0 }
 0x1f1   : > { %v8657_v3 = vadd.f32 %v1858_v21, %v8644_v6  ;;  %v8670_v17 = vadd.f32 %v2125_v52, %v8659_v15 }
 0x1f2   : > { %v1540_v1 = vadd.f32 %v1539_v58, %v1451_v27 }
 0x1f3   : > { %1897 = vmatmul.bf16.gmra.mxu1 %v8500_v48  ;;  %2164 = vmatmul.bf16.gmra.mxu0 %v8500_v48  ;;  %v2404_v7 = vmul.f32 %v8657_v3, %v8657_v3  ;;  %v2407_v10 = vmul.f32 %v8670_v17, %v8670_v17 }
 0x1f4   : > { %v1629_v36 = vadd.f32 %v1628_v29, %v1540_v1  ;;  %1986 = vmatmul.bf16.gmra.mxu2 %v8500_v48  ;;  %2075 = vmatmul.bf16.gmra.mxu3 %v8500_v48 }
 0x1f6   : > { %v8654_v13 = vpack.c.bf16 %v1629_v36, %v1627_v45 }
 0x1f7   : > { %v1947_v35 = vpop.f32.mrf.mxu2  ;;  %v2036_v0 = vpop.f32.mrf.mxu3 }
 0x1f8   : > { %v8662_v9 = vadd.f32 %v1947_v35, %v8650_v2  ;;  %v8665_v14 = vadd.f32 %v2036_v0, %v8652_v34  ;;  %v1860_v48 = vpop.f32.mrf.mxu1  ;;  %v2127_v56 = vpop.f32.mrf.mxu0 }
 0x1f9   : > { %v8686_v22 = vadd.f32 %v1860_v48, %v8644_v6  ;;  %v8700_v32 = vadd.f32 %v2127_v56, %v8659_v15  ;;  %v7198_v48 = vld [vmem:[%s12535_s7 + $0x360] sm:$0xf]  ;;  %v7541_v56 = vld [vmem:[%s12535_s7 + $0x36c] sm:$0xf0] }
 0x1fa   : > { %v2405_v16 = vmul.f32 %v8662_v9, %v8662_v9  ;;  %v2205_v38 = vadd.f32 %v8662_v9, %v8657_v3  ;;  %v2406_v20 = vmul.f32 %v8665_v14, %v8665_v14 }
 0x1fb   : > { %v2408_v31 = vmul.f32 %v8686_v22, %v8686_v22  ;;  %v2411_v50 = vmul.f32 %v8700_v32, %v8700_v32 }
 0x1fc   : > { %v2206_v40 = vadd.f32 %v2205_v38, %v8665_v14  ;;  %v2532_v12 = vadd.f32 %v2405_v16, %v2404_v7  ;;  %v7199_v7 = vor.u32 %v7541_v56, %v7198_v48 }
 0x1fe   : > { %v2207_v23 = vadd.f32 %v2206_v40, %v8670_v17  ;;  %v2533_v54 = vadd.f32 %v2532_v12, %v2406_v20  ;;  %4785 = vmatpush.bf16.msrb.mxu0 %v7199_v7 }
 0x1ff   : > { %v1949_v24 = vpop.f32.mrf.mxu2  ;;  %v2038_v25 = vpop.f32.mrf.mxu3 }
 0x200   : > { %v8692_v26 = vadd.f32 %v1949_v24, %v8650_v2  ;;  %v8695_v55 = vadd.f32 %v2038_v25, %v8652_v34  ;;  %2208 = vadd.xlane.f32.xlu0 %v2207_v23  ;;  %v1863_v5 = vpop.f32.mrf.mxu1  ;;  %v2130_v43 = vpop.f32.mrf.mxu0  ;;  %v2534_v30 = vadd.f32 %v2533_v54, %v2407_v10 }
 0x201   : > { %v8726_v33 = vadd.f32 %v1863_v5, %v8644_v6  ;;  %v8740_v36 = vadd.f32 %v2130_v43, %v8659_v15 }
 0x202   : > { %v2409_v59 = vmul.f32 %v8692_v26, %v8692_v26  ;;  %2535 = vadd.xlane.f32.xlu1 %v2534_v30  ;;  %v2210_v53 = vadd.f32 %v8692_v26, %v8686_v22  ;;  %v2410_v39 = vmul.f32 %v8695_v55, %v8695_v55 }
 0x203   : > { %1902 = vmatmul.bf16.gmra.mxu1 %v8526_v62  ;;  %2169 = vmatmul.bf16.gmra.mxu0 %v8526_v62  ;;  %v2412_v1 = vmul.f32 %v8726_v33, %v8726_v33  ;;  %v2415_v20 = vmul.f32 %v8740_v36, %v8740_v36 }
 0x204   : > { %1991 = vmatmul.bf16.gmra.mxu2 %v8526_v62  ;;  %2080 = vmatmul.bf16.gmra.mxu3 %v8526_v62  ;;  %v2211_v29 = vadd.f32 %v2210_v53, %v8695_v55  ;;  %v2537_v47 = vadd.f32 %v2409_v59, %v2408_v31 }
 0x206   : > { %v2212_v61 = vadd.f32 %v2211_v29, %v8700_v32  ;;  %v2538_v45 = vadd.f32 %v2537_v47, %v2410_v39 }
 0x207   : > { %v1952_v42 = vpop.f32.mrf.mxu2  ;;  %v2041_v58 = vpop.f32.mrf.mxu3 }
 0x208   : > { %v8732_v60 = vadd.f32 %v1952_v42, %v8650_v2  ;;  %v8735_v62 = vadd.f32 %v2041_v58, %v8652_v34  ;;  %2213 = vadd.xlane.f32.xlu0 %v2212_v61  ;;  %v1865_v27 = vpop.f32.mrf.mxu1  ;;  %v2132_v21 = vpop.f32.mrf.mxu0  ;;  %v2539_v52 = vadd.f32 %v2538_v45, %v2411_v50 }
 0x209   : > { %v8756_v19 = vadd.f32 %v1865_v27, %v8644_v6  ;;  %v8770_v30 = vadd.f32 %v2132_v21, %v8659_v15 }
 0x20a   : > { %v2413_v35 = vmul.f32 %v8732_v60, %v8732_v60  ;;  %2540 = vadd.xlane.f32.xlu1 %v2539_v52  ;;  %v2215_v0 = vadd.f32 %v8732_v60, %v8726_v33  ;;  %v2414_v16 = vmul.f32 %v8735_v62, %v8735_v62  ;;  %v6926_v52 = vld [vmem:[%s12535_s7 + $0x140] sm:$0xf] }
 0x20b   : > { %v2416_v43 = vmul.f32 %v8756_v19, %v8756_v19  ;;  %v2419_v51 = vmul.f32 %v8770_v30, %v8770_v30 }
 0x20c   : > { %v2216_v38 = vadd.f32 %v2215_v0, %v8735_v62  ;;  %v2542_v18 = vadd.f32 %v2413_v35, %v2412_v1  ;;  %v7473_v1 = vld [vmem:[%s12535_s7 + $0x14c] sm:$0xf0] }
 0x20d   : > { %v6927_v56 = vor.u32 %v7473_v1, %v6926_v52 }
 0x20e   : > { %v2217_v40 = vadd.f32 %v2216_v38, %v8740_v36  ;;  %v2543_v12 = vadd.f32 %v2542_v18, %v2414_v16 }
 0x20f   : > { %v1954_v49 = vpop.f32.mrf.mxu2  ;;  %v2043_v23 = vpop.f32.mrf.mxu3  ;;  %4608 = vmatpush.bf16.msrb.mxu2 %v6927_v56 }
 0x210   : > { %v8762_v10 = vadd.f32 %v1954_v49, %v8650_v2  ;;  %v8765_v54 = vadd.f32 %v2043_v23, %v8652_v34  ;;  %2218 = vadd.xlane.f32.xlu2 %v2217_v40  ;;  %v1868_v24 = vpop.f32.mrf.mxu1  ;;  %v2135_v25 = vpop.f32.mrf.mxu0  ;;  %v2544_v5 = vadd.f32 %v2543_v12, %v2415_v20 }
 0x211   : > { %v8784_v39 = vadd.f32 %v1868_v24, %v8644_v6  ;;  %v8798_v58 = vadd.f32 %v2135_v25, %v8659_v15 }
 0x212   : > { %v2417_v31 = vmul.f32 %v8762_v10, %v8762_v10  ;;  %2545 = vadd.xlane.f32.xlu0 %v2544_v5  ;;  %v2220_v59 = vadd.f32 %v8762_v10, %v8756_v19  ;;  %v2418_v57 = vmul.f32 %v8765_v54, %v8765_v54 }
 0x213   : > { %1907 = vmatmul.bf16.gmra.mxu1 %v8540_v63  ;;  %2174 = vmatmul.bf16.gmra.mxu0 %v8540_v63  ;;  %v2420_v42 = vmul.f32 %v8784_v39, %v8784_v39  ;;  %v2423_v38 = vmul.f32 %v8798_v58, %v8798_v58 }
 0x214   : > { %1996 = vmatmul.bf16.gmra.mxu2 %v8540_v63  ;;  %2085 = vmatmul.bf16.gmra.mxu3 %v8540_v63  ;;  %v2221_v53 = vadd.f32 %v2220_v59, %v8765_v54  ;;  %v2547_v11 = vadd.f32 %v2417_v31, %v2416_v43 }
 0x216   : > { %v2222_v41 = vadd.f32 %v2221_v53, %v8770_v30  ;;  %v2548_v28 = vadd.f32 %v2547_v11, %v2418_v57  ;;  %v7054_v53 = vld [vmem:[%s12535_s7 + $0x240] sm:$0xf]  ;;  %v7505_v57 = vld [vmem:[%s12535_s7 + $0x24c] sm:$0xf0] }
 0x217   : > { %v1957_v29 = vpop.f32.mrf.mxu2  ;;  %v2046_v47 = vpop.f32.mrf.mxu3 }
 0x218   : > { %v8790_v37 = vadd.f32 %v1957_v29, %v8650_v2  ;;  %v8793_v63 = vadd.f32 %v2046_v47, %v8652_v34  ;;  %2223 = vadd.xlane.f32.xlu2 %v2222_v41  ;;  %v1870_v61 = vpop.f32.mrf.mxu1  ;;  %v2137_v50 = vpop.f32.mrf.mxu0  ;;  %v2549_v45 = vadd.f32 %v2548_v28, %v2419_v51  ;;  %v7055_v41 = vor.u32 %v7505_v57, %v7054_v53  ;;  %v6798_v51 = vld [vmem:[%s12535_s7 + $0x40] sm:$0xf]  ;;  %v7441_v28 = vld [vmem:[%s12535_s7 + $0x4c] sm:$0xf0] }
 0x219   : > { %v8814_v7 = vadd.f32 %v1870_v61, %v8644_v6  ;;  %v8828_v43 = vadd.f32 %v2137_v50, %v8659_v15  ;;  %v6799_v61 = vor.u32 %v7441_v28, %v6798_v51 }
 0x21a   : > { %v2225_v27 = vadd.f32 %v8790_v37, %v8784_v39  ;;  %v2421_v21 = vmul.f32 %v8790_v37, %v8790_v37  ;;  %2550 = vadd.xlane.f32.xlu1 %v2549_v45  ;;  %v2422_v35 = vmul.f32 %v8793_v63, %v8793_v63  ;;  %4697 = vmatpush.bf16.msrb.mxu3 %v7055_v41 }
 0x21b   : > { %v2424_v5 = vmul.f32 %v8814_v7, %v8814_v7  ;;  %4519 = vmatpush.bf16.msrb.mxu1 %v6799_v61 }
 0x21c   : > { %v2226_v0 = vadd.f32 %v2225_v27, %v8793_v63  ;;  %v2552_v48 = vadd.f32 %v2421_v21, %v2420_v42  ;;  %v2427_v42 = vmul.f32 %v8828_v43, %v8828_v43 }
 0x21e   : > { %v2227_v16 = vadd.f32 %v2226_v0, %v8798_v58  ;;  %v2553_v18 = vadd.f32 %v2552_v48, %v2422_v35 }
 0x21f   : > { %v1959_v40 = vpop.f32.mrf.mxu2  ;;  %v2048_v20 = vpop.f32.mrf.mxu3 }
 0x220   : > { %v8820_v12 = vadd.f32 %v1959_v40, %v8650_v2  ;;  %v8823_v49 = vadd.f32 %v2048_v20, %v8652_v34  ;;  %2228 = vadd.xlane.f32.xlu2 %v2227_v16  ;;  %v1873_v23 = vpop.f32.mrf.mxu1  ;;  %v2140_v24 = vpop.f32.mrf.mxu0  ;;  %v2554_v25 = vadd.f32 %v2553_v18, %v2423_v38  ;;  %v7182_v40 = vld [vmem:[%s12535_s7 + $0x340] sm:$0xf]  ;;  %v7537_v20 = vld [vmem:[%s12535_s7 + $0x34c] sm:$0xf0] }
 0x221   : > { %v8854_v50 = vadd.f32 %v1873_v23, %v8644_v6  ;;  %v8868_v16 = vadd.f32 %v2140_v24, %v8659_v15  ;;  %v7183_v23 = vor.u32 %v7537_v20, %v7182_v40 }
 0x222   : > { %v2425_v31 = vmul.f32 %v8820_v12, %v8820_v12  ;;  %2555 = vadd.xlane.f32.xlu1 %v2554_v25  ;;  %v2230_v59 = vadd.f32 %v8820_v12, %v8814_v7  ;;  %v2426_v11 = vmul.f32 %v8823_v49, %v8823_v49 }
 0x223   : > { %1912 = vmatmul.bf16.gmra.mxu1 %v8566_v44  ;;  %2179 = vmatmul.bf16.gmra.mxu0 %v8566_v44  ;;  %12779 = vst [vmem:[#allocation5_spill] sm:$0xff] %v8854_v50  ;;  %v2428_v56 = vmul.f32 %v8854_v50, %v8854_v50  ;;  %v2431_v53 = vmul.f32 %v8868_v16, %v8868_v16 }
 0x224   : > { %2001 = vmatmul.bf16.gmra.mxu2 %v8566_v44  ;;  %2090 = vmatmul.bf16.gmra.mxu3 %v8566_v44  ;;  %v2231_v29 = vadd.f32 %v2230_v59, %v8823_v49  ;;  %v2557_v47 = vadd.f32 %v2425_v31, %v2424_v5  ;;  %12782 = vst [vmem:[#allocation8_spill] sm:$0xff] %v8868_v16 }
 0x225   : > { %4786 = vmatpush.bf16.msrb.mxu0 %v7183_v23 }
 0x226   : > { %v2232_v45 = vadd.f32 %v2231_v29, %v8828_v43  ;;  %v2558_v27 = vadd.f32 %v2557_v47, %v2426_v11 }
 0x227   : > { %v1962_v21 = vpop.f32.mrf.mxu2  ;;  %v2051_v52 = vpop.f32.mrf.mxu3 }
 0x228   : > { %v8860_v1 = vadd.f32 %v1962_v21, %v8650_v2  ;;  %v8863_v44 = vadd.f32 %v2051_v52, %v8652_v34  ;;  %2233 = vadd.xlane.f32.xlu0 %v2232_v45  ;;  %v1875_v35 = vpop.f32.mrf.mxu1  ;;  %v2142_v0 = vpop.f32.mrf.mxu0  ;;  %v2559_v48 = vadd.f32 %v2558_v27, %v2427_v42 }
 0x229   : > { %v8884_v31 = vadd.f32 %v1875_v35, %v8644_v6  ;;  %v8898_v42 = vadd.f32 %v2142_v0, %v8659_v15 }
 0x22a   : > { %12780 = vst [vmem:[#allocation6_spill] sm:$0xff] %v8860_v1  ;;  %v2235_v38 = vadd.f32 %v8860_v1, %v8854_v50  ;;  %v2429_v18 = vmul.f32 %v8860_v1, %v8860_v1  ;;  %2560 = vadd.xlane.f32.xlu2 %v2559_v48  ;;  %v2430_v24 = vmul.f32 %v8863_v44, %v8863_v44 }
 0x22b   : > { %12781 = vst [vmem:[#allocation7_spill] sm:$0xff] %v8863_v44  ;;  %v2432_v45 = vmul.f32 %v8884_v31, %v8884_v31 }
 0x22c   : > { %v2236_v25 = vadd.f32 %v2235_v38, %v8863_v44  ;;  %v2562_v5 = vadd.f32 %v2429_v18, %v2428_v56  ;;  %12783 = vst [vmem:[#allocation9_spill] sm:$0xff] %v8884_v31  ;;  %v2435_v38 = vmul.f32 %v8898_v42, %v8898_v42 }
 0x22d   : > { %12786 = vst [vmem:[#allocation12_spill] sm:$0xff] %v8898_v42 }
 0x22e   : > { %v2237_v59 = vadd.f32 %v2236_v25, %v8868_v16  ;;  %v2563_v57 = vadd.f32 %v2562_v5, %v2430_v24 }
 0x22f   : > { %v1964_v11 = vpop.f32.mrf.mxu2  ;;  %v2053_v41 = vpop.f32.mrf.mxu3 }
 0x230   : > { %v8890_v51 = vadd.f32 %v1964_v11, %v8650_v2  ;;  %v8893_v28 = vadd.f32 %v2053_v41, %v8652_v34  ;;  %2238 = vadd.xlane.f32.xlu0 %v2237_v59  ;;  %v1878_v29 = vpop.f32.mrf.mxu1  ;;  %v2145_v47 = vpop.f32.mrf.mxu0  ;;  %v2564_v61 = vadd.f32 %v2563_v57, %v2431_v53  ;;  %v6910_v41 = vld [vmem:[%s12535_s7 + $0x120] sm:$0xf] }
 0x231   : > { %v8912_v48 = vadd.f32 %v1878_v29, %v8644_v6  ;;  %v8926_v53 = vadd.f32 %v2145_v47, %v8659_v15  ;;  %v7469_v29 = vld [vmem:[%s12535_s7 + $0x12c] sm:$0xf0] }
 0x232   : > { %12784 = vst [vmem:[#allocation10_spill] sm:$0xff] %v8890_v51  ;;  %v2433_v27 = vmul.f32 %v8890_v51, %v8890_v51  ;;  %2565 = vadd.xlane.f32.xlu2 %v2564_v61  ;;  %v2240_v21 = vadd.f32 %v8890_v51, %v8884_v31  ;;  %v2434_v35 = vmul.f32 %v8893_v28, %v8893_v28 }
 0x233   : > { %12785 = vst [vmem:[#allocation11_spill] sm:$0xff] %v8893_v28  ;;  %1917 = vmatmul.bf16.gmra.mxu1 %v8580_v46  ;;  %2184 = vmatmul.bf16.gmra.mxu0 %v8580_v46  ;;  %v2436_v59 = vmul.f32 %v8912_v48, %v8912_v48 }
 0x234   : > { %2006 = vmatmul.bf16.gmra.mxu2 %v8580_v46  ;;  %2095 = vmatmul.bf16.gmra.mxu3 %v8580_v46  ;;  %v2241_v52 = vadd.f32 %v2240_v21, %v8893_v28  ;;  %v2567_v0 = vadd.f32 %v2433_v27, %v2432_v45  ;;  %12787 = vst [vmem:[#allocation13_spill] sm:$0xff] %v8912_v48 }
 0x235   : > { %12790 = vst [vmem:[#allocation16_spill] sm:$0xff] %v8926_v53  ;;  %v6911_v27 = vor.u32 %v7469_v29, %v6910_v41  ;;  %v7038_v29 = vld [vmem:[%s12535_s7 + $0x220] sm:$0xf] }
 0x236   : > { %v2242_v56 = vadd.f32 %v2241_v52, %v8898_v42  ;;  %v2568_v18 = vadd.f32 %v2567_v0, %v2434_v35  ;;  %v2439_v35 = vmul.f32 %v8926_v53, %v8926_v53 }
 0x237   : > { %v1967_v40 = vpop.f32.mrf.mxu2  ;;  %v2056_v20 = vpop.f32.mrf.mxu3  ;;  %4609 = vmatpush.bf16.msrb.mxu2 %v6911_v27  ;;  %v7437_v27 = vld [vmem:[%s12535_s7 + $0x2c] sm:$0xf0] }
 0x238   : > { %v8918_v23 = vadd.f32 %v1967_v40, %v8650_v2  ;;  %v8921_v46 = vadd.f32 %v2056_v20, %v8652_v34  ;;  %2243 = vadd.xlane.f32.xlu1 %v2242_v56  ;;  %v1880_v24 = vpop.f32.mrf.mxu1  ;;  %v2147_v25 = vpop.f32.mrf.mxu0  ;;  %v2569_v5 = vadd.f32 %v2568_v18, %v2435_v38 }
 0x239   : > { %v8942_v21 = vadd.f32 %v1880_v24, %v8644_v6 }
 0x23a   : > { %12788 = vst [vmem:[#allocation14_spill] sm:$0xff] %v8918_v23  ;;  %v2245_v57 = vadd.f32 %v8918_v23, %v8912_v48  ;;  %v2437_v11 = vmul.f32 %v8918_v23, %v8918_v23  ;;  %2570 = vadd.xlane.f32.xlu0 %v2569_v5  ;;  %v2438_v61 = vmul.f32 %v8921_v46, %v8921_v46 }
 0x23b   : > { %12789 = vst [vmem:[#allocation15_spill] sm:$0xff] %v8921_v46 }
 0x23c   : > { %v2246_v47 = vadd.f32 %v2245_v57, %v8921_v46  ;;  %v2572_v45 = vadd.f32 %v2437_v11, %v2436_v59  ;;  %12791 = vst [vmem:[#allocation17_spill] sm:$0xff] %v8942_v21  ;;  %v2440_v59 = vmul.f32 %v8942_v21, %v8942_v21  ;;  %v8956_v57 = vadd.f32 %v2147_v25, %v8659_v15 }
 0x23e   : > { %v2247_v52 = vadd.f32 %v2246_v47, %v8926_v53  ;;  %v2573_v0 = vadd.f32 %v2572_v45, %v2438_v61  ;;  %12794 = vst [vmem:[#allocation20_spill] sm:$0xff] %v8956_v57  ;;  %v7501_v61 = vld [vmem:[%s12535_s7 + $0x22c] sm:$0xf0]  ;;  %v6782_v45 = vld [vmem:[%s12535_s7 + $0x20] sm:$0xf] }
 0x23f   : > { %v1969_v56 = vpop.f32.mrf.mxu2  ;;  %v2058_v38 = vpop.f32.mrf.mxu3  ;;  %v7039_v47 = vor.u32 %v7501_v61, %v7038_v29 }
 0x240   : > { %v8948_v18 = vadd.f32 %v1969_v56, %v8650_v2  ;;  %v8951_v40 = vadd.f32 %v2058_v38, %v8652_v34  ;;  %2248 = vadd.xlane.f32.xlu1 %v2247_v52  ;;  %v1883_v20 = vpop.f32.mrf.mxu1  ;;  %v2150_v5 = vpop.f32.mrf.mxu0  ;;  %v2574_v24 = vadd.f32 %v2573_v0, %v2439_v35  ;;  %v6783_v0 = vor.u32 %v7437_v27, %v6782_v45  ;;  %v7533_v27 = vld [vmem:[%s12535_s7 + $0x32c] sm:$0xf0] }
 0x241   : > { %4698 = vmatpush.bf16.msrb.mxu3 %v7039_v47  ;;  %v8982_v56 = vadd.f32 %v1883_v20, %v8644_v6  ;;  %v8996_v47 = vadd.f32 %v2150_v5, %v8659_v15 }
 0x242   : > { %12792 = vst [vmem:[#allocation18_spill] sm:$0xff] %v8948_v18  ;;  %v2441_v11 = vmul.f32 %v8948_v18, %v8948_v18  ;;  %2575 = vadd.xlane.f32.xlu0 %v2574_v24  ;;  %v2250_v41 = vadd.f32 %v8948_v18, %v8942_v21  ;;  %v2442_v25 = vmul.f32 %v8951_v40, %v8951_v40 }
 0x243   : > { %12793 = vst [vmem:[#allocation19_spill] sm:$0xff] %v8951_v40  ;;  %1922 = vmatmul.bf16.gmra.mxu1 %v8606_v8  ;;  %2189 = vmatmul.bf16.gmra.mxu0 %v8606_v8  ;;  %v2443_v24 = vmul.f32 %v8956_v57, %v8956_v57 }
 0x244   : > { %2011 = vmatmul.bf16.gmra.mxu2 %v8606_v8  ;;  %2100 = vmatmul.bf16.gmra.mxu3 %v8606_v8  ;;  %v2251_v52 = vadd.f32 %v2250_v41, %v8951_v40  ;;  %v2577_v35 = vadd.f32 %v2441_v11, %v2440_v59  ;;  %12795 = vst [vmem:[#allocation21_spill] sm:$0xff] %v8982_v56 }
 0x245   : > { %4520 = vmatpush.bf16.msrb.mxu1 %v6783_v0  ;;  %v2444_v41 = vmul.f32 %v8982_v56, %v8982_v56  ;;  %12798 = vst [vmem:[#allocation24_spill] sm:$0xff] %v8996_v47 }
 0x246   : > { %v2252_v38 = vadd.f32 %v2251_v52, %v8956_v57  ;;  %v2578_v29 = vadd.f32 %v2577_v35, %v2442_v25 }
 0x247   : > { %v1972_v61 = vpop.f32.mrf.mxu2  ;;  %v2061_v18 = vpop.f32.mrf.mxu3 }
 0x248   : > { %v8988_v21 = vadd.f32 %v1972_v61, %v8650_v2  ;;  %v8991_v8 = vadd.f32 %v2061_v18, %v8652_v34  ;;  %2253 = vadd.xlane.f32.xlu2 %v2252_v38  ;;  %v1885_v59 = vpop.f32.mrf.mxu1  ;;  %v2152_v11 = vpop.f32.mrf.mxu0  ;;  %v2579_v20 = vadd.f32 %v2578_v29, %v2443_v24  ;;  %v7166_v18 = vld [vmem:[%s12535_s7 + $0x320] sm:$0xf]  ;;  %v2447_v29 = vmul.f32 %v8996_v47, %v8996_v47 }
 0x249   : > { %v7167_v52 = vor.u32 %v7533_v27, %v7166_v18  ;;  %v9012_v38 = vadd.f32 %v1885_v59, %v8644_v6 }
 0x24a   : > { %12796 = vst [vmem:[#allocation22_spill] sm:$0xff] %v8988_v21  ;;  %v2255_v25 = vadd.f32 %v8988_v21, %v8982_v56  ;;  %v2445_v45 = vmul.f32 %v8988_v21, %v8988_v21  ;;  %2580 = vadd.xlane.f32.xlu1 %v2579_v20  ;;  %v2446_v5 = vmul.f32 %v8991_v8, %v8991_v8  ;;  %v7529_v56 = vld [vmem:[%s12535_s7 + $0x30c] sm:$0xf0] }
 0x24b   : > { %12797 = vst [vmem:[#allocation23_spill] sm:$0xff] %v8991_v8  ;;  %4787 = vmatpush.bf16.msrb.mxu0 %v7167_v52  ;;  %v2448_v59 = vmul.f32 %v9012_v38, %v9012_v38  ;;  %v9026_v52 = vadd.f32 %v2152_v11, %v8659_v15 }
 0x24c   : > { %v2256_v35 = vadd.f32 %v2255_v25, %v8991_v8  ;;  %v2582_v0 = vadd.f32 %v2445_v45, %v2444_v41  ;;  %12799 = vst [vmem:[#allocation25_spill] sm:$0xff] %v9012_v38 }
 0x24d   : > { %12802 = vst [vmem:[#allocation28_spill] sm:$0xff] %v9026_v52 }
 0x24e   : > { %v2257_v24 = vadd.f32 %v2256_v35, %v8996_v47  ;;  %v2583_v61 = vadd.f32 %v2582_v0, %v2446_v5 }
 0x24f   : > { %v1974_v20 = vpop.f32.mrf.mxu2  ;;  %v2063_v21 = vpop.f32.mrf.mxu3 }
 0x250   : > { %v9018_v18 = vadd.f32 %v1974_v20, %v8650_v2  ;;  %v9021_v27 = vadd.f32 %v2063_v21, %v8652_v34  ;;  %2258 = vadd.xlane.f32.xlu2 %v2257_v24  ;;  %v1888_v41 = vpop.f32.mrf.mxu1  ;;  %v2155_v25 = vpop.f32.mrf.mxu0  ;;  %v2584_v45 = vadd.f32 %v2583_v61, %v2447_v29  ;;  %v2451_v61 = vmul.f32 %v9026_v52, %v9026_v52 }
 0x251   : > { %v9040_v24 = vadd.f32 %v1888_v41, %v8644_v6  ;;  %v7761_v41 = vmov 512.0  }
 0x252   : > { %12800 = vst [vmem:[#allocation26_spill] sm:$0xff] %v9018_v18  ;;  %v2449_v5 = vmul.f32 %v9018_v18, %v9018_v18  ;;  %2585 = vadd.xlane.f32.xlu1 %v2584_v45  ;;  %v2260_v35 = vadd.f32 %v9018_v18, %v9012_v38  ;;  %v2450_v11 = vmul.f32 %v9021_v27, %v9021_v27  ;;  %7629 = vrcp.f32 %v7761_v41 }
 0x253   : > { %12801 = vst [vmem:[#allocation27_spill] sm:$0xff] %v9021_v27  ;;  %1927 = vmatmul.bf16.gmra.mxu1 %v8632_v4  ;;  %2194 = vmatmul.bf16.gmra.mxu0 %v8632_v4 }
 0x254   : > { %2016 = vmatmul.bf16.gmra.mxu2 %v8632_v4  ;;  %2105 = vmatmul.bf16.gmra.mxu3 %v8632_v4  ;;  %v2261_v21 = vadd.f32 %v2260_v35, %v9021_v27  ;;  %v2587_v0 = vadd.f32 %v2449_v5, %v2448_v59  ;;  %12803 = vst [vmem:[#allocation29_spill] sm:$0xff] %v9040_v24 }
 0x256   : > { %v2262_v29 = vadd.f32 %v2261_v21, %v9026_v52  ;;  %v2588_v20 = vadd.f32 %v2587_v0, %v2450_v11  ;;  %v2452_v21 = vmul.f32 %v9040_v24, %v9040_v24  ;;  %v9054_v52 = vadd.f32 %v2155_v25, %v8659_v15 }
 0x257   : > { %v1977_v45 = vpop.f32.mrf.mxu2  ;;  %v2066_v18 = vpop.f32.mrf.mxu3 }
 0x258   : > { %v9046_v38 = vadd.f32 %v1977_v45, %v8650_v2  ;;  %v9049_v4 = vadd.f32 %v2066_v18, %v8652_v34  ;;  %2263 = vadd.xlane.f32.xlu0 %v2262_v29  ;;  %v1890_v35 = vpop.f32.mrf.mxu1  ;;  %v2157_v59 = vpop.f32.mrf.mxu0  ;;  %v2589_v5 = vadd.f32 %v2588_v20, %v2451_v61  ;;  %12806 = vst [vmem:[#allocation32_spill] sm:$0xff] %v9054_v52 }
 0x259   : > { %v7630_v20 = vpop.eup %7629  ;;  %v9064_v45 = vadd.f32 %v1890_v35, %v8644_v6  ;;  %v2455_v41 = vmul.f32 %v9054_v52, %v9054_v52 }
 0x25a   : > { %12804 = vst [vmem:[#allocation30_spill] sm:$0xff] %v9046_v38  ;;  %v2265_v11 = vadd.f32 %v9046_v38, %v9040_v24  ;;  %v2453_v0 = vmul.f32 %v9046_v38, %v9046_v38  ;;  %2590 = vadd.xlane.f32.xlu2 %v2589_v5  ;;  %v2454_v18 = vmul.f32 %v9049_v4, %v9049_v4  ;;  %v2366_v35 = vmul.f32 512.0, %v7630_v20 }
 0x25b   : > { %12805 = vst [vmem:[#allocation31_spill] sm:$0xff] %v9049_v4  ;;  %vm2370_vm2 = vweird.f32 %v7630_v20 }
 0x25c   : > { %v2266_v29 = vadd.f32 %v2265_v11, %v9049_v4  ;;  %v2592_v61 = vadd.f32 %v2453_v0, %v2452_v21  ;;  %12807 = vst [vmem:[#allocation33_spill] sm:$0xff] %v9064_v45  ;;  %v9078_v4 = vadd.f32 %v2157_v59, %v8659_v15 }
 0x25e   : > { %v2267_v25 = vadd.f32 %v2266_v29, %v9054_v52  ;;  %v2593_v24 = vadd.f32 %v2592_v61, %v2454_v18  ;;  %v2456_v29 = vmul.f32 %v9064_v45, %v9064_v45  ;;  %12810 = vst [vmem:[#allocation36_spill] sm:$0xff] %v9078_v4  ;;  %v2367_v61 = vsub.f32 1.0, %v2366_v35 }
 0x25f   : > { %v1979_v27 = vpop.f32.mrf.mxu2  ;;  %v2068_v47 = vpop.f32.mrf.mxu3 }
 0x260   : > { %v9070_v5 = vadd.f32 %v1979_v27, %v8650_v2  ;;  %v9073_v38 = vadd.f32 %v2068_v47, %v8652_v34  ;;  %2268 = vadd.xlane.f32.xlu0 %v2267_v25  ;;  %v1893_v21 = vpop.f32.mrf.mxu1  ;;  %v2160_v11 = vpop.f32.mrf.mxu0  ;;  %v2594_v0 = vadd.f32 %v2593_v24, %v2455_v41 }
 0x261   : > { %v9092_v25 = vadd.f32 %v1893_v21, %v8644_v6 }
 0x262   : > { %12808 = vst [vmem:[#allocation34_spill] sm:$0xff] %v9070_v5  ;;  %v2457_v18 = vmul.f32 %v9070_v5, %v9070_v5  ;;  %2595 = vadd.xlane.f32.xlu2 %v2594_v0  ;;  %v2270_v27 = vadd.f32 %v9070_v5, %v9064_v45  ;;  %v2458_v24 = vmul.f32 %v9073_v38, %v9073_v38 }
 0x263   : > { %12809 = vst [vmem:[#allocation35_spill] sm:$0xff] %v9073_v38  ;;  %1932 = vmatmul.bf16.gmra.mxu1 %v8654_v13  ;;  %2199 = vmatmul.bf16.gmra.mxu0 %v8654_v13  ;;  %v2459_v0 = vmul.f32 %v9078_v4, %v9078_v4  ;;  %v2460_v21 = vmul.f32 %v9092_v25, %v9092_v25 }
 0x264   : > { %2021 = vmatmul.bf16.gmra.mxu2 %v8654_v13  ;;  %2110 = vmatmul.bf16.gmra.mxu3 %v8654_v13  ;;  %v2271_v47 = vadd.f32 %v2270_v27, %v9073_v38  ;;  %v2597_v59 = vadd.f32 %v2457_v18, %v2456_v29  ;;  %12811 = vst [vmem:[#allocation37_spill] sm:$0xff] %v9092_v25 }
 0x265   : > { %v2368_v18 = vmul.f32 %v7630_v20, %v2367_v61 }
 0x266   : > { %v2272_v41 = vadd.f32 %v2271_v47, %v9078_v4  ;;  %v2598_v5 = vadd.f32 %v2597_v59, %v2458_v24  ;;  %v9106_v47 = vadd.f32 %v2160_v11, %v8659_v15 }
 0x267   : > { %v1982_v52 = vpop.f32.mrf.mxu2  ;;  %v2071_v45 = vpop.f32.mrf.mxu3 }
 0x268   : > { %v9098_v13 = vadd.f32 %v1982_v52, %v8650_v2  ;;  %v9101_v27 = vadd.f32 %v2071_v45, %v8652_v34  ;;  %2273 = vadd.xlane.f32.xlu1 %v2272_v41  ;;  %v1895_v29 = vpop.f32.mrf.mxu1  ;;  %v2599_v35 = vadd.f32 %v2598_v5, %v2459_v0  ;;  %12814 = vst [vmem:[#allocation40_spill] sm:$0xff] %v9106_v47  ;;  %v2162_v59 = vpop.f32.mrf.mxu0 }
 0x269   : > { %v2369_v41 = vadd.f32 %v7630_v20, %v2368_v18  ;;  %v9116_v0 = vadd.f32 %v1895_v29, %v8644_v6 }
 0x26a   : > { %12812 = vst [vmem:[#allocation38_spill] sm:$0xff] %v9098_v13  ;;  %v2275_v24 = vadd.f32 %v9098_v13, %v9092_v25  ;;  %v2461_v52 = vmul.f32 %v9098_v13, %v9098_v13  ;;  %2600 = vadd.xlane.f32.xlu0 %v2599_v35  ;;  %v2462_v45 = vmul.f32 %v9101_v27, %v9101_v27 }
 0x26b   : > { %12813 = vst [vmem:[#allocation39_spill] sm:$0xff] %v9101_v27  ;;  %v2463_v25 = vmul.f32 %v9106_v47, %v9106_v47  ;;  %v2464_v29 = vmul.f32 %v9116_v0, %v9116_v0 }
 0x26c   : > { %v2276_v5 = vadd.f32 %v2275_v24, %v9101_v27  ;;  %v2602_v61 = vadd.f32 %v2461_v52, %v2460_v21  ;;  %12815 = vst [vmem:[#allocation41_spill] sm:$0xff] %v9116_v0  ;;  %v9127_v21 = vsel %vm2370_vm2, %v7630_v20, %v2369_v41  ;;  %v9132_v52 = vadd.f32 %v2162_v59, %v8659_v15 }
 0x26e   : > { %v2277_v11 = vadd.f32 %v2276_v5, %v9106_v47  ;;  %v2603_v4 = vadd.f32 %v2602_v61, %v2462_v45  ;;  %12818 = vst [vmem:[#allocation44_spill] sm:$0xff] %v9132_v52 }
 0x26f   : > { %v1984_v13 = vpop.f32.mrf.mxu2  ;;  %v2073_v38 = vpop.f32.mrf.mxu3 }
 0x270   : > { %v9122_v35 = vadd.f32 %v1984_v13, %v8650_v2  ;;  %2278 = vadd.xlane.f32.xlu1 %v2277_v11  ;;  %v1898_v8 = vpop.f32.mrf.mxu1  ;;  %v2604_v24 = vadd.f32 %v2603_v4, %v2463_v25  ;;  %v9125_v18 = vadd.f32 %v2073_v38, %v8652_v34  ;;  %v2165_v4 = vpop.f32.mrf.mxu0  ;;  %v2467_v11 = vmul.f32 %v9132_v52, %v9132_v52 }
 0x271   : > { %v9145_v41 = vadd.f32 %v1898_v8, %v8644_v6  ;;  %v7465_v8 = vld [vmem:[%s12535_s7 + $0x10c] sm:$0xf0] }
 0x272   : > { %12816 = vst [vmem:[#allocation42_spill] sm:$0xff] %v9122_v35  ;;  %v2465_v45 = vmul.f32 %v9122_v35, %v9122_v35  ;;  %2605 = vadd.xlane.f32.xlu0 %v2604_v24  ;;  %v2280_v13 = vadd.f32 %v9122_v35, %v9116_v0  ;;  %v2466_v59 = vmul.f32 %v9125_v18, %v9125_v18 }
 0x273   : > { %12817 = vst [vmem:[#allocation43_spill] sm:$0xff] %v9125_v18  ;;  %v2209_v5 = vpop.xlane.xlu0 %2208  ;;  %v2468_v57 = vmul.f32 %v9145_v41, %v9145_v41 }
 0x274   : > { %v9139_v38 = vmul.f32 %v9127_v21, %v2209_v5  ;;  %v2281_v20 = vadd.f32 %v2280_v13, %v9125_v18  ;;  %v2607_v25 = vadd.f32 %v2465_v45, %v2464_v29  ;;  %12819 = vst [vmem:[#allocation45_spill] sm:$0xff] %v9145_v41  ;;  %v6894_v45 = vld [vmem:[%s12535_s7 + $0x100] sm:$0xf] }
 0x275   : > { %v2536_v61 = vpop.xlane.xlu1 %2535  ;;  %v6895_v0 = vor.u32 %v7465_v8, %v6894_v45  ;;  %v7150_v8 = vld [vmem:[%s12535_s7 + $0x300] sm:$0xf] }
 0x276   : > { %v2692_v24 = vmul.f32 %v2536_v61, %v9127_v21  ;;  %v2724_v47 = vmul.f32 %v9139_v38, %v9139_v38  ;;  %v2282_v13 = vadd.f32 %v2281_v20, %v9132_v52  ;;  %v2608_v29 = vadd.f32 %v2607_v25, %v2466_v59  ;;  %v7022_v61 = vld [vmem:[%s12535_s7 + $0x200] sm:$0xf]  ;;  %v7497_v20 = vld [vmem:[%s12535_s7 + $0x20c] sm:$0xf0] }
 0x277   : > { %v1987_v5 = vpop.f32.mrf.mxu2  ;;  %v2076_v35 = vpop.f32.mrf.mxu3  ;;  %v6766_v25 = vld [vmem:[%s12535_s7] sm:$0xf]  ;;  %v7433_v59 = vld [vmem:[%s12535_s7 + $0xc] sm:$0xf0]  ;;  %v9175_v52 = vadd.f32 %v2165_v4, %v8659_v15  ;;  %4610 = vmatpush.bf16.msrb.mxu2 %v6895_v0  ;;  %v7151_v40 = vor.u32 %v7529_v56, %v7150_v8  ;;  %v2788_v48 = vsub.f32 %v8657_v3, %v9139_v38 }
 0x278   : > { %v9163_v18 = vadd.f32 %v1987_v5, %v8650_v2  ;;  %v2756_v27 = vsub.f32 %v2692_v24, %v2724_v47  ;;  %v9178_v5 = vadd.f32 %v2076_v35, %v8652_v34  ;;  %2283 = vadd.xlane.f32.xlu2 %v2282_v13  ;;  %v2609_v45 = vadd.f32 %v2608_v29, %v2467_v11  ;;  %v1900_v35 = vpop.f32.mrf.mxu1 }
 0x279   : > { %12821 = vst [vmem:[#allocation47_spill] sm:$0xff] %v9175_v52  ;;  %v7023_v11 = vor.u32 %v7497_v20, %v7022_v61  ;;  %v6767_v29 = vor.u32 %v7433_v59, %v6766_v25  ;;  %4788 = vmatpush.bf16.msrb.mxu0 %v7151_v40  ;;  %v2167_v61 = vpop.f32.mrf.mxu0  ;;  %v2471_v56 = vmul.f32 %v9175_v52, %v9175_v52 }
 0x27a   : > { %12820 = vst [vmem:[#allocation46_spill] sm:$0xff] %v9163_v18  ;;  %v2285_v4 = vadd.f32 %v9163_v18, %v9145_v41  ;;  %v2469_v47 = vmul.f32 %v9163_v18, %v9163_v18  ;;  %v9192_v24 = vadd.f32 1e-05, %v2756_v27  ;;  %2610 = vadd.xlane.f32.xlu1 %v2609_v45  ;;  %v2470_v18 = vmul.f32 %v9178_v5, %v9178_v5 }
 0x27b   : > { %12822 = vst [vmem:[#allocation48_spill] sm:$0xff] %v9178_v5  ;;  %v2214_v13 = vpop.xlane.xlu0 %2213  ;;  %4699 = vmatpush.bf16.msrb.mxu3 %v7023_v11  ;;  %4521 = vmatpush.bf16.msrb.mxu1 %v6767_v29  ;;  %v9202_v27 = vadd.f32 %v1900_v35, %v8644_v6 }
 0x27c   : > { %v9195_v53 = vmul.f32 %v9127_v21, %v2214_v13  ;;  %v2286_v46 = vadd.f32 %v2285_v4, %v9178_v5  ;;  %v2612_v23 = vadd.f32 %v2469_v47, %v2468_v57  ;;  %7631 = vrsqrt.f32 %v9192_v24 }
 0x27d   : > { %v2541_v0 = vpop.xlane.xlu1 %2540  ;;  %12823 = vst [vmem:[#allocation49_spill] sm:$0xff] %v9202_v27  ;;  %vm2954_vm5 = vweird.f32 %v9192_v24 }
 0x27e   : > { %v2693_v20 = vmul.f32 %v2541_v0, %v9127_v21  ;;  %v2725_v57 = vmul.f32 %v9195_v53, %v9195_v53  ;;  %v2287_v45 = vadd.f32 %v2286_v46, %v9175_v52  ;;  %v2613_v8 = vadd.f32 %v2612_v23, %v2470_v18 }
 0x27f   : > { %v1989_v25 = vpop.f32.mrf.mxu2  ;;  %v2078_v59 = vpop.f32.mrf.mxu3  ;;  %v2472_v23 = vmul.f32 %v9202_v27, %v9202_v27 }
 0x280   : > { %v9211_v4 = vadd.f32 %v1989_v25, %v8650_v2  ;;  %v2757_v40 = vsub.f32 %v2693_v20, %v2725_v57  ;;  %2288 = vadd.xlane.f32.xlu2 %v2287_v45  ;;  %v2614_v47 = vadd.f32 %v2613_v8, %v2471_v56  ;;  %v9216_v11 = vadd.f32 %v2078_v59, %v8652_v34  ;;  %v1903_v56 = vpop.f32.mrf.mxu1 }
 0x281   : > { %v9233_v25 = vadd.f32 %v2167_v61, %v8659_v15  ;;  %v9244_v61 = vadd.f32 %v1903_v56, %v8644_v6  ;;  %v2170_v5 = vpop.f32.mrf.mxu0 }
 0x282   : > { %12824 = vst [vmem:[#allocation50_spill] sm:$0xff] %v9211_v4  ;;  %v2473_v35 = vmul.f32 %v9211_v4, %v9211_v4  ;;  %v2290_v13 = vadd.f32 %v9211_v4, %v9202_v27  ;;  %v9220_v29 = vpop.eup %7631  ;;  %v9224_v46 = vadd.f32 1e-05, %v2757_v40  ;;  %2615 = vadd.xlane.f32.xlu1 %v2614_v47  ;;  %v2474_v40 = vmul.f32 %v9216_v11, %v9216_v11 }
 0x283   : > { %12825 = vst [vmem:[#allocation51_spill] sm:$0xff] %v9216_v11  ;;  %v2219_v18 = vpop.xlane.xlu2 %2218  ;;  %v2949_v0 = vmul.f32 %v9220_v29, %v9192_v24  ;;  %v9256_v56 = vadd.f32 %v2170_v5, %v8659_v15  ;;  %vm2955_vm3 = vweird.f32 %v9220_v29 }
 0x284   : > { %v9229_v20 = vmul.f32 %v9127_v21, %v2219_v18  ;;  %v2291_v57 = vadd.f32 %v2290_v13, %v9216_v11  ;;  %12826 = vst [vmem:[#allocation52_spill] sm:$0xff] %v9233_v25  ;;  %7633 = vrsqrt.f32 %v9224_v46  ;;  %v2617_v45 = vadd.f32 %v2473_v35, %v2472_v23  ;;  %vm2956_vm7 = vmor %vm2954_vm5, %vm2955_vm3 }
 0x285   : > { %v2546_v59 = vpop.xlane.xlu0 %2545  ;;  %v2950_v8 = vmul.f32 %v9220_v29, %v2949_v0  ;;  %12827 = vst [vmem:[#allocation53_spill] sm:$0xff] %v9244_v61  ;;  %v2475_v0 = vmul.f32 %v9233_v25, %v9233_v25  ;;  %v2479_v42 = vmul.f32 %v9256_v56, %v9256_v56  ;;  %vm2964_vm6 = vweird.f32 %v9224_v46 }
 0x286   : > { %v2726_v47 = vmul.f32 %v9229_v20, %v9229_v20  ;;  %v2694_v18 = vmul.f32 %v2546_v59, %v9127_v21  ;;  %v2292_v13 = vadd.f32 %v2291_v57, %v9233_v25  ;;  %v2618_v23 = vadd.f32 %v2617_v45, %v2474_v40  ;;  %12829 = vst [vmem:[#allocation55_spill] sm:$0xff] %v9256_v56 }
 0x287   : > { %v1992_v4 = vpop.f32.mrf.mxu2  ;;  %v2081_v52 = vpop.f32.mrf.mxu3  ;;  %v2951_v11 = vmul.f32 0.5, %v2950_v8  ;;  %v2476_v8 = vmul.f32 %v9244_v61, %v9244_v61 }
 0x288   : > { %v9247_v35 = vadd.f32 %v1992_v4, %v8650_v2  ;;  %2293 = vadd.xlane.f32.xlu0 %v2292_v13  ;;  %v2758_v41 = vsub.f32 %v2694_v18, %v2726_v47  ;;  %v9259_v4 = vadd.f32 %v2081_v52, %v8652_v34  ;;  %v2619_v45 = vadd.f32 %v2618_v23, %v2475_v0  ;;  %v1905_v23 = vpop.f32.mrf.mxu1 }
 0x289   : > { %v2952_v47 = vsub.f32 1.5, %v2951_v11  ;;  %v9288_v3 = vadd.f32 %v1905_v23, %v8644_v6 }
 0x28a   : > { %12828 = vst [vmem:[#allocation54_spill] sm:$0xff] %v9247_v35  ;;  %v2295_v59 = vadd.f32 %v9247_v35, %v9244_v61  ;;  %v2477_v27 = vmul.f32 %v9247_v35, %v9247_v35  ;;  %v7634_v57 = vpop.eup %7633  ;;  %v9270_v35 = vld [vmem:[%s12533_s5] sm:$0xf]  ;;  %2620 = vadd.xlane.f32.xlu2 %v2619_v45  ;;  %v9275_v61 = vadd.f32 1e-05, %v2758_v41  ;;  %v2478_v11 = vmul.f32 %v9259_v4, %v9259_v4 }
 0x28b   : > { %12830 = vst [vmem:[#allocation56_spill] sm:$0xff] %v9259_v4  ;;  %v2224_v40 = vpop.xlane.xlu2 %2223  ;;  %v2959_v13 = vmul.f32 %v7634_v57, %v9224_v46  ;;  %v9280_v28 = vperm.slane %v9270_v35, 0  ;;  %v2953_v51 = vmul.f32 %v9220_v29, %v2952_v47  ;;  %vm2965_vm4 = vweird.f32 %v7634_v57 }
 0x28c   : > { %v9265_v25 = vmul.f32 %v9127_v21, %v2224_v40  ;;  %v2296_v52 = vadd.f32 %v2295_v59, %v9259_v4  ;;  %v2622_v0 = vadd.f32 %v2477_v27, %v2476_v8  ;;  %12831 = vst [vmem:[#allocation57_spill] sm:$0xff] %v9288_v3  ;;  %7635 = vrsqrt.f32 %v9275_v61  ;;  %vm2966_vm8 = vmor %vm2964_vm6, %vm2965_vm4 }
 0x28d   : > { %v2551_v5 = vpop.xlane.xlu1 %2550  ;;  %v2960_v18 = vmul.f32 %v7634_v57, %v2959_v13  ;;  %v2789_v46 = vsub.f32 %v8662_v9, %v9139_v38  ;;  %v2792_v9 = vsub.f32 %v8686_v22, %v9195_v53  ;;  %vm2974_vm9 = vweird.f32 %v9275_v61 }
 0x28e   : > { %v2727_v27 = vmul.f32 %v9265_v25, %v9265_v25  ;;  %v2695_v41 = vmul.f32 %v2551_v5, %v9127_v21  ;;  %v2297_v8 = vadd.f32 %v2296_v52, %v9256_v56  ;;  %v2623_v31 = vadd.f32 %v2622_v0, %v2478_v11  ;;  %v2172_v52 = vpop.f32.mrf.mxu0 }
 0x28f   : > { %v1994_v40 = vpop.f32.mrf.mxu2  ;;  %v2961_v45 = vmul.f32 0.5, %v2960_v18  ;;  %v2083_v13 = vpop.f32.mrf.mxu3  ;;  %v2480_v0 = vmul.f32 %v9288_v3, %v9288_v3 }
 0x290   : > { %v9292_v59 = vadd.f32 %v1994_v40, %v8650_v2  ;;  %v2759_v4 = vsub.f32 %v2695_v41, %v2727_v27  ;;  %2298 = vadd.xlane.f32.xlu0 %v2297_v8  ;;  %v9304_v47 = vadd.f32 %v2083_v13, %v8652_v34  ;;  %v2624_v11 = vadd.f32 %v2623_v31, %v2479_v42 }
 0x291   : > { %v2962_v18 = vsub.f32 1.5, %v2961_v45  ;;  %v2790_v41 = vsub.f32 %v8665_v14, %v9139_v38  ;;  %v2791_v13 = vsub.f32 %v8670_v17, %v9139_v38  ;;  %v3534_v17 = vld [vmem:[%s12534_s6] sm:$0xf]  ;;  %v9335_v38 = vperm.slane %v9270_v35, 1 }
 0x292   : > { %12832 = vst [vmem:[#allocation58_spill] sm:$0xff] %v9292_v59  ;;  %v2481_v23 = vmul.f32 %v9292_v59, %v9292_v59  ;;  %v2300_v5 = vadd.f32 %v9292_v59, %v9288_v3  ;;  %v9310_v45 = vadd.f32 1e-05, %v2759_v4  ;;  %v2957_v4 = vsel %vm2956_vm7, %v9220_v29, %v2953_v51  ;;  %2625 = vadd.xlane.f32.xlu2 %v2624_v11  ;;  %v9337_v51 = vpop.eup %7635 }
 0x293   : > { %v2229_v16 = vpop.xlane.xlu2 %2228  ;;  %v2963_v40 = vmul.f32 %v7634_v57, %v2962_v18  ;;  %12833 = vst [vmem:[#allocation59_spill] sm:$0xff] %v9304_v47  ;;  %v2793_v29 = vsub.f32 %v8692_v26, %v9195_v53  ;;  %v2482_v18 = vmul.f32 %v9304_v47, %v9304_v47  ;;  %v9359_v59 = vperm.slane %v3534_v17, 1 }
 0x294   : > { %v9313_v27 = vmul.f32 %v9127_v21, %v2229_v16  ;;  %v2301_v8 = vadd.f32 %v2300_v5, %v9304_v47  ;;  %v9325_v16 = vadd.f32 %v2172_v52, %v8659_v15  ;;  %v2627_v42 = vadd.f32 %v2481_v23, %v2480_v0 }
 0x295   : > { %v2556_v24 = vpop.xlane.xlu1 %2555  ;;  %v2967_v31 = vsel %vm2966_vm8, %v7634_v57, %v2963_v40  ;;  %7637 = vrsqrt.f32 %v9310_v45  ;;  %v2794_v57 = vsub.f32 %v8695_v55, %v9195_v53  ;;  %v3268_v23 = vmul.f32 %v2957_v4, %v2788_v48 }
 0x296   : > { %12834 = vst [vmem:[#allocation60_spill] sm:$0xff] %v9325_v16  ;;  %v2696_v14 = vmul.f32 %v2556_v24, %v9127_v21  ;;  %v2728_v22 = vmul.f32 %v9313_v27, %v9313_v27  ;;  %v2795_v5 = vsub.f32 %v8700_v32, %v9195_v53  ;;  %v3272_v40 = vmul.f32 %v2967_v31, %v2792_v9 }
 0x297   : > { %v2302_v52 = vadd.f32 %v2301_v8, %v9325_v16  ;;  %v2483_v0 = vmul.f32 %v9325_v16, %v9325_v16  ;;  %v2628_v26 = vadd.f32 %v2627_v42, %v2482_v18  ;;  %v9352_v24 = vperm.slane %v3534_v17, 0  ;;  %v1997_v9 = vpop.f32.mrf.mxu2 }
 0x298   : > { %v9355_v55 = vperm.slane %v9270_v35, 2  ;;  %v2969_v47 = vmul.f32 %v9337_v51, %v9275_v61  ;;  %v2760_v48 = vsub.f32 %v2696_v14, %v2728_v22  ;;  %v9361_v32 = vperm.slane %v3534_v17, 2 }
 0x299   : > { %2303 = vadd.xlane.f32.xlu1 %v2302_v52  ;;  %v3269_v53 = vmul.f32 %v2957_v4, %v2789_v46  ;;  %v3270_v8 = vmul.f32 %v2957_v4, %v2790_v41  ;;  %v2629_v16 = vadd.f32 %v2628_v26, %v2483_v0  ;;  %v3273_v56 = vmul.f32 %v2967_v31, %v2793_v29  ;;  %v1908_v29 = vpop.f32.mrf.mxu1 }
 0x29a   : > { %v3274_v3 = vmul.f32 %v2967_v31, %v2794_v57  ;;  %v3406_v1 = vmul.f32 %v9280_v28, %v3268_v23  ;;  %v3410_v14 = vmul.f32 %v9280_v28, %v3272_v40  ;;  %v3271_v22 = vmul.f32 %v2957_v4, %v2791_v13 }
 0x29b   : > { %v2234_v11 = vpop.xlane.xlu0 %2233  ;;  %v9366_v18 = vpop.eup %7637  ;;  %2630 = vadd.xlane.f32.xlu0 %v2629_v16  ;;  %v9373_v46 = vperm.slane %v9270_v35, 3  ;;  %v9375_v41 = vperm.slane %v3534_v17, 3  ;;  %v3275_v0 = vmul.f32 %v2967_v31, %v2795_v5  ;;  %v2970_v26 = vmul.f32 %v9337_v51, %v2969_v47 }
 0x29c   : > { %v9364_v42 = vmul.f32 %v9127_v21, %v2234_v11  ;;  %v2979_v52 = vmul.f32 %v9366_v18, %v9310_v45  ;;  %v9378_v57 = vadd.f32 1e-05, %v2760_v48  ;;  %v9381_v23 = vadd.f32 %v1997_v9, %v8650_v2  ;;  %v2086_v17 = vpop.f32.mrf.mxu3  ;;  %v2175_v9 = vpop.f32.mrf.mxu0 }
 0x29d   : > { %v2561_v44 = vpop.xlane.xlu2 %2560  ;;  %v3544_v16 = vadd.f32 %v9352_v24, %v3406_v1  ;;  %v3548_v35 = vadd.f32 %v9352_v24, %v3410_v14  ;;  %v3407_v31 = vmul.f32 %v9335_v38, %v3269_v53  ;;  %v3411_v47 = vmul.f32 %v9335_v38, %v3273_v56 }
 0x29e   : > { %12835 = vst [vmem:[#allocation61_spill] sm:$0xff] %v9381_v23  ;;  %v2697_v13 = vmul.f32 %v2561_v44, %v9127_v21  ;;  %v2729_v4 = vmul.f32 %v9364_v42, %v9364_v42  ;;  %v3408_v5 = vmul.f32 %v9355_v55, %v3270_v8  ;;  %v3412_v40 = vmul.f32 %v9355_v55, %v3274_v3 }
 0x29f   : > { %v2980_v11 = vmul.f32 %v9366_v18, %v2979_v52  ;;  %v9394_v44 = vadd.f32 %v1908_v29, %v8644_v6  ;;  %v9396_v48 = vpack.c.bf16 %v3548_v35, %v3544_v16  ;;  %v3409_v1 = vmul.f32 %v9373_v46, %v3271_v22  ;;  %v7491_v22 = vld [vmem:[%s12535_s7 + $0x1e4] sm:$0xf]  ;;  %v7008_v16 = vld [vmem:[%s12535_s7 + $0x1f0] sm:$0xf0] }
 0x2a0   : > { %v3545_v14 = vadd.f32 %v9359_v59, %v3407_v31  ;;  %v3549_v53 = vadd.f32 %v9359_v59, %v3411_v47  ;;  %v3546_v56 = vadd.f32 %v9361_v32, %v3408_v5  ;;  %v3550_v8 = vadd.f32 %v9361_v32, %v3412_v40  ;;  %v7459_v47 = vld [vmem:[%s12535_s7 + $0xe4] sm:$0xf] }
 0x2a1   : > { %12836 = vst [vmem:[#allocation62_spill] sm:$0xff] %v9396_v48  ;;  %v2971_v52 = vmul.f32 0.5, %v2970_v26  ;;  %v2761_v50 = vsub.f32 %v2697_v13, %v2729_v4  ;;  %4522 = vmatmul.bf16.vlgmr.msrb.gmra.mxu1 %v9396_v48  ;;  %v3413_v29 = vmul.f32 %v9373_v46, %v3275_v0  ;;  %7639 = vrsqrt.f32 %v9378_v57  ;;  %v7523_v0 = vld [vmem:[%s12535_s7 + $0x2e4] sm:$0xf]  ;;  %v7136_v13 = vld [vmem:[%s12535_s7 + $0x2f0] sm:$0xf0]  ;;  %v1999_v4 = vpop.f32.mrf.mxu2 }
 0x2a2   : > { %v2305_v35 = vadd.f32 %v9381_v23, %v9394_v44  ;;  %v9416_v31 = vpack.c.bf16 %v3549_v53, %v3545_v14  ;;  %v9418_v26 = vpack.c.bf16 %v3550_v8, %v3546_v56  ;;  %v3547_v5 = vadd.f32 %v9375_v41, %v3409_v1 }
 0x2a3   : > { %v3551_v40 = vadd.f32 %v9375_v41, %v3413_v29  ;;  %v2981_v14 = vmul.f32 0.5, %v2980_v11  ;;  %v2485_v53 = vmul.f32 %v9381_v23, %v9381_v23  ;;  %v9435_v56 = vadd.f32 %v2086_v17, %v8652_v34  ;;  %v6880_v11 = vld [vmem:[%s12535_s7 + $0xf0] sm:$0xf0]  ;;  %v2239_v23 = vpop.xlane.xlu0 %2238 }
 0x2a4   : > { %12837 = vst [vmem:[#allocation63_spill] sm:$0xff] %v9416_v31  ;;  %4611 = vmatmul.bf16.vlgmr.msrb.gmra.mxu2 %v9416_v31  ;;  %4700 = vmatmul.bf16.vlgmr.msrb.gmra.mxu3 %v9418_v26  ;;  %v7011_v8 = vor.u32 %v7491_v22, %v7008_v16  ;;  %v9447_v29 = vadd.f32 1e-05, %v2761_v50  ;;  %v7139_v3 = vor.u32 %v7523_v0, %v7136_v13  ;;  %v2972_v31 = vsub.f32 1.5, %v2971_v52 }
 0x2a5   : > { %12838 = vst [vmem:[#allocation64_spill] sm:$0xff] %v9418_v26  ;;  %v9449_v17 = vpack.c.bf16 %v3551_v40, %v3547_v5  ;;  %v2484_v22 = vmul.f32 %v9394_v44, %v9394_v44  ;;  %v9454_v16 = vadd.f32 %v2175_v9, %v8659_v15  ;;  %v1910_v26 = vpop.f32.mrf.mxu1  ;;  %v2306_v48 = vadd.f32 %v2305_v35, %v9435_v56  ;;  %v2088_v35 = vpop.f32.mrf.mxu3 }
 0x2a6   : > { %12839 = vst [vmem:[#allocation65_spill] sm:$0xff] %v9435_v56  ;;  %4959 = vmatpush.bf16.msra.mxu2 %v7011_v8  ;;  %v9462_v52 = vadd.f32 %v1999_v4, %v8650_v2  ;;  %5048 = vmatpush.bf16.msra.mxu3 %v7139_v3  ;;  %v6883_v0 = vor.u32 %v7459_v47, %v6880_v11  ;;  %v2982_v9 = vsub.f32 1.5, %v2981_v14  ;;  %7641 = vrsqrt.f32 %v9447_v29  ;;  %v2566_v4 = vpop.xlane.xlu2 %2565  ;;  %v2177_v14 = vpop.f32.mrf.mxu0 }
 0x2a7   : > { %12840 = vst [vmem:[#allocation66_spill] sm:$0xff] %v9449_v17  ;;  %4789 = vmatmul.bf16.vlgmr.msrb.gmra.mxu0 %v9449_v17  ;;  %v9464_v13 = vpop.eup %7639  ;;  %v2486_v5 = vmul.f32 %v9435_v56, %v9435_v56  ;;  %v2307_v40 = vadd.f32 %v2306_v48, %v9454_v16  ;;  %v2632_v8 = vadd.f32 %v2485_v53, %v2484_v22  ;;  %vm2975_vm10 = vweird.f32 %v9337_v51 }
 0x2a8   : > { %12841 = vst [vmem:[#allocation67_spill] sm:$0xff] %v9454_v16  ;;  %v9472_v50 = vadd.f32 %v1910_v26, %v8644_v6  ;;  %4870 = vmatpush.bf16.msra.mxu1 %v6883_v0  ;;  %v9476_v3 = vmul.f32 %v9127_v21, %v2239_v23  ;;  %v2973_v47 = vmul.f32 %v9337_v51, %v2972_v31  ;;  %v7555_v26 = vld [vmem:[%s12535_s7 + $0x3e4] sm:$0xf]  ;;  %v7264_v23 = vld [vmem:[%s12535_s7 + $0x3f0] sm:$0xf0]  ;;  %vm2985_vm11 = vweird.f32 %v9366_v18  ;;  %vm2976_vm12 = vmor %vm2974_vm9, %vm2975_vm10 }
 0x2a9   : > { %12842 = vst [vmem:[#allocation68_spill] sm:$0xff] %v9462_v52  ;;  %2308 = vadd.xlane.f32.xlu1 %v2307_v40  ;;  %v2487_v48 = vmul.f32 %v9454_v16, %v9454_v16  ;;  %v2633_v53 = vadd.f32 %v2632_v8, %v2486_v5  ;;  %v2989_v31 = vmul.f32 %v9464_v13, %v9378_v57  ;;  %vm2984_vm13 = vweird.f32 %v9310_v45 }
 0x2aa   : > { %12843 = vst [vmem:[#allocation69_spill] sm:$0xff] %v9472_v50  ;;  %v2489_v11 = vmul.f32 %v9462_v52, %v9462_v52  ;;  %v9494_v22 = vadd.f32 %v2088_v35, %v8652_v34  ;;  %v2983_v0 = vmul.f32 %v9366_v18, %v2982_v9  ;;  %v2698_v40 = vmul.f32 %v2566_v4, %v9127_v21  ;;  %vm2986_vm14 = vmor %vm2984_vm13, %vm2985_vm11 }
 0x2ab   : > { %v2634_v5 = vadd.f32 %v2633_v53, %v2487_v48  ;;  %v2730_v8 = vmul.f32 %v9476_v3, %v9476_v3  ;;  %v2802_v1 = vsub.f32 %v8765_v54, %v9265_v25  ;;  %v2488_v35 = vmul.f32 %v9472_v50, %v9472_v50  ;;  %v2244_v53 = vpop.xlane.xlu1 %2243 }
 0x2ac   : > { %12844 = vst [vmem:[#allocation70_spill] sm:$0xff] %v9494_v22  ;;  %v9509_v17 = vadd.f32 %v2177_v14, %v8659_v15  ;;  %v7267_v9 = vor.u32 %v7555_v26, %v7264_v23  ;;  %v2977_v4 = vsel %vm2976_vm12, %v9337_v51, %v2973_v47  ;;  %v2803_v48 = vsub.f32 %v8770_v30, %v9265_v25  ;;  %v9517_v54 = vpop.eup %7641  ;;  %v2002_v47 = vpop.f32.mrf.mxu2 }
 0x2ad   : > { %2635 = vadd.xlane.f32.xlu0 %v2634_v5  ;;  %v2310_v61 = vadd.f32 %v9462_v52, %v9472_v50  ;;  %v2990_v51 = vmul.f32 %v9464_v13, %v2989_v31  ;;  %v2490_v30 = vmul.f32 %v9494_v22, %v9494_v22  ;;  %v2637_v45 = vadd.f32 %v2489_v11, %v2488_v35  ;;  %v1913_v5 = vpop.f32.mrf.mxu1  ;;  %v2091_v23 = vpop.f32.mrf.mxu3 }
 0x2ae   : > { %12845 = vst [vmem:[#allocation71_spill] sm:$0xff] %v9509_v17  ;;  %5137 = vmatpush.bf16.msra.mxu0 %v7267_v9  ;;  %v2987_v26 = vsel %vm2986_vm14, %v9366_v18, %v2983_v0  ;;  %v2762_v52 = vsub.f32 %v2698_v40, %v2730_v8  ;;  %v2491_v14 = vmul.f32 %v9509_v17, %v9509_v17  ;;  %v2571_v9 = vpop.xlane.xlu0 %2570  ;;  %vm2994_vm15 = vweird.f32 %v9378_v57 }
 0x2af   : > { %v2311_v16 = vadd.f32 %v2310_v61, %v9494_v22  ;;  %v2638_v50 = vadd.f32 %v2637_v45, %v2490_v30  ;;  %v9533_v31 = vmul.f32 %v9127_v21, %v2244_v53  ;;  %v12846_v11 = vsub.f32 %v8726_v33, %v9229_v20 }
 0x2b0   : > { %v2999_v0 = vmul.f32 %v9517_v54, %v9447_v29  ;;  %v9543_v40 = vadd.f32 %v2002_v47, %v8650_v2  ;;  %v9548_v53 = vmul.f32 0.5, %v2990_v51  ;;  %v9551_v30 = vadd.f32 %v1913_v5, %v8644_v6 }
 0x2b1   : > { %v3276_v35 = vmul.f32 %v2977_v4, %v12846_v11  ;;  %v2312_v8 = vadd.f32 %v2311_v16, %v9509_v17  ;;  %v2639_v33 = vadd.f32 %v2638_v50, %v2491_v14  ;;  %v9553_v45 = vadd.f32 1e-05, %v2762_v52 }
 0x2b2   : > { %12847 = vst [vmem:[#allocation72_spill] sm:$0xff] %v9543_v40  ;;  %v2731_v11 = vmul.f32 %v9533_v31, %v9533_v31  ;;  %v2699_v47 = vmul.f32 %v2571_v9, %v9127_v21  ;;  %v12849_v16 = vsub.f32 %v8756_v19, %v9265_v25  ;;  %v12850_v5 = vsub.f32 %v8732_v60, %v9229_v20 }
 0x2b3   : > { %12848 = vst [vmem:[#allocation73_spill] sm:$0xff] %v9551_v30  ;;  %2313 = vadd.xlane.f32.xlu2 %v2312_v8  ;;  %2640 = vadd.xlane.f32.xlu1 %v2639_v33  ;;  %v3414_v51 = vmul.f32 %v9280_v28, %v3276_v35  ;;  %v12851_v52 = vsub.f32 %v8762_v10, %v9265_v25  ;;  %7643 = vrsqrt.f32 %v9553_v45  ;;  %vm2995_vm0 = vweird.f32 %v9464_v13 }
 0x2b4   : > { %v3280_v18 = vmul.f32 %v2987_v26, %v12849_v16  ;;  %v3277_v50 = vmul.f32 %v2977_v4, %v12850_v5  ;;  %v12852_v8 = vsub.f32 %v8735_v62, %v9229_v20  ;;  %v3000_v61 = vmul.f32 %v9517_v54, %v2999_v0  ;;  %v2180_v16 = vpop.f32.mrf.mxu0  ;;  %vm2996_vm1 = vmor %vm2994_vm15, %vm2995_vm0 }
 0x2b5   : > { %v3281_v14 = vmul.f32 %v2987_v26, %v12851_v52  ;;  %v2315_v19 = vadd.f32 %v9543_v40, %v9551_v30  ;;  %v3282_v35 = vmul.f32 %v2987_v26, %v2802_v1  ;;  %v12853_v25 = vsub.f32 %v8740_v36, %v9229_v20 }
 0x2b6   : > { %v3278_v9 = vmul.f32 %v2977_v4, %v12852_v8  ;;  %v3418_v33 = vmul.f32 %v9280_v28, %v3280_v18  ;;  %v3415_v60 = vmul.f32 %v9335_v38, %v3277_v50  ;;  %v3552_v52 = vadd.f32 %v9352_v24, %v3414_v51 }
 0x2b7   : > { %v3419_v5 = vmul.f32 %v9335_v38, %v3281_v14  ;;  %v3279_v62 = vmul.f32 %v2977_v4, %v12853_v25  ;;  %v3420_v8 = vmul.f32 %v9355_v55, %v3282_v35  ;;  %v3283_v17 = vmul.f32 %v2987_v26, %v2803_v48 }
 0x2b8   : > { %v3416_v10 = vmul.f32 %v9355_v55, %v3278_v9  ;;  %v3556_v0 = vadd.f32 %v9352_v24, %v3418_v33  ;;  %v2763_v1 = vsub.f32 %v2699_v47, %v2731_v11  ;;  %v3553_v18 = vadd.f32 %v9359_v59, %v3415_v60  ;;  %v2004_v33 = vpop.f32.mrf.mxu2 }
 0x2b9   : > { %v3557_v50 = vadd.f32 %v9359_v59, %v3419_v5  ;;  %v9588_v14 = vadd.f32 %v2180_v16, %v8659_v15  ;;  %v2493_v36 = vmul.f32 %v9543_v40, %v9543_v40  ;;  %v9593_v20 = vadd.f32 %v2091_v23, %v8652_v34  ;;  %v1915_v5 = vpop.f32.mrf.mxu1  ;;  %v12866_v16 = vld [vmem:[#allocation7_spill] sm:$0xff] }
 0x2ba   : > { %v9595_v4 = vpack.c.bf16 %v3556_v0, %v3552_v52  ;;  %v3554_v26 = vadd.f32 %v9361_v32, %v3416_v10  ;;  %v3558_v11 = vadd.f32 %v9361_v32, %v3420_v8  ;;  %v3417_v47 = vmul.f32 %v9373_v46, %v3279_v62  ;;  %v9621_v52 = vpop.eup %7643 }
 0x2bb   : > { %12854 = vst [vmem:[#allocation74_spill] sm:$0xff] %v9588_v14  ;;  %v9598_v48 = vpack.c.bf16 %v3557_v50, %v3553_v18  ;;  %v2992_v51 = vsub.f32 1.5, %v9548_v53  ;;  %v3001_v9 = vmul.f32 0.5, %v3000_v61  ;;  %v3421_v23 = vmul.f32 %v9373_v46, %v3283_v17  ;;  %v2249_v61 = vpop.xlane.xlu1 %2248 }
 0x2bc   : > { %12855 = vst [vmem:[#allocation75_spill] sm:$0xff] %v9593_v20  ;;  %4527 = vmatmul.bf16.gmra.mxu1 %v9595_v4  ;;  %v2316_v35 = vadd.f32 %v2315_v19, %v9593_v20  ;;  %v2492_v60 = vmul.f32 %v9551_v30, %v9551_v30  ;;  %v9611_v10 = vadd.f32 1e-05, %v2763_v1  ;;  %v9614_v53 = vpack.c.bf16 %v3558_v11, %v3554_v26  ;;  %v2093_v1 = vpop.f32.mrf.mxu3 }
 0x2bd   : > { %12856 = vst [vmem:[#allocation76_spill] sm:$0xff] %v9595_v4  ;;  %4616 = vmatmul.bf16.gmra.mxu2 %v9598_v48  ;;  %v3555_v25 = vadd.f32 %v9375_v41, %v3417_v47  ;;  %v3559_v19 = vadd.f32 %v9375_v41, %v3421_v23  ;;  %v2494_v0 = vmul.f32 %v9593_v20, %v9593_v20  ;;  %v3002_v26 = vsub.f32 1.5, %v3001_v9  ;;  %v2576_v23 = vpop.xlane.xlu0 %2575 }
 0x2be   : > { %12857 = vst [vmem:[#allocation77_spill] sm:$0xff] %v9598_v48  ;;  %v2317_v62 = vadd.f32 %v2316_v35, %v9588_v14  ;;  %4705 = vmatmul.bf16.gmra.mxu3 %v9614_v53  ;;  %v9628_v8 = vadd.f32 %v2004_v33, %v8650_v2  ;;  %v2642_v18 = vadd.f32 %v2493_v36, %v2492_v60  ;;  %7645 = vrsqrt.f32 %v9611_v10  ;;  %v2182_v60 = vpop.f32.mrf.mxu0 }
 0x2bf   : > { %12858 = vst [vmem:[#allocation78_spill] sm:$0xff] %v9614_v53  ;;  %v2993_v50 = vmul.f32 %v9464_v13, %v2992_v51  ;;  %v9631_v11 = vpack.c.bf16 %v3559_v19, %v3555_v25  ;;  %v9634_v47 = vmul.f32 %v9127_v21, %v2249_v61  ;;  %v9637_v35 = vadd.f32 %v1915_v5, %v8644_v6 }
 0x2c0   : > { %12859 = vst [vmem:[#allocation79_spill] sm:$0xff] %v9628_v8  ;;  %2318 = vadd.xlane.f32.xlu2 %v2317_v62  ;;  %v2495_v33 = vmul.f32 %v9588_v14, %v9588_v14  ;;  %v2643_v17 = vadd.f32 %v2642_v18, %v2494_v0  ;;  %v2810_v36 = vsub.f32 %v8823_v49, %v9364_v42  ;;  %vm3004_vm2 = vweird.f32 %v9447_v29  ;;  %v12869_v14 = vld [vmem:[#allocation9_spill] sm:$0xff] }
 0x2c1   : > { %12860 = vst [vmem:[#allocation80_spill] sm:$0xff] %v9631_v11  ;;  %v3009_v9 = vmul.f32 %v9621_v52, %v9553_v45  ;;  %4794 = vmatmul.bf16.gmra.mxu0 %v9631_v11  ;;  %v9650_v5 = vadd.f32 %v2093_v1, %v8652_v34  ;;  %v2497_v61 = vmul.f32 %v9628_v8, %v9628_v8  ;;  %vm3005_vm3 = vweird.f32 %v9517_v54  ;;  %v12863_v1 = vld [vmem:[#allocation5_spill] sm:$0xff]  ;;  %v1918_v48 = vpop.f32.mrf.mxu1 }
 0x2c2   : > { %12861 = vst [vmem:[#allocation81_spill] sm:$0xff] %v9637_v35  ;;  %v2644_v25 = vadd.f32 %v2643_v17, %v2495_v33  ;;  %v2732_v19 = vmul.f32 %v9634_v47, %v9634_v47  ;;  %v2700_v49 = vmul.f32 %v2576_v23, %v9127_v21  ;;  %v3003_v62 = vmul.f32 %v9517_v54, %v3002_v26  ;;  %v2254_v26 = vpop.xlane.xlu2 %2253  ;;  %v12865_v33 = vld [vmem:[#allocation6_spill] sm:$0xff]  ;;  %vm3006_vm4 = vmor %vm3004_vm2, %vm3005_vm3 }
 0x2c3   : > { %12862 = vst [vmem:[#allocation82_spill] sm:$0xff] %v9650_v5  ;;  %v2320_v0 = vadd.f32 %v9628_v8, %v9637_v35  ;;  %v2997_v17 = vsel %vm2996_vm1, %v9464_v13, %v2993_v50  ;;  %v2496_v23 = vmul.f32 %v9637_v35, %v9637_v35  ;;  %v9672_v57 = vadd.f32 %v2182_v60, %v8659_v15  ;;  %v2581_v50 = vpop.xlane.xlu1 %2580  ;;  %v12867_v60 = vld [vmem:[#allocation8_spill] sm:$0xff] }
 0x2c4   : > { %2645 = vadd.xlane.f32.xlu1 %v2644_v25  ;;  %v3010_v53 = vmul.f32 %v9621_v52, %v3009_v9  ;;  %v9680_v18 = vpop.eup %7645  ;;  %v2764_v4 = vsub.f32 %v2700_v49, %v2732_v19  ;;  %v2498_v51 = vmul.f32 %v9650_v5, %v9650_v5  ;;  %v3007_v11 = vsel %vm3006_vm4, %v9517_v54, %v3003_v62  ;;  %v12870_v54 = vld [vmem:[#allocation10_spill] sm:$0xff] }
 0x2c5   : > { %12864 = vst [vmem:[#allocation5_spill] sm:$0xff] %v9672_v57  ;;  %v2321_v13 = vadd.f32 %v2320_v0, %v9650_v5  ;;  %v2647_v8 = vadd.f32 %v2497_v61, %v2496_v23  ;;  %v9691_v0 = vmul.f32 %v9127_v21, %v2254_v26  ;;  %v12868_v29 = vsub.f32 %v8784_v39, %v9313_v27 }
 0x2c6   : > { %v2499_v19 = vmul.f32 %v9672_v57, %v9672_v57  ;;  %v2701_v61 = vmul.f32 %v2581_v50, %v9127_v21  ;;  %v9701_v23 = vmul.f32 0.5, %v3010_v53  ;;  %v3019_v26 = vmul.f32 %v9680_v18, %v9611_v10  ;;  %v2185_v5 = vpop.f32.mrf.mxu0 }
 0x2c7   : > { %v2322_v9 = vadd.f32 %v2321_v13, %v9672_v57  ;;  %v3284_v35 = vmul.f32 %v2997_v17, %v12868_v29  ;;  %v2648_v49 = vadd.f32 %v2647_v8, %v2498_v51  ;;  %v9708_v39 = vadd.f32 %v1918_v48, %v8644_v6  ;;  %v2007_v13 = vpop.f32.mrf.mxu2 }
 0x2c8   : > { %v9710_v29 = vadd.f32 1e-05, %v2764_v4  ;;  %v2733_v8 = vmul.f32 %v9691_v0, %v9691_v0  ;;  %v12872_v53 = vsub.f32 %v8814_v7, %v9364_v42  ;;  %v12873_v62 = vsub.f32 %v8790_v37, %v9313_v27 }
 0x2c9   : > { %12871 = vst [vmem:[#allocation6_spill] sm:$0xff] %v9708_v39  ;;  %2323 = vadd.xlane.f32.xlu0 %v2322_v9  ;;  %v2649_v25 = vadd.f32 %v2648_v49, %v2499_v19  ;;  %v3422_v50 = vmul.f32 %v9280_v28, %v3284_v35  ;;  %v12874_v48 = vsub.f32 %v8820_v12, %v9364_v42  ;;  %vm3014_vm5 = vweird.f32 %v9553_v45 }
 0x2ca   : > { %v3288_v51 = vmul.f32 %v3007_v11, %v12872_v53  ;;  %v3285_v57 = vmul.f32 %v2997_v17, %v12873_v62  ;;  %v12875_v4 = vsub.f32 %v8793_v63, %v9313_v27  ;;  %v9728_v49 = vadd.f32 %v2007_v13, %v8650_v2 }
 0x2cb   : > { %v3289_v9 = vmul.f32 %v3007_v11, %v12874_v48  ;;  %2650 = vadd.xlane.f32.xlu2 %v2649_v25  ;;  %v2765_v7 = vsub.f32 %v2701_v61, %v2733_v8  ;;  %v3290_v35 = vmul.f32 %v3007_v11, %v2810_v36  ;;  %v12877_v48 = vsub.f32 %v8798_v58, %v9313_v27  ;;  %v7487_v27 = vld [vmem:[%s12535_s7 + $0x1c4] sm:$0xf] }
 0x2cc   : > { %v3286_v19 = vmul.f32 %v2997_v17, %v12875_v4  ;;  %12876 = vst [vmem:[#allocation7_spill] sm:$0xff] %v9728_v49  ;;  %v3426_v53 = vmul.f32 %v9280_v28, %v3288_v51  ;;  %v3423_v37 = vmul.f32 %v9335_v38, %v3285_v57  ;;  %v2096_v4 = vpop.f32.mrf.mxu3  ;;  %v3560_v13 = vadd.f32 %v9352_v24, %v3422_v50 }
 0x2cd   : > { %v3427_v62 = vmul.f32 %v9335_v38, %v3289_v9  ;;  %v3287_v63 = vmul.f32 %v2997_v17, %v12877_v48  ;;  %v3428_v61 = vmul.f32 %v9355_v55, %v3290_v35  ;;  %v12878_v36 = vsub.f32 %v8828_v43, %v9364_v42  ;;  %v6992_v17 = vld [vmem:[%s12535_s7 + $0x1d0] sm:$0xf0] }
 0x2ce   : > { %v3424_v12 = vmul.f32 %v9355_v55, %v3286_v19  ;;  %v3564_v25 = vadd.f32 %v9352_v24, %v3426_v53  ;;  %v3020_v57 = vmul.f32 %v9680_v18, %v3019_v26  ;;  %7647 = vrsqrt.f32 %v9710_v29  ;;  %v7519_v26 = vld [vmem:[%s12535_s7 + $0x2c4] sm:$0xf]  ;;  %v7120_v9 = vld [vmem:[%s12535_s7 + $0x2d0] sm:$0xf0] }
 0x2cf   : > { %v3291_v8 = vmul.f32 %v3007_v11, %v12878_v36  ;;  %v3561_v51 = vadd.f32 %v9359_v59, %v3423_v37  ;;  %v3565_v58 = vadd.f32 %v9359_v59, %v3427_v62  ;;  %v9754_v50 = vadd.f32 %v2185_v5, %v8659_v15 }
 0x2d0   : > { %v2325_v43 = vadd.f32 %v9728_v49, %v9708_v39  ;;  %v9758_v42 = vadd.f32 1e-05, %v2765_v7  ;;  %v9760_v11 = vpack.c.bf16 %v3564_v25, %v3560_v13  ;;  %v3562_v5 = vadd.f32 %v9361_v32, %v3424_v12  ;;  %v7455_v13 = vld [vmem:[%s12535_s7 + $0xc4] sm:$0xf]  ;;  %v6864_v12 = vld [vmem:[%s12535_s7 + $0xd0] sm:$0xf0] }
 0x2d1   : > { %12879 = vst [vmem:[#allocation8_spill] sm:$0xff] %v9754_v50  ;;  %v9769_v19 = vpack.c.bf16 %v3565_v58, %v3561_v51  ;;  %v3566_v53 = vadd.f32 %v9361_v32, %v3428_v61  ;;  %v3425_v7 = vmul.f32 %v9373_v46, %v3287_v63  ;;  %v2501_v35 = vmul.f32 %v9728_v49, %v9728_v49 }
 0x2d2   : > { %12880 = vst [vmem:[#allocation9_spill] sm:$0xff] %v9760_v11  ;;  %v9777_v37 = vadd.f32 %v2096_v4, %v8652_v34  ;;  %4532 = vmatmul.bf16.gmra.mxu1 %v9760_v11  ;;  %v3429_v62 = vmul.f32 %v9373_v46, %v3291_v8  ;;  %v6995_v48 = vor.u32 %v7487_v27, %v6992_v17  ;;  %v3012_v63 = vsub.f32 1.5, %v9701_v23  ;;  %v1920_v8 = vpop.f32.mrf.mxu1  ;;  %v2009_v27 = vpop.f32.mrf.mxu2  ;;  %v12884_v23 = vld [vmem:[#allocation11_spill] sm:$0xff] }
 0x2d3   : > { %12881 = vst [vmem:[#allocation10_spill] sm:$0xff] %v9769_v19  ;;  %v3021_v25 = vmul.f32 0.5, %v3020_v57  ;;  %4621 = vmatmul.bf16.gmra.mxu2 %v9769_v19  ;;  %v9789_v4 = vpack.c.bf16 %v3566_v53, %v3562_v5  ;;  %v7123_v61 = vor.u32 %v7519_v26, %v7120_v9  ;;  %v2500_v36 = vmul.f32 %v9708_v39, %v9708_v39  ;;  %v12885_v5 = vld [vmem:[#allocation12_spill] sm:$0xff]  ;;  %v2259_v53 = vpop.xlane.xlu2 %2258 }
 0x2d4   : > { %12882 = vst [vmem:[#allocation83_spill] sm:$0xff] %v9777_v37  ;;  %v3563_v51 = vadd.f32 %v9375_v41, %v3425_v7  ;;  %v3567_v58 = vadd.f32 %v9375_v41, %v3429_v62  ;;  %4960 = vmatpush.bf16.msra.mxu2 %v6995_v48  ;;  %v2326_v17 = vadd.f32 %v2325_v43, %v9777_v37  ;;  %v9796_v11 = vpop.eup %7647  ;;  %7649 = vrsqrt.f32 %v9758_v42 }
 0x2d5   : > { %12883 = vst [vmem:[#allocation84_spill] sm:$0xff] %v9789_v4  ;;  %4710 = vmatmul.bf16.gmra.mxu3 %v9789_v4  ;;  %v6867_v9 = vor.u32 %v7455_v13, %v6864_v12  ;;  %v2502_v7 = vmul.f32 %v9777_v37, %v9777_v37  ;;  %v2652_v48 = vadd.f32 %v2501_v35, %v2500_v36  ;;  %vm3015_vm6 = vweird.f32 %v9621_v52  ;;  %v2098_v12 = vpop.f32.mrf.mxu3  ;;  %v12889_v36 = vld [vmem:[#allocation14_spill] sm:$0xff] }
 0x2d6   : > { %v9806_v62 = vpack.c.bf16 %v3567_v58, %v3563_v51  ;;  %5049 = vmatpush.bf16.msra.mxu3 %v7123_v61  ;;  %v2327_v43 = vadd.f32 %v2326_v17, %v9754_v50  ;;  %v3013_v57 = vmul.f32 %v9621_v52, %v3012_v63  ;;  %v3022_v26 = vsub.f32 1.5, %v3021_v25  ;;  %v12888_v25 = vld [vmem:[#allocation13_spill] sm:$0xff]  ;;  %vm3016_vm9 = vmor %vm3014_vm5, %vm3015_vm6 }
 0x2d7   : > { %v9812_v19 = vadd.f32 %v2009_v27, %v8650_v2  ;;  %4871 = vmatpush.bf16.msra.mxu1 %v6867_v9  ;;  %vm3024_vm7 = vweird.f32 %v9611_v10  ;;  %v3029_v13 = vmul.f32 %v9796_v11, %v9710_v29  ;;  %v2503_v35 = vmul.f32 %v9754_v50, %v9754_v50  ;;  %v2187_v27 = vpop.f32.mrf.mxu0  ;;  %v7551_v17 = vld [vmem:[%s12535_s7 + $0x3c4] sm:$0xf]  ;;  %v7248_v9 = vld [vmem:[%s12535_s7 + $0x3d0] sm:$0xf0] }
 0x2d8   : > { %12886 = vst [vmem:[#allocation11_spill] sm:$0xff] %v9806_v62  ;;  %4799 = vmatmul.bf16.gmra.mxu0 %v9806_v62  ;;  %2328 = vadd.xlane.f32.xlu0 %v2327_v43  ;;  %v2653_v63 = vadd.f32 %v2652_v48, %v2502_v7  ;;  %vm3025_vm8 = vweird.f32 %v9680_v18  ;;  %v9826_v58 = vadd.f32 %v1920_v8, %v8644_v6  ;;  %v12891_v7 = vld [vmem:[#allocation15_spill] sm:$0xff]  ;;  %v12892_v8 = vld [vmem:[#allocation16_spill] sm:$0xff]  ;;  %v2586_v43 = vpop.xlane.xlu1 %2585  ;;  %vm3035_vm11 = vweird.f32 %v9796_v11 }
 0x2d9   : > { %12887 = vst [vmem:[#allocation12_spill] sm:$0xff] %v9812_v19  ;;  %v9843_v61 = vmul.f32 %v9127_v21, %v2259_v53  ;;  %v3017_v4 = vsel %vm3016_vm9, %v9621_v52, %v3013_v57  ;;  %v3023_v50 = vmul.f32 %v9680_v18, %v3022_v26  ;;  %v2505_v45 = vmul.f32 %v9812_v19, %v9812_v19  ;;  %v2264_v52 = vpop.xlane.xlu0 %2263  ;;  %v12894_v26 = vld [vmem:[#allocation17_spill] sm:$0xff]  ;;  %vm3026_vm10 = vmor %vm3024_vm7, %vm3025_vm8 }
 0x2da   : > { %12890 = vst [vmem:[#allocation13_spill] sm:$0xff] %v9826_v58  ;;  %v2654_v51 = vadd.f32 %v2653_v63, %v2503_v35  ;;  %v9845_v62 = vpop.eup %7649  ;;  %v9852_v37 = vadd.f32 %v2098_v12, %v8652_v34  ;;  %v3030_v49 = vmul.f32 %v9796_v11, %v3029_v13  ;;  %v9856_v35 = vadd.f32 %v2187_v27, %v8659_v15  ;;  %v12895_v12 = vld [vmem:[#allocation18_spill] sm:$0xff]  ;;  %v12896_v13 = vld [vmem:[#allocation19_spill] sm:$0xff] }
 0x2db   : > { %v7251_v53 = vor.u32 %v7551_v17, %v7248_v9  ;;  %v2330_v63 = vadd.f32 %v9812_v19, %v9826_v58  ;;  %v2504_v57 = vmul.f32 %v9826_v58, %v9826_v58  ;;  %v2591_v27 = vpop.xlane.xlu2 %2590  ;;  %v1923_v17 = vpop.f32.mrf.mxu1  ;;  %v2734_v9 = vmul.f32 %v9843_v61, %v9843_v61 }
 0x2dc   : > { %12893 = vst [vmem:[#allocation14_spill] sm:$0xff] %v9856_v35  ;;  %2655 = vadd.xlane.f32.xlu2 %v2654_v51  ;;  %v3039_v51 = vmul.f32 %v9845_v62, %v9758_v42  ;;  %v2702_v48 = vmul.f32 %v2586_v43, %v9127_v21  ;;  %v2012_v19 = vpop.f32.mrf.mxu2  ;;  %v3027_v20 = vsel %vm3026_vm10, %v9680_v18, %v3023_v50  ;;  %v3031_v30 = vmul.f32 0.5, %v3030_v49 }
 0x2dd   : > { %5138 = vmatpush.bf16.msra.mxu0 %v7251_v53  ;;  %v2331_v39 = vadd.f32 %v2330_v63, %v9852_v37  ;;  %v2506_v58 = vmul.f32 %v9852_v37, %v9852_v37  ;;  %v2657_v10 = vadd.f32 %v2505_v45, %v2504_v57  ;;  %v9882_v40 = vmul.f32 %v9127_v21, %v2264_v52 }
 0x2de   : > { %v2703_v56 = vmul.f32 %v2591_v27, %v9127_v21  ;;  %v12897_v43 = vsub.f32 %v12863_v1, %v9476_v3  ;;  %v9890_v63 = vadd.f32 %v1923_v17, %v8644_v6  ;;  %v9893_v18 = vadd.f32 %v2012_v19, %v8650_v2 }
 0x2df   : > { %v2332_v22 = vadd.f32 %v2331_v39, %v9856_v35  ;;  %v2507_v50 = vmul.f32 %v9856_v35, %v9856_v35  ;;  %v2658_v45 = vadd.f32 %v2657_v10, %v2506_v58  ;;  %v3040_v49 = vmul.f32 %v9845_v62, %v3039_v51  ;;  %v2190_v27 = vpop.f32.mrf.mxu0 }
 0x2e0   : > { %v3292_v53 = vmul.f32 %v3017_v4, %v12897_v43  ;;  %12898 = vst [vmem:[#allocation15_spill] sm:$0xff] %v9890_v63  ;;  %v2766_v52 = vsub.f32 %v2702_v48, %v2734_v9  ;;  %v2735_v39 = vmul.f32 %v9882_v40, %v9882_v40  ;;  %v12900_v1 = vsub.f32 %v12869_v14, %v9533_v31 }
 0x2e1   : > { %12899 = vst [vmem:[#allocation16_spill] sm:$0xff] %v9893_v18  ;;  %2333 = vadd.xlane.f32.xlu1 %v2332_v22  ;;  %v2659_v17 = vadd.f32 %v2658_v45, %v2507_v50  ;;  %v12901_v43 = vsub.f32 %v12865_v33, %v9476_v3  ;;  %v12902_v58 = vsub.f32 %v12870_v54, %v9533_v31  ;;  %v2101_v50 = vpop.f32.mrf.mxu3  ;;  %vm3034_vm12 = vweird.f32 %v9710_v29 }
 0x2e2   : > { %v3296_v57 = vmul.f32 %v3027_v20, %v12900_v1  ;;  %v3430_v19 = vmul.f32 %v9280_v28, %v3292_v53  ;;  %v2767_v22 = vsub.f32 %v2703_v56, %v2735_v39  ;;  %v12903_v14 = vsub.f32 %v12866_v16, %v9476_v3  ;;  %vm3036_vm14 = vmor %vm3034_vm12, %vm3035_vm11 }
 0x2e3   : > { %v3293_v35 = vmul.f32 %v3017_v4, %v12901_v43  ;;  %v3297_v48 = vmul.f32 %v3027_v20, %v12902_v58  ;;  %v12904_v10 = vsub.f32 %v12884_v23, %v9533_v31  ;;  %v2335_v33 = vadd.f32 %v9893_v18, %v9890_v63  ;;  %2660 = vadd.xlane.f32.xlu0 %v2659_v17 }
 0x2e4   : > { %v3434_v51 = vmul.f32 %v9280_v28, %v3296_v57  ;;  %v3294_v9 = vmul.f32 %v3017_v4, %v12903_v14  ;;  %v3568_v54 = vadd.f32 %v9352_v24, %v3430_v19  ;;  %v12905_v1 = vsub.f32 %v12867_v60, %v9476_v3 }
 0x2e5   : > { %v3298_v53 = vmul.f32 %v3027_v20, %v12904_v10  ;;  %v3431_v45 = vmul.f32 %v9335_v38, %v3293_v35  ;;  %v3435_v56 = vmul.f32 %v9335_v38, %v3297_v48  ;;  %v3032_v43 = vsub.f32 1.5, %v3031_v30 }
 0x2e6   : > { %v3572_v16 = vadd.f32 %v9352_v24, %v3434_v51  ;;  %v3432_v39 = vmul.f32 %v9355_v55, %v3294_v9  ;;  %v3295_v57 = vmul.f32 %v3017_v4, %v12905_v1  ;;  %v9930_v17 = vadd.f32 1e-05, %v2766_v52 }
 0x2e7   : > { %v3436_v23 = vmul.f32 %v9355_v55, %v3298_v53  ;;  %v3569_v19 = vadd.f32 %v9359_v59, %v3431_v45  ;;  %v3573_v35 = vadd.f32 %v9359_v59, %v3435_v56  ;;  %v3041_v58 = vmul.f32 0.5, %v3040_v49  ;;  %v2596_v56 = vpop.xlane.xlu2 %2595 }
 0x2e8   : > { %v9935_v48 = vadd.f32 %v2101_v50, %v8652_v34  ;;  %v9937_v51 = vadd.f32 1e-05, %v2767_v22  ;;  %v9939_v14 = vpack.c.bf16 %v3572_v16, %v3568_v54  ;;  %v3570_v3 = vadd.f32 %v9361_v32, %v3432_v39  ;;  %v1925_v22 = vpop.f32.mrf.mxu1  ;;  %v12912_v16 = vld [vmem:[#allocation20_spill] sm:$0xff]  ;;  %v2274_v39 = vpop.xlane.xlu1 %2273 }
 0x2e9   : > { %v9941_v9 = vpack.c.bf16 %v3573_v35, %v3569_v19  ;;  %v3574_v30 = vadd.f32 %v9361_v32, %v3436_v23  ;;  %v12909_v60 = vsub.f32 %v12885_v5, %v9533_v31  ;;  %v9949_v52 = vadd.f32 %v2190_v27, %v8659_v15  ;;  %v2014_v5 = vpop.f32.mrf.mxu2  ;;  %v2269_v27 = vpop.xlane.xlu0 %2268 }
 0x2ea   : > { %12906 = vst [vmem:[#allocation17_spill] sm:$0xff] %v9935_v48  ;;  %v2509_v49 = vmul.f32 %v9893_v18, %v9893_v18  ;;  %4537 = vmatmul.bf16.gmra.mxu1 %v9939_v14  ;;  %v3433_v10 = vmul.f32 %v9373_v46, %v3295_v57  ;;  %v2336_v53 = vadd.f32 %v2335_v33, %v9935_v48  ;;  %7651 = vrsqrt.f32 %v9930_v17  ;;  %v2192_v23 = vpop.f32.mrf.mxu0 }
 0x2eb   : > { %12907 = vst [vmem:[#allocation18_spill] sm:$0xff] %v9939_v14  ;;  %v3299_v4 = vmul.f32 %v3027_v20, %v12909_v60  ;;  %v2508_v50 = vmul.f32 %v9890_v63, %v9890_v63  ;;  %4626 = vmatmul.bf16.gmra.mxu2 %v9941_v9  ;;  %v9960_v31 = vpack.c.bf16 %v3574_v30, %v3570_v3  ;;  %v3042_v45 = vsub.f32 1.5, %v3041_v58  ;;  %v2103_v60 = vpop.f32.mrf.mxu3 }
 0x2ec   : > { %12908 = vst [vmem:[#allocation19_spill] sm:$0xff] %v9941_v9  ;;  %v3033_v54 = vmul.f32 %v9796_v11, %v3032_v43  ;;  %7653 = vrsqrt.f32 %v9937_v51  ;;  %v2337_v33 = vadd.f32 %v2336_v53, %v9949_v52  ;;  %vm3044_vm13 = vweird.f32 %v9758_v42  ;;  %v12922_v42 = vld [vmem:[#allocation25_spill] sm:$0xff] }
 0x2ed   : > { %12910 = vst [vmem:[#allocation85_spill] sm:$0xff] %v9949_v52  ;;  %v3437_v20 = vmul.f32 %v9373_v46, %v3299_v4  ;;  %4715 = vmatmul.bf16.gmra.mxu3 %v9960_v31  ;;  %v3571_v1 = vadd.f32 %v9375_v41, %v3433_v10  ;;  %v2510_v43 = vmul.f32 %v9935_v48, %v9935_v48  ;;  %vm3045_vm15 = vweird.f32 %v9845_v62 }
 0x2ee   : > { %12911 = vst [vmem:[#allocation86_spill] sm:$0xff] %v9960_v31  ;;  %v9975_v19 = vadd.f32 %v2014_v5, %v8650_v2  ;;  %2338 = vadd.xlane.f32.xlu1 %v2337_v33  ;;  %v2662_v35 = vadd.f32 %v2509_v49, %v2508_v50  ;;  %v9978_v58 = vmul.f32 %v9127_v21, %v2269_v27  ;;  %v12917_v5 = vld [vmem:[#allocation22_spill] sm:$0xff]  ;;  %v12918_v33 = vld [vmem:[#allocation23_spill] sm:$0xff]  ;;  %vm3046_vm0 = vmor %vm3044_vm13, %vm3045_vm15  ;;  %vm3054_vm1 = vweird.f32 %v9930_v17 }
 0x2ef   : > { %v3575_v57 = vadd.f32 %v9375_v41, %v3437_v20  ;;  %v9986_v3 = vadd.f32 %v1925_v22, %v8644_v6  ;;  %v2704_v4 = vmul.f32 %v2596_v56, %v9127_v21  ;;  %v9992_v49 = vsel %vm3036_vm14, %v9796_v11, %v3033_v54  ;;  %v12916_v20 = vld [vmem:[#allocation21_spill] sm:$0xff] }
 0x2f0   : > { %12913 = vst [vmem:[#allocation20_spill] sm:$0xff] %v9975_v19  ;;  %v3043_v10 = vmul.f32 %v9845_v62, %v3042_v45  ;;  %v2511_v53 = vmul.f32 %v9949_v52, %v9949_v52  ;;  %v2663_v29 = vadd.f32 %v2662_v35, %v2510_v43  ;;  %v9997_v50 = vpop.eup %7651  ;;  %v2736_v11 = vmul.f32 %v9978_v58, %v9978_v58  ;;  %v12919_v45 = vld [vmem:[#allocation24_spill] sm:$0xff]  ;;  %v1928_v14 = vpop.f32.mrf.mxu1 }
 0x2f1   : > { %12914 = vst [vmem:[#allocation87_spill] sm:$0xff] %v9986_v3  ;;  %v9988_v30 = vpack.c.bf16 %v3575_v57, %v3571_v1  ;;  %v2513_v57 = vmul.f32 %v9975_v19, %v9975_v19  ;;  %v10015_v43 = vadd.f32 %v2103_v60, %v8652_v34  ;;  %v2512_v56 = vmul.f32 %v9986_v3, %v9986_v3  ;;  %v12926_v52 = vld [vmem:[#allocation28_spill] sm:$0xff] }
 0x2f2   : > { %v10008_v54 = vpop.eup %7653  ;;  %v2664_v35 = vadd.f32 %v2663_v29, %v2511_v53  ;;  %v10024_v27 = vadd.f32 %v2192_v23, %v8659_v15  ;;  %v2768_v22 = vsub.f32 %v2704_v4, %v2736_v11  ;;  %v2340_v1 = vadd.f32 %v9975_v19, %v9986_v3  ;;  %v2601_v23 = vpop.xlane.xlu0 %2600  ;;  %v12924_v4 = vld [vmem:[#allocation27_spill] sm:$0xff] }
 0x2f3   : > { %12915 = vst [vmem:[#allocation88_spill] sm:$0xff] %v9988_v30  ;;  %4804 = vmatmul.bf16.gmra.mxu0 %v9988_v30  ;;  %v10029_v60 = vsel %vm3046_vm0, %v9845_v62, %v3043_v10  ;;  %v3049_v53 = vmul.f32 %v9997_v50, %v9930_v17  ;;  %v12923_v30 = vld [vmem:[#allocation26_spill] sm:$0xff]  ;;  %v3059_v9 = vmul.f32 %v10008_v54, %v9937_v51  ;;  %v2017_v19 = vpop.f32.mrf.mxu2  ;;  %vm3055_vm2 = vweird.f32 %v9997_v50 }
 0x2f4   : > { %12920 = vst [vmem:[#allocation21_spill] sm:$0xff] %v10015_v43  ;;  %2665 = vadd.xlane.f32.xlu0 %v2664_v35  ;;  %v10041_v62 = vadd.f32 1e-05, %v2768_v22  ;;  %v2341_v10 = vadd.f32 %v2340_v1, %v10015_v43  ;;  %v2514_v29 = vmul.f32 %v10015_v43, %v10015_v43  ;;  %v2667_v3 = vadd.f32 %v2513_v57, %v2512_v56  ;;  %v10055_v22 = vpop.f32.mrf.mxu0  ;;  %vm3056_vm4 = vmor %vm3054_vm1, %vm3055_vm2  ;;  %v12942_v17 = vld [vmem:[#allocation30_spill] sm:$0xff] }
 0x2f5   : > { %12921 = vst [vmem:[#allocation22_spill] sm:$0xff] %v10024_v27  ;;  %v10047_v31 = vmul.f32 %v9127_v21, %v2274_v39  ;;  %v12925_v35 = vsub.f32 %v12888_v25, %v9634_v47  ;;  %v2705_v43 = vmul.f32 %v2601_v23, %v9127_v21  ;;  %v3050_v56 = vmul.f32 %v9997_v50, %v3049_v53 }
 0x2f6   : > { %7655 = vrsqrt.f32 %v10041_v62  ;;  %v2342_v1 = vadd.f32 %v2341_v10, %v10024_v27  ;;  %v10062_v39 = vadd.f32 %v1928_v14, %v8644_v6  ;;  %v2515_v25 = vmul.f32 %v10024_v27, %v10024_v27  ;;  %v2106_v14 = vpop.f32.mrf.mxu3 }
 0x2f7   : > { %v3300_v11 = vmul.f32 %v9992_v49, %v12925_v35  ;;  %v2668_v57 = vadd.f32 %v2667_v3, %v2514_v29  ;;  %v3060_v35 = vmul.f32 %v10008_v54, %v3059_v9  ;;  %v10068_v48 = vadd.f32 %v2017_v19, %v8650_v2 }
 0x2f8   : > { %2343 = vadd.xlane.f32.xlu2 %v2342_v1  ;;  %v2737_v10 = vmul.f32 %v10047_v31, %v10047_v31  ;;  %v12927_v23 = vsub.f32 %v12894_v26, %v9691_v0  ;;  %v12928_v3 = vsub.f32 %v12889_v36, %v9634_v47  ;;  %v12929_v19 = vsub.f32 %v12895_v12, %v9691_v0 }
 0x2f9   : > { %v2669_v18 = vadd.f32 %v2668_v57, %v2515_v25  ;;  %v3438_v63 = vmul.f32 %v9280_v28, %v3300_v11  ;;  %v12930_v26 = vsub.f32 %v12891_v7, %v9634_v47  ;;  %v12931_v11 = vsub.f32 %v12896_v13, %v9691_v0 }
 0x2fa   : > { %v3304_v53 = vmul.f32 %v10029_v60, %v12927_v23  ;;  %v3301_v9 = vmul.f32 %v9992_v49, %v12928_v3  ;;  %v3305_v29 = vmul.f32 %v10029_v60, %v12929_v19  ;;  %v2769_v1 = vsub.f32 %v2705_v43, %v2737_v10 }
 0x2fb   : > { %v3302_v25 = vmul.f32 %v9992_v49, %v12930_v26  ;;  %v3306_v36 = vmul.f32 %v10029_v60, %v12931_v11  ;;  %2670 = vadd.xlane.f32.xlu1 %v2669_v18  ;;  %v3576_v57 = vadd.f32 %v9352_v24, %v3438_v63  ;;  %v12932_v43 = vsub.f32 %v12892_v8, %v9634_v47  ;;  %v7483_v8 = vld [vmem:[%s12535_s7 + $0x1a4] sm:$0xf] }
 0x2fc   : > { %v3442_v27 = vmul.f32 %v9280_v28, %v3304_v53  ;;  %v3439_v12 = vmul.f32 %v9335_v38, %v3301_v9  ;;  %v3443_v23 = vmul.f32 %v9335_v38, %v3305_v29  ;;  %v10101_v7 = vpop.eup %7655  ;;  %v10103_v53 = vadd.f32 1e-05, %v2769_v1  ;;  %v7515_v26 = vld [vmem:[%s12535_s7 + $0x2a4] sm:$0xf] }
 0x2fd   : > { %v3303_v10 = vmul.f32 %v9992_v49, %v12932_v43  ;;  %v3440_v3 = vmul.f32 %v9355_v55, %v3302_v25  ;;  %v3444_v18 = vmul.f32 %v9355_v55, %v3306_v36  ;;  %v3051_v63 = vmul.f32 0.5, %v3050_v56  ;;  %v6976_v49 = vld [vmem:[%s12535_s7 + $0x1b0] sm:$0xf0]  ;;  %v1930_v56 = vpop.f32.mrf.mxu1 }
 0x2fe   : > { %v3580_v13 = vadd.f32 %v9352_v24, %v3442_v27  ;;  %v2345_v9 = vadd.f32 %v10068_v48, %v10062_v39  ;;  %v3577_v19 = vadd.f32 %v9359_v59, %v3439_v12  ;;  %v3581_v47 = vadd.f32 %v9359_v59, %v3443_v23  ;;  %v7104_v25 = vld [vmem:[%s12535_s7 + $0x2b0] sm:$0xf0] }
 0x2ff   : > { %v3061_v27 = vmul.f32 0.5, %v3060_v35  ;;  %v3069_v29 = vmul.f32 %v10101_v7, %v10041_v62  ;;  %7657 = vrsqrt.f32 %v10103_v53  ;;  %v3578_v35 = vadd.f32 %v9361_v32, %v3440_v3 }
 0x300   : > { %v10121_v1 = vpack.c.bf16 %v3580_v13, %v3576_v57  ;;  %v10129_v11 = vpack.c.bf16 %v3581_v47, %v3577_v19  ;;  %v3582_v36 = vadd.f32 %v9361_v32, %v3444_v18  ;;  %v12935_v12 = vsub.f32 %v12912_v16, %v9691_v0  ;;  %v2197_v13 = vpop.f32.mrf.mxu0  ;;  %v7451_v0 = vld [vmem:[%s12535_s7 + $0xa4] sm:$0xf]  ;;  %v6848_v16 = vld [vmem:[%s12535_s7 + $0xb0] sm:$0xf0]  ;;  %v2019_v47 = vpop.f32.mrf.mxu2 }
 0x301   : > { %v2517_v23 = vmul.f32 %v10068_v48, %v10068_v48  ;;  %v10141_v43 = vadd.f32 %v2106_v14, %v8652_v34  ;;  %v3441_v3 = vmul.f32 %v9373_v46, %v3303_v10  ;;  %v6979_v19 = vor.u32 %v7483_v8, %v6976_v49 }
 0x302   : > { %12933 = vst [vmem:[#allocation23_spill] sm:$0xff] %v10121_v1  ;;  %v3307_v57 = vmul.f32 %v10029_v60, %v12935_v12  ;;  %4542 = vmatmul.bf16.gmra.mxu1 %v10121_v1  ;;  %v3052_v60 = vsub.f32 1.5, %v3051_v63  ;;  %4631 = vmatmul.bf16.gmra.mxu2 %v10129_v11  ;;  %v10152_v18 = vpack.c.bf16 %v3582_v36, %v3578_v35  ;;  %v3062_v1 = vsub.f32 1.5, %v3061_v27 }
 0x303   : > { %12934 = vst [vmem:[#allocation24_spill] sm:$0xff] %v10129_v11  ;;  %v7107_v12 = vor.u32 %v7515_v26, %v7104_v25  ;;  %v2516_v10 = vmul.f32 %v10062_v39, %v10062_v39  ;;  %v10159_v8 = vadd.f32 %v10055_v22, %v8659_v15  ;;  %4961 = vmatpush.bf16.msra.mxu2 %v6979_v19  ;;  %v2108_v26 = vpop.f32.mrf.mxu3  ;;  %v2279_v25 = vpop.xlane.xlu1 %2278  ;;  %vm3065_vm3 = vweird.f32 %v10008_v54 }
 0x304   : > { %12936 = vst [vmem:[#allocation25_spill] sm:$0xff] %v10152_v18  ;;  %v3445_v14 = vmul.f32 %v9373_v46, %v3307_v57  ;;  %v2346_v49 = vadd.f32 %v2345_v9, %v10141_v43  ;;  %v3070_v63 = vmul.f32 %v10101_v7, %v3069_v29  ;;  %4720 = vmatmul.bf16.gmra.mxu3 %v10152_v18  ;;  %v2606_v18 = vpop.xlane.xlu0 %2605  ;;  %vm3064_vm5 = vweird.f32 %v9937_v51 }
 0x305   : > { %12937 = vst [vmem:[#allocation26_spill] sm:$0xff] %v10159_v8  ;;  %v3579_v35 = vadd.f32 %v9375_v41, %v3441_v3  ;;  %v6851_v27 = vor.u32 %v7451_v0, %v6848_v16  ;;  %v10166_v57 = vpop.eup %7657  ;;  %v2518_v22 = vmul.f32 %v10141_v43, %v10141_v43  ;;  %v10171_v19 = vadd.f32 %v2019_v47, %v8650_v2  ;;  %v7547_v3 = vld [vmem:[%s12535_s7 + $0x3a4] sm:$0xf]  ;;  %v7232_v0 = vld [vmem:[%s12535_s7 + $0x3b0] sm:$0xf0]  ;;  %vm3066_vm6 = vmor %vm3064_vm5, %vm3065_vm3 }
 0x306   : > { %v3583_v36 = vadd.f32 %v9375_v41, %v3445_v14  ;;  %5050 = vmatpush.bf16.msra.mxu3 %v7107_v12  ;;  %v2347_v9 = vadd.f32 %v2346_v49, %v10159_v8  ;;  %v2672_v29 = vadd.f32 %v2517_v23, %v2516_v10  ;;  %v3053_v16 = vmul.f32 %v9997_v50, %v3052_v60 }
 0x307   : > { %12938 = vst [vmem:[#allocation27_spill] sm:$0xff] %v10171_v19  ;;  %4872 = vmatpush.bf16.msra.mxu1 %v6851_v27  ;;  %v10186_v23 = vadd.f32 %v1930_v56, %v8644_v6  ;;  %v2519_v47 = vmul.f32 %v10159_v8, %v10159_v8  ;;  %v10191_v10 = vmul.f32 %v9127_v21, %v2279_v25  ;;  %v3071_v49 = vmul.f32 0.5, %v3070_v63 }
 0x308   : > { %v10183_v14 = vpack.c.bf16 %v3583_v36, %v3579_v35  ;;  %2348 = vadd.xlane.f32.xlu2 %v2347_v9  ;;  %v2673_v12 = vadd.f32 %v2672_v29, %v2518_v22  ;;  %v3063_v60 = vmul.f32 %v10008_v54, %v3062_v1  ;;  %v2706_v35 = vmul.f32 %v2606_v18, %v9127_v21  ;;  %v1933_v22 = vpop.f32.mrf.mxu1  ;;  %v12941_v1 = vld [vmem:[#allocation29_spill] sm:$0xff]  ;;  %v2022_v18 = vpop.f32.mrf.mxu2 }
 0x309   : > { %12940 = vst [vmem:[#allocation89_spill] sm:$0xff] %v10186_v23  ;;  %v7235_v36 = vor.u32 %v7547_v3, %v7232_v0  ;;  %v3079_v56 = vmul.f32 %v10166_v57, %v10103_v53  ;;  %v2521_v27 = vmul.f32 %v10171_v19, %v10171_v19  ;;  %v10201_v9 = vadd.f32 %v2108_v26, %v8652_v34  ;;  %v2200_v0 = vpop.f32.mrf.mxu0 }
 0x30a   : > { %12939 = vst [vmem:[#allocation28_spill] sm:$0xff] %v10183_v14  ;;  %4809 = vmatmul.bf16.gmra.mxu0 %v10183_v14  ;;  %v2674_v25 = vadd.f32 %v2673_v12, %v2519_v47  ;;  %v10211_v63 = vadd.f32 %v2197_v13, %v8659_v15  ;;  %v2738_v29 = vmul.f32 %v10191_v10, %v10191_v10  ;;  %v2284_v47 = vpop.xlane.xlu2 %2283  ;;  %vm3075_vm7 = vweird.f32 %v10101_v7 }
 0x30b   : > { %5139 = vmatpush.bf16.msra.mxu0 %v7235_v36  ;;  %v3057_v26 = vsel %vm3056_vm4, %v9997_v50, %v3053_v16  ;;  %v2520_v51 = vmul.f32 %v10186_v23, %v10186_v23  ;;  %v2350_v13 = vadd.f32 %v10171_v19, %v10186_v23  ;;  %v3067_v12 = vsel %vm3066_vm6, %v10008_v54, %v3063_v60  ;;  %v2611_v8 = vpop.xlane.xlu1 %2610  ;;  %v2111_v54 = vpop.f32.mrf.mxu3 }
 0x30c   : > { %2675 = vadd.xlane.f32.xlu1 %v2674_v25  ;;  %v3072_v36 = vsub.f32 1.5, %v3071_v49  ;;  %v10226_v50 = vadd.f32 %v1933_v22, %v8644_v6  ;;  %v2770_v16 = vsub.f32 %v2706_v35, %v2738_v29  ;;  %v3080_v14 = vmul.f32 %v10166_v57, %v3079_v56 }
 0x30d   : > { %v2351_v3 = vadd.f32 %v2350_v13, %v10201_v9  ;;  %v2522_v11 = vmul.f32 %v10201_v9, %v10201_v9  ;;  %v2677_v25 = vadd.f32 %v2521_v27, %v2520_v51  ;;  %v10233_v19 = vadd.f32 %v2200_v0, %v8659_v15 }
 0x30e   : > { %12943 = vst [vmem:[#allocation29_spill] sm:$0xff] %v10226_v50  ;;  %v10235_v23 = vadd.f32 1e-05, %v2770_v16  ;;  %v2523_v60 = vmul.f32 %v10211_v63, %v10211_v63  ;;  %v10240_v49 = vmul.f32 %v9127_v21, %v2284_v47  ;;  %v12945_v22 = vsub.f32 %v12916_v20, %v9843_v61 }
 0x30f   : > { %12944 = vst [vmem:[#allocation30_spill] sm:$0xff] %v10233_v19  ;;  %v2352_v35 = vadd.f32 %v2351_v3, %v10211_v63  ;;  %v2678_v56 = vadd.f32 %v2677_v25, %v2522_v11  ;;  %v12946_v29 = vsub.f32 %v12922_v42, %v9882_v40  ;;  %v10250_v0 = vmul.f32 %v10101_v7, %v3072_v36 }
 0x310   : > { %v3308_v27 = vmul.f32 %v3057_v26, %v12945_v22  ;;  %v2524_v13 = vmul.f32 %v10226_v50, %v10226_v50  ;;  %v10255_v47 = vadd.f32 %v2022_v18, %v8650_v2  ;;  %v2707_v3 = vmul.f32 %v2611_v8, %v9127_v21 }
 0x311   : > { %v3312_v51 = vmul.f32 %v3067_v12, %v12946_v29  ;;  %v3081_v11 = vmul.f32 0.5, %v3080_v14  ;;  %7659 = vrsqrt.f32 %v10235_v23  ;;  %v10260_v20 = vadd.f32 %v2111_v54, %v8652_v34  ;;  %2353 = vadd.xlane.f32.xlu0 %v2352_v35 }
 0x312   : > { %12947 = vst [vmem:[#allocation90_spill] sm:$0xff] %v10255_v47  ;;  %v2679_v42 = vadd.f32 %v2678_v56, %v2523_v60  ;;  %v2739_v36 = vmul.f32 %v10240_v49, %v10240_v49  ;;  %v3446_v16 = vmul.f32 %v9280_v28, %v3308_v27  ;;  %v12949_v8 = vsub.f32 %v12917_v5, %v9843_v61 }
 0x313   : > { %12948 = vst [vmem:[#allocation91_spill] sm:$0xff] %v10260_v20  ;;  %v3450_v18 = vmul.f32 %v9280_v28, %v3312_v51  ;;  %v12950_v25 = vsub.f32 %v12923_v30, %v9882_v40  ;;  %v12951_v60 = vsub.f32 %v12918_v33, %v9843_v61  ;;  %v12952_v56 = vsub.f32 %v12924_v4, %v9882_v40 }
 0x314   : > { %v3309_v14 = vmul.f32 %v3057_v26, %v12949_v8  ;;  %2680 = vadd.xlane.f32.xlu2 %v2679_v42  ;;  %v12953_v27 = vsub.f32 %v12919_v45, %v9843_v61  ;;  %vm3074_vm8 = vweird.f32 %v10041_v62  ;;  %v2771_v5 = vsub.f32 %v2707_v3, %v2739_v36 }
 0x315   : > { %v3313_v54 = vmul.f32 %v3067_v12, %v12950_v25  ;;  %v3310_v35 = vmul.f32 %v3057_v26, %v12951_v60  ;;  %v3314_v22 = vmul.f32 %v3067_v12, %v12952_v56  ;;  %v3584_v51 = vadd.f32 %v9352_v24, %v3446_v16  ;;  %v2024_v16 = vpop.f32.mrf.mxu2  ;;  %vm3076_vm10 = vmor %vm3074_vm8, %vm3075_vm7 }
 0x316   : > { %v3311_v29 = vmul.f32 %v3057_v26, %v12953_v27  ;;  %v3588_v30 = vadd.f32 %v9352_v24, %v3450_v18  ;;  %v3447_v42 = vmul.f32 %v9335_v38, %v3309_v14  ;;  %v12954_v25 = vsub.f32 %v12926_v52, %v9882_v40  ;;  %v2289_v52 = vpop.xlane.xlu2 %2288 }
 0x317   : > { %v3451_v33 = vmul.f32 %v9335_v38, %v3313_v54  ;;  %v3448_v8 = vmul.f32 %v9355_v55, %v3310_v35  ;;  %v3452_v4 = vmul.f32 %v9355_v55, %v3314_v22  ;;  %v2355_v45 = vadd.f32 %v10255_v47, %v10226_v50  ;;  %v10299_v18 = vpop.eup %7659 }
 0x318   : > { %v3315_v61 = vmul.f32 %v3067_v12, %v12954_v25  ;;  %v10294_v26 = vadd.f32 1e-05, %v2771_v5  ;;  %v10296_v3 = vpack.c.bf16 %v3588_v30, %v3584_v51  ;;  %v3449_v36 = vmul.f32 %v9373_v46, %v3311_v29  ;;  %v1935_v12 = vpop.f32.mrf.mxu1  ;;  %v2113_v5 = vpop.f32.mrf.mxu3 }
 0x319   : > { %v3082_v14 = vsub.f32 1.5, %v3081_v11  ;;  %v2525_v54 = vmul.f32 %v10255_v47, %v10255_v47  ;;  %v3585_v60 = vadd.f32 %v9359_v59, %v3447_v42  ;;  %v3589_v40 = vadd.f32 %v9359_v59, %v3451_v33 }
 0x31a   : > { %12955 = vst [vmem:[#allocation92_spill] sm:$0xff] %v10296_v3  ;;  %7661 = vrsqrt.f32 %v10294_v26  ;;  %4547 = vmatmul.bf16.gmra.mxu1 %v10296_v3  ;;  %v3586_v35 = vadd.f32 %v9361_v32, %v3448_v8  ;;  %v3590_v56 = vadd.f32 %v9361_v32, %v3452_v4  ;;  %v3453_v22 = vmul.f32 %v9373_v46, %v3315_v61  ;;  %v2202_v61 = vpop.f32.mrf.mxu0 }
 0x31b   : > { %vm3085_vm9 = vweird.f32 %v10166_v57  ;;  %v2526_v11 = vmul.f32 %v10260_v20, %v10260_v20  ;;  %v10313_v27 = vpack.c.bf16 %v3589_v40, %v3585_v60  ;;  %v10316_v29 = vadd.f32 %v2024_v16, %v8650_v2  ;;  %v2616_v16 = vpop.xlane.xlu1 %2615  ;;  %v2294_v40 = vpop.xlane.xlu0 %2293 }
 0x31c   : > { %v10318_v51 = vpack.c.bf16 %v3590_v56, %v3586_v35  ;;  %v3587_v30 = vadd.f32 %v9375_v41, %v3449_v36  ;;  %v3591_v42 = vadd.f32 %v9375_v41, %v3453_v22  ;;  %v2356_v33 = vadd.f32 %v2355_v45, %v10260_v20 }
 0x31d   : > { %12956 = vst [vmem:[#allocation93_spill] sm:$0xff] %v10313_v27  ;;  %v3083_v8 = vmul.f32 %v10166_v57, %v3082_v14  ;;  %v3089_v4 = vmul.f32 %v10299_v18, %v10235_v23  ;;  %v10327_v25 = vadd.f32 %v1935_v12, %v8644_v6  ;;  %4636 = vmatmul.bf16.gmra.mxu2 %v10313_v27  ;;  %vm3084_vm11 = vweird.f32 %v10103_v53 }
 0x31e   : > { %12957 = vst [vmem:[#allocation94_spill] sm:$0xff] %v10316_v29  ;;  %v2682_v2 = vadd.f32 %v2525_v54, %v2524_v13  ;;  %4725 = vmatmul.bf16.gmra.mxu3 %v10318_v51  ;;  %v10331_v36 = vpack.c.bf16 %v3591_v42, %v3587_v30  ;;  %v10334_v60 = vadd.f32 %v2113_v5, %v8652_v34  ;;  %vm3086_vm12 = vmor %vm3084_vm11, %vm3085_vm9  ;;  %vm3094_vm13 = vweird.f32 %v10235_v23 }
 0x31f   : > { %12958 = vst [vmem:[#allocation95_spill] sm:$0xff] %v10318_v51  ;;  %v2357_v45 = vadd.f32 %v2356_v33, %v10233_v19  ;;  %v10338_v14 = vmul.f32 %v9127_v21, %v2289_v52  ;;  %v2529_v6 = vmul.f32 %v10316_v29, %v10316_v29  ;;  %v2527_v13 = vmul.f32 %v10233_v19, %v10233_v19 }
 0x320   : > { %12959 = vst [vmem:[#allocation96_spill] sm:$0xff] %v10327_v25  ;;  %v2683_v54 = vadd.f32 %v2682_v2, %v2526_v11  ;;  %v2360_v34 = vadd.f32 %v10316_v29, %v10327_v25  ;;  %v10350_v12 = vpop.eup %7661  ;;  %v3077_v52 = vsel %vm3076_vm10, %v10101_v7, %v10250_v0  ;;  %v10356_v62 = vadd.f32 %v2202_v61, %v8659_v15  ;;  %v2621_v0 = vpop.xlane.xlu2 %2620  ;;  %v12963_v15 = vld [vmem:[#allocation31_spill] sm:$0xff] }
 0x321   : > { %12960 = vst [vmem:[#allocation97_spill] sm:$0xff] %v10331_v36  ;;  %4814 = vmatmul.bf16.gmra.mxu0 %v10331_v36  ;;  %2358 = vadd.xlane.f32.xlu0 %v2357_v45  ;;  %v2708_v35 = vmul.f32 %v2616_v16, %v9127_v21  ;;  %v3090_v56 = vmul.f32 %v10299_v18, %v3089_v4  ;;  %vm3095_vm14 = vweird.f32 %v10299_v18  ;;  %vm3105_vm15 = vweird.f32 %v10350_v12 }
 0x322   : > { %12961 = vst [vmem:[#allocation98_spill] sm:$0xff] %v10334_v60  ;;  %v2528_v22 = vmul.f32 %v10327_v25, %v10327_v25  ;;  %v3099_v7 = vmul.f32 %v10350_v12, %v10294_v26  ;;  %v2684_v53 = vadd.f32 %v2683_v54, %v2527_v13  ;;  %v2838_v11 = vsub.f32 %v12963_v15, %v9978_v58  ;;  %v12965_v54 = vld [vmem:[#allocation33_spill] sm:$0xff]  ;;  %vm3096_vm0 = vmor %vm3094_vm13, %vm3095_vm14 }
 0x323   : > { %12962 = vst [vmem:[#allocation99_spill] sm:$0xff] %v10356_v62  ;;  %v3087_v5 = vsel %vm3086_vm12, %v10166_v57, %v3083_v8  ;;  %v2740_v30 = vmul.f32 %v10338_v14, %v10338_v14  ;;  %v2361_v42 = vadd.f32 %v2360_v34, %v10334_v60  ;;  %v2530_v4 = vmul.f32 %v10334_v60, %v10334_v60 }
 0x324   : > { %v3100_v33 = vmul.f32 %v10350_v12, %v3099_v7  ;;  %2685 = vadd.xlane.f32.xlu2 %v2684_v53  ;;  %v2687_v61 = vadd.f32 %v2529_v6, %v2528_v22  ;;  %v10377_v2 = vmul.f32 %v9127_v21, %v2294_v40  ;;  %v2709_v57 = vmul.f32 %v2621_v0, %v9127_v21  ;;  %v12966_v40 = vld [vmem:[#allocation32_spill] sm:$0xff]  ;;  %v12968_v0 = vld [vmem:[#allocation35_spill] sm:$0xff] }
 0x325   : > { %v2772_v16 = vsub.f32 %v2708_v35, %v2740_v30  ;;  %v2362_v45 = vadd.f32 %v2361_v42, %v10356_v62  ;;  %v12964_v8 = vsub.f32 %v12941_v1, %v9978_v58  ;;  %v2840_v34 = vsub.f32 %v12965_v54, %v10047_v31  ;;  %v12967_v35 = vld [vmem:[#allocation34_spill] sm:$0xff] }
 0x326   : > { %v3091_v7 = vmul.f32 0.5, %v3090_v56  ;;  %v2531_v53 = vmul.f32 %v10356_v62, %v10356_v62  ;;  %v2688_v6 = vadd.f32 %v2687_v61, %v2530_v4  ;;  %v2839_v22 = vsub.f32 %v12966_v40, %v9978_v58 }
 0x327   : > { %v3316_v13 = vmul.f32 %v3077_v52, %v12964_v8  ;;  %v2841_v15 = vsub.f32 %v12967_v35, %v10047_v31  ;;  %v10392_v30 = vadd.f32 1e-05, %v2772_v16  ;;  %2363 = vadd.xlane.f32.xlu1 %v2362_v45  ;;  %v2741_v1 = vmul.f32 %v10377_v2, %v10377_v2  ;;  %v12970_v45 = vld [vmem:[#allocation36_spill] sm:$0xff] }
 0x328   : > { %v2842_v42 = vsub.f32 %v12968_v0, %v10047_v31  ;;  %v2689_v56 = vadd.f32 %v2688_v6, %v2531_v53  ;;  %v3320_v8 = vmul.f32 %v3087_v5, %v2840_v34  ;;  %v3101_v4 = vmul.f32 0.5, %v3100_v33  ;;  %v2299_v53 = vpop.xlane.xlu0 %2298 }
 0x329   : > { %v3454_v54 = vmul.f32 %v9280_v28, %v3316_v13  ;;  %7663 = vrsqrt.f32 %v10392_v30  ;;  %v2773_v61 = vsub.f32 %v2709_v57, %v2741_v1  ;;  %v12969_v40 = vsub.f32 %v12942_v17, %v9978_v58  ;;  %v7479_v58 = vld [vmem:[%s12535_s7 + $0x184] sm:$0xf]  ;;  %v7088_v1 = vld [vmem:[%s12535_s7 + $0x290] sm:$0xf0] }
 0x32a   : > { %v2843_v35 = vsub.f32 %v12970_v45, %v10047_v31  ;;  %v3092_v36 = vsub.f32 1.5, %v3091_v7  ;;  %2690 = vadd.xlane.f32.xlu0 %v2689_v56  ;;  %v3458_v51 = vmul.f32 %v9280_v28, %v3320_v8  ;;  %v3321_v0 = vmul.f32 %v3087_v5, %v2841_v15  ;;  %v6960_v15 = vld [vmem:[%s12535_s7 + $0x190] sm:$0xf0] }
 0x32b   : > { %v3317_v16 = vmul.f32 %v3077_v52, %v12969_v40  ;;  %v10407_v13 = vadd.f32 1e-05, %v2773_v61  ;;  %v3318_v57 = vmul.f32 %v3077_v52, %v2838_v11  ;;  %v3322_v34 = vmul.f32 %v3087_v5, %v2842_v42  ;;  %v7511_v11 = vld [vmem:[%s12535_s7 + $0x284] sm:$0xf] }
 0x32c   : > { %v3592_v31 = vadd.f32 %v9352_v24, %v3454_v54  ;;  %v3596_v17 = vadd.f32 %v9352_v24, %v3458_v51  ;;  %v3459_v7 = vmul.f32 %v9335_v38, %v3321_v0  ;;  %v3319_v6 = vmul.f32 %v3077_v52, %v2839_v22  ;;  %v7447_v61 = vld [vmem:[%s12535_s7 + $0x84] sm:$0xf] }
 0x32d   : > { %v3455_v33 = vmul.f32 %v9335_v38, %v3317_v16  ;;  %v3102_v42 = vsub.f32 1.5, %v3101_v4  ;;  %7665 = vrsqrt.f32 %v10407_v13  ;;  %v3456_v56 = vmul.f32 %v9355_v55, %v3318_v57  ;;  %v6832_v4 = vld [vmem:[%s12535_s7 + $0x90] sm:$0xf0] }
 0x32e   : > { %v10428_v52 = vpack.c.bf16 %v3596_v17, %v3592_v31  ;;  %v3597_v22 = vadd.f32 %v9359_v59, %v3459_v7  ;;  %v3460_v8 = vmul.f32 %v9355_v55, %v3322_v34  ;;  %v3323_v54 = vmul.f32 %v3087_v5, %v2843_v35  ;;  %v7543_v34 = vld [vmem:[%s12535_s7 + $0x384] sm:$0xf]  ;;  %v2304_v31 = vpop.xlane.xlu1 %2303 }
 0x32f   : > { %v3593_v51 = vadd.f32 %v9359_v59, %v3455_v33  ;;  %v10438_v40 = vpop.eup %7663  ;;  %v3457_v16 = vmul.f32 %v9373_v46, %v3319_v6  ;;  %v6963_v45 = vor.u32 %v7479_v58, %v6960_v15  ;;  %v7091_v0 = vor.u32 %v7511_v11, %v7088_v1  ;;  %v7216_v58 = vld [vmem:[%s12535_s7 + $0x390] sm:$0xf0]  ;;  %v2626_v15 = vpop.xlane.xlu2 %2625 }
 0x330   : > { %12971 = vst [vmem:[#allocation31_spill] sm:$0xff] %v10428_v52  ;;  %v3109_v33 = vmul.f32 %v10438_v40, %v10392_v30  ;;  %4552 = vmatmul.bf16.gmra.mxu1 %v10428_v52  ;;  %v3594_v35 = vadd.f32 %v9361_v32, %v3456_v56  ;;  %v3598_v57 = vadd.f32 %v9361_v32, %v3460_v8  ;;  %vm3104_vm1 = vweird.f32 %v10294_v26 }
 0x331   : > { %v10445_v5 = vpack.c.bf16 %v3597_v22, %v3593_v51  ;;  %v3093_v17 = vmul.f32 %v10299_v18, %v3092_v36  ;;  %v3461_v7 = vmul.f32 %v9373_v46, %v3323_v54  ;;  %4962 = vmatpush.bf16.msra.mxu2 %v6963_v45  ;;  %5051 = vmatpush.bf16.msra.mxu3 %v7091_v0  ;;  %v2631_v36 = vpop.xlane.xlu0 %2630  ;;  %v12975_v0 = vld [vmem:[#allocation38_spill] sm:$0xff]  ;;  %vm3106_vm2 = vmor %vm3104_vm1, %vm3105_vm15  ;;  %vm3115_vm3 = vweird.f32 %v10438_v40 }
 0x332   : > { %v6835_v6 = vor.u32 %v7447_v61, %v6832_v4  ;;  %v3103_v11 = vmul.f32 %v10350_v12, %v3102_v42  ;;  %v3110_v1 = vmul.f32 %v10438_v40, %v3109_v33  ;;  %v10461_v51 = vpack.c.bf16 %v3598_v57, %v3594_v35  ;;  %v12974_v4 = vld [vmem:[#allocation37_spill] sm:$0xff] }
 0x333   : > { %12972 = vst [vmem:[#allocation33_spill] sm:$0xff] %v10445_v5  ;;  %4641 = vmatmul.bf16.gmra.mxu2 %v10445_v5  ;;  %v10464_v56 = vmul.f32 %v9127_v21, %v2299_v53  ;;  %v10466_v22 = vpop.eup %7665  ;;  %v3595_v8 = vadd.f32 %v9375_v41, %v3457_v16  ;;  %v3599_v54 = vadd.f32 %v9375_v41, %v3461_v7  ;;  %v12977_v7 = vld [vmem:[#allocation39_spill] sm:$0xff]  ;;  %vm3114_vm4 = vweird.f32 %v10392_v30 }
 0x334   : > { %12973 = vst [vmem:[#allocation32_spill] sm:$0xff] %v10461_v51  ;;  %4873 = vmatpush.bf16.msra.mxu1 %v6835_v6  ;;  %v7219_v61 = vor.u32 %v7543_v34, %v7216_v58  ;;  %v10471_v42 = vmul.f32 %v9127_v21, %v2304_v31  ;;  %v2844_v45 = vsub.f32 %v12974_v4, %v10191_v10  ;;  %v3111_v34 = vmul.f32 0.5, %v3110_v1  ;;  %vm3116_vm6 = vmor %vm3114_vm4, %vm3115_vm3 }
 0x335   : > { %v3119_v53 = vmul.f32 %v10466_v22, %v10407_v13  ;;  %4730 = vmatmul.bf16.gmra.mxu3 %v10461_v51  ;;  %v2710_v16 = vmul.f32 %v2626_v15, %v9127_v21  ;;  %v2845_v33 = vsub.f32 %v12975_v0, %v10191_v10  ;;  %v3097_v35 = vsel %vm3096_vm0, %v10299_v18, %v3093_v17  ;;  %v12978_v18 = vld [vmem:[#allocation41_spill] sm:$0xff]  ;;  %v12979_v15 = vld [vmem:[#allocation42_spill] sm:$0xff] }
 0x336   : > { %v10489_v57 = vpack.c.bf16 %v3599_v54, %v3595_v8  ;;  %5140 = vmatpush.bf16.msra.mxu0 %v7219_v61  ;;  %v2711_v23 = vmul.f32 %v2631_v36, %v9127_v21  ;;  %v3107_v26 = vsel %vm3106_vm2, %v10350_v12, %v3103_v11  ;;  %v2742_v31 = vmul.f32 %v10464_v56, %v10464_v56  ;;  %v12980_v11 = vld [vmem:[#allocation40_spill] sm:$0xff] }
 0x337   : > { %v3120_v58 = vmul.f32 %v10466_v22, %v3119_v53  ;;  %v2846_v6 = vsub.f32 %v12977_v7, %v10191_v10  ;;  %v2848_v17 = vsub.f32 %v12978_v18, %v10240_v49  ;;  %v2849_v8 = vsub.f32 %v12979_v15, %v10240_v49  ;;  %v12981_v18 = vld [vmem:[#allocation43_spill] sm:$0xff] }
 0x338   : > { %12976 = vst [vmem:[#allocation34_spill] sm:$0xff] %v10489_v57  ;;  %4819 = vmatmul.bf16.gmra.mxu0 %v10489_v57  ;;  %v2743_v12 = vmul.f32 %v10471_v42, %v10471_v42  ;;  %v2847_v1 = vsub.f32 %v12980_v11, %v10191_v10  ;;  %v2774_v54 = vsub.f32 %v2710_v16, %v2742_v31  ;;  %v3112_v5 = vsub.f32 1.5, %v3111_v34  ;;  %v10517_v16 = vpop.f32.mrf.mxu1  ;;  %v2309_v31 = vpop.xlane.xlu1 %2308 }
 0x339   : > { %v3121_v36 = vmul.f32 0.5, %v3120_v58  ;;  %v3324_v61 = vmul.f32 %v3097_v35, %v2844_v45  ;;  %v3328_v53 = vmul.f32 %v3107_v26, %v2848_v17  ;;  %v3325_v0 = vmul.f32 %v3097_v35, %v2845_v33  ;;  %v12982_v33 = vld [vmem:[#allocation44_spill] sm:$0xff]  ;;  %v12983_v58 = vld [vmem:[#allocation45_spill] sm:$0xff]  ;;  %v10525_v17 = vpop.f32.mrf.mxu0 }
 0x33a   : > { %v2775_v4 = vsub.f32 %v2711_v23, %v2743_v12  ;;  %v3329_v7 = vmul.f32 %v3107_v26, %v2849_v8  ;;  %v2850_v51 = vsub.f32 %v12981_v18, %v10240_v49  ;;  %v10509_v15 = vadd.f32 1e-05, %v2774_v54 }
 0x33b   : > { %v3462_v57 = vmul.f32 %v9280_v28, %v3324_v61  ;;  %v3466_v27 = vmul.f32 %v9280_v28, %v3328_v53  ;;  %v3463_v10 = vmul.f32 %v9335_v38, %v3325_v0  ;;  %v2851_v23 = vsub.f32 %v12982_v33, %v10240_v49  ;;  %v2636_v33 = vpop.xlane.xlu0 %2635 }
 0x33c   : > { %v10512_v52 = vadd.f32 1e-05, %v2775_v4  ;;  %v3467_v45 = vmul.f32 %v9335_v38, %v3329_v7  ;;  %v2852_v34 = vsub.f32 %v12983_v58, %v10338_v14  ;;  %7667 = vrsqrt.f32 %v10509_v15 }
 0x33d   : > { %v3122_v8 = vsub.f32 1.5, %v3121_v36  ;;  %v3600_v12 = vadd.f32 %v9352_v24, %v3462_v57  ;;  %v3604_v11 = vadd.f32 %v9352_v24, %v3466_v27  ;;  %v3601_v54 = vadd.f32 %v9359_v59, %v3463_v10 }
 0x33e   : > { %7669 = vrsqrt.f32 %v10512_v52  ;;  %v3605_v49 = vadd.f32 %v9359_v59, %v3467_v45  ;;  %v3326_v61 = vmul.f32 %v3097_v35, %v2846_v6  ;;  %v3330_v4 = vmul.f32 %v3107_v26, %v2850_v51 }
 0x33f   : > { %v3113_v53 = vmul.f32 %v10438_v40, %v3112_v5  ;;  %v10533_v0 = vpack.c.bf16 %v3604_v11, %v3600_v12  ;;  %v3327_v7 = vmul.f32 %v3097_v35, %v2847_v1  ;;  %v3331_v18 = vmul.f32 %v3107_v26, %v2851_v23  ;;  %v10547_v35 = vpop.f32.mrf.mxu2  ;;  %v10549_v26 = vpop.f32.mrf.mxu3 }
 0x340   : > { %v10535_v36 = vpack.c.bf16 %v3605_v49, %v3601_v54  ;;  %v3464_v58 = vmul.f32 %v9355_v55, %v3326_v61  ;;  %v3468_v57 = vmul.f32 %v9355_v55, %v3330_v4  ;;  %v10540_v27 = vmul.f32 %v9127_v21, %v2309_v31  ;;  %v2314_v23 = vpop.xlane.xlu2 %2313  ;;  %v10569_v49 = vpop.f32.mrf.mxu1 }
 0x341   : > { %12984 = vst [vmem:[#allocation35_spill] sm:$0xff] %v10533_v0  ;;  %vm3125_vm5 = vweird.f32 %v10466_v22  ;;  %4557 = vmatmul.bf16.gmra.mxu1 %v10533_v0  ;;  %v3465_v5 = vmul.f32 %v9373_v46, %v3327_v7  ;;  %v3469_v51 = vmul.f32 %v9373_v46, %v3331_v18  ;;  %v3123_v1 = vmul.f32 %v10466_v22, %v3122_v8 }
 0x342   : > { %12985 = vst [vmem:[#allocation36_spill] sm:$0xff] %v10535_v36  ;;  %v10551_v6 = vpop.eup %7667  ;;  %v3602_v30 = vadd.f32 %v9361_v32, %v3464_v58  ;;  %v3606_v10 = vadd.f32 %v9361_v32, %v3468_v57  ;;  %v2712_v45 = vmul.f32 %v2636_v33, %v9127_v21  ;;  %v10563_v12 = vsel %vm3116_vm6, %v10438_v40, %v3113_v53  ;;  %v2641_v53 = vpop.xlane.xlu1 %2640 }
 0x343   : > { %4646 = vmatmul.bf16.gmra.mxu2 %v10535_v36  ;;  %v3129_v11 = vmul.f32 %v10551_v6, %v10509_v15  ;;  %v3603_v54 = vadd.f32 %v9375_v41, %v3465_v5  ;;  %v3607_v8 = vadd.f32 %v9375_v41, %v3469_v51  ;;  %12986 = vst [vmem:[#allocation37_spill] sm:$0xff] %v10569_v49  ;;  %vm3124_vm7 = vweird.f32 %v10407_v13  ;;  %v10589_v5 = vpop.f32.mrf.mxu0  ;;  %v12990_v51 = vld [vmem:[#allocation46_spill] sm:$0xff] }
 0x344   : > { %v10560_v31 = vpop.eup %7669  ;;  %v10574_v4 = vpack.c.bf16 %v3606_v10, %v3602_v30  ;;  %v2744_v40 = vmul.f32 %v10540_v27, %v10540_v27  ;;  %vm3126_vm8 = vmor %vm3124_vm7, %vm3125_vm5  ;;  %v10583_v18 = vmul.f32 %v9127_v21, %v2314_v23  ;;  %v3332_v57 = vmul.f32 %v10563_v12, %v2852_v34  ;;  %12989 = vst [vmem:[#allocation41_spill] sm:$0xff] %v10589_v5  ;;  %v12991_v10 = vld [vmem:[#allocation49_spill] sm:$0xff]  ;;  %v12992_v34 = vld [vmem:[#allocation48_spill] sm:$0xff] }
 0x345   : > { %v3139_v61 = vmul.f32 %v10560_v31, %v10512_v52  ;;  %v10580_v7 = vpack.c.bf16 %v3607_v8, %v3603_v54  ;;  %v3127_v33 = vsel %vm3126_vm8, %v10466_v22, %v3123_v1  ;;  %v3130_v13 = vmul.f32 %v10551_v6, %v3129_v11  ;;  %v3864_v22 = vld [vmem:[%s12536_s8] sm:$0xf]  ;;  %v12993_v11 = vld [vmem:[#allocation47_spill] sm:$0xff] }
 0x346   : > { %12987 = vst [vmem:[#allocation38_spill] sm:$0xff] %v10574_v4  ;;  %4735 = vmatmul.bf16.gmra.mxu3 %v10574_v4  ;;  %v2776_v58 = vsub.f32 %v2712_v45, %v2744_v40  ;;  %v2853_v30 = vsub.f32 %v12990_v51, %v10338_v14  ;;  %v2856_v54 = vsub.f32 %v12991_v10, %v10377_v2  ;;  %v12994_v40 = vld [vmem:[#allocation50_spill] sm:$0xff]  ;;  %vm3135_vm9 = vweird.f32 %v10551_v6 }
 0x347   : > { %12988 = vst [vmem:[#allocation39_spill] sm:$0xff] %v10580_v7  ;;  %v3140_v23 = vmul.f32 %v10560_v31, %v3139_v61  ;;  %v2713_v1 = vmul.f32 %v2641_v53, %v9127_v21  ;;  %v2854_v45 = vsub.f32 %v12992_v34, %v10338_v14  ;;  %v2855_v8 = vsub.f32 %v12993_v11, %v10338_v14  ;;  %v12995_v61 = vld [vmem:[#allocation51_spill] sm:$0xff]  ;;  %v12996_v11 = vld [vmem:[#allocation52_spill] sm:$0xff]  ;;  %v10621_v0 = vpop.f32.mrf.mxu2  ;;  %v10623_v3 = vpop.f32.mrf.mxu3 }
 0x348   : > { %4824 = vmatmul.bf16.gmra.mxu0 %v10580_v7  ;;  %v2857_v51 = vsub.f32 %v12994_v40, %v10377_v2  ;;  %v10607_v10 = vadd.f32 1e-05, %v2776_v58  ;;  %v2858_v5 = vsub.f32 %v12995_v61, %v10377_v2  ;;  %v2745_v49 = vmul.f32 %v10583_v18, %v10583_v18  ;;  %12997 = vst [vmem:[#allocation42_spill] sm:$0xff] %v10621_v0 }
 0x349   : > { %v3336_v7 = vmul.f32 %v3127_v33, %v2856_v54  ;;  %v3470_v53 = vmul.f32 %v9280_v28, %v3332_v57  ;;  %v3131_v4 = vmul.f32 0.5, %v3130_v13  ;;  %v10615_v34 = vperm.slane %v3864_v22, 0  ;;  %12998 = vst [vmem:[#allocation40_spill] sm:$0xff] %v10623_v3  ;;  %v2319_v3 = vpop.xlane.xlu2 %2318 }
 0x34a   : > { %7671 = vrsqrt.f32 %v10607_v10  ;;  %v3333_v14 = vmul.f32 %v10563_v12, %v2853_v30  ;;  %v2859_v58 = vsub.f32 %v12996_v11, %v10377_v2  ;;  %v3141_v40 = vmul.f32 0.5, %v3140_v23  ;;  %v10632_v23 = vpop.f32.mrf.mxu1  ;;  %v2646_v29 = vpop.xlane.xlu1 %2645 }
 0x34b   : > { %v2777_v36 = vsub.f32 %v2713_v1, %v2745_v49  ;;  %v3474_v61 = vmul.f32 %v9280_v28, %v3336_v7  ;;  %v3337_v13 = vmul.f32 %v3127_v33, %v2857_v51  ;;  %v3334_v54 = vmul.f32 %v10563_v12, %v2854_v45  ;;  %v6944_v45 = vld [vmem:[%s12535_s7 + $0x170] sm:$0xf0]  ;;  %v10665_v0 = vpop.f32.mrf.mxu0 }
 0x34c   : > { %v3471_v57 = vmul.f32 %v9335_v38, %v3333_v14  ;;  %v3608_v30 = vadd.f32 %v9352_v24, %v3470_v53  ;;  %v3338_v49 = vmul.f32 %v3127_v33, %v2858_v5  ;;  %v3132_v7 = vsub.f32 1.5, %v3131_v4  ;;  %v7072_v14 = vld [vmem:[%s12535_s7 + $0x270] sm:$0xf0] }
 0x34d   : > { %v10628_v22 = vadd.f32 1e-05, %v2777_v36  ;;  %v3612_v2 = vadd.f32 %v9352_v24, %v3474_v61  ;;  %v4524_v1 = vadd.f32 %v10517_v16, %v10615_v34  ;;  %v3475_v11 = vmul.f32 %v9335_v38, %v3337_v13  ;;  %v7475_v36 = vld [vmem:[%s12535_s7 + $0x164] sm:$0xf] }
 0x34e   : > { %v3472_v51 = vmul.f32 %v9355_v55, %v3334_v54  ;;  %v3142_v53 = vsub.f32 1.5, %v3141_v40  ;;  %v3476_v4 = vmul.f32 %v9355_v55, %v3338_v49  ;;  %v7507_v16 = vld [vmem:[%s12535_s7 + $0x264] sm:$0xf]  ;;  %v3609_v13 = vadd.f32 %v9359_v59, %v3471_v57  ;;  %v6816_v49 = vld [vmem:[%s12535_s7 + $0x70] sm:$0xf0] }
 0x34f   : > { %7673 = vrsqrt.f32 %v10628_v22  ;;  %v10645_v5 = vpack.c.bf16 %v3612_v2, %v3608_v30  ;;  %v3613_v40 = vadd.f32 %v9359_v59, %v3475_v11  ;;  %v3335_v54 = vmul.f32 %v10563_v12, %v2855_v8  ;;  %v7443_v2 = vld [vmem:[%s12535_s7 + $0x64] sm:$0xf] }
 0x350   : > { %v10654_v61 = vpop.eup %7671  ;;  %v3339_v30 = vmul.f32 %v3127_v33, %v2859_v58  ;;  %v3610_v57 = vadd.f32 %v9361_v32, %v3472_v51  ;;  %v3614_v12 = vadd.f32 %v9361_v32, %v3476_v4  ;;  %v6947_v33 = vor.u32 %v7475_v36, %v6944_v45  ;;  %v10686_v4 = vpop.f32.mrf.mxu2 }
 0x351   : > { %12999 = vst [vmem:[#allocation43_spill] sm:$0xff] %v10645_v5  ;;  %v3149_v19 = vmul.f32 %v10654_v61, %v10607_v10  ;;  %4562 = vmatmul.bf16.gmra.mxu1 %v10645_v5  ;;  %v10672_v8 = vpack.c.bf16 %v3613_v40, %v3609_v13  ;;  %v3473_v58 = vmul.f32 %v9373_v46, %v3335_v54  ;;  %vm3134_vm10 = vweird.f32 %v10509_v15  ;;  %v13005_v54 = vld [vmem:[#allocation53_spill] sm:$0xff] }
 0x352   : > { %v3477_v11 = vmul.f32 %v9373_v46, %v3339_v30  ;;  %v7075_v62 = vor.u32 %v7507_v16, %v7072_v14  ;;  %v3133_v20 = vmul.f32 %v10551_v6, %v3132_v7  ;;  %v10677_v60 = vpack.c.bf16 %v3614_v12, %v3610_v57  ;;  %4963 = vmatpush.bf16.msra.mxu2 %v6947_v33  ;;  %v10688_v7 = vpop.f32.mrf.mxu3  ;;  %v10702_v14 = vpop.f32.mrf.mxu1  ;;  %vm3136_vm12 = vmor %vm3134_vm10, %vm3135_vm9  ;;  %v13007_v33 = vld [vmem:[#allocation54_spill] sm:$0xff] }
 0x353   : > { %13000 = vst [vmem:[#allocation44_spill] sm:$0xff] %v10672_v8  ;;  %v4613_v47 = vadd.f32 %v10547_v35, %v4524_v1  ;;  %v6819_v5 = vor.u32 %v7443_v2, %v6816_v49  ;;  %4651 = vmatmul.bf16.gmra.mxu2 %v10672_v8  ;;  %v3611_v51 = vadd.f32 %v9375_v41, %v3473_v58  ;;  %vm3145_vm11 = vweird.f32 %v10560_v31  ;;  %v2651_v2 = vpop.xlane.xlu2 %2650  ;;  %v10730_v12 = vpop.f32.mrf.mxu0 }
 0x354   : > { %13001 = vst [vmem:[#allocation45_spill] sm:$0xff] %v10677_v60  ;;  %v3615_v36 = vadd.f32 %v9375_v41, %v3477_v11  ;;  %5052 = vmatpush.bf16.msra.mxu3 %v7075_v62  ;;  %v10684_v45 = vmul.f32 %v9127_v21, %v2319_v3  ;;  %v3143_v35 = vmul.f32 %v10560_v31, %v3142_v53  ;;  %v7539_v3 = vld [vmem:[%s12535_s7 + $0x364] sm:$0xf]  ;;  %v7200_v62 = vld [vmem:[%s12535_s7 + $0x370] sm:$0xf0]  ;;  %vm3144_vm13 = vweird.f32 %v10512_v52  ;;  %v13008_v11 = vld [vmem:[#allocation56_spill] sm:$0xff] }
 0x355   : > { %v10690_v16 = vpop.eup %7673  ;;  %v4702_v1 = vadd.f32 %v10549_v26, %v4613_v47  ;;  %4874 = vmatpush.bf16.msra.mxu1 %v6819_v5  ;;  %13002 = vst [vmem:[#allocation46_spill] sm:$0xff] %v10702_v14  ;;  %v3150_v15 = vmul.f32 %v10654_v61, %v3149_v19  ;;  %v2714_v26 = vmul.f32 %v2646_v29, %v9127_v21  ;;  %v2324_v5 = vpop.xlane.xlu0 %2323  ;;  %vm3146_vm14 = vmor %vm3144_vm13, %vm3145_vm11  ;;  %vm3155_vm15 = vweird.f32 %v10654_v61 }
 0x356   : > { %v3159_v53 = vmul.f32 %v10690_v16, %v10628_v22  ;;  %4740 = vmatmul.bf16.gmra.mxu3 %v10677_v60  ;;  %v10710_v47 = vpack.c.bf16 %v3615_v36, %v3611_v51  ;;  %v3137_v13 = vsel %vm3136_vm12, %v10551_v6, %v3133_v20  ;;  %v2860_v19 = vsub.f32 %v13005_v54, %v10464_v56  ;;  %v13009_v36 = vld [vmem:[#allocation57_spill] sm:$0xff]  ;;  %v13013_v54 = vld [vmem:[#allocation60_spill] sm:$0xff] }
 0x357   : > { %v10716_v40 = vadd.f32 %v10525_v17, %v4702_v1  ;;  %v2746_v30 = vmul.f32 %v10684_v45, %v10684_v45  ;;  %v7203_v29 = vor.u32 %v7539_v3, %v7200_v62  ;;  %v3147_v20 = vsel %vm3146_vm14, %v10560_v31, %v3143_v35  ;;  %13006 = vst [vmem:[#allocation47_spill] sm:$0xff] %v10730_v12  ;;  %v13010_v1 = vld [vmem:[#allocation55_spill] sm:$0xff]  ;;  %v13011_v62 = vld [vmem:[#allocation58_spill] sm:$0xff] }
 0x358   : > { %13003 = vst [vmem:[#allocation49_spill] sm:$0xff] %v10710_v47  ;;  %4829 = vmatmul.bf16.gmra.mxu0 %v10710_v47  ;;  %v10727_v52 = vmul.f32 %v9127_v21, %v2324_v5  ;;  %v3151_v17 = vmul.f32 0.5, %v3150_v15  ;;  %v3160_v6 = vmul.f32 %v10690_v16, %v3159_v53  ;;  %v3340_v57 = vmul.f32 %v3137_v13, %v2860_v19  ;;  %v13012_v53 = vld [vmem:[#allocation59_spill] sm:$0xff] }
 0x359   : > { %13004 = vst [vmem:[#allocation48_spill] sm:$0xff] %v10716_v40  ;;  %v2778_v49 = vsub.f32 %v2714_v26, %v2746_v30  ;;  %5141 = vmatpush.bf16.msra.mxu0 %v7203_v29  ;;  %v2861_v58 = vsub.f32 %v13007_v33, %v10464_v56  ;;  %v2862_v51 = vsub.f32 %v13008_v11, %v10464_v56  ;;  %v10752_v33 = vpop.f32.mrf.mxu2  ;;  %vm3165_vm0 = vweird.f32 %v10690_v16 }
 0x35a   : > { %v2864_v31 = vsub.f32 %v13009_v36, %v10471_v42  ;;  %v2715_v35 = vmul.f32 %v2651_v2, %v9127_v21  ;;  %v2863_v3 = vsub.f32 %v13010_v1, %v10464_v56  ;;  %v2865_v15 = vsub.f32 %v13011_v62, %v10471_v42  ;;  %13014 = vst [vmem:[#allocation50_spill] sm:$0xff] %v10752_v33  ;;  %v10754_v56 = vpop.f32.mrf.mxu3 }
 0x35b   : > { %v2866_v26 = vsub.f32 %v13012_v53, %v10471_v42  ;;  %v10745_v5 = vadd.f32 1e-05, %v2778_v49  ;;  %v2867_v19 = vsub.f32 %v13013_v54, %v10471_v42  ;;  %v2747_v30 = vmul.f32 %v10727_v52, %v10727_v52  ;;  %13015 = vst [vmem:[#allocation51_spill] sm:$0xff] %v10754_v56  ;;  %v10761_v53 = vpop.f32.mrf.mxu1 }
 0x35c   : > { %v3344_v29 = vmul.f32 %v3147_v20, %v2864_v31  ;;  %v3478_v2 = vmul.f32 %v9280_v28, %v3340_v57  ;;  %v3152_v11 = vsub.f32 1.5, %v3151_v17  ;;  %v3161_v36 = vmul.f32 0.5, %v3160_v6 }
 0x35d   : > { %7675 = vrsqrt.f32 %v10745_v5  ;;  %v3341_v49 = vmul.f32 %v3137_v13, %v2861_v58  ;;  %v4529_v42 = vadd.f32 %v10632_v23, %v10615_v34  ;;  %v2779_v1 = vsub.f32 %v2715_v35, %v2747_v30 }
 0x35e   : > { %v3482_v62 = vmul.f32 %v9280_v28, %v3344_v29  ;;  %v3345_v31 = vmul.f32 %v3147_v20, %v2865_v15  ;;  %v3616_v57 = vadd.f32 %v9352_v24, %v3478_v2  ;;  %v3342_v17 = vmul.f32 %v3137_v13, %v2862_v51  ;;  %v2329_v2 = vpop.xlane.xlu0 %2328 }
 0x35f   : > { %v3479_v54 = vmul.f32 %v9335_v38, %v3341_v49  ;;  %v3346_v12 = vmul.f32 %v3147_v20, %v2866_v26  ;;  %v10765_v56 = vadd.f32 1e-05, %v2779_v1  ;;  %v3343_v33 = vmul.f32 %v3137_v13, %v2863_v3 }
 0x360   : > { %v3620_v6 = vadd.f32 %v9352_v24, %v3482_v62  ;;  %v3483_v58 = vmul.f32 %v9335_v38, %v3345_v31  ;;  %v3162_v23 = vsub.f32 1.5, %v3161_v36  ;;  %v3480_v35 = vmul.f32 %v9355_v55, %v3342_v17  ;;  %v2656_v31 = vpop.xlane.xlu2 %2655 }
 0x361   : > { %v3484_v15 = vmul.f32 %v9355_v55, %v3346_v12  ;;  %v3347_v30 = vmul.f32 %v3147_v20, %v2867_v19  ;;  %7677 = vrsqrt.f32 %v10765_v56  ;;  %v3617_v51 = vadd.f32 %v9359_v59, %v3479_v54  ;;  %v10782_v20 = vpop.f32.mrf.mxu0 }
 0x362   : > { %v10772_v29 = vpack.c.bf16 %v3620_v6, %v3616_v57  ;;  %v3621_v26 = vadd.f32 %v9359_v59, %v3483_v58  ;;  %v3618_v1 = vadd.f32 %v9361_v32, %v3480_v35  ;;  %v3481_v3 = vmul.f32 %v9373_v46, %v3343_v33  ;;  %v2334_v6 = vpop.xlane.xlu1 %2333  ;;  %v10796_v58 = vpop.f32.mrf.mxu2 }
 0x363   : > { %v10776_v49 = vpop.eup %7675  ;;  %v3622_v13 = vadd.f32 %v9361_v32, %v3484_v15  ;;  %v3485_v12 = vmul.f32 %v9373_v46, %v3347_v30  ;;  %v4618_v62 = vadd.f32 %v10686_v4, %v4529_v42  ;;  %v3153_v57 = vmul.f32 %v10654_v61, %v3152_v11  ;;  %v10805_v11 = vpop.f32.mrf.mxu3 }
 0x364   : > { %13016 = vst [vmem:[#allocation52_spill] sm:$0xff] %v10772_v29  ;;  %v3169_v19 = vmul.f32 %v10776_v49, %v10745_v5  ;;  %4567 = vmatmul.bf16.gmra.mxu1 %v10772_v29  ;;  %v10788_v36 = vpack.c.bf16 %v3621_v26, %v3617_v51  ;;  %v3619_v33 = vadd.f32 %v9375_v41, %v3481_v3  ;;  %vm3154_vm1 = vweird.f32 %v10607_v10  ;;  %v10811_v51 = vpop.f32.mrf.mxu1 }
 0x365   : > { %v10792_v54 = vpack.c.bf16 %v3622_v13, %v3618_v1  ;;  %v3623_v17 = vadd.f32 %v9375_v41, %v3485_v12  ;;  %v3163_v35 = vmul.f32 %v10690_v16, %v3162_v23  ;;  %v4707_v4 = vadd.f32 %v10688_v7, %v4618_v62  ;;  %13020 = vst [vmem:[#allocation57_spill] sm:$0xff] %v10811_v51  ;;  %vm3156_vm2 = vmor %vm3154_vm1, %vm3155_vm15  ;;  %v13023_v62 = vld [vmem:[#allocation65_spill] sm:$0xff] }
 0x366   : > { %13017 = vst [vmem:[#allocation53_spill] sm:$0xff] %v10788_v36  ;;  %v3170_v15 = vmul.f32 %v10776_v49, %v3169_v19  ;;  %4656 = vmatmul.bf16.gmra.mxu2 %v10788_v36  ;;  %v10803_v42 = vmul.f32 %v9127_v21, %v2329_v2  ;;  %vm3164_vm3 = vweird.f32 %v10628_v22  ;;  %v2716_v26 = vmul.f32 %v2656_v31, %v9127_v21  ;;  %v2661_v12 = vpop.xlane.xlu0 %2660  ;;  %v13022_v19 = vld [vmem:[#allocation61_spill] sm:$0xff] }
 0x367   : > { %13018 = vst [vmem:[#allocation54_spill] sm:$0xff] %v10792_v54  ;;  %4745 = vmatmul.bf16.gmra.mxu3 %v10792_v54  ;;  %v10809_v30 = vpack.c.bf16 %v3623_v17, %v3619_v33  ;;  %v10813_v23 = vpop.eup %7677  ;;  %v10819_v7 = vadd.f32 %v10665_v0, %v4707_v4  ;;  %v10823_v10 = vmul.f32 %v9127_v21, %v2334_v6  ;;  %vm3166_vm4 = vmor %vm3164_vm3, %vm3165_vm0  ;;  %v13024_v33 = vld [vmem:[#allocation69_spill] sm:$0xff]  ;;  %vm3175_vm5 = vweird.f32 %v10776_v49 }
 0x368   : > { %v2868_v2 = vsub.f32 %v9394_v44, %v10540_v27  ;;  %v3179_v1 = vmul.f32 %v10813_v23, %v10765_v56  ;;  %v3157_v22 = vsel %vm3156_vm2, %v10654_v61, %v3153_v57  ;;  %v3167_v0 = vsel %vm3166_vm4, %v10690_v16, %v3163_v35  ;;  %v13025_v61 = vld [vmem:[#allocation67_spill] sm:$0xff]  ;;  %v13026_v16 = vld [vmem:[#allocation68_spill] sm:$0xff] }
 0x369   : > { %13019 = vst [vmem:[#allocation56_spill] sm:$0xff] %v10809_v30  ;;  %4834 = vmatmul.bf16.gmra.mxu0 %v10809_v30  ;;  %v3171_v13 = vmul.f32 0.5, %v3170_v15  ;;  %v2748_v3 = vmul.f32 %v10803_v42, %v10803_v42  ;;  %v2869_v44 = vsub.f32 %v13022_v19, %v10540_v27  ;;  %v2870_v31 = vsub.f32 %v13023_v62, %v10540_v27  ;;  %v13027_v19 = vld [vmem:[#allocation70_spill] sm:$0xff] }
 0x36a   : > { %13021 = vst [vmem:[#allocation55_spill] sm:$0xff] %v10819_v7  ;;  %v2872_v17 = vsub.f32 %v13024_v33, %v10583_v18  ;;  %v3180_v6 = vmul.f32 %v10813_v23, %v3179_v1  ;;  %v2871_v57 = vsub.f32 %v13025_v61, %v10540_v27  ;;  %v2873_v35 = vsub.f32 %v13026_v16, %v10583_v18  ;;  %v10852_v33 = vpop.f32.mrf.mxu0  ;;  %v10860_v36 = vpop.f32.mrf.mxu2 }
 0x36b   : > { %v2780_v15 = vsub.f32 %v2716_v26, %v2748_v3  ;;  %v2749_v4 = vmul.f32 %v10823_v10, %v10823_v10  ;;  %v2874_v51 = vsub.f32 %v13027_v19, %v10583_v18  ;;  %v2717_v62 = vmul.f32 %v2661_v12, %v9127_v21  ;;  %13028 = vst [vmem:[#allocation58_spill] sm:$0xff] %v10852_v33  ;;  %v13030_v12 = vld [vmem:[#allocation71_spill] sm:$0xff] }
 0x36c   : > { %v3348_v7 = vmul.f32 %v3157_v22, %v2868_v2  ;;  %v3352_v14 = vmul.f32 %v3167_v0, %v2872_v17  ;;  %v3172_v1 = vsub.f32 1.5, %v3171_v13  ;;  %v3349_v27 = vmul.f32 %v3157_v22, %v2869_v44  ;;  %13029 = vst [vmem:[#allocation59_spill] sm:$0xff] %v10860_v36  ;;  %v10867_v44 = vpop.f32.mrf.mxu3 }
 0x36d   : > { %v10854_v30 = vadd.f32 1e-05, %v2780_v15  ;;  %v3353_v61 = vmul.f32 %v3167_v0, %v2873_v35  ;;  %v10856_v54 = vmul.f32 0.5, %v3180_v6  ;;  %v2781_v26 = vsub.f32 %v2717_v62, %v2749_v4  ;;  %13031 = vst [vmem:[#allocation60_spill] sm:$0xff] %v10867_v44  ;;  %v10878_v15 = vpop.f32.mrf.mxu1 }
 0x36e   : > { %v3486_v3 = vmul.f32 %v9280_v28, %v3348_v7  ;;  %v3490_v16 = vmul.f32 %v9280_v28, %v3352_v14  ;;  %v2875_v2 = vsub.f32 %v13030_v12, %v10583_v18  ;;  %v3487_v13 = vmul.f32 %v9335_v38, %v3349_v27  ;;  %v7471_v18 = vld [vmem:[%s12535_s7 + $0x144] sm:$0xf]  ;;  %v6800_v12 = vld [vmem:[%s12535_s7 + $0x50] sm:$0xf0] }
 0x36f   : > { %7679 = vrsqrt.f32 %v10854_v30  ;;  %v3491_v17 = vmul.f32 %v9335_v38, %v3353_v61  ;;  %v4534_v6 = vadd.f32 %v10761_v53, %v10615_v34  ;;  %v10871_v35 = vadd.f32 1e-05, %v2781_v26  ;;  %v6928_v53 = vld [vmem:[%s12535_s7 + $0x150] sm:$0xf0]  ;;  %v7503_v61 = vld [vmem:[%s12535_s7 + $0x244] sm:$0xf] }
 0x370   : > { %v3624_v14 = vadd.f32 %v9352_v24, %v3486_v3  ;;  %v3628_v7 = vadd.f32 %v9352_v24, %v3490_v16  ;;  %v3625_v4 = vadd.f32 %v9359_v59, %v3487_v13  ;;  %v3350_v62 = vmul.f32 %v3157_v22, %v2870_v31  ;;  %v7056_v26 = vld [vmem:[%s12535_s7 + $0x250] sm:$0xf0] }
 0x371   : > { %v3629_v19 = vadd.f32 %v9359_v59, %v3491_v17  ;;  %v3354_v27 = vmul.f32 %v3167_v0, %v2874_v51  ;;  %v3173_v3 = vmul.f32 %v10776_v49, %v3172_v1  ;;  %v3182_v16 = vsub.f32 1.5, %v10856_v54  ;;  %v7439_v51 = vld [vmem:[%s12535_s7 + $0x44] sm:$0xf]  ;;  %v2339_v54 = vpop.xlane.xlu1 %2338 }
 0x372   : > { %7681 = vrsqrt.f32 %v10871_v35  ;;  %v10894_v31 = vpack.c.bf16 %v3628_v7, %v3624_v14  ;;  %v3488_v17 = vmul.f32 %v9355_v55, %v3350_v62  ;;  %v3351_v33 = vmul.f32 %v3157_v22, %v2871_v57  ;;  %v2666_v57 = vpop.xlane.xlu0 %2665 }
 0x373   : > { %v10902_v13 = vpack.c.bf16 %v3629_v19, %v3625_v4  ;;  %v3492_v1 = vmul.f32 %v9355_v55, %v3354_v27  ;;  %v3355_v14 = vmul.f32 %v3167_v0, %v2875_v2  ;;  %v6931_v7 = vor.u32 %v7471_v18, %v6928_v53  ;;  %v10919_v2 = vpop.f32.mrf.mxu0  ;;  %v10927_v18 = vpop.f32.mrf.mxu2 }
 0x374   : > { %13032 = vst [vmem:[#allocation61_spill] sm:$0xff] %v10894_v31  ;;  %4572 = vmatmul.bf16.gmra.mxu1 %v10894_v31  ;;  %v7059_v44 = vor.u32 %v7503_v61, %v7056_v26  ;;  %v4623_v36 = vadd.f32 %v10796_v58, %v4534_v6  ;;  %v3626_v4 = vadd.f32 %v9361_v32, %v3488_v17  ;;  %vm3174_vm6 = vweird.f32 %v10745_v5  ;;  %v7535_v5 = vld [vmem:[%s12535_s7 + $0x344] sm:$0xf]  ;;  %v7184_v61 = vld [vmem:[%s12535_s7 + $0x350] sm:$0xf0]  ;;  %v2344_v26 = vpop.xlane.xlu2 %2343 }
 0x375   : > { %13033 = vst [vmem:[#allocation65_spill] sm:$0xff] %v10902_v13  ;;  %v10908_v29 = vpop.eup %7679  ;;  %v3630_v19 = vadd.f32 %v9361_v32, %v3492_v1  ;;  %v3489_v62 = vmul.f32 %v9373_v46, %v3351_v33  ;;  %v6803_v27 = vor.u32 %v7439_v51, %v6800_v12  ;;  %v3493_v0 = vmul.f32 %v9373_v46, %v3355_v14  ;;  %vm3176_vm8 = vmor %vm3174_vm6, %vm3175_vm5  ;;  %v10951_v1 = vpop.f32.mrf.mxu3  ;;  %v13037_v14 = vld [vmem:[#allocation73_spill] sm:$0xff] }
 0x376   : > { %4661 = vmatmul.bf16.gmra.mxu2 %v10902_v13  ;;  %v3189_v22 = vmul.f32 %v10908_v29, %v10854_v30  ;;  %5053 = vmatpush.bf16.msra.mxu3 %v7059_v44  ;;  %v4712_v58 = vadd.f32 %v10805_v11, %v4623_v36  ;;  %v10925_v33 = vmul.f32 %v9127_v21, %v2339_v54  ;;  %vm3185_vm7 = vweird.f32 %v10813_v23  ;;  %v10953_v54 = vpop.f32.mrf.mxu1 }
 0x377   : > { %4964 = vmatpush.bf16.msra.mxu2 %v6931_v7  ;;  %v10922_v6 = vpack.c.bf16 %v3630_v19, %v3626_v4  ;;  %4875 = vmatpush.bf16.msra.mxu1 %v6803_v27  ;;  %v3627_v44 = vadd.f32 %v9375_v41, %v3489_v62  ;;  %v3631_v36 = vadd.f32 %v9375_v41, %v3493_v0  ;;  %vm3184_vm9 = vweird.f32 %v10765_v56  ;;  %v13039_v0 = vld [vmem:[#allocation72_spill] sm:$0xff] }
 0x378   : > { %v10929_v53 = vpop.eup %7681  ;;  %v10935_v11 = vadd.f32 %v10782_v20, %v4712_v58  ;;  %v3183_v51 = vmul.f32 %v10813_v23, %v3182_v16  ;;  %v3190_v12 = vmul.f32 %v10908_v29, %v3189_v22  ;;  %v2718_v17 = vmul.f32 %v2666_v57, %v9127_v21  ;;  %13036 = vst [vmem:[#allocation68_spill] sm:$0xff] %v10953_v54  ;;  %v13040_v57 = vld [vmem:[#allocation75_spill] sm:$0xff]  ;;  %vm3186_vm10 = vmor %vm3184_vm9, %vm3185_vm7 }
 0x379   : > { %13034 = vst [vmem:[#allocation69_spill] sm:$0xff] %v10922_v6  ;;  %v3199_v20 = vmul.f32 %v10929_v53, %v10871_v35  ;;  %4750 = vmatmul.bf16.gmra.mxu3 %v10922_v6  ;;  %v2876_v7 = vsub.f32 %v13037_v14, %v10684_v45  ;;  %v3177_v4 = vsel %vm3176_vm8, %v10776_v49, %v3173_v3  ;;  %v2671_v22 = vpop.xlane.xlu1 %2670  ;;  %vm3195_vm11 = vweird.f32 %v10908_v29 }
 0x37a   : > { %13035 = vst [vmem:[#allocation67_spill] sm:$0xff] %v10935_v11  ;;  %v10958_v19 = vpack.c.bf16 %v3631_v36, %v3627_v44  ;;  %v2750_v62 = vmul.f32 %v10925_v33, %v10925_v33  ;;  %v7187_v27 = vor.u32 %v7535_v5, %v7184_v61  ;;  %v2877_v58 = vsub.f32 %v13039_v0, %v10684_v45  ;;  %v13041_v5 = vld [vmem:[#allocation74_spill] sm:$0xff]  ;;  %v13043_v11 = vld [vmem:[#allocation79_spill] sm:$0xff] }
 0x37b   : > { %v3200_v16 = vmul.f32 %v10929_v53, %v3199_v20  ;;  %v2878_v54 = vsub.f32 %v13040_v57, %v10684_v45  ;;  %v10972_v56 = vmul.f32 %v9127_v21, %v2344_v26  ;;  %v3187_v49 = vsel %vm3186_vm10, %v10813_v23, %v3183_v51  ;;  %v13042_v20 = vld [vmem:[#allocation81_spill] sm:$0xff]  ;;  %v13044_v26 = vld [vmem:[#allocation82_spill] sm:$0xff] }
 0x37c   : > { %13038 = vst [vmem:[#allocation70_spill] sm:$0xff] %v10958_v19  ;;  %4839 = vmatmul.bf16.gmra.mxu0 %v10958_v19  ;;  %v3191_v3 = vmul.f32 0.5, %v3190_v12  ;;  %v2782_v44 = vsub.f32 %v2718_v17, %v2750_v62  ;;  %v3356_v36 = vmul.f32 %v3177_v4, %v2876_v7  ;;  %v2879_v61 = vsub.f32 %v13041_v5, %v10684_v45  ;;  %v13045_v23 = vld [vmem:[#allocation5_spill] sm:$0xff] }
 0x37d   : > { %5142 = vmatpush.bf16.msra.mxu0 %v7187_v27  ;;  %v2880_v14 = vsub.f32 %v13042_v20, %v10727_v52  ;;  %v3201_v0 = vmul.f32 0.5, %v3200_v16  ;;  %v2719_v57 = vmul.f32 %v2671_v22, %v9127_v21  ;;  %v2881_v19 = vsub.f32 %v13043_v11, %v10727_v52  ;;  %v10992_v16 = vpop.f32.mrf.mxu0  ;;  %v10997_v11 = vpop.f32.mrf.mxu2 }
 0x37e   : > { %v2882_v6 = vsub.f32 %v13044_v26, %v10727_v52  ;;  %v2883_v51 = vsub.f32 %v13045_v23, %v10727_v52  ;;  %v10986_v12 = vadd.f32 1e-05, %v2782_v44  ;;  %v2751_v45 = vmul.f32 %v10972_v56, %v10972_v56  ;;  %13046 = vst [vmem:[#allocation71_spill] sm:$0xff] %v10992_v16  ;;  %v11002_v26 = vpop.f32.mrf.mxu3 }
 0x37f   : > { %v3360_v17 = vmul.f32 %v3187_v49, %v2880_v14  ;;  %v3494_v7 = vmul.f32 %v9280_v28, %v3356_v36  ;;  %v3192_v62 = vsub.f32 1.5, %v3191_v3  ;;  %vm3194_vm12 = vweird.f32 %v10854_v30  ;;  %13047 = vst [vmem:[#allocation73_spill] sm:$0xff] %v10997_v11  ;;  %v11004_v23 = vpop.f32.mrf.mxu1 }
 0x380   : > { %vm3205_vm13 = vweird.f32 %v10929_v53  ;;  %7683 = vrsqrt.f32 %v10986_v12  ;;  %v3357_v52 = vmul.f32 %v3177_v4, %v2877_v58  ;;  %v3202_v27 = vsub.f32 1.5, %v3201_v0  ;;  %13048 = vst [vmem:[#allocation72_spill] sm:$0xff] %v11002_v26  ;;  %vm11042_vm14 = vmor %vm3194_vm12, %vm3195_vm11  ;;  %v13061_v26 = vld [vmem:[#allocation12_spill] sm:$0xff] }
 0x381   : > { %v2783_v22 = vsub.f32 %v2719_v57, %v2751_v45  ;;  %v3498_v44 = vmul.f32 %v9280_v28, %v3360_v17  ;;  %v3361_v5 = vmul.f32 %v3187_v49, %v2881_v19  ;;  %v3632_v20 = vadd.f32 %v9352_v24, %v3494_v7  ;;  %v2349_v45 = vpop.xlane.xlu2 %2348 }
 0x382   : > { %v3495_v36 = vmul.f32 %v9335_v38, %v3357_v52  ;;  %v3358_v14 = vmul.f32 %v3177_v4, %v2878_v54  ;;  %v3362_v3 = vmul.f32 %v3187_v49, %v2882_v6  ;;  %v3359_v57 = vmul.f32 %v3177_v4, %v2879_v61 }
 0x383   : > { %v11006_v16 = vadd.f32 1e-05, %v2783_v22  ;;  %v3636_v58 = vadd.f32 %v9352_v24, %v3498_v44  ;;  %v3499_v0 = vmul.f32 %v9335_v38, %v3361_v5  ;;  %v4539_v19 = vadd.f32 %v10878_v15, %v10615_v34 }
 0x384   : > { %v3496_v17 = vmul.f32 %v9355_v55, %v3358_v14  ;;  %v3500_v54 = vmul.f32 %v9355_v55, %v3362_v3  ;;  %v3363_v6 = vmul.f32 %v3187_v49, %v2883_v51  ;;  %v3633_v52 = vadd.f32 %v9359_v59, %v3495_v36  ;;  %v2676_v14 = vpop.xlane.xlu1 %2675 }
 0x385   : > { %7685 = vrsqrt.f32 %v11006_v16  ;;  %v11015_v7 = vpack.c.bf16 %v3636_v58, %v3632_v20  ;;  %v3637_v22 = vadd.f32 %v9359_v59, %v3499_v0  ;;  %v3497_v15 = vmul.f32 %v9373_v46, %v3359_v57 }
 0x386   : > { %v11019_v44 = vpop.eup %7683  ;;  %v3634_v4 = vadd.f32 %v9361_v32, %v3496_v17  ;;  %v3638_v61 = vadd.f32 %v9361_v32, %v3500_v54  ;;  %v3501_v5 = vmul.f32 %v9373_v46, %v3363_v6  ;;  %v3193_v49 = vmul.f32 %v10908_v29, %v3192_v62  ;;  %v13054_v17 = vld [vmem:[#allocation6_spill] sm:$0xff]  ;;  %v13055_v54 = vld [vmem:[#allocation7_spill] sm:$0xff] }
 0x387   : > { %13049 = vst [vmem:[#allocation75_spill] sm:$0xff] %v11015_v7  ;;  %v3203_v51 = vmul.f32 %v10929_v53, %v3202_v27  ;;  %4577 = vmatmul.bf16.gmra.mxu1 %v11015_v7  ;;  %v11028_v20 = vpack.c.bf16 %v3637_v22, %v3633_v52  ;;  %v4628_v36 = vadd.f32 %v10927_v18, %v4539_v19  ;;  %vm3204_vm15 = vweird.f32 %v10871_v35  ;;  %v11052_v19 = vpop.f32.mrf.mxu0  ;;  %v13056_v52 = vld [vmem:[#allocation83_spill] sm:$0xff] }
 0x388   : > { %v11031_v3 = vpack.c.bf16 %v3638_v61, %v3634_v4  ;;  %v3635_v58 = vadd.f32 %v9375_v41, %v3497_v15  ;;  %v3639_v0 = vadd.f32 %v9375_v41, %v3501_v5  ;;  %v11036_v57 = vmul.f32 %v9127_v21, %v2349_v45  ;;  %vm3206_vm0 = vmor %vm3204_vm15, %vm3205_vm13  ;;  %v11065_v4 = vpop.f32.mrf.mxu2 }
 0x389   : > { %13050 = vst [vmem:[#allocation74_spill] sm:$0xff] %v11028_v20  ;;  %v3209_v18 = vmul.f32 %v11019_v44, %v10986_v12  ;;  %4666 = vmatmul.bf16.gmra.mxu2 %v11028_v20  ;;  %v4717_v27 = vadd.f32 %v10951_v1, %v4628_v36  ;;  %v2720_v45 = vmul.f32 %v2676_v14, %v9127_v21  ;;  %v2354_v1 = vpop.xlane.xlu0 %2353  ;;  %vm3214_vm1 = vweird.f32 %v10986_v12 }
 0x38a   : > { %13051 = vst [vmem:[#allocation81_spill] sm:$0xff] %v11031_v3  ;;  %v2884_v30 = vsub.f32 %v13054_v17, %v10803_v42  ;;  %v2885_v6 = vsub.f32 %v13055_v54, %v10803_v42  ;;  %v2886_v35 = vsub.f32 %v13056_v52, %v10803_v42  ;;  %4755 = vmatmul.bf16.gmra.mxu3 %v11031_v3  ;;  %v13060_v54 = vld [vmem:[#allocation13_spill] sm:$0xff]  ;;  %v13065_v3 = vld [vmem:[#allocation16_spill] sm:$0xff]  ;;  %vm3215_vm2 = vweird.f32 %v11019_v44 }
 0x38b   : > { %v11063_v22 = vpack.c.bf16 %v3639_v0, %v3635_v58  ;;  %v11067_v61 = vpop.eup %7685  ;;  %v3197_v15 = vsel %vm11042_vm14, %v10908_v29, %v3193_v49  ;;  %v11073_v5 = vsel %vm3206_vm0, %v10929_v53, %v3203_v51  ;;  %v11076_v14 = vadd.f32 %v10919_v2, %v4717_v27  ;;  %v2681_v58 = vpop.xlane.xlu2 %2680  ;;  %v13059_v0 = vld [vmem:[#allocation8_spill] sm:$0xff]  ;;  %vm3216_vm5 = vmor %vm3214_vm1, %vm3215_vm2 }
 0x38c   : > { %v2752_v36 = vmul.f32 %v11036_v57, %v11036_v57  ;;  %v2887_v17 = vsub.f32 %v13059_v0, %v10803_v42  ;;  %v2888_v52 = vsub.f32 %v13060_v54, %v10823_v10  ;;  %v2889_v62 = vsub.f32 %v13061_v26, %v10823_v10  ;;  %v11089_v2 = vpop.f32.mrf.mxu3  ;;  %v11091_v53 = vpop.f32.mrf.mxu1  ;;  %v13063_v26 = vld [vmem:[#allocation14_spill] sm:$0xff] }
 0x38d   : > { %13057 = vst [vmem:[#allocation79_spill] sm:$0xff] %v11063_v22  ;;  %v3219_v29 = vmul.f32 %v11067_v61, %v11006_v16  ;;  %4844 = vmatmul.bf16.gmra.mxu0 %v11063_v22  ;;  %v2890_v49 = vsub.f32 %v9852_v37, %v10823_v10  ;;  %v3210_v42 = vmul.f32 %v11019_v44, %v3209_v18  ;;  %v13064_v22 = vld [vmem:[#allocation15_spill] sm:$0xff]  ;;  %v13070_v37 = vld [vmem:[#allocation21_spill] sm:$0xff]  ;;  %vm3224_vm3 = vweird.f32 %v11006_v16 }
 0x38e   : > { %13058 = vst [vmem:[#allocation82_spill] sm:$0xff] %v11076_v14  ;;  %v2784_v51 = vsub.f32 %v2720_v45, %v2752_v36  ;;  %v11097_v27 = vmul.f32 %v9127_v21, %v2354_v1  ;;  %v2891_v0 = vsub.f32 %v13063_v26, %v10823_v10  ;;  %v3364_v14 = vmul.f32 %v3197_v15, %v2884_v30  ;;  %v13066_v45 = vld [vmem:[#allocation17_spill] sm:$0xff]  ;;  %v13068_v30 = vld [vmem:[#allocation87_spill] sm:$0xff] }
 0x38f   : > { %13062 = vst [vmem:[#allocation5_spill] sm:$0xff] %v11091_v53  ;;  %v3220_v54 = vmul.f32 %v11067_v61, %v3219_v29  ;;  %v3368_v11 = vmul.f32 %v11073_v5, %v2888_v52  ;;  %v2721_v18 = vmul.f32 %v2681_v58, %v9127_v21  ;;  %v13067_v10 = vld [vmem:[#allocation85_spill] sm:$0xff]  ;;  %v13069_v52 = vld [vmem:[#allocation20_spill] sm:$0xff]  ;;  %v11118_v53 = vmul.f32 0.5, %v3210_v42  ;;  %v11131_v40 = vpop.f32.mrf.mxu0 }
 0x390   : > { %v11107_v20 = vadd.f32 1e-05, %v2784_v51  ;;  %v2753_v58 = vmul.f32 %v11097_v27, %v11097_v27  ;;  %v3502_v36 = vmul.f32 %v9280_v28, %v3364_v14  ;;  %v3365_v29 = vmul.f32 %v3197_v15, %v2885_v6  ;;  %13071 = vst [vmem:[#allocation6_spill] sm:$0xff] %v11131_v40  ;;  %v13072_v51 = vld [vmem:[#allocation22_spill] sm:$0xff]  ;;  %v11138_v8 = vpop.f32.mrf.mxu2 }
 0x391   : > { %v11125_v1 = vmul.f32 0.5, %v3220_v54  ;;  %v3506_v7 = vmul.f32 %v9280_v28, %v3368_v11  ;;  %v3369_v26 = vmul.f32 %v11073_v5, %v2889_v62  ;;  %v3366_v42 = vmul.f32 %v3197_v15, %v2886_v35  ;;  %13073 = vst [vmem:[#allocation7_spill] sm:$0xff] %v11138_v8 }
 0x392   : > { %7687 = vrsqrt.f32 %v11107_v20  ;;  %v2785_v13 = vsub.f32 %v2721_v18, %v2753_v58  ;;  %v3370_v31 = vmul.f32 %v11073_v5, %v2890_v49  ;;  %v3640_v60 = vadd.f32 %v9352_v24, %v3502_v36  ;;  %v7467_v49 = vld [vmem:[%s12535_s7 + $0x124] sm:$0xf] }
 0x393   : > { %v3644_v54 = vadd.f32 %v9352_v24, %v3506_v7  ;;  %v3503_v14 = vmul.f32 %v9335_v38, %v3365_v29  ;;  %v3507_v6 = vmul.f32 %v9335_v38, %v3369_v26  ;;  %v3504_v35 = vmul.f32 %v9355_v55, %v3366_v42  ;;  %v6912_v7 = vld [vmem:[%s12535_s7 + $0x130] sm:$0xf0] }
 0x394   : > { %v11140_v11 = vadd.f32 1e-05, %v2785_v13  ;;  %v3508_v62 = vmul.f32 %v9355_v55, %v3370_v31  ;;  %v3212_v18 = vsub.f32 1.5, %v11118_v53  ;;  %v4544_v13 = vadd.f32 %v11004_v23, %v10615_v34  ;;  %v7499_v31 = vld [vmem:[%s12535_s7 + $0x224] sm:$0xf]  ;;  %v11163_v58 = vpop.f32.mrf.mxu3 }
 0x395   : > { %v11155_v36 = vpack.c.bf16 %v3644_v54, %v3640_v60  ;;  %v3367_v29 = vmul.f32 %v3197_v15, %v2887_v17  ;;  %v7040_v26 = vld [vmem:[%s12535_s7 + $0x230] sm:$0xf0]  ;;  %13075 = vst [vmem:[#allocation8_spill] sm:$0xff] %v11163_v58  ;;  %v3222_v47 = vsub.f32 1.5, %v11125_v1  ;;  %v3641_v60 = vadd.f32 %v9359_v59, %v3503_v14  ;;  %v2359_v15 = vpop.xlane.xlu0 %2358  ;;  %v7435_v1 = vld [vmem:[%s12535_s7 + $0x24] sm:$0xf] }
 0x396   : > { %7689 = vrsqrt.f32 %v11140_v11  ;;  %v3645_v23 = vadd.f32 %v9359_v59, %v3507_v6  ;;  %v3642_v54 = vadd.f32 %v9361_v32, %v3504_v35  ;;  %v3646_v40 = vadd.f32 %v9361_v32, %v3508_v62  ;;  %v6784_v14 = vld [vmem:[%s12535_s7 + $0x30] sm:$0xf0]  ;;  %v7531_v62 = vld [vmem:[%s12535_s7 + $0x324] sm:$0xf] }
 0x397   : > { %13074 = vst [vmem:[#allocation83_spill] sm:$0xff] %v11155_v36  ;;  %v11165_v42 = vpop.f32.mrf.mxu1  ;;  %4582 = vmatmul.bf16.gmra.mxu1 %v11155_v36  ;;  %v3371_v58 = vmul.f32 %v11073_v5, %v2891_v0  ;;  %v3505_v8 = vmul.f32 %v9373_v46, %v3367_v29  ;;  %v6915_v50 = vor.u32 %v7467_v49, %v6912_v7  ;;  %v2686_v7 = vpop.xlane.xlu2 %2685  ;;  %vm3225_vm4 = vweird.f32 %v11067_v61 }
 0x398   : > { %v11167_v53 = vpop.eup %7687  ;;  %v11185_v6 = vpack.c.bf16 %v3645_v23, %v3641_v60  ;;  %v7043_v36 = vor.u32 %v7499_v31, %v7040_v26  ;;  %v11189_v25 = vpack.c.bf16 %v3646_v40, %v3642_v54  ;;  %v4633_v0 = vadd.f32 %v11065_v4, %v4544_v13  ;;  %v7168_v60 = vld [vmem:[%s12535_s7 + $0x330] sm:$0xf0]  ;;  %vm3226_vm6 = vmor %vm3224_vm3, %vm3225_vm4 }
 0x399   : > { %v3229_v17 = vmul.f32 %v11167_v53, %v11107_v20  ;;  %v3509_v5 = vmul.f32 %v9373_v46, %v3371_v58  ;;  %v3643_v40 = vadd.f32 %v9375_v41, %v3505_v8  ;;  %v6787_v49 = vor.u32 %v7435_v1, %v6784_v14  ;;  %4965 = vmatpush.bf16.msra.mxu2 %v6915_v50 }
 0x39a   : > { %13076 = vst [vmem:[#allocation13_spill] sm:$0xff] %v11189_v25  ;;  %4671 = vmatmul.bf16.gmra.mxu2 %v11185_v6  ;;  %5054 = vmatpush.bf16.msra.mxu3 %v7043_v36  ;;  %v4722_v29 = vadd.f32 %v11089_v2, %v4633_v0  ;;  %v11207_v31 = vmul.f32 %v9127_v21, %v2359_v15  ;;  %v2364_v26 = vpop.xlane.xlu1 %2363  ;;  %v13078_v0 = vld [vmem:[#allocation26_spill] sm:$0xff]  ;;  %vm3234_vm7 = vweird.f32 %v11107_v20  ;;  %vm3235_vm8 = vweird.f32 %v11167_v53 }
 0x39b   : > { %v3230_v35 = vmul.f32 %v11167_v53, %v3229_v17  ;;  %4760 = vmatmul.bf16.gmra.mxu3 %v11189_v25  ;;  %v3647_v13 = vadd.f32 %v9375_v41, %v3509_v5  ;;  %v3213_v23 = vmul.f32 %v11019_v44, %v3212_v18  ;;  %v3223_v8 = vmul.f32 %v11067_v61, %v3222_v47  ;;  %vm3236_vm11 = vmor %vm3234_vm7, %vm3235_vm8 }
 0x39c   : > { %v11209_v58 = vpop.eup %7689  ;;  %4876 = vmatpush.bf16.msra.mxu1 %v6787_v49  ;;  %v7171_v36 = vor.u32 %v7531_v62, %v7168_v60  ;;  %v2900_v50 = vsub.f32 %v10062_v39, %v11036_v57  ;;  %v2722_v54 = vmul.f32 %v2686_v7, %v9127_v21  ;;  %v11232_v14 = vadd.f32 %v11052_v19, %v4722_v29  ;;  %v13080_v29 = vld [vmem:[#allocation27_spill] sm:$0xff] }
 0x39d   : > { %v3231_v4 = vmul.f32 0.5, %v3230_v35  ;;  %v3239_v2 = vmul.f32 %v11209_v58, %v11140_v11  ;;  %v11220_v15 = vpack.c.bf16 %v3647_v13, %v3643_v40  ;;  %v11235_v35 = vmul.f32 %v9127_v21, %v2364_v26  ;;  %v2691_v5 = vpop.xlane.xlu0 %2690 }
 0x39e   : > { %v11214_v17 = vpop.f32.mrf.mxu0  ;;  %5143 = vmatpush.bf16.msra.mxu0 %v7171_v36  ;;  %v2754_v19 = vmul.f32 %v11207_v31, %v11207_v31  ;;  %v3217_v7 = vsel %vm3216_vm5, %v11019_v44, %v3213_v23  ;;  %v3227_v16 = vsel %vm3226_vm6, %v11067_v61, %v3223_v8  ;;  %vm3245_vm9 = vweird.f32 %v11209_v58 }
 0x39f   : > { %13077 = vst [vmem:[#allocation12_spill] sm:$0xff] %v11220_v15  ;;  %v3232_v18 = vsub.f32 1.5, %v3231_v4  ;;  %v3240_v60 = vmul.f32 %v11209_v58, %v3239_v2  ;;  %4849 = vmatmul.bf16.gmra.mxu0 %v11220_v15  ;;  %v4550_v49 = vpop.f32.mrf.mxu1  ;;  %v13079_v4 = vld [vmem:[#allocation89_spill] sm:$0xff]  ;;  %v2755_v44 = vmul.f32 %v11235_v35, %v11235_v35  ;;  %v2723_v61 = vmul.f32 %v2691_v5, %v9127_v21 }
 0x3a0   : > { %v11223_v1 = vpop.f32.mrf.mxu2  ;;  %v2786_v2 = vsub.f32 %v2722_v54, %v2754_v19  ;;  %v13081_v12 = vsub.f32 %v13064_v22, %v10925_v33  ;;  %v13084_v13 = vsub.f32 %v13069_v52, %v10972_v56  ;;  %v13085_v5 = vsub.f32 %v13066_v45, %v10925_v33 }
 0x3a1   : > { %v4726_v40 = vpop.f32.mrf.mxu3  ;;  %v3241_v36 = vmul.f32 0.5, %v3240_v60  ;;  %v3233_v62 = vmul.f32 %v11167_v53, %v3232_v18  ;;  %v13082_v60 = vsub.f32 %v13068_v30, %v10972_v56  ;;  %v2787_v19 = vsub.f32 %v2723_v61, %v2755_v44 }
 0x3a2   : > { %v11262_v8 = vadd.f32 1e-05, %v2786_v2  ;;  %v3372_v26 = vmul.f32 %v3217_v7, %v13081_v12  ;;  %v13083_v18 = vsub.f32 %v13065_v3, %v10925_v33  ;;  %v3377_v21 = vmul.f32 %v3227_v16, %v13084_v13 }
 0x3a3   : > { %v3242_v23 = vsub.f32 1.5, %v3241_v36  ;;  %v3376_v54 = vmul.f32 %v3227_v16, %v13082_v60  ;;  %v3374_v36 = vmul.f32 %v3217_v7, %v13085_v5  ;;  %vm3244_vm10 = vweird.f32 %v11140_v11 }
 0x3a4   : > { %v3373_v47 = vmul.f32 %v3217_v7, %v13083_v18  ;;  %7691 = vrsqrt.f32 %v11262_v8  ;;  %v3510_v30 = vmul.f32 %v9280_v28, %v3372_v26  ;;  %v11287_v3 = vadd.f32 1e-05, %v2787_v19  ;;  %vm3246_vm12 = vmor %vm3244_vm10, %vm3245_vm9 }
 0x3a5   : > { %v3243_v22 = vmul.f32 %v11209_v58, %v3242_v23  ;;  %v3514_v52 = vmul.f32 %v9280_v28, %v3376_v54  ;;  %v3515_v12 = vmul.f32 %v9335_v38, %v3377_v21  ;;  %v11295_v11 = vsel %vm3236_vm11, %v11167_v53, %v3233_v62 }
 0x3a6   : > { %v3511_v45 = vmul.f32 %v9335_v38, %v3373_v47  ;;  %v11292_v13 = vpop.f32.mrf.mxu0  ;;  %v4549_v20 = vadd.f32 %v11165_v42, %v10615_v34  ;;  %v13086_v26 = vsub.f32 %v13070_v37, %v10972_v56  ;;  %v3512_v44 = vmul.f32 %v9355_v55, %v3374_v36 }
 0x3a7   : > { %v11306_v61 = vsel %vm3246_vm12, %v11209_v58, %v3243_v22  ;;  %7693 = vrsqrt.f32 %v11287_v3  ;;  %v3648_v53 = vadd.f32 %v9352_v24, %v3510_v30  ;;  %v3652_v62 = vadd.f32 %v9352_v24, %v3514_v52 }
 0x3a8   : > { %v3378_v2 = vmul.f32 %v3227_v16, %v13086_v26  ;;  %v4639_v47 = vpop.f32.mrf.mxu2  ;;  %v3649_v23 = vadd.f32 %v9359_v59, %v3511_v45  ;;  %v3653_v42 = vadd.f32 %v9359_v59, %v3515_v12  ;;  %v13087_v37 = vsub.f32 %v13067_v10, %v10925_v33 }
 0x3a9   : > { %v4728_v19 = vpop.f32.mrf.mxu3  ;;  %v11317_v58 = vpack.c.bf16 %v3652_v62, %v3648_v53  ;;  %v3650_v21 = vadd.f32 %v9361_v32, %v3512_v44  ;;  %v13088_v5 = vsub.f32 %v13072_v51, %v10972_v56  ;;  %v4638_v22 = vadd.f32 %v11223_v1, %v4549_v20 }
 0x3aa   : > { %v3516_v60 = vmul.f32 %v9355_v55, %v3378_v2  ;;  %v3375_v54 = vmul.f32 %v3217_v7, %v13087_v37  ;;  %v11324_v30 = vpop.eup %7691  ;;  %v11326_v52 = vpack.c.bf16 %v3653_v42, %v3649_v23  ;;  %v4551_v10 = vadd.f32 %v4550_v49, %v10615_v34  ;;  %v13092_v37 = vld [vmem:[#allocation96_spill] sm:$0xff] }
 0x3ab   : > { %v3379_v36 = vmul.f32 %v3227_v16, %v13088_v5  ;;  %v2906_v7 = vsub.f32 %v10201_v9, %v11097_v27  ;;  %v3249_v12 = vmul.f32 %v11324_v30, %v11262_v8  ;;  %4587 = vmatmul.bf16.gmra.mxu1 %v11317_v58  ;;  %v4727_v51 = vadd.f32 %v4726_v40, %v4638_v22 }
 0x3ac   : > { %v3654_v45 = vadd.f32 %v9361_v32, %v3516_v60  ;;  %v3513_v33 = vmul.f32 %v9373_v46, %v3375_v54  ;;  %4676 = vmatmul.bf16.gmra.mxu2 %v11326_v52  ;;  %v4640_v20 = vadd.f32 %v4639_v47, %v4551_v10  ;;  %v3380_v9 = vmul.f32 %v11295_v11, %v2900_v50 }
 0x3ad   : > { %v4553_v18 = vpop.f32.mrf.mxu1  ;;  %v3517_v56 = vmul.f32 %v9373_v46, %v3379_v36  ;;  %v11345_v49 = vpop.eup %7693  ;;  %v3250_v26 = vmul.f32 %v11324_v30, %v3249_v12  ;;  %v11350_v40 = vadd.f32 %v11214_v17, %v4727_v51  ;;  %v13090_v44 = vsub.f32 %v13079_v4, %v11097_v27 }
 0x3ae   : > { %v11338_v1 = vpack.c.bf16 %v3654_v45, %v3650_v21  ;;  %v3651_v16 = vadd.f32 %v9375_v41, %v3513_v33  ;;  %v2907_v47 = vsub.f32 %v10211_v63, %v11097_v27  ;;  %v3259_v39 = vmul.f32 %v11345_v49, %v11287_v3 }
 0x3af   : > { %v3655_v2 = vadd.f32 %v9375_v41, %v3517_v56  ;;  %v3384_v53 = vmul.f32 %v11306_v61, %v13090_v44  ;;  %v11361_v50 = vadd.f32 %v4728_v19, %v4640_v20  ;;  %v3518_v62 = vmul.f32 %v9280_v28, %v3380_v9  ;;  %v7024_v44 = vld [vmem:[%s12535_s7 + $0x210] sm:$0xf0] }
 0x3b0   : > { %13089 = vst [vmem:[#allocation14_spill] sm:$0xff] %v11338_v1  ;;  %4765 = vmatmul.bf16.gmra.mxu3 %v11338_v1  ;;  %v3251_v23 = vmul.f32 0.5, %v3250_v26  ;;  %v13091_v60 = vsub.f32 %v10068_v48, %v11036_v57  ;;  %v2912_v54 = vsub.f32 %v13092_v37, %v11235_v35  ;;  %v3260_v19 = vmul.f32 %v11345_v49, %v3259_v39 }
 0x3b1   : > { %v11364_v17 = vpack.c.bf16 %v3655_v2, %v3651_v16  ;;  %v3522_v4 = vmul.f32 %v9280_v28, %v3384_v53  ;;  %vm3264_vm13 = vweird.f32 %v11287_v3  ;;  %v13093_v21 = vsub.f32 %v13080_v29, %v11097_v27  ;;  %v7463_v16 = vld [vmem:[%s12535_s7 + $0x104] sm:$0xf] }
 0x3b2   : > { %v3381_v63 = vmul.f32 %v11295_v11, %v13091_v60  ;;  %v3252_v45 = vsub.f32 1.5, %v3251_v23  ;;  %v4554_v48 = vadd.f32 %v4553_v18, %v10615_v34  ;;  %v13094_v10 = vsub.f32 %v10141_v43, %v11036_v57  ;;  %v6896_v18 = vld [vmem:[%s12535_s7 + $0x110] sm:$0xf0]  ;;  %v7495_v2 = vld [vmem:[%s12535_s7 + $0x204] sm:$0xf] }
 0x3b3   : > { %v3385_v5 = vmul.f32 %v11306_v61, %v13093_v21  ;;  %4854 = vmatmul.bf16.gmra.mxu0 %v11364_v17  ;;  %v3660_v33 = vadd.f32 %v9352_v24, %v3522_v4  ;;  %v3261_v56 = vmul.f32 0.5, %v3260_v19  ;;  %v3386_v51 = vmul.f32 %v11306_v61, %v2906_v7  ;;  %v7527_v21 = vld [vmem:[%s12535_s7 + $0x304] sm:$0xf] }
 0x3b4   : > { %v3382_v12 = vmul.f32 %v11295_v11, %v13094_v10  ;;  %v3519_v27 = vmul.f32 %v9335_v38, %v3381_v63  ;;  %vm3265_vm14 = vweird.f32 %v11345_v49  ;;  %v3656_v43 = vadd.f32 %v9352_v24, %v3518_v62 }
 0x3b5   : > { %v11366_v42 = vpop.f32.mrf.mxu0  ;;  %v11381_v22 = vpop.f32.mrf.mxu1  ;;  %v3523_v29 = vmul.f32 %v9335_v38, %v3385_v5  ;;  %v13095_v26 = vsub.f32 %v13078_v0, %v11036_v57  ;;  %v3262_v53 = vsub.f32 1.5, %v3261_v56  ;;  %v3524_v62 = vmul.f32 %v9355_v55, %v3386_v51  ;;  %v7431_v57 = vld [vmem:[%s12535_s7 + $0x4] sm:$0xf]  ;;  %v6768_v0 = vld [vmem:[%s12535_s7 + $0x10] sm:$0xf0]  ;;  %vm3266_vm0 = vmor %vm3264_vm13, %vm3265_vm14 }
 0x3b6   : > { %v4642_v36 = vpop.f32.mrf.mxu2  ;;  %v3520_v9 = vmul.f32 %v9355_v55, %v3382_v12  ;;  %v3387_v23 = vmul.f32 %v11306_v61, %v2907_v47  ;;  %vm3255_vm15 = vweird.f32 %v11324_v30  ;;  %v11423_v4 = vpack.c.bf16 %v3660_v33, %v3656_v43  ;;  %v7152_v5 = vld [vmem:[%s12535_s7 + $0x310] sm:$0xf0] }
 0x3b7   : > { %v3383_v7 = vmul.f32 %v11295_v11, %v13095_v26  ;;  %v3661_v39 = vadd.f32 %v9359_v59, %v3523_v29  ;;  %v3253_v11 = vmul.f32 %v11324_v30, %v3252_v45  ;;  %v6899_v60 = vor.u32 %v7463_v16, %v6896_v18  ;;  %v13097_v26 = vld [vmem:[#allocation94_spill] sm:$0xff] }
 0x3b8   : > { %v4731_v20 = vpop.f32.mrf.mxu3  ;;  %v3263_v63 = vmul.f32 %v11345_v49, %v3262_v53  ;;  %v3657_v19 = vadd.f32 %v9359_v59, %v3519_v27  ;;  %v3662_v61 = vadd.f32 %v9361_v32, %v3524_v62  ;;  %v3525_v47 = vmul.f32 %v9373_v46, %v3387_v23  ;;  %v13100_v62 = vld [vmem:[#allocation98_spill] sm:$0xff] }
 0x3b9   : > { %v3521_v45 = vmul.f32 %v9373_v46, %v3383_v7  ;;  %4966 = vmatpush.bf16.msra.mxu2 %v6899_v60  ;;  %v7027_v33 = vor.u32 %v7495_v2, %v7024_v44  ;;  %v4643_v10 = vadd.f32 %v4642_v36, %v4554_v48  ;;  %v6771_v12 = vor.u32 %v7431_v57, %v6768_v0 }
 0x3ba   : > { %vm3254_vm1 = vweird.f32 %v11262_v8  ;;  %v3267_v27 = vsel %vm3266_vm0, %v11345_v49, %v3263_v63  ;;  %v11444_v29 = vpack.c.bf16 %v3661_v39, %v3657_v19  ;;  %v3658_v51 = vadd.f32 %v9361_v32, %v3520_v9  ;;  %v13096_v8 = vld [vmem:[#allocation29_spill] sm:$0xff] }
 0x3bb   : > { %vm3256_vm2 = vmor %vm3254_vm1, %vm3255_vm15  ;;  %v3663_v3 = vadd.f32 %v9375_v41, %v3525_v47  ;;  %5055 = vmatpush.bf16.msra.mxu3 %v7027_v33  ;;  %v4732_v36 = vadd.f32 %v4731_v20, %v4643_v10  ;;  %4877 = vmatpush.bf16.msra.mxu1 %v6771_v12  ;;  %v7155_v48 = vor.u32 %v7527_v21, %v7152_v5  ;;  %v13103_v10 = vld [vmem:[#allocation30_spill] sm:$0xff] }
 0x3bc   : > { %v2908_v43 = vsub.f32 %v13096_v8, %v11207_v31  ;;  %v3257_v49 = vsel %vm3256_vm2, %v11324_v30, %v3253_v11  ;;  %v2913_v9 = vsub.f32 %v13097_v26, %v11235_v35  ;;  %v11457_v7 = vpack.c.bf16 %v3662_v61, %v3658_v51  ;;  %4592 = vmatmul.bf16.gmra.mxu1 %v11423_v4  ;;  %v13099_v30 = vld [vmem:[#allocation90_spill] sm:$0xff] }
 0x3bd   : > { %v11440_v56 = vpop.f32.mrf.mxu0  ;;  %v3659_v44 = vadd.f32 %v9375_v41, %v3521_v45  ;;  %v11464_v20 = vadd.f32 %v11366_v42, %v4732_v36  ;;  %5144 = vmatpush.bf16.msra.mxu0 %v7155_v48  ;;  %v3392_v53 = vmul.f32 %v3267_v27, %v2912_v54  ;;  %v2909_v39 = vsub.f32 %v13099_v30, %v11207_v31  ;;  %v13101_v42 = vld [vmem:[#allocation91_spill] sm:$0xff]  ;;  %v6886_v26 = vld [vmem:[%s12535_s7 + $0xe8] sm:$0xf] }
 0x3be   : > { %v11447_v16 = vpop.f32.mrf.mxu2  ;;  %v4558_v18 = vpop.f32.mrf.mxu1  ;;  %13098 = vst [vmem:[#allocation15_spill] sm:$0xff] %v11457_v7  ;;  %v2914_v23 = vsub.f32 %v13100_v62, %v11235_v35  ;;  %4681 = vmatmul.bf16.gmra.mxu2 %v11444_v29  ;;  %v3393_v57 = vmul.f32 %v3267_v27, %v2913_v9  ;;  %v3388_v11 = vmul.f32 %v3257_v49, %v2908_v43  ;;  %v13102_v54 = vld [vmem:[#allocation99_spill] sm:$0xff]  ;;  %v7526_v43 = vld [vmem:[%s12535_s7 + $0x2f4] sm:$0xf0] }
 0x3bf   : > { %v11474_v0 = vpack.c.bf16 %v3663_v3, %v3659_v44  ;;  %v2910_v60 = vsub.f32 %v13101_v42, %v11207_v31  ;;  %v3389_v63 = vmul.f32 %v3257_v49, %v2909_v39  ;;  %v2915_v19 = vsub.f32 %v13102_v54, %v11235_v35  ;;  %v7014_v35 = vld [vmem:[%s12535_s7 + $0x1e8] sm:$0xf]  ;;  %v7462_v9 = vld [vmem:[%s12535_s7 + $0xf4] sm:$0xf0] }
 0x3c0   : > { %v11459_v2 = vpop.f32.mrf.mxu3  ;;  %4770 = vmatmul.bf16.gmra.mxu3 %v11457_v7  ;;  %v3394_v37 = vmul.f32 %v3267_v27, %v2914_v23  ;;  %v4559_v61 = vadd.f32 %v4558_v18, %v10615_v34  ;;  %v3530_v21 = vmul.f32 %v9280_v28, %v3392_v53  ;;  %v3531_v5 = vmul.f32 %v9335_v38, %v3393_v57  ;;  %v7494_v18 = vld [vmem:[%s12535_s7 + $0x1f4] sm:$0xf0]  ;;  %v7270_v39 = vld [vmem:[%s12535_s7 + $0x3e8] sm:$0xf] }
 0x3c1   : > { %v3390_v45 = vmul.f32 %v3257_v49, %v2910_v60  ;;  %v2911_v12 = vsub.f32 %v13103_v10, %v11207_v31  ;;  %v3526_v51 = vmul.f32 %v9280_v28, %v3388_v11  ;;  %v3395_v3 = vmul.f32 %v3267_v27, %v2915_v19  ;;  %v7142_v31 = vld [vmem:[%s12535_s7 + $0x2e8] sm:$0xf]  ;;  %v7558_v62 = vld [vmem:[%s12535_s7 + $0x3f4] sm:$0xf0] }
 0x3c2   : > { %v3527_v8 = vmul.f32 %v9335_v38, %v3389_v63  ;;  %v3532_v28 = vmul.f32 %v9355_v55, %v3394_v37  ;;  %v7015_v27 = vor.u32 %v7494_v18, %v7014_v35  ;;  %v3668_v44 = vadd.f32 %v9352_v24, %v3530_v21 }
 0x3c3   : > { %4859 = vmatmul.bf16.gmra.mxu0 %v11474_v0  ;;  %v3391_v53 = vmul.f32 %v3257_v49, %v2911_v12  ;;  %v7143_v30 = vor.u32 %v7526_v43, %v7142_v31  ;;  %v6887_v38 = vor.u32 %v7462_v9, %v6886_v26  ;;  %v3669_v23 = vadd.f32 %v9359_v59, %v3531_v5  ;;  %v13106_v43 = vld [vmem:[#allocation63_spill] sm:$0xff] }
 0x3c4   : > { %v3528_v57 = vmul.f32 %v9355_v55, %v3390_v45  ;;  %5315 = vmatpush.bf16.msrb.mxu2 %v7015_v27  ;;  %v7271_v42 = vor.u32 %v7558_v62, %v7270_v39  ;;  %v3664_v60 = vadd.f32 %v9352_v24, %v3526_v51  ;;  %v3533_v49 = vmul.f32 %v9373_v46, %v3395_v3  ;;  %v7126_v39 = vld [vmem:[%s12535_s7 + $0x2c8] sm:$0xf] }
 0x3c5   : > { %v4825_v47 = vpop.f32.mrf.mxu0  ;;  %5404 = vmatpush.bf16.msrb.mxu3 %v7143_v30  ;;  %5226 = vmatpush.bf16.msrb.mxu1 %v6887_v38  ;;  %v3665_v37 = vadd.f32 %v9359_v59, %v3527_v8  ;;  %v3670_v54 = vadd.f32 %v9361_v32, %v3532_v28  ;;  %v13105_v28 = vld [vmem:[#allocation62_spill] sm:$0xff]  ;;  %v7490_v38 = vld [vmem:[%s12535_s7 + $0x1d4] sm:$0xf0] }
 0x3c6   : > { %v4647_v33 = vpop.f32.mrf.mxu2  ;;  %v11488_v48 = vpop.f32.mrf.mxu1  ;;  %5493 = vmatpush.bf16.msrb.mxu0 %v7271_v42  ;;  %v11523_v19 = vpack.c.bf16 %v3668_v44, %v3664_v60  ;;  %v3666_v24 = vadd.f32 %v9361_v32, %v3528_v57  ;;  %v13107_v44 = vld [vmem:[#allocation64_spill] sm:$0xff]  ;;  %v6998_v30 = vld [vmem:[%s12535_s7 + $0x1c8] sm:$0xf] }
 0x3c7   : > { %v4648_v36 = vadd.f32 %v4647_v33, %v4559_v61  ;;  %v3529_v61 = vmul.f32 %v9373_v46, %v3391_v53  ;;  %v11530_v5 = vpack.c.bf16 %v3669_v23, %v3665_v37  ;;  %v3671_v33 = vadd.f32 %v9375_v41, %v3533_v49  ;;  %v13108_v53 = vld [vmem:[#allocation66_spill] sm:$0xff]  ;;  %v7522_v57 = vld [vmem:[%s12535_s7 + $0x2d4] sm:$0xf0] }
 0x3c8   : > { %v11536_v10 = vpack.c.bf16 %v3670_v54, %v3666_v24  ;;  %v6999_v23 = vor.u32 %v7490_v38, %v6998_v30  ;;  %v7458_v42 = vld [vmem:[%s12535_s7 + $0xd4] sm:$0xf0]  ;;  %v7127_v60 = vor.u32 %v7522_v57, %v7126_v39  ;;  %v13112_v30 = vld [vmem:[#allocation78_spill] sm:$0xff] }
 0x3c9   : > { %v4736_v11 = vpop.f32.mrf.mxu3  ;;  %v3667_v12 = vadd.f32 %v9375_v41, %v3529_v61  ;;  %v7554_v37 = vld [vmem:[%s12535_s7 + $0x3d4] sm:$0xf0] }
 0x3ca   : > { %v4737_v63 = vadd.f32 %v4736_v11, %v4648_v36  ;;  %13104 = vst [vmem:[#allocation16_spill] sm:$0xff] %v11536_v10  ;;  %v6870_v11 = vld [vmem:[%s12535_s7 + $0xc8] sm:$0xf]  ;;  %5316 = vmatpush.bf16.msrb.mxu2 %v6999_v23  ;;  %5405 = vmatpush.bf16.msrb.mxu3 %v7127_v60 }
 0x3cb   : > { %v6871_v49 = vor.u32 %v7458_v42, %v6870_v11  ;;  %v13113_v11 = vld [vmem:[#allocation80_spill] sm:$0xff] }
 0x3cc   : > { %v11526_v55 = vadd.f32 %v4825_v47, %v4737_v63  ;;  %4597 = vmatmul.bf16.gmra.mxu1 %v11523_v19  ;;  %v11543_v47 = vpack.c.bf16 %v3671_v33, %v3667_v12  ;;  %v7254_v63 = vld [vmem:[%s12535_s7 + $0x3c8] sm:$0xf] }
 0x3cd   : > { %v11528_v21 = vpop.f32.mrf.mxu0  ;;  %v7255_v61 = vor.u32 %v7554_v37, %v7254_v63  ;;  %5227 = vmatpush.bf16.msrb.mxu1 %v6871_v49 }
 0x3ce   : > { %v11533_v45 = vpop.f32.mrf.mxu2  ;;  %v4563_v59 = vpop.f32.mrf.mxu1  ;;  %4686 = vmatmul.bf16.gmra.mxu2 %v11530_v5 }
 0x3cf   : > { %v4564_v51 = vadd.f32 %v4563_v59, %v10615_v34  ;;  %5494 = vmatpush.bf16.msrb.mxu0 %v7255_v61 }
 0x3d0   : > { %4775 = vmatmul.bf16.gmra.mxu3 %v11536_v10 }
 0x3d1   : > { %v11541_v46 = vpop.f32.mrf.mxu3 }
 0x3d3   : > { %4864 = vmatmul.bf16.gmra.mxu0 %v11543_v47 }
 0x3d5   : > { %v4830_v32 = vpop.f32.mrf.mxu0 }
 0x3d6   : > { %v4652_v3 = vpop.f32.mrf.mxu2  ;;  %v11548_v35 = vpop.f32.mrf.mxu1 }
 0x3d7   : > { %v4653_v36 = vadd.f32 %v4652_v3, %v4564_v51  ;;  %v13110_v3 = vld [vmem:[#allocation76_spill] sm:$0xff] }
 0x3d9   : > { %v4741_v18 = vpop.f32.mrf.mxu3 }
 0x3da   : > { %v4742_v31 = vadd.f32 %v4741_v18, %v4653_v36  ;;  %v13111_v36 = vld [vmem:[#allocation77_spill] sm:$0xff] }
 0x3dc   : > { %v11550_v41 = vadd.f32 %v4830_v32, %v4742_v31  ;;  %4878 = vmatmul.bf16.vlgmr.msra.gmra.mxu1 %v13105_v28 }
 0x3dd   : > { %v11552_v8 = vpop.f32.mrf.mxu0 }
 0x3de   : > { %v11555_v27 = vpop.f32.mrf.mxu2  ;;  %4967 = vmatmul.bf16.vlgmr.msra.gmra.mxu2 %v13106_v43 }
 0x3e0   : > { %5056 = vmatmul.bf16.vlgmr.msra.gmra.mxu3 %v13107_v44 }
 0x3e1   : > { %v11558_v26 = vpop.f32.mrf.mxu3  ;;  %v4568_v9 = vpop.f32.mrf.mxu1 }
 0x3e2   : > { %v4569_v54 = vadd.f32 %v4568_v9, %v10615_v34 }
 0x3e3   : > { %5145 = vmatmul.bf16.vlgmr.msra.gmra.mxu0 %v13108_v53 }
 0x3e6   : > { %v4835_v62 = vpop.f32.mrf.mxu0 }
 0x3e9   : > { %v4657_v24 = vpop.f32.mrf.mxu2  ;;  %v4570_v33 = vpop.f32.mrf.mxu1 }
 0x3ea   : > { %v4658_v59 = vadd.f32 %v4657_v24, %v4569_v54  ;;  %v4746_v12 = vpop.f32.mrf.mxu3  ;;  %v4571_v18 = vadd.f32 %v4570_v33, %v10615_v34  ;;  %v13115_v24 = vld [vmem:[#allocation9_spill] sm:$0xff]  ;;  %v13116_v33 = vld [vmem:[#allocation10_spill] sm:$0xff] }
 0x3ec   : > { %v4747_v32 = vadd.f32 %v4746_v12, %v4658_v59  ;;  %4883 = vmatmul.bf16.gmra.mxu1 %v13110_v3 }
 0x3ee   : > { %v11587_v51 = vadd.f32 %v4835_v62, %v4747_v32  ;;  %4972 = vmatmul.bf16.gmra.mxu2 %v13111_v36  ;;  %v4837_v31 = vpop.f32.mrf.mxu0 }
 0x3f0   : > { %13109 = vst [vmem:[#allocation17_spill] sm:$0xff] %v11587_v51  ;;  %5061 = vmatmul.bf16.gmra.mxu3 %v13112_v30 }
 0x3f1   : > { %v4659_v9 = vpop.f32.mrf.mxu2  ;;  %v4573_v39 = vpop.f32.mrf.mxu1 }
 0x3f2   : > { %v4660_v38 = vadd.f32 %v4659_v9, %v4571_v18  ;;  %v4748_v23 = vpop.f32.mrf.mxu3  ;;  %v4574_v62 = vadd.f32 %v4573_v39, %v10615_v34  ;;  %v13118_v18 = vld [vmem:[#allocation84_spill] sm:$0xff] }
 0x3f3   : > { %5150 = vmatmul.bf16.gmra.mxu0 %v13113_v11  ;;  %v13158_v11 = vld [vmem:[#allocation40_spill] sm:$0xff] }
 0x3f4   : > { %v4749_v57 = vadd.f32 %v4748_v23, %v4660_v38  ;;  %v13119_v38 = vld [vmem:[#allocation11_spill] sm:$0xff]  ;;  %v6982_v23 = vld [vmem:[%s12535_s7 + $0x1a8] sm:$0xf] }
 0x3f6   : > { %v11594_v42 = vadd.f32 %v4837_v31, %v4749_v57  ;;  %v7486_v57 = vld [vmem:[%s12535_s7 + $0x1b4] sm:$0xf0] }
 0x3f8   : > { %13114 = vst [vmem:[#allocation85_spill] sm:$0xff] %v11594_v42  ;;  %v13122_v42 = vld [vmem:[#allocation19_spill] sm:$0xff] }
 0x3f9   : > { %v4662_v60 = vpop.f32.mrf.mxu2  ;;  %v4840_v49 = vpop.f32.mrf.mxu0 }
 0x3fa   : > { %v4663_v63 = vadd.f32 %v4662_v60, %v4574_v62  ;;  %v4575_v37 = vpop.f32.mrf.mxu1  ;;  %v7110_v62 = vld [vmem:[%s12535_s7 + $0x2a8] sm:$0xf] }
 0x3fb   : > { %v4576_v12 = vadd.f32 %v4575_v37, %v10615_v34  ;;  %v7518_v37 = vld [vmem:[%s12535_s7 + $0x2b4] sm:$0xf0] }
 0x3fc   : > { %v4751_v54 = vpop.f32.mrf.mxu3  ;;  %4888 = vmatmul.bf16.gmra.mxu1 %v13115_v24  ;;  %v13123_v24 = vld [vmem:[#allocation86_spill] sm:$0xff] }
 0x3fd   : > { %v4752_v61 = vadd.f32 %v4751_v54, %v4663_v63  ;;  %v6983_v63 = vor.u32 %v7486_v57, %v6982_v23  ;;  %v6854_v54 = vld [vmem:[%s12535_s7 + $0xa8] sm:$0xf] }
 0x3fe   : > { %4977 = vmatmul.bf16.gmra.mxu2 %v13116_v33 }
 0x3ff   : > { %v11599_v59 = vadd.f32 %v4840_v49, %v4752_v61  ;;  %v7454_v61 = vld [vmem:[%s12535_s7 + $0xb4] sm:$0xf0]  ;;  %5317 = vmatpush.bf16.msrb.mxu2 %v6983_v63 }
 0x400   : > { %5066 = vmatmul.bf16.gmra.mxu3 %v13118_v18 }
 0x401   : > { %13117 = vst [vmem:[#allocation87_spill] sm:$0xff] %v11599_v59  ;;  %v4664_v32 = vpop.f32.mrf.mxu2  ;;  %v4842_v31 = vpop.f32.mrf.mxu0 }
 0x402   : > { %v4665_v9 = vadd.f32 %v4664_v32, %v4576_v12  ;;  %v7111_v12 = vor.u32 %v7518_v37, %v7110_v62  ;;  %v6855_v32 = vor.u32 %v7454_v61, %v6854_v54  ;;  %v13121_v54 = vld [vmem:[#allocation18_spill] sm:$0xff] }
 0x403   : > { %5155 = vmatmul.bf16.gmra.mxu0 %v13119_v38 }
 0x404   : > { %v4753_v39 = vpop.f32.mrf.mxu3  ;;  %v4578_v49 = vpop.f32.mrf.mxu1  ;;  %5406 = vmatpush.bf16.msrb.mxu3 %v7111_v12  ;;  %5228 = vmatpush.bf16.msrb.mxu1 %v6855_v32 }
 0x405   : > { %v4754_v60 = vadd.f32 %v4753_v39, %v4665_v9  ;;  %v7238_v9 = vld [vmem:[%s12535_s7 + $0x3a8] sm:$0xf]  ;;  %v7550_v39 = vld [vmem:[%s12535_s7 + $0x3b4] sm:$0xf0]  ;;  %v4579_v38 = vadd.f32 %v4578_v49, %v10615_v34 }
 0x406   : > { %v7239_v57 = vor.u32 %v7550_v39, %v7238_v9 }
 0x407   : > { %v11628_v23 = vadd.f32 %v4842_v31, %v4754_v60  ;;  %v13125_v60 = vld [vmem:[#allocation88_spill] sm:$0xff] }
 0x408   : > { %5495 = vmatpush.bf16.msrb.mxu0 %v7239_v57 }
 0x409   : > { %13120 = vst [vmem:[#allocation20_spill] sm:$0xff] %v11628_v23 }
 0x40a   : > { %v4845_v59 = vpop.f32.mrf.mxu0 }
 0x40c   : > { %v4667_v62 = vpop.f32.mrf.mxu2  ;;  %v4580_v37 = vpop.f32.mrf.mxu1  ;;  %4893 = vmatmul.bf16.gmra.mxu1 %v13121_v54 }
 0x40d   : > { %v4668_v61 = vadd.f32 %v4667_v62, %v4579_v38  ;;  %v4756_v18 = vpop.f32.mrf.mxu3  ;;  %v4581_v63 = vadd.f32 %v4580_v37, %v10615_v34 }
 0x40e   : > { %4982 = vmatmul.bf16.gmra.mxu2 %v13122_v42  ;;  %v13136_v42 = vld [vmem:[#allocation97_spill] sm:$0xff] }
 0x40f   : > { %v4757_v33 = vadd.f32 %v4756_v18, %v4668_v61  ;;  %v13127_v18 = vld [vmem:[#allocation23_spill] sm:$0xff]  ;;  %v13128_v61 = vld [vmem:[#allocation24_spill] sm:$0xff] }
 0x410   : > { %5071 = vmatmul.bf16.gmra.mxu3 %v13123_v24 }
 0x411   : > { %v11634_v31 = vadd.f32 %v4845_v59, %v4757_v33 }
 0x412   : > { %v4847_v12 = vpop.f32.mrf.mxu0 }
 0x413   : > { %13124 = vst [vmem:[#allocation21_spill] sm:$0xff] %v11634_v31  ;;  %5160 = vmatmul.bf16.gmra.mxu0 %v13125_v60  ;;  %v13129_v60 = vld [vmem:[#allocation25_spill] sm:$0xff] }
 0x414   : > { %v4669_v32 = vpop.f32.mrf.mxu2  ;;  %v4583_v39 = vpop.f32.mrf.mxu1 }
 0x415   : > { %v4670_v49 = vadd.f32 %v4669_v32, %v4581_v63  ;;  %v4758_v9 = vpop.f32.mrf.mxu3  ;;  %v4584_v38 = vadd.f32 %v4583_v39, %v10615_v34  ;;  %v13130_v63 = vld [vmem:[#allocation28_spill] sm:$0xff] }
 0x417   : > { %v4759_v57 = vadd.f32 %v4758_v9, %v4670_v49  ;;  %v7482_v49 = vld [vmem:[%s12535_s7 + $0x194] sm:$0xf0]  ;;  %v7094_v9 = vld [vmem:[%s12535_s7 + $0x288] sm:$0xf] }
 0x419   : > { %v11638_v23 = vadd.f32 %v4847_v12, %v4759_v57  ;;  %v6966_v12 = vld [vmem:[%s12535_s7 + $0x188] sm:$0xf] }
 0x41a   : > { %v6967_v39 = vor.u32 %v7482_v49, %v6966_v12 }
 0x41b   : > { %13126 = vst [vmem:[#allocation22_spill] sm:$0xff] %v11638_v23  ;;  %v13133_v23 = vld [vmem:[#allocation92_spill] sm:$0xff] }
 0x41c   : > { %v4850_v62 = vpop.f32.mrf.mxu0  ;;  %4898 = vmatmul.bf16.gmra.mxu1 %v13127_v18  ;;  %v4585_v37 = vpop.f32.mrf.mxu1  ;;  %5318 = vmatpush.bf16.msrb.mxu2 %v6967_v39 }
 0x41d   : > { %v4672_v33 = vpop.f32.mrf.mxu2 }
 0x41e   : > { %4987 = vmatmul.bf16.gmra.mxu2 %v13128_v61  ;;  %v4673_v59 = vadd.f32 %v4672_v33, %v4584_v38  ;;  %v4761_v31 = vpop.f32.mrf.mxu3  ;;  %v6838_v33 = vld [vmem:[%s12535_s7 + $0x88] sm:$0xf] }
 0x420   : > { %5076 = vmatmul.bf16.gmra.mxu3 %v13129_v60  ;;  %v4762_v24 = vadd.f32 %v4761_v31, %v4673_v59  ;;  %v7514_v31 = vld [vmem:[%s12535_s7 + $0x294] sm:$0xf0] }
 0x421   : > { %v7095_v57 = vor.u32 %v7514_v31, %v7094_v9  ;;  %v7450_v59 = vld [vmem:[%s12535_s7 + $0x94] sm:$0xf0] }
 0x422   : > { %v11645_v32 = vadd.f32 %v4850_v62, %v4762_v24  ;;  %v4586_v24 = vadd.f32 %v4585_v37, %v10615_v34  ;;  %v6839_v12 = vor.u32 %v7450_v59, %v6838_v33  ;;  %v7222_v37 = vld [vmem:[%s12535_s7 + $0x388] sm:$0xf]  ;;  %v7546_v9 = vld [vmem:[%s12535_s7 + $0x394] sm:$0xf0]  ;;  %v13135_v33 = vld [vmem:[#allocation95_spill] sm:$0xff] }
 0x423   : > { %5165 = vmatmul.bf16.gmra.mxu0 %v13130_v63  ;;  %5407 = vmatpush.bf16.msrb.mxu3 %v7095_v57  ;;  %v7223_v31 = vor.u32 %v7546_v9, %v7222_v37 }
 0x424   : > { %13131 = vst [vmem:[#allocation26_spill] sm:$0xff] %v11645_v32  ;;  %v4852_v38 = vpop.f32.mrf.mxu0  ;;  %5229 = vmatpush.bf16.msrb.mxu1 %v6839_v12 }
 0x425   : > { %v4674_v62 = vpop.f32.mrf.mxu2  ;;  %5496 = vmatpush.bf16.msrb.mxu0 %v7223_v31 }
 0x426   : > { %v4675_v32 = vadd.f32 %v4674_v62, %v4586_v24  ;;  %v4763_v49 = vpop.f32.mrf.mxu3  ;;  %v13134_v24 = vld [vmem:[#allocation93_spill] sm:$0xff] }
 0x428   : > { %v4764_v39 = vadd.f32 %v4763_v49, %v4675_v32  ;;  %v4588_v63 = vpop.f32.mrf.mxu1 }
 0x429   : > { %v4589_v57 = vadd.f32 %v4588_v63, %v10615_v34 }
 0x42a   : > { %v11672_v60 = vadd.f32 %v4852_v38, %v4764_v39 }
 0x42c   : > { %13132 = vst [vmem:[#allocation89_spill] sm:$0xff] %v11672_v60  ;;  %4903 = vmatmul.bf16.gmra.mxu1 %v13133_v23  ;;  %v13148_v23 = vld [vmem:[#allocation39_spill] sm:$0xff] }
 0x42e   : > { %4992 = vmatmul.bf16.gmra.mxu2 %v13134_v24  ;;  %v13138_v24 = vld [vmem:[#allocation31_spill] sm:$0xff] }
 0x42f   : > { %v4677_v59 = vpop.f32.mrf.mxu2 }
 0x430   : > { %v4855_v62 = vpop.f32.mrf.mxu0  ;;  %5081 = vmatmul.bf16.gmra.mxu3 %v13135_v33  ;;  %v4678_v61 = vadd.f32 %v4677_v59, %v4589_v57  ;;  %v4590_v18 = vpop.f32.mrf.mxu1  ;;  %v13140_v57 = vld [vmem:[#allocation33_spill] sm:$0xff] }
 0x431   : > { %v4591_v38 = vadd.f32 %v4590_v18, %v10615_v34 }
 0x433   : > { %5170 = vmatmul.bf16.gmra.mxu0 %v13136_v42  ;;  %v4766_v32 = vpop.f32.mrf.mxu3 }
 0x434   : > { %v4767_v12 = vadd.f32 %v4766_v32, %v4678_v61  ;;  %v13141_v61 = vld [vmem:[#allocation32_spill] sm:$0xff] }
 0x436   : > { %v11679_v49 = vadd.f32 %v4855_v62, %v4767_v12  ;;  %v13142_v12 = vld [vmem:[#allocation34_spill] sm:$0xff] }
 0x437   : > { %v4679_v9 = vpop.f32.mrf.mxu2 }
 0x438   : > { %13137 = vst [vmem:[#allocation27_spill] sm:$0xff] %v11679_v49  ;;  %v4857_v37 = vpop.f32.mrf.mxu0  ;;  %v4680_v39 = vadd.f32 %v4679_v9, %v4591_v38  ;;  %v7078_v9 = vld [vmem:[%s12535_s7 + $0x268] sm:$0xf] }
 0x439   : > { %v4593_v31 = vpop.f32.mrf.mxu1 }
 0x43a   : > { %v4594_v59 = vadd.f32 %v4593_v31, %v10615_v34 }
 0x43b   : > { %v4768_v60 = vpop.f32.mrf.mxu3 }
 0x43c   : > { %v4769_v63 = vadd.f32 %v4768_v60, %v4680_v39  ;;  %4908 = vmatmul.bf16.gmra.mxu1 %v13138_v24  ;;  %v6950_v60 = vld [vmem:[%s12535_s7 + $0x168] sm:$0xf] }
 0x43e   : > { %v11683_v33 = vadd.f32 %v4857_v37, %v4769_v63  ;;  %4997 = vmatmul.bf16.gmra.mxu2 %v13140_v57  ;;  %v7478_v37 = vld [vmem:[%s12535_s7 + $0x174] sm:$0xf0] }
 0x43f   : > { %v6951_v31 = vor.u32 %v7478_v37, %v6950_v60  ;;  %v7510_v63 = vld [vmem:[%s12535_s7 + $0x274] sm:$0xf0] }
 0x440   : > { %13139 = vst [vmem:[#allocation96_spill] sm:$0xff] %v11683_v33  ;;  %v4860_v42 = vpop.f32.mrf.mxu0  ;;  %5086 = vmatmul.bf16.gmra.mxu3 %v13141_v61 }
 0x441   : > { %v4682_v62 = vpop.f32.mrf.mxu2  ;;  %v4595_v18 = vpop.f32.mrf.mxu1  ;;  %5319 = vmatpush.bf16.msrb.mxu2 %v6951_v31  ;;  %v13146_v31 = vld [vmem:[#allocation36_spill] sm:$0xff] }
 0x442   : > { %v4683_v32 = vadd.f32 %v4682_v62, %v4594_v59  ;;  %v7079_v59 = vor.u32 %v7510_v63, %v7078_v9  ;;  %v13144_v9 = vld [vmem:[#allocation35_spill] sm:$0xff] }
 0x443   : > { %5175 = vmatmul.bf16.gmra.mxu0 %v13142_v12  ;;  %v4771_v38 = vpop.f32.mrf.mxu3  ;;  %v4596_v12 = vadd.f32 %v4595_v18, %v10615_v34  ;;  %v7542_v18 = vld [vmem:[%s12535_s7 + $0x374] sm:$0xf0] }
 0x444   : > { %v4772_v39 = vadd.f32 %v4771_v38, %v4683_v32  ;;  %5408 = vmatpush.bf16.msrb.mxu3 %v7079_v59  ;;  %v6822_v32 = vld [vmem:[%s12535_s7 + $0x68] sm:$0xf]  ;;  %v7446_v38 = vld [vmem:[%s12535_s7 + $0x74] sm:$0xf0] }
 0x445   : > { %v6823_v37 = vor.u32 %v7446_v38, %v6822_v32 }
 0x446   : > { %v11701_v62 = vadd.f32 %v4860_v42, %v4772_v39  ;;  %v7206_v42 = vld [vmem:[%s12535_s7 + $0x368] sm:$0xf] }
 0x447   : > { %5230 = vmatpush.bf16.msrb.mxu1 %v6823_v37 }
 0x448   : > { %13143 = vst [vmem:[#allocation29_spill] sm:$0xff] %v11701_v62  ;;  %v4862_v61 = vpop.f32.mrf.mxu0  ;;  %v13147_v62 = vld [vmem:[#allocation38_spill] sm:$0xff] }
 0x449   : > { %v4684_v33 = vpop.f32.mrf.mxu2  ;;  %v4598_v24 = vpop.f32.mrf.mxu1 }
 0x44a   : > { %v4685_v57 = vadd.f32 %v4684_v33, %v4596_v12  ;;  %v7207_v12 = vor.u32 %v7542_v18, %v7206_v42  ;;  %v4599_v63 = vadd.f32 %v4598_v24, %v10615_v34 }
 0x44b   : > { %v4773_v60 = vpop.f32.mrf.mxu3 }
 0x44c   : > { %v4774_v33 = vadd.f32 %v4773_v60, %v4685_v57  ;;  %4913 = vmatmul.bf16.gmra.mxu1 %v13144_v9  ;;  %5497 = vmatpush.bf16.msrb.mxu0 %v7207_v12 }
 0x44e   : > { %v11717_v39 = vadd.f32 %v4862_v61, %v4774_v33  ;;  %5002 = vmatmul.bf16.gmra.mxu2 %v13146_v31  ;;  %v13157_v31 = vld [vmem:[#allocation48_spill] sm:$0xff] }
 0x450   : > { %13145 = vst [vmem:[#allocation94_spill] sm:$0xff] %v11717_v39  ;;  %v4865_v59 = vpop.f32.mrf.mxu0  ;;  %5091 = vmatmul.bf16.gmra.mxu3 %v13147_v62 }
 0x451   : > { %v4687_v32 = vpop.f32.mrf.mxu2  ;;  %v4600_v49 = vpop.f32.mrf.mxu1 }
 0x452   : > { %v4688_v38 = vadd.f32 %v4687_v32, %v4599_v63  ;;  %v4601_v61 = vadd.f32 %v4600_v49, %v10615_v34  ;;  %v7695_v63 = vld [vmem:[%s12536_s8] sm:$0xf] }
 0x453   : > { %5180 = vmatmul.bf16.gmra.mxu0 %v13148_v23  ;;  %v4776_v57 = vpop.f32.mrf.mxu3  ;;  %v11729_v32 = vperm.slane %v7695_v63, 1  ;;  %v13150_v23 = vld [vmem:[#allocation43_spill] sm:$0xff] }
 0x454   : > { %v4777_v42 = vadd.f32 %v4776_v57, %v4688_v38  ;;  %v13152_v38 = vld [vmem:[#allocation44_spill] sm:$0xff] }
 0x456   : > { %v11723_v60 = vadd.f32 %v4865_v59, %v4777_v42  ;;  %v13153_v42 = vld [vmem:[#allocation45_spill] sm:$0xff] }
 0x458   : > { %13149 = vst [vmem:[#allocation90_spill] sm:$0xff] %v11723_v60  ;;  %v4867_v18 = vpop.f32.mrf.mxu0 }
 0x459   : > { %v4689_v37 = vpop.f32.mrf.mxu2  ;;  %v4879_v12 = vpop.f32.mrf.mxu1 }
 0x45a   : > { %v4690_v33 = vadd.f32 %v4689_v37, %v4601_v61  ;;  %v4880_v49 = vadd.f32 %v4879_v12, %v11729_v32  ;;  %v13155_v12 = vld [vmem:[#allocation37_spill] sm:$0xff] }
 0x45b   : > { %v4778_v24 = vpop.f32.mrf.mxu3 }
 0x45c   : > { %v4779_v39 = vadd.f32 %v4778_v24, %v4690_v33  ;;  %4918 = vmatmul.bf16.gmra.mxu1 %v13150_v23  ;;  %v13154_v24 = vld [vmem:[#allocation49_spill] sm:$0xff]  ;;  %v6934_v23 = vld [vmem:[%s12535_s7 + $0x148] sm:$0xf] }
 0x45e   : > { %v11732_v59 = vadd.f32 %v4867_v18, %v4779_v39  ;;  %5007 = vmatmul.bf16.gmra.mxu2 %v13152_v38  ;;  %v7474_v39 = vld [vmem:[%s12535_s7 + $0x154] sm:$0xf0]  ;;  %v7062_v18 = vld [vmem:[%s12535_s7 + $0x248] sm:$0xf] }
 0x45f   : > { %v13156_v38 = vld [vmem:[#allocation42_spill] sm:$0xff] }
 0x460   : > { %13151 = vst [vmem:[#allocation98_spill] sm:$0xff] %v11732_v59  ;;  %v5146_v57 = vpop.f32.mrf.mxu0  ;;  %5096 = vmatmul.bf16.gmra.mxu3 %v13153_v42  ;;  %v4526_v42 = vadd.f32 %v13155_v12, %v10615_v34 }
 0x461   : > { %v4968_v61 = vpop.f32.mrf.mxu2  ;;  %v4881_v33 = vpop.f32.mrf.mxu1 }
 0x462   : > { %v4969_v37 = vadd.f32 %v4968_v61, %v4880_v49  ;;  %v6935_v61 = vor.u32 %v7474_v39, %v6934_v23  ;;  %v4615_v60 = vadd.f32 %v13156_v38, %v4526_v42  ;;  %v4882_v54 = vadd.f32 %v4881_v33, %v11729_v32  ;;  %v6806_v38 = vld [vmem:[%s12535_s7 + $0x48] sm:$0xf]  ;;  %v13160_v42 = vld [vmem:[#allocation41_spill] sm:$0xff] }
 0x463   : > { %5185 = vmatmul.bf16.gmra.mxu0 %v13154_v24  ;;  %v5057_v63 = vpop.f32.mrf.mxu3  ;;  %v7506_v24 = vld [vmem:[%s12535_s7 + $0x254] sm:$0xf0] }
 0x464   : > { %v5058_v49 = vadd.f32 %v5057_v63, %v4969_v37  ;;  %v7063_v59 = vor.u32 %v7506_v24, %v7062_v18  ;;  %5320 = vmatpush.bf16.msrb.mxu2 %v6935_v61  ;;  %v4704_v30 = vadd.f32 %v13158_v11, %v4615_v60  ;;  %v13161_v63 = vld [vmem:[#allocation53_spill] sm:$0xff]  ;;  %v13162_v61 = vld [vmem:[#allocation54_spill] sm:$0xff] }
 0x466   : > { %v5147_v62 = vadd.f32 %v5146_v57, %v5058_v49  ;;  %5409 = vmatpush.bf16.msrb.mxu3 %v7063_v59  ;;  %v13159_v57 = vld [vmem:[#allocation52_spill] sm:$0xff]  ;;  %v4793_v33 = vadd.f32 %v13160_v42, %v4704_v30 }
 0x468   : > { %v5938_v9 = vpack.c.bf16 %v5147_v62, %v13157_v31  ;;  %v5148_v51 = vpop.f32.mrf.mxu0  ;;  %v7442_v62 = vld [vmem:[%s12535_s7 + $0x54] sm:$0xf0]  ;;  %v7190_v31 = vld [vmem:[%s12535_s7 + $0x348] sm:$0xf] }
 0x469   : > { %v4970_v12 = vpop.f32.mrf.mxu2  ;;  %v4884_v37 = vpop.f32.mrf.mxu1  ;;  %v6807_v11 = vor.u32 %v7442_v62, %v6806_v38  ;;  %v13163_v62 = vld [vmem:[#allocation56_spill] sm:$0xff] }
 0x46a   : > { %6002 = vst [vmem:[%s11759_s29] sm:$0xff] %v5938_v9  ;;  %v4971_v23 = vadd.f32 %v4970_v12, %v4882_v54  ;;  %v7538_v54 = vld [vmem:[%s12535_s7 + $0x354] sm:$0xf0]  ;;  %v4885_v18 = vadd.f32 %v4884_v37, %v11729_v32 }
 0x46b   : > { %v5059_v59 = vpop.f32.mrf.mxu3  ;;  %v7191_v60 = vor.u32 %v7538_v54, %v7190_v31  ;;  %5231 = vmatpush.bf16.msrb.mxu1 %v6807_v11  ;;  %v13165_v11 = vld [vmem:[#allocation50_spill] sm:$0xff] }
 0x46c   : > { %v5060_v9 = vadd.f32 %v5059_v59, %v4971_v23  ;;  %4923 = vmatmul.bf16.gmra.mxu1 %v13159_v57  ;;  %v13168_v57 = vld [vmem:[#allocation61_spill] sm:$0xff] }
 0x46d   : > { %5498 = vmatpush.bf16.msrb.mxu0 %v7191_v60  ;;  %v13166_v60 = vld [vmem:[#allocation55_spill] sm:$0xff] }
 0x46e   : > { %v5149_v24 = vadd.f32 %v5148_v51, %v5060_v9  ;;  %5012 = vmatmul.bf16.gmra.mxu2 %v13161_v63  ;;  %v13164_v51 = vld [vmem:[#allocation46_spill] sm:$0xff] }
 0x46f   : > { %v4531_v30 = vadd.f32 %v13164_v51, %v10615_v34 }
 0x470   : > { %v5940_v39 = vpack.c.bf16 %v5149_v24, %v4793_v33  ;;  %v5151_v49 = vpop.f32.mrf.mxu0  ;;  %5101 = vmatmul.bf16.gmra.mxu3 %v13162_v61  ;;  %v13167_v61 = vld [vmem:[#allocation51_spill] sm:$0xff] }
 0x471   : > { %v4973_v12 = vpop.f32.mrf.mxu2  ;;  %v4886_v38 = vpop.f32.mrf.mxu1  ;;  %v4620_v54 = vadd.f32 %v13165_v11, %v4531_v30  ;;  %v13171_v11 = vld [vmem:[#allocation69_spill] sm:$0xff] }
 0x472   : > { %6004 = vst [vmem:[%s11759_s29 + $0x10] sm:$0xff] %v5940_v39  ;;  %v4974_v23 = vadd.f32 %v4973_v12, %v4885_v18  ;;  %v4887_v42 = vadd.f32 %v4886_v38, %v11729_v32 }
 0x473   : > { %5190 = vmatmul.bf16.gmra.mxu0 %v13163_v62  ;;  %v5062_v31 = vpop.f32.mrf.mxu3  ;;  %v4709_v39 = vadd.f32 %v13167_v61, %v4620_v54 }
 0x474   : > { %v5063_v59 = vadd.f32 %v5062_v31, %v4974_v23  ;;  %v13169_v23 = vld [vmem:[#allocation47_spill] sm:$0xff] }
 0x475   : > { %v4798_v31 = vadd.f32 %v13169_v23, %v4709_v39 }
 0x476   : > { %v5152_v9 = vadd.f32 %v5151_v49, %v5063_v59  ;;  %v13170_v49 = vld [vmem:[#allocation65_spill] sm:$0xff] }
 0x478   : > { %v5942_v37 = vpack.c.bf16 %v5152_v9, %v13166_v60  ;;  %v5153_v33 = vpop.f32.mrf.mxu0  ;;  %v13172_v60 = vld [vmem:[#allocation70_spill] sm:$0xff] }
 0x479   : > { %v4975_v24 = vpop.f32.mrf.mxu2  ;;  %v4889_v12 = vpop.f32.mrf.mxu1 }
 0x47a   : > { %6006 = vst [vmem:[%s11759_s29 + $0x20] sm:$0xff] %v5942_v37  ;;  %v4976_v18 = vadd.f32 %v4975_v24, %v4887_v42  ;;  %v4890_v38 = vadd.f32 %v4889_v12, %v11729_v32  ;;  %v6918_v37 = vld [vmem:[%s12535_s7 + $0x128] sm:$0xf]  ;;  %v7502_v12 = vld [vmem:[%s12535_s7 + $0x234] sm:$0xf0] }
 0x47b   : > { %v5064_v62 = vpop.f32.mrf.mxu3  ;;  %v7046_v42 = vld [vmem:[%s12535_s7 + $0x228] sm:$0xf] }
 0x47c   : > { %v5065_v63 = vadd.f32 %v5064_v62, %v4976_v18  ;;  %4928 = vmatmul.bf16.gmra.mxu1 %v13168_v57  ;;  %v7047_v23 = vor.u32 %v7502_v12, %v7046_v42  ;;  %v13176_v57 = vld [vmem:[#allocation60_spill] sm:$0xff] }
 0x47e   : > { %v5154_v51 = vadd.f32 %v5153_v33, %v5065_v63  ;;  %5017 = vmatmul.bf16.gmra.mxu2 %v13170_v49  ;;  %v7470_v63 = vld [vmem:[%s12535_s7 + $0x134] sm:$0xf0]  ;;  %v13173_v33 = vld [vmem:[#allocation57_spill] sm:$0xff]  ;;  %5410 = vmatpush.bf16.msrb.mxu3 %v7047_v23  ;;  %v13179_v23 = vld [vmem:[#allocation74_spill] sm:$0xff] }
 0x47f   : > { %v4536_v24 = vadd.f32 %v13173_v33, %v10615_v34  ;;  %v6919_v18 = vor.u32 %v7470_v63, %v6918_v37  ;;  %v6790_v37 = vld [vmem:[%s12535_s7 + $0x28] sm:$0xf] }
 0x480   : > { %v5944_v30 = vpack.c.bf16 %v5154_v51, %v4798_v31  ;;  %v5156_v59 = vpop.f32.mrf.mxu0  ;;  %5106 = vmatmul.bf16.gmra.mxu3 %v13171_v11  ;;  %v13174_v31 = vld [vmem:[#allocation59_spill] sm:$0xff] }
 0x481   : > { %v4978_v9 = vpop.f32.mrf.mxu2  ;;  %v4891_v54 = vpop.f32.mrf.mxu1  ;;  %v4625_v51 = vadd.f32 %v13174_v31, %v4536_v24  ;;  %5321 = vmatpush.bf16.msrb.mxu2 %v6919_v18  ;;  %v13177_v24 = vld [vmem:[#allocation75_spill] sm:$0xff] }
 0x482   : > { %6008 = vst [vmem:[%s11759_s29 + $0x30] sm:$0xff] %v5944_v30  ;;  %v4979_v61 = vadd.f32 %v4978_v9, %v4890_v38  ;;  %v13175_v38 = vld [vmem:[#allocation67_spill] sm:$0xff] }
 0x483   : > { %5195 = vmatmul.bf16.gmra.mxu0 %v13172_v60  ;;  %v5067_v62 = vpop.f32.mrf.mxu3  ;;  %v4892_v60 = vadd.f32 %v4891_v54, %v11729_v32  ;;  %v4714_v33 = vadd.f32 %v13176_v57, %v4625_v51  ;;  %v7174_v54 = vld [vmem:[%s12535_s7 + $0x328] sm:$0xf]  ;;  %v7534_v57 = vld [vmem:[%s12535_s7 + $0x334] sm:$0xf0] }
 0x484   : > { %v5068_v39 = vadd.f32 %v5067_v62, %v4979_v61 }
 0x486   : > { %v5157_v30 = vadd.f32 %v5156_v59, %v5068_v39  ;;  %v7438_v59 = vld [vmem:[%s12535_s7 + $0x34] sm:$0xf0]  ;;  %v13178_v39 = vld [vmem:[#allocation58_spill] sm:$0xff] }
 0x487   : > { %v6791_v42 = vor.u32 %v7438_v59, %v6790_v37  ;;  %v4803_v18 = vadd.f32 %v13178_v39, %v4714_v33  ;;  %v13181_v59 = vld [vmem:[#allocation79_spill] sm:$0xff] }
 0x488   : > { %v5946_v9 = vpack.c.bf16 %v5157_v30, %v13175_v38  ;;  %v5158_v11 = vpop.f32.mrf.mxu0  ;;  %v13180_v38 = vld [vmem:[#allocation81_spill] sm:$0xff] }
 0x489   : > { %v4980_v49 = vpop.f32.mrf.mxu2  ;;  %v4894_v62 = vpop.f32.mrf.mxu1  ;;  %5232 = vmatpush.bf16.msrb.mxu1 %v6791_v42  ;;  %v13183_v42 = vld [vmem:[#allocation73_spill] sm:$0xff] }
 0x48a   : > { %6010 = vst [vmem:[%s11759_s29 + $0x40] sm:$0xff] %v5946_v9  ;;  %v4981_v61 = vadd.f32 %v4980_v49, %v4892_v60  ;;  %v7175_v60 = vor.u32 %v7534_v57, %v7174_v54  ;;  %v4895_v51 = vadd.f32 %v4894_v62, %v11729_v32 }
 0x48b   : > { %v5069_v63 = vpop.f32.mrf.mxu3 }
 0x48c   : > { %v5070_v49 = vadd.f32 %v5069_v63, %v4981_v61  ;;  %4933 = vmatmul.bf16.gmra.mxu1 %v13177_v24  ;;  %5499 = vmatpush.bf16.msrb.mxu0 %v7175_v60  ;;  %v13184_v60 = vld [vmem:[#allocation82_spill] sm:$0xff]  ;;  %v13186_v24 = vld [vmem:[#allocation83_spill] sm:$0xff] }
 0x48e   : > { %v5159_v12 = vadd.f32 %v5158_v11, %v5070_v49  ;;  %5022 = vmatmul.bf16.gmra.mxu2 %v13179_v23  ;;  %v13182_v11 = vld [vmem:[#allocation68_spill] sm:$0xff] }
 0x48f   : > { %v4541_v33 = vadd.f32 %v13182_v11, %v10615_v34 }
 0x490   : > { %v5948_v31 = vpack.c.bf16 %v5159_v12, %v4803_v18  ;;  %v5161_v30 = vpop.f32.mrf.mxu0  ;;  %5111 = vmatmul.bf16.gmra.mxu3 %v13180_v38  ;;  %v13185_v38 = vld [vmem:[#allocation72_spill] sm:$0xff] }
 0x491   : > { %v4983_v9 = vpop.f32.mrf.mxu2  ;;  %v4896_v37 = vpop.f32.mrf.mxu1  ;;  %v4630_v57 = vadd.f32 %v13183_v42, %v4541_v33 }
 0x492   : > { %6012 = vst [vmem:[%s11759_s29 + $0x50] sm:$0xff] %v5948_v31  ;;  %v4984_v61 = vadd.f32 %v4983_v9, %v4895_v51  ;;  %v4897_v39 = vadd.f32 %v4896_v37, %v11729_v32 }
 0x493   : > { %5200 = vmatmul.bf16.gmra.mxu0 %v13181_v59  ;;  %v5072_v63 = vpop.f32.mrf.mxu3  ;;  %v4719_v31 = vadd.f32 %v13185_v38, %v4630_v57  ;;  %v6902_v57 = vld [vmem:[%s12535_s7 + $0x108] sm:$0xf] }
 0x494   : > { %v5073_v54 = vadd.f32 %v5072_v63, %v4984_v61  ;;  %v13187_v61 = vld [vmem:[#allocation71_spill] sm:$0xff] }
 0x495   : > { %v4808_v63 = vadd.f32 %v13187_v61, %v4719_v31 }
 0x496   : > { %v5162_v49 = vadd.f32 %v5161_v30, %v5073_v54 }
 0x498   : > { %v5950_v62 = vpack.c.bf16 %v5162_v49, %v13184_v60  ;;  %v5163_v18 = vpop.f32.mrf.mxu0  ;;  %v7030_v49 = vld [vmem:[%s12535_s7 + $0x208] sm:$0xf]  ;;  %v13188_v60 = vld [vmem:[#allocation5_spill] sm:$0xff] }
 0x499   : > { %v4985_v12 = vpop.f32.mrf.mxu2  ;;  %v4899_v9 = vpop.f32.mrf.mxu1 }
 0x49a   : > { %6014 = vst [vmem:[%s11759_s29 + $0x60] sm:$0xff] %v5950_v62  ;;  %v4986_v51 = vadd.f32 %v4985_v12, %v4897_v39  ;;  %v4900_v37 = vadd.f32 %v4899_v9, %v11729_v32  ;;  %v4546_v62 = vadd.f32 %v13188_v60, %v10615_v34  ;;  %v7498_v12 = vld [vmem:[%s12535_s7 + $0x214] sm:$0xf0] }
 0x49b   : > { %v5074_v59 = vpop.f32.mrf.mxu3  ;;  %v7031_v31 = vor.u32 %v7498_v12, %v7030_v49 }
 0x49c   : > { %v5075_v23 = vadd.f32 %v5074_v59, %v4986_v51  ;;  %4938 = vmatmul.bf16.gmra.mxu1 %v13186_v24  ;;  %v13189_v51 = vld [vmem:[#allocation7_spill] sm:$0xff] }
 0x49d   : > { %v4635_v9 = vadd.f32 %v13189_v51, %v4546_v62  ;;  %5411 = vmatpush.bf16.msrb.mxu3 %v7031_v31 }
 0x49e   : > { %v5164_v11 = vadd.f32 %v5163_v18, %v5075_v23  ;;  %5027 = vmatmul.bf16.gmra.mxu2 %v11185_v6  ;;  %v7466_v23 = vld [vmem:[%s12535_s7 + $0x114] sm:$0xf0] }
 0x49f   : > { %v6903_v18 = vor.u32 %v7466_v23, %v6902_v57  ;;  %v6774_v57 = vld [vmem:[%s12535_s7 + $0x8] sm:$0xf] }
 0x4a0   : > { %v5952_v30 = vpack.c.bf16 %v5164_v11, %v4808_v63  ;;  %v5166_v33 = vpop.f32.mrf.mxu0  ;;  %5116 = vmatmul.bf16.gmra.mxu3 %v11189_v25 }
 0x4a1   : > { %v4988_v54 = vpop.f32.mrf.mxu2  ;;  %v4901_v42 = vpop.f32.mrf.mxu1  ;;  %5322 = vmatpush.bf16.msrb.mxu2 %v6903_v18  ;;  %v13191_v18 = vld [vmem:[#allocation6_spill] sm:$0xff] }
 0x4a2   : > { %6016 = vst [vmem:[%s11759_s29 + $0x70] sm:$0xff] %v5952_v30  ;;  %v4989_v38 = vadd.f32 %v4988_v54, %v4900_v37  ;;  %v4902_v11 = vadd.f32 %v4901_v42, %v11729_v32  ;;  %v13190_v54 = vld [vmem:[#allocation8_spill] sm:$0xff] }
 0x4a3   : > { %5205 = vmatmul.bf16.gmra.mxu0 %v11220_v15  ;;  %v5077_v59 = vpop.f32.mrf.mxu3  ;;  %v4724_v60 = vadd.f32 %v13190_v54, %v4635_v9  ;;  %v7530_v42 = vld [vmem:[%s12535_s7 + $0x314] sm:$0xf0] }
 0x4a4   : > { %v5078_v39 = vadd.f32 %v5077_v59, %v4989_v38 }
 0x4a5   : > { %v4813_v12 = vadd.f32 %v13191_v18, %v4724_v60 }
 0x4a6   : > { %v5167_v61 = vadd.f32 %v5166_v33, %v5078_v39  ;;  %v7434_v33 = vld [vmem:[%s12535_s7 + $0x14] sm:$0xf0] }
 0x4a7   : > { %v6775_v49 = vor.u32 %v7434_v33, %v6774_v57 }
 0x4a8   : > { %v5954_v63 = vpack.c.bf16 %v5167_v61, %v11232_v14  ;;  %v5168_v30 = vpop.f32.mrf.mxu0  ;;  %v7158_v14 = vld [vmem:[%s12535_s7 + $0x308] sm:$0xf] }
 0x4a9   : > { %v4990_v37 = vpop.f32.mrf.mxu2  ;;  %v4904_v59 = vpop.f32.mrf.mxu1  ;;  %v7159_v39 = vor.u32 %v7530_v42, %v7158_v14  ;;  %5233 = vmatpush.bf16.msrb.mxu1 %v6775_v49 }
 0x4aa   : > { %6018 = vst [vmem:[%s11759_s29 + $0x80] sm:$0xff] %v5954_v63  ;;  %v4991_v38 = vadd.f32 %v4990_v37, %v4902_v11  ;;  %v4905_v9 = vadd.f32 %v4904_v59, %v11729_v32 }
 0x4ab   : > { %v5079_v23 = vpop.f32.mrf.mxu3  ;;  %5500 = vmatpush.bf16.msrb.mxu0 %v7159_v39 }
 0x4ac   : > { %v5080_v62 = vadd.f32 %v5079_v23, %v4991_v38  ;;  %4943 = vmatmul.bf16.gmra.mxu1 %v11317_v58 }
 0x4ae   : > { %v5169_v31 = vadd.f32 %v5168_v30, %v5080_v62  ;;  %5032 = vmatmul.bf16.gmra.mxu2 %v11326_v52  ;;  %v4818_v62 = vadd.f32 %v11292_v13, %v11361_v50  ;;  %v7492_v13 = vld [vmem:[%s12535_s7 + $0x1ec] sm:$0xf]  ;;  %v7016_v50 = vld [vmem:[%s12535_s7 + $0x1f8] sm:$0xf0] }
 0x4b0   : > { %v5956_v51 = vpack.c.bf16 %v5169_v31, %v4813_v12  ;;  %v5171_v61 = vpop.f32.mrf.mxu0  ;;  %5121 = vmatmul.bf16.gmra.mxu3 %v11338_v1 }
 0x4b1   : > { %v4993_v63 = vpop.f32.mrf.mxu2  ;;  %v4906_v37 = vpop.f32.mrf.mxu1 }
 0x4b2   : > { %6020 = vst [vmem:[%s11759_s29 + $0x90] sm:$0xff] %v5956_v51  ;;  %v4994_v11 = vadd.f32 %v4993_v63, %v4905_v9  ;;  %v4907_v57 = vadd.f32 %v4906_v37, %v11729_v32  ;;  %v7524_v63 = vld [vmem:[%s12535_s7 + $0x2ec] sm:$0xf] }
 0x4b3   : > { %5210 = vmatmul.bf16.gmra.mxu0 %v11364_v17  ;;  %v5082_v54 = vpop.f32.mrf.mxu3 }
 0x4b4   : > { %v5083_v60 = vadd.f32 %v5082_v54, %v4994_v11  ;;  %v4556_v11 = vadd.f32 %v11381_v22, %v10615_v34  ;;  %v7019_v54 = vor.u32 %v7492_v13, %v7016_v50 }
 0x4b6   : > { %v5172_v30 = vadd.f32 %v5171_v61, %v5083_v60  ;;  %v7144_v60 = vld [vmem:[%s12535_s7 + $0x2f8] sm:$0xf0]  ;;  %5671 = vmatpush.bf16.msra.mxu2 %v7019_v54 }
 0x4b8   : > { %v5958_v38 = vpack.c.bf16 %v5172_v30, %v11350_v40  ;;  %v5173_v33 = vpop.f32.mrf.mxu0  ;;  %v7147_v30 = vor.u32 %v7524_v63, %v7144_v60 }
 0x4b9   : > { %v4995_v23 = vpop.f32.mrf.mxu2  ;;  %v4909_v49 = vpop.f32.mrf.mxu1 }
 0x4ba   : > { %6022 = vst [vmem:[%s11759_s29 + $0xa0] sm:$0xff] %v5958_v38  ;;  %v4996_v59 = vadd.f32 %v4995_v23, %v4907_v57  ;;  %v4910_v40 = vadd.f32 %v4909_v49, %v11729_v32  ;;  %v4645_v38 = vadd.f32 %v11447_v16, %v4556_v11  ;;  %5760 = vmatpush.bf16.msra.mxu3 %v7147_v30  ;;  %v6888_v16 = vld [vmem:[%s12535_s7 + $0xf8] sm:$0xf0] }
 0x4bb   : > { %v5084_v14 = vpop.f32.mrf.mxu3 }
 0x4bc   : > { %v5085_v42 = vadd.f32 %v5084_v14, %v4996_v59  ;;  %4948 = vmatmul.bf16.gmra.mxu1 %v11423_v4  ;;  %v4734_v22 = vadd.f32 %v11459_v2, %v4645_v38  ;;  %v7272_v2 = vld [vmem:[%s12535_s7 + $0x3f8] sm:$0xf0] }
 0x4be   : > { %v5174_v39 = vadd.f32 %v5173_v33, %v5085_v42  ;;  %5037 = vmatmul.bf16.gmra.mxu2 %v11444_v29 }
 0x4c0   : > { %v5960_v18 = vpack.c.bf16 %v5174_v39, %v4818_v62  ;;  %v5176_v12 = vpop.f32.mrf.mxu0  ;;  %5126 = vmatmul.bf16.gmra.mxu3 %v11457_v7  ;;  %v7460_v62 = vld [vmem:[%s12535_s7 + $0xec] sm:$0xf] }
 0x4c1   : > { %v4998_v31 = vpop.f32.mrf.mxu2  ;;  %v4911_v9 = vpop.f32.mrf.mxu1 }
 0x4c2   : > { %6024 = vst [vmem:[%s11759_s29 + $0xb0] sm:$0xff] %v5960_v18  ;;  %v4999_v51 = vadd.f32 %v4998_v31, %v4910_v40  ;;  %v4912_v23 = vadd.f32 %v4911_v9, %v11729_v32  ;;  %v6891_v18 = vor.u32 %v7460_v62, %v6888_v16  ;;  %v4823_v31 = vadd.f32 %v11440_v56, %v4734_v22 }
 0x4c3   : > { %5215 = vmatmul.bf16.gmra.mxu0 %v11474_v0  ;;  %v5087_v61 = vpop.f32.mrf.mxu3  ;;  %v4561_v56 = vadd.f32 %v11488_v48, %v10615_v34 }
 0x4c4   : > { %v5088_v37 = vadd.f32 %v5087_v61, %v4999_v51  ;;  %5582 = vmatpush.bf16.msra.mxu1 %v6891_v18 }
 0x4c5   : > { %v4650_v60 = vadd.f32 %v11533_v45, %v4561_v56 }
 0x4c6   : > { %v5177_v57 = vadd.f32 %v5176_v12, %v5088_v37 }
 0x4c8   : > { %v5962_v33 = vpack.c.bf16 %v5177_v57, %v11464_v20  ;;  %v5178_v59 = vpop.f32.mrf.mxu0  ;;  %v7556_v20 = vld [vmem:[%s12535_s7 + $0x3ec] sm:$0xf] }
 0x4c9   : > { %v5000_v49 = vpop.f32.mrf.mxu2  ;;  %v4914_v42 = vpop.f32.mrf.mxu1  ;;  %v7275_v12 = vor.u32 %v7556_v20, %v7272_v2  ;;  %v7000_v2 = vld [vmem:[%s12535_s7 + $0x1d8] sm:$0xf0] }
 0x4ca   : > { %6026 = vst [vmem:[%s11759_s29 + $0xc0] sm:$0xff] %v5962_v33  ;;  %v5001_v14 = vadd.f32 %v5000_v49, %v4912_v23  ;;  %v4915_v61 = vadd.f32 %v4914_v42, %v11729_v32 }
 0x4cb   : > { %v5089_v39 = vpop.f32.mrf.mxu3  ;;  %5849 = vmatpush.bf16.msra.mxu0 %v7275_v12  ;;  %v4566_v12 = vadd.f32 %v11548_v35, %v10615_v34 }
 0x4cc   : > { %v5090_v40 = vadd.f32 %v5089_v39, %v5001_v14  ;;  %4953 = vmatmul.bf16.gmra.mxu1 %v11523_v19 }
 0x4ce   : > { %v5179_v51 = vadd.f32 %v5178_v59, %v5090_v40  ;;  %5042 = vmatmul.bf16.gmra.mxu2 %v11530_v5  ;;  %v4739_v59 = vadd.f32 %v11541_v46, %v4650_v60  ;;  %v7520_v40 = vld [vmem:[%s12535_s7 + $0x2cc] sm:$0xf] }
 0x4cf   : > { %v7456_v60 = vld [vmem:[%s12535_s7 + $0xcc] sm:$0xf] }
 0x4d0   : > { %v5964_v9 = vpack.c.bf16 %v5179_v51, %v4823_v31  ;;  %v5181_v13 = vpop.f32.mrf.mxu0  ;;  %5131 = vmatmul.bf16.gmra.mxu3 %v11536_v10  ;;  %v4828_v48 = vadd.f32 %v11528_v21, %v4739_v59  ;;  %v7488_v21 = vld [vmem:[%s12535_s7 + $0x1cc] sm:$0xf] }
 0x4d1   : > { %v5003_v50 = vpop.f32.mrf.mxu2  ;;  %v4916_v11 = vpop.f32.mrf.mxu1  ;;  %v7003_v51 = vor.u32 %v7488_v21, %v7000_v2 }
 0x4d2   : > { %6028 = vst [vmem:[%s11759_s29 + $0xd0] sm:$0xff] %v5964_v9  ;;  %v5004_v63 = vadd.f32 %v5003_v50, %v4915_v61  ;;  %v4917_v57 = vadd.f32 %v4916_v11, %v11729_v32  ;;  %v7128_v9 = vld [vmem:[%s12535_s7 + $0x2d8] sm:$0xf0] }
 0x4d3   : > { %5220 = vmatmul.bf16.gmra.mxu0 %v11543_v47  ;;  %v5092_v37 = vpop.f32.mrf.mxu3  ;;  %v7131_v61 = vor.u32 %v7520_v40, %v7128_v9  ;;  %5672 = vmatpush.bf16.msra.mxu2 %v7003_v51  ;;  %v13195_v9 = vld [vmem:[#allocation9_spill] sm:$0xff] }
 0x4d4   : > { %v5093_v54 = vadd.f32 %v5092_v37, %v5004_v63 }
 0x4d5   : > { %5761 = vmatpush.bf16.msra.mxu3 %v7131_v61 }
 0x4d6   : > { %v5182_v30 = vadd.f32 %v5181_v13, %v5093_v54  ;;  %v4655_v13 = vadd.f32 %v11555_v27, %v4566_v12  ;;  %v6872_v27 = vld [vmem:[%s12535_s7 + $0xd8] sm:$0xf0] }
 0x4d8   : > { %v5966_v38 = vpack.c.bf16 %v5182_v30, %v11526_v55  ;;  %v5183_v33 = vpop.f32.mrf.mxu0  ;;  %v4744_v34 = vadd.f32 %v11558_v26, %v4655_v13  ;;  %v7256_v26 = vld [vmem:[%s12535_s7 + $0x3d8] sm:$0xf0]  ;;  %v13196_v13 = vld [vmem:[#allocation10_spill] sm:$0xff] }
 0x4d9   : > { %v5005_v23 = vpop.f32.mrf.mxu2  ;;  %v4919_v22 = vpop.f32.mrf.mxu1 }
 0x4da   : > { %6030 = vst [vmem:[%s11759_s29 + $0xe0] sm:$0xff] %v5966_v38  ;;  %v5006_v49 = vadd.f32 %v5005_v23, %v4917_v57  ;;  %v4920_v62 = vadd.f32 %v4919_v22, %v11729_v32  ;;  %v6875_v38 = vor.u32 %v7456_v60, %v6872_v27  ;;  %v4833_v23 = vadd.f32 %v11552_v8, %v4744_v34  ;;  %v13199_v60 = vld [vmem:[#allocation11_spill] sm:$0xff] }
 0x4db   : > { %v5094_v14 = vpop.f32.mrf.mxu3 }
 0x4dc   : > { %v5095_v42 = vadd.f32 %v5094_v14, %v5006_v49  ;;  %5234 = vmatmul.bf16.vlgmr.msrb.gmra.mxu1 %v13105_v28 }
 0x4dd   : > { %5583 = vmatpush.bf16.msra.mxu1 %v6875_v38  ;;  %v6984_v38 = vld [vmem:[%s12535_s7 + $0x1b8] sm:$0xf0] }
 0x4de   : > { %v5184_v45 = vadd.f32 %v5183_v33, %v5095_v42  ;;  %5323 = vmatmul.bf16.vlgmr.msrb.gmra.mxu2 %v13106_v43  ;;  %v13192_v42 = vld [vmem:[#allocation78_spill] sm:$0xff] }
 0x4e0   : > { %v5968_v55 = vpack.c.bf16 %v5184_v45, %v4828_v48  ;;  %v5186_v16 = vpop.f32.mrf.mxu0  ;;  %5412 = vmatmul.bf16.vlgmr.msrb.gmra.mxu3 %v13107_v44 }
 0x4e1   : > { %v5008_v39 = vpop.f32.mrf.mxu2  ;;  %v4921_v18 = vpop.f32.mrf.mxu1 }
 0x4e2   : > { %6032 = vst [vmem:[%s11759_s29 + $0xf0] sm:$0xff] %v5968_v55  ;;  %v5009_v46 = vadd.f32 %v5008_v39, %v4920_v62  ;;  %v4922_v11 = vadd.f32 %v4921_v18, %v11729_v32  ;;  %v13193_v62 = vld [vmem:[#allocation80_spill] sm:$0xff] }
 0x4e3   : > { %5501 = vmatmul.bf16.vlgmr.msrb.gmra.mxu0 %v13108_v53  ;;  %v5097_v20 = vpop.f32.mrf.mxu3 }
 0x4e4   : > { %v5098_v31 = vadd.f32 %v5097_v20, %v5009_v46  ;;  %v13194_v46 = vld [vmem:[#allocation17_spill] sm:$0xff] }
 0x4e6   : > { %v5187_v50 = vadd.f32 %v5186_v16, %v5098_v31 }
 0x4e8   : > { %v5970_v63 = vpack.c.bf16 %v5187_v50, %v11550_v41  ;;  %v5188_v37 = vpop.f32.mrf.mxu0  ;;  %v7552_v41 = vld [vmem:[%s12535_s7 + $0x3cc] sm:$0xf]  ;;  %v13197_v50 = vld [vmem:[#allocation85_spill] sm:$0xff] }
 0x4e9   : > { %v5010_v56 = vpop.f32.mrf.mxu2  ;;  %v4924_v54 = vpop.f32.mrf.mxu1  ;;  %v7259_v33 = vor.u32 %v7552_v41, %v7256_v26  ;;  %v7516_v41 = vld [vmem:[%s12535_s7 + $0x2ac] sm:$0xf] }
 0x4ea   : > { %6034 = vst [vmem:[%s11759_s29 + $0x100] sm:$0xff] %v5970_v63  ;;  %v5011_v35 = vadd.f32 %v5010_v56, %v4922_v11  ;;  %v4925_v22 = vadd.f32 %v4924_v54, %v11729_v32  ;;  %v13198_v56 = vld [vmem:[#allocation84_spill] sm:$0xff] }
 0x4eb   : > { %v5099_v30 = vpop.f32.mrf.mxu3  ;;  %5850 = vmatpush.bf16.msra.mxu0 %v7259_v33  ;;  %v7112_v33 = vld [vmem:[%s12535_s7 + $0x2b8] sm:$0xf0] }
 0x4ec   : > { %v5100_v57 = vadd.f32 %v5099_v30, %v5011_v35  ;;  %5239 = vmatmul.bf16.gmra.mxu1 %v13110_v3  ;;  %v7484_v30 = vld [vmem:[%s12535_s7 + $0x1ac] sm:$0xf] }
 0x4ee   : > { %v5189_v59 = vadd.f32 %v5188_v37, %v5100_v57  ;;  %5328 = vmatmul.bf16.gmra.mxu2 %v13111_v36  ;;  %v6987_v57 = vor.u32 %v7484_v30, %v6984_v38 }
 0x4f0   : > { %v5972_v49 = vpack.c.bf16 %v5189_v59, %v4833_v23  ;;  %v5191_v14 = vpop.f32.mrf.mxu0  ;;  %5417 = vmatmul.bf16.gmra.mxu3 %v13192_v42  ;;  %v7115_v23 = vor.u32 %v7516_v41, %v7112_v33  ;;  %5673 = vmatpush.bf16.msra.mxu2 %v6987_v57 }
 0x4f1   : > { %v5013_v48 = vpop.f32.mrf.mxu2  ;;  %v4926_v55 = vpop.f32.mrf.mxu1 }
 0x4f2   : > { %6036 = vst [vmem:[%s11759_s29 + $0x110] sm:$0xff] %v5972_v49  ;;  %v5014_v45 = vadd.f32 %v5013_v48, %v4925_v22  ;;  %v4927_v20 = vadd.f32 %v4926_v55, %v11729_v32  ;;  %5762 = vmatpush.bf16.msra.mxu3 %v7115_v23  ;;  %v13200_v49 = vld [vmem:[#allocation87_spill] sm:$0xff] }
 0x4f3   : > { %5506 = vmatmul.bf16.gmra.mxu0 %v13193_v62  ;;  %v5102_v16 = vpop.f32.mrf.mxu3 }
 0x4f4   : > { %v5103_v8 = vadd.f32 %v5102_v16, %v5014_v45 }
 0x4f6   : > { %v5192_v39 = vadd.f32 %v5191_v14, %v5103_v8  ;;  %v7452_v8 = vld [vmem:[%s12535_s7 + $0xac] sm:$0xf] }
 0x4f8   : > { %v5974_v18 = vpack.c.bf16 %v5192_v39, %v13194_v46  ;;  %v5193_v21 = vpop.f32.mrf.mxu0  ;;  %v6856_v39 = vld [vmem:[%s12535_s7 + $0xb8] sm:$0xf0] }
 0x4f9   : > { %v5015_v2 = vpop.f32.mrf.mxu2  ;;  %v4929_v12 = vpop.f32.mrf.mxu1 }
 0x4fa   : > { %6038 = vst [vmem:[%s11759_s29 + $0x120] sm:$0xff] %v5974_v18  ;;  %v5016_v40 = vadd.f32 %v5015_v2, %v4927_v20  ;;  %v4930_v11 = vadd.f32 %v4929_v12, %v11729_v32  ;;  %v6859_v18 = vor.u32 %v7452_v8, %v6856_v39  ;;  %v7548_v20 = vld [vmem:[%s12535_s7 + $0x3ac] sm:$0xf] }
 0x4fb   : > { %v5104_v31 = vpop.f32.mrf.mxu3  ;;  %v13201_v12 = vld [vmem:[#allocation18_spill] sm:$0xff] }
 0x4fc   : > { %v5105_v51 = vadd.f32 %v5104_v31, %v5016_v40  ;;  %5244 = vmatmul.bf16.gmra.mxu1 %v13195_v9  ;;  %v13209_v8 = vld [vmem:[#allocation22_spill] sm:$0xff] }
 0x4fd   : > { %5584 = vmatpush.bf16.msra.mxu1 %v6859_v18 }
 0x4fe   : > { %v5194_v61 = vadd.f32 %v5193_v21, %v5105_v51  ;;  %5333 = vmatmul.bf16.gmra.mxu2 %v13196_v13  ;;  %v7240_v21 = vld [vmem:[%s12535_s7 + $0x3b8] sm:$0xf0]  ;;  %v13202_v51 = vld [vmem:[#allocation19_spill] sm:$0xff] }
 0x4ff   : > { %v7243_v40 = vor.u32 %v7548_v20, %v7240_v21  ;;  %v13210_v20 = vld [vmem:[#allocation25_spill] sm:$0xff] }
 0x500   : > { %v5976_v63 = vpack.c.bf16 %v5194_v61, %v13197_v50  ;;  %v5196_v37 = vpop.f32.mrf.mxu0  ;;  %5422 = vmatmul.bf16.gmra.mxu3 %v13198_v56  ;;  %v13203_v61 = vld [vmem:[#allocation20_spill] sm:$0xff] }
 0x501   : > { %v5018_v34 = vpop.f32.mrf.mxu2  ;;  %v4931_v54 = vpop.f32.mrf.mxu1  ;;  %5851 = vmatpush.bf16.msra.mxu0 %v7243_v40 }
 0x502   : > { %6040 = vst [vmem:[%s11759_s29 + $0x130] sm:$0xff] %v5976_v63  ;;  %v5019_v35 = vadd.f32 %v5018_v34, %v4930_v11  ;;  %v4932_v14 = vadd.f32 %v4931_v54, %v11729_v32 }
 0x503   : > { %5511 = vmatmul.bf16.gmra.mxu0 %v13199_v60  ;;  %v5107_v27 = vpop.f32.mrf.mxu3 }
 0x504   : > { %v5108_v26 = vadd.f32 %v5107_v27, %v5019_v35  ;;  %v13205_v27 = vld [vmem:[#allocation88_spill] sm:$0xff] }
 0x506   : > { %v5197_v59 = vadd.f32 %v5196_v37, %v5108_v26  ;;  %v13204_v37 = vld [vmem:[#allocation86_spill] sm:$0xff]  ;;  %v13206_v26 = vld [vmem:[#allocation21_spill] sm:$0xff] }
 0x508   : > { %v5978_v22 = vpack.c.bf16 %v5197_v59, %v13200_v49  ;;  %v5198_v48 = vpop.f32.mrf.mxu0 }
 0x509   : > { %v5020_v45 = vpop.f32.mrf.mxu2  ;;  %v4934_v16 = vpop.f32.mrf.mxu1 }
 0x50a   : > { %6042 = vst [vmem:[%s11759_s29 + $0x140] sm:$0xff] %v5978_v22  ;;  %v5021_v55 = vadd.f32 %v5020_v45, %v4932_v14  ;;  %v4935_v63 = vadd.f32 %v4934_v16, %v11729_v32  ;;  %v13207_v45 = vld [vmem:[#allocation23_spill] sm:$0xff]  ;;  %v13208_v16 = vld [vmem:[#allocation24_spill] sm:$0xff] }
 0x50b   : > { %v5109_v46 = vpop.f32.mrf.mxu3 }
 0x50c   : > { %v5110_v2 = vadd.f32 %v5109_v46, %v5021_v55  ;;  %5249 = vmatmul.bf16.gmra.mxu1 %v13201_v12 }
 0x50e   : > { %v5199_v31 = vadd.f32 %v5198_v48, %v5110_v2  ;;  %5338 = vmatmul.bf16.gmra.mxu2 %v13202_v51 }
 0x510   : > { %v5980_v50 = vpack.c.bf16 %v5199_v31, %v13203_v61  ;;  %v5201_v11 = vpop.f32.mrf.mxu0  ;;  %5427 = vmatmul.bf16.gmra.mxu3 %v13204_v37  ;;  %v13211_v31 = vld [vmem:[#allocation28_spill] sm:$0xff] }
 0x511   : > { %v5023_v34 = vpop.f32.mrf.mxu2  ;;  %v4936_v54 = vpop.f32.mrf.mxu1 }
 0x512   : > { %6044 = vst [vmem:[%s11759_s29 + $0x150] sm:$0xff] %v5980_v50  ;;  %v5024_v35 = vadd.f32 %v5023_v34, %v4935_v63  ;;  %v4937_v33 = vadd.f32 %v4936_v54, %v11729_v32  ;;  %v7480_v50 = vld [vmem:[%s12535_s7 + $0x18c] sm:$0xf]  ;;  %v6968_v63 = vld [vmem:[%s12535_s7 + $0x198] sm:$0xf0] }
 0x513   : > { %5516 = vmatmul.bf16.gmra.mxu0 %v13205_v27  ;;  %v5112_v30 = vpop.f32.mrf.mxu3  ;;  %v7096_v54 = vld [vmem:[%s12535_s7 + $0x298] sm:$0xf0] }
 0x514   : > { %v5113_v38 = vadd.f32 %v5112_v30, %v5024_v35  ;;  %v6971_v35 = vor.u32 %v7480_v50, %v6968_v63 }
 0x516   : > { %v5202_v41 = vadd.f32 %v5201_v11, %v5113_v38  ;;  %v7512_v11 = vld [vmem:[%s12535_s7 + $0x28c] sm:$0xf]  ;;  %5674 = vmatpush.bf16.msra.mxu2 %v6971_v35 }
 0x517   : > { %v7099_v30 = vor.u32 %v7512_v11, %v7096_v54 }
 0x518   : > { %v5982_v57 = vpack.c.bf16 %v5202_v41, %v13206_v26  ;;  %v5203_v23 = vpop.f32.mrf.mxu0  ;;  %v13212_v41 = vld [vmem:[#allocation26_spill] sm:$0xff] }
 0x519   : > { %v5025_v59 = vpop.f32.mrf.mxu2  ;;  %v4939_v22 = vpop.f32.mrf.mxu1  ;;  %5763 = vmatpush.bf16.msra.mxu3 %v7099_v30 }
 0x51a   : > { %6046 = vst [vmem:[%s11759_s29 + $0x160] sm:$0xff] %v5982_v57  ;;  %v5026_v49 = vadd.f32 %v5025_v59, %v4937_v33  ;;  %v4940_v46 = vadd.f32 %v4939_v22, %v11729_v32  ;;  %v7448_v22 = vld [vmem:[%s12535_s7 + $0x8c] sm:$0xf] }
 0x51b   : > { %v5114_v14 = vpop.f32.mrf.mxu3 }
 0x51c   : > { %v5115_v48 = vadd.f32 %v5114_v14, %v5026_v49  ;;  %5254 = vmatmul.bf16.gmra.mxu1 %v13207_v45  ;;  %v6840_v14 = vld [vmem:[%s12535_s7 + $0x98] sm:$0xf0] }
 0x51e   : > { %v5204_v55 = vadd.f32 %v5203_v23, %v5115_v48  ;;  %5343 = vmatmul.bf16.gmra.mxu2 %v13208_v16 }
 0x520   : > { %v5984_v39 = vpack.c.bf16 %v5204_v55, %v13209_v8  ;;  %v5206_v18 = vpop.f32.mrf.mxu0  ;;  %5432 = vmatmul.bf16.gmra.mxu3 %v13210_v20  ;;  %v6843_v55 = vor.u32 %v7448_v22, %v6840_v14  ;;  %v7544_v8 = vld [vmem:[%s12535_s7 + $0x38c] sm:$0xf] }
 0x521   : > { %v5028_v21 = vpop.f32.mrf.mxu2  ;;  %v4941_v40 = vpop.f32.mrf.mxu1 }
 0x522   : > { %6048 = vst [vmem:[%s11759_s29 + $0x170] sm:$0xff] %v5984_v39  ;;  %v5029_v2 = vadd.f32 %v5028_v21, %v4940_v46  ;;  %v4942_v57 = vadd.f32 %v4941_v40, %v11729_v32  ;;  %v7224_v39 = vld [vmem:[%s12535_s7 + $0x398] sm:$0xf0]  ;;  %v13214_v40 = vld [vmem:[#allocation93_spill] sm:$0xff]  ;;  %5585 = vmatpush.bf16.msra.mxu1 %v6843_v55 }
 0x523   : > { %5521 = vmatmul.bf16.gmra.mxu0 %v13211_v31  ;;  %v5117_v61 = vpop.f32.mrf.mxu3  ;;  %v13213_v21 = vld [vmem:[#allocation92_spill] sm:$0xff] }
 0x524   : > { %v5118_v34 = vadd.f32 %v5117_v61, %v5029_v2  ;;  %v13215_v61 = vld [vmem:[#allocation89_spill] sm:$0xff] }
 0x526   : > { %v5207_v38 = vadd.f32 %v5206_v18, %v5118_v34  ;;  %v7227_v18 = vor.u32 %v7544_v8, %v7224_v39  ;;  %v13216_v34 = vld [vmem:[#allocation95_spill] sm:$0xff] }
 0x527   : > { %v13219_v39 = vld [vmem:[#allocation31_spill] sm:$0xff] }
 0x528   : > { %v5986_v26 = vpack.c.bf16 %v5207_v38, %v13212_v41  ;;  %v5208_v33 = vpop.f32.mrf.mxu0  ;;  %5852 = vmatpush.bf16.msra.mxu0 %v7227_v18  ;;  %v13217_v38 = vld [vmem:[#allocation97_spill] sm:$0xff] }
 0x529   : > { %v5030_v23 = vpop.f32.mrf.mxu2  ;;  %v4944_v49 = vpop.f32.mrf.mxu1  ;;  %v13220_v18 = vld [vmem:[#allocation33_spill] sm:$0xff] }
 0x52a   : > { %6050 = vst [vmem:[%s11759_s29 + $0x180] sm:$0xff] %v5986_v26  ;;  %v5031_v59 = vadd.f32 %v5030_v23, %v4942_v57  ;;  %v4945_v63 = vadd.f32 %v4944_v49, %v11729_v32 }
 0x52b   : > { %v5119_v48 = vpop.f32.mrf.mxu3 }
 0x52c   : > { %v5120_v46 = vadd.f32 %v5119_v48, %v5031_v59  ;;  %5259 = vmatmul.bf16.gmra.mxu1 %v13213_v21 }
 0x52e   : > { %v5209_v2 = vadd.f32 %v5208_v33, %v5120_v46  ;;  %5348 = vmatmul.bf16.gmra.mxu2 %v13214_v40  ;;  %v13218_v33 = vld [vmem:[#allocation27_spill] sm:$0xff] }
 0x530   : > { %v5988_v50 = vpack.c.bf16 %v5209_v2, %v13215_v61  ;;  %v5211_v11 = vpop.f32.mrf.mxu0  ;;  %5437 = vmatmul.bf16.gmra.mxu3 %v13216_v34  ;;  %v13221_v2 = vld [vmem:[#allocation96_spill] sm:$0xff] }
 0x531   : > { %v5033_v35 = vpop.f32.mrf.mxu2  ;;  %v4946_v30 = vpop.f32.mrf.mxu1 }
 0x532   : > { %6052 = vst [vmem:[%s11759_s29 + $0x190] sm:$0xff] %v5988_v50  ;;  %v5034_v54 = vadd.f32 %v5033_v35, %v4945_v63  ;;  %v4947_v59 = vadd.f32 %v4946_v30, %v11729_v32 }
 0x533   : > { %5526 = vmatmul.bf16.gmra.mxu0 %v13217_v38  ;;  %v5122_v41 = vpop.f32.mrf.mxu3 }
 0x534   : > { %v5123_v26 = vadd.f32 %v5122_v41, %v5034_v54  ;;  %v13223_v41 = vld [vmem:[#allocation34_spill] sm:$0xff] }
 0x536   : > { %v5212_v57 = vadd.f32 %v5211_v11, %v5123_v26  ;;  %v13222_v11 = vld [vmem:[#allocation32_spill] sm:$0xff] }
 0x538   : > { %v5990_v23 = vpack.c.bf16 %v5212_v57, %v13218_v33  ;;  %v5213_v22 = vpop.f32.mrf.mxu0  ;;  %v7476_v57 = vld [vmem:[%s12535_s7 + $0x16c] sm:$0xf]  ;;  %v6952_v33 = vld [vmem:[%s12535_s7 + $0x178] sm:$0xf0] }
 0x539   : > { %v5035_v14 = vpop.f32.mrf.mxu2  ;;  %v4949_v48 = vpop.f32.mrf.mxu1 }
 0x53a   : > { %6054 = vst [vmem:[%s11759_s29 + $0x1a0] sm:$0xff] %v5990_v23  ;;  %v5036_v49 = vadd.f32 %v5035_v14, %v4947_v59  ;;  %v4950_v50 = vadd.f32 %v4949_v48, %v11729_v32  ;;  %v7508_v23 = vld [vmem:[%s12535_s7 + $0x26c] sm:$0xf]  ;;  %v7080_v14 = vld [vmem:[%s12535_s7 + $0x278] sm:$0xf0] }
 0x53b   : > { %v5124_v55 = vpop.f32.mrf.mxu3 }
 0x53c   : > { %v5125_v8 = vadd.f32 %v5124_v55, %v5036_v49  ;;  %5264 = vmatmul.bf16.gmra.mxu1 %v13219_v39  ;;  %v7083_v49 = vor.u32 %v7508_v23, %v7080_v14  ;;  %v7444_v55 = vld [vmem:[%s12535_s7 + $0x6c] sm:$0xf] }
 0x53e   : > { %v5214_v46 = vadd.f32 %v5213_v22, %v5125_v8  ;;  %5353 = vmatmul.bf16.gmra.mxu2 %v13220_v18  ;;  %v6955_v22 = vor.u32 %v7476_v57, %v6952_v33  ;;  %v6824_v8 = vld [vmem:[%s12535_s7 + $0x78] sm:$0xf0]  ;;  %5764 = vmatpush.bf16.msra.mxu3 %v7083_v49 }
 0x53f   : > { %v13226_v49 = vld [vmem:[#allocation36_spill] sm:$0xff] }
 0x540   : > { %v5992_v61 = vpack.c.bf16 %v5214_v46, %v13221_v2  ;;  %v5216_v63 = vpop.f32.mrf.mxu0  ;;  %5442 = vmatmul.bf16.gmra.mxu3 %v13222_v11  ;;  %5675 = vmatpush.bf16.msra.mxu2 %v6955_v22  ;;  %v6827_v46 = vor.u32 %v7444_v55, %v6824_v8  ;;  %v13224_v2 = vld [vmem:[#allocation29_spill] sm:$0xff] }
 0x541   : > { %v5038_v35 = vpop.f32.mrf.mxu2  ;;  %v4951_v30 = vpop.f32.mrf.mxu1 }
 0x542   : > { %6056 = vst [vmem:[%s11759_s29 + $0x1b0] sm:$0xff] %v5992_v61  ;;  %v5039_v54 = vadd.f32 %v5038_v35, %v4950_v50  ;;  %v4952_v50 = vadd.f32 %v4951_v30, %v11729_v32  ;;  %5586 = vmatpush.bf16.msra.mxu1 %v6827_v46  ;;  %v13225_v30 = vld [vmem:[#allocation35_spill] sm:$0xff]  ;;  %v13228_v46 = vld [vmem:[#allocation38_spill] sm:$0xff] }
 0x543   : > { %5531 = vmatmul.bf16.gmra.mxu0 %v13223_v41  ;;  %v5127_v26 = vpop.f32.mrf.mxu3 }
 0x544   : > { %v5128_v59 = vadd.f32 %v5127_v26, %v5039_v54  ;;  %v7208_v54 = vld [vmem:[%s12535_s7 + $0x378] sm:$0xf0] }
 0x546   : > { %v5217_v48 = vadd.f32 %v5216_v63, %v5128_v59  ;;  %v7540_v63 = vld [vmem:[%s12535_s7 + $0x36c] sm:$0xf] }
 0x547   : > { %v7211_v57 = vor.u32 %v7540_v63, %v7208_v54  ;;  %v13229_v54 = vld [vmem:[#allocation39_spill] sm:$0xff] }
 0x548   : > { %v5994_v61 = vpack.c.bf16 %v5217_v48, %v13224_v2  ;;  %v5218_v35 = vpop.f32.mrf.mxu0  ;;  %v13227_v48 = vld [vmem:[#allocation94_spill] sm:$0xff] }
 0x549   : > { %v5040_v26 = vpop.f32.mrf.mxu2  ;;  %v4954_v23 = vpop.f32.mrf.mxu1  ;;  %5853 = vmatpush.bf16.msra.mxu0 %v7211_v57 }
 0x54a   : > { %6058 = vst [vmem:[%s11759_s29 + $0x1c0] sm:$0xff] %v5994_v61  ;;  %v5041_v33 = vadd.f32 %v5040_v26, %v4952_v50  ;;  %v4955_v8 = vadd.f32 %v4954_v23, %v11729_v32 }
 0x54b   : > { %v5129_v59 = vpop.f32.mrf.mxu3 }
 0x54c   : > { %v5130_v22 = vadd.f32 %v5129_v59, %v5041_v33  ;;  %5269 = vmatmul.bf16.gmra.mxu1 %v13225_v30 }
 0x54e   : > { %v5219_v14 = vadd.f32 %v5218_v35, %v5130_v22  ;;  %5358 = vmatmul.bf16.gmra.mxu2 %v13226_v49  ;;  %v13230_v35 = vld [vmem:[#allocation90_spill] sm:$0xff] }
 0x550   : > { %v5996_v55 = vpack.c.bf16 %v5219_v14, %v13227_v48  ;;  %v5221_v2 = vpop.f32.mrf.mxu0  ;;  %5447 = vmatmul.bf16.gmra.mxu3 %v13228_v46 }
 0x551   : > { %v5043_v63 = vpop.f32.mrf.mxu2  ;;  %v4956_v50 = vpop.f32.mrf.mxu1 }
 0x552   : > { %6060 = vst [vmem:[%s11759_s29 + $0x1d0] sm:$0xff] %v5996_v55  ;;  %v5044_v61 = vadd.f32 %v5043_v63, %v4955_v8  ;;  %v4957_v22 = vadd.f32 %v4956_v50, %v11729_v32  ;;  %v12124_v55 = vld [vmem:[%s12536_s8] sm:$0xf]  ;;  %v13233_v32 = vld [vmem:[#allocation44_spill] sm:$0xff] }
 0x553   : > { %5536 = vmatmul.bf16.gmra.mxu0 %v13229_v54  ;;  %v5132_v26 = vpop.f32.mrf.mxu3  ;;  %13231 = vst [vmem:[#allocation91_spill] sm:$0xff] %v12124_v55  ;;  %v12127_v8 = vperm.slane %v12124_v55, 2 }
 0x554   : > { %v5133_v57 = vadd.f32 %v5132_v26, %v5044_v61  ;;  %v13234_v61 = vld [vmem:[#allocation98_spill] sm:$0xff] }
 0x556   : > { %v5222_v33 = vadd.f32 %v5221_v2, %v5133_v57  ;;  %v13232_v2 = vld [vmem:[#allocation43_spill] sm:$0xff] }
 0x558   : > { %v5998_v59 = vpack.c.bf16 %v5222_v33, %v13230_v35  ;;  %v5223_v14 = vpop.f32.mrf.mxu0  ;;  %v13235_v33 = vld [vmem:[#allocation45_spill] sm:$0xff] }
 0x559   : > { %v5045_v48 = vpop.f32.mrf.mxu2  ;;  %v5235_v49 = vpop.f32.mrf.mxu1 }
 0x55a   : > { %6062 = vst [vmem:[%s11759_s29 + $0x1e0] sm:$0xff] %v5998_v59  ;;  %v5046_v23 = vadd.f32 %v5045_v48, %v4957_v22  ;;  %v5236_v26 = vadd.f32 %v5235_v49, %v12127_v8  ;;  %v13236_v22 = vld [vmem:[#allocation49_spill] sm:$0xff]  ;;  %v7504_v49 = vld [vmem:[%s12535_s7 + $0x24c] sm:$0xf] }
 0x55b   : > { %v5134_v46 = vpop.f32.mrf.mxu3 }
 0x55c   : > { %v5135_v30 = vadd.f32 %v5134_v46, %v5046_v23  ;;  %5274 = vmatmul.bf16.gmra.mxu1 %v13232_v2  ;;  %v13241_v2 = vld [vmem:[#allocation54_spill] sm:$0xff] }
 0x55e   : > { %v5224_v63 = vadd.f32 %v5223_v14, %v5135_v30  ;;  %5363 = vmatmul.bf16.gmra.mxu2 %v13233_v32  ;;  %v7472_v30 = vld [vmem:[%s12535_s7 + $0x14c] sm:$0xf]  ;;  %v6936_v14 = vld [vmem:[%s12535_s7 + $0x158] sm:$0xf0] }
 0x560   : > { %v6000_v50 = vpack.c.bf16 %v5224_v63, %v13234_v61  ;;  %v5502_v57 = vpop.f32.mrf.mxu0  ;;  %5452 = vmatmul.bf16.gmra.mxu3 %v13235_v33  ;;  %v6939_v63 = vor.u32 %v7472_v30, %v6936_v14  ;;  %v7064_v61 = vld [vmem:[%s12535_s7 + $0x258] sm:$0xf0]  ;;  %v7536_v30 = vld [vmem:[%s12535_s7 + $0x34c] sm:$0xf] }
 0x561   : > { %v5324_v46 = vpop.f32.mrf.mxu2  ;;  %v5237_v59 = vpop.f32.mrf.mxu1 }
 0x562   : > { %6064 = vst [vmem:[%s11759_s29 + $0x1f0] sm:$0xff] %v6000_v50  ;;  %v5325_v35 = vadd.f32 %v5324_v46, %v5236_v26  ;;  %v7067_v50 = vor.u32 %v7504_v49, %v7064_v61  ;;  %5676 = vmatpush.bf16.msra.mxu2 %v6939_v63  ;;  %v7440_v46 = vld [vmem:[%s12535_s7 + $0x4c] sm:$0xf] }
 0x563   : > { %5541 = vmatmul.bf16.gmra.mxu0 %v13236_v22  ;;  %v5413_v48 = vpop.f32.mrf.mxu3  ;;  %v6808_v22 = vld [vmem:[%s12535_s7 + $0x58] sm:$0xf0] }
 0x564   : > { %v5414_v23 = vadd.f32 %v5413_v48, %v5325_v35  ;;  %5765 = vmatpush.bf16.msra.mxu3 %v7067_v50  ;;  %v6811_v33 = vor.u32 %v7440_v46, %v6808_v22  ;;  %v5238_v35 = vadd.f32 %v5237_v59, %v12127_v8  ;;  %v13238_v22 = vld [vmem:[#allocation52_spill] sm:$0xff]  ;;  %v13240_v46 = vld [vmem:[#allocation53_spill] sm:$0xff] }
 0x566   : > { %v12148_v26 = vadd.f32 %v5502_v57, %v5414_v23  ;;  %v7192_v57 = vld [vmem:[%s12535_s7 + $0x358] sm:$0xf0]  ;;  %5587 = vmatpush.bf16.msra.mxu1 %v6811_v33 }
 0x567   : > { %v7195_v49 = vor.u32 %v7536_v30, %v7192_v57  ;;  %v13242_v30 = vld [vmem:[#allocation56_spill] sm:$0xff] }
 0x568   : > { %13237 = vst [vmem:[#allocation99_spill] sm:$0xff] %v12148_v26  ;;  %v5504_v48 = vpop.f32.mrf.mxu0 }
 0x569   : > { %v5326_v14 = vpop.f32.mrf.mxu2  ;;  %v5240_v63 = vpop.f32.mrf.mxu1  ;;  %5854 = vmatpush.bf16.msra.mxu0 %v7195_v49 }
 0x56a   : > { %v5327_v23 = vadd.f32 %v5326_v14, %v5238_v35  ;;  %v5241_v26 = vadd.f32 %v5240_v63, %v12127_v8 }
 0x56b   : > { %v5415_v61 = vpop.f32.mrf.mxu3 }
 0x56c   : > { %v5416_v50 = vadd.f32 %v5415_v61, %v5327_v23  ;;  %5279 = vmatmul.bf16.gmra.mxu1 %v13238_v22 }
 0x56e   : > { %v12164_v59 = vadd.f32 %v5504_v48, %v5416_v50  ;;  %5368 = vmatmul.bf16.gmra.mxu2 %v13240_v46  ;;  %v13244_v46 = vld [vmem:[#allocation61_spill] sm:$0xff] }
 0x570   : > { %13239 = vst [vmem:[#allocation30_spill] sm:$0xff] %v12164_v59  ;;  %v5507_v32 = vpop.f32.mrf.mxu0  ;;  %5457 = vmatmul.bf16.gmra.mxu3 %v13241_v2 }
 0x571   : > { %v5329_v55 = vpop.f32.mrf.mxu2  ;;  %v5242_v33 = vpop.f32.mrf.mxu1 }
 0x572   : > { %v5330_v54 = vadd.f32 %v5329_v55, %v5241_v26  ;;  %v5243_v49 = vadd.f32 %v5242_v33, %v12127_v8  ;;  %v13246_v55 = vld [vmem:[#allocation65_spill] sm:$0xff] }
 0x573   : > { %5546 = vmatmul.bf16.gmra.mxu0 %v13242_v30  ;;  %v5418_v35 = vpop.f32.mrf.mxu3 }
 0x574   : > { %v5419_v57 = vadd.f32 %v5418_v35, %v5330_v54  ;;  %v13247_v54 = vld [vmem:[#allocation69_spill] sm:$0xff] }
 0x576   : > { %v12170_v14 = vadd.f32 %v5507_v32, %v5419_v57  ;;  %v13248_v57 = vld [vmem:[#allocation70_spill] sm:$0xff] }
 0x578   : > { %13243 = vst [vmem:[#allocation62_spill] sm:$0xff] %v12170_v14  ;;  %v5509_v48 = vpop.f32.mrf.mxu0 }
 0x579   : > { %v5331_v23 = vpop.f32.mrf.mxu2  ;;  %v5245_v50 = vpop.f32.mrf.mxu1 }
 0x57a   : > { %v5332_v61 = vadd.f32 %v5331_v23, %v5243_v49  ;;  %v5246_v26 = vadd.f32 %v5245_v50, %v12127_v8  ;;  %v7500_v23 = vld [vmem:[%s12535_s7 + $0x22c] sm:$0xf] }
 0x57b   : > { %v5420_v59 = vpop.f32.mrf.mxu3 }
 0x57c   : > { %v5421_v63 = vadd.f32 %v5420_v59, %v5332_v61  ;;  %5284 = vmatmul.bf16.gmra.mxu1 %v13244_v46  ;;  %v7468_v59 = vld [vmem:[%s12535_s7 + $0x12c] sm:$0xf]  ;;  %v13253_v46 = vld [vmem:[#allocation81_spill] sm:$0xff] }
 0x57e   : > { %v12174_v2 = vadd.f32 %v5509_v48, %v5421_v63  ;;  %5373 = vmatmul.bf16.gmra.mxu2 %v13246_v55  ;;  %v6920_v48 = vld [vmem:[%s12535_s7 + $0x138] sm:$0xf0] }
 0x57f   : > { %v6923_v50 = vor.u32 %v7468_v59, %v6920_v48  ;;  %v7048_v63 = vld [vmem:[%s12535_s7 + $0x238] sm:$0xf0]  ;;  %v7532_v59 = vld [vmem:[%s12535_s7 + $0x32c] sm:$0xf] }
 0x580   : > { %13245 = vst [vmem:[#allocation63_spill] sm:$0xff] %v12174_v2  ;;  %v5512_v30 = vpop.f32.mrf.mxu0  ;;  %5462 = vmatmul.bf16.gmra.mxu3 %v13247_v54  ;;  %v6792_v54 = vld [vmem:[%s12535_s7 + $0x38] sm:$0xf0] }
 0x581   : > { %v5334_v32 = vpop.f32.mrf.mxu2  ;;  %v5247_v33 = vpop.f32.mrf.mxu1  ;;  %5677 = vmatpush.bf16.msra.mxu2 %v6923_v50 }
 0x582   : > { %v5335_v35 = vadd.f32 %v5334_v32, %v5246_v26  ;;  %v7051_v26 = vor.u32 %v7500_v23, %v7048_v63 }
 0x583   : > { %5551 = vmatmul.bf16.gmra.mxu0 %v13248_v57  ;;  %v5423_v49 = vpop.f32.mrf.mxu3  ;;  %v7436_v57 = vld [vmem:[%s12535_s7 + $0x2c] sm:$0xf] }
 0x584   : > { %v5424_v61 = vadd.f32 %v5423_v49, %v5335_v35  ;;  %5766 = vmatpush.bf16.msra.mxu3 %v7051_v26  ;;  %v6795_v2 = vor.u32 %v7436_v57, %v6792_v54  ;;  %v5248_v35 = vadd.f32 %v5247_v33, %v12127_v8  ;;  %v13250_v54 = vld [vmem:[#allocation75_spill] sm:$0xff]  ;;  %v13252_v57 = vld [vmem:[#allocation74_spill] sm:$0xff] }
 0x586   : > { %v12192_v32 = vadd.f32 %v5512_v30, %v5424_v61  ;;  %v7176_v30 = vld [vmem:[%s12535_s7 + $0x338] sm:$0xf0]  ;;  %5588 = vmatpush.bf16.msra.mxu1 %v6795_v2 }
 0x587   : > { %v7179_v23 = vor.u32 %v7532_v59, %v7176_v30  ;;  %v13254_v59 = vld [vmem:[#allocation79_spill] sm:$0xff] }
 0x588   : > { %13249 = vst [vmem:[#allocation64_spill] sm:$0xff] %v12192_v32  ;;  %v5514_v49 = vpop.f32.mrf.mxu0 }
 0x589   : > { %v5336_v48 = vpop.f32.mrf.mxu2  ;;  %v5250_v50 = vpop.f32.mrf.mxu1  ;;  %5855 = vmatpush.bf16.msra.mxu0 %v7179_v23 }
 0x58a   : > { %v5337_v61 = vadd.f32 %v5336_v48, %v5248_v35  ;;  %v5251_v32 = vadd.f32 %v5250_v50, %v12127_v8 }
 0x58b   : > { %v5425_v63 = vpop.f32.mrf.mxu3 }
 0x58c   : > { %v5426_v26 = vadd.f32 %v5425_v63, %v5337_v61  ;;  %5289 = vmatmul.bf16.gmra.mxu1 %v13250_v54 }
 0x58e   : > { %v12208_v33 = vadd.f32 %v5514_v49, %v5426_v26  ;;  %5378 = vmatmul.bf16.gmra.mxu2 %v13252_v57 }
 0x590   : > { %13251 = vst [vmem:[#allocation66_spill] sm:$0xff] %v12208_v33  ;;  %v5517_v55 = vpop.f32.mrf.mxu0  ;;  %5467 = vmatmul.bf16.gmra.mxu3 %v13253_v46 }
 0x591   : > { %v5339_v14 = vpop.f32.mrf.mxu2  ;;  %v5252_v2 = vpop.f32.mrf.mxu1 }
 0x592   : > { %v5340_v22 = vadd.f32 %v5339_v14, %v5251_v32  ;;  %v5253_v23 = vadd.f32 %v5252_v2, %v12127_v8 }
 0x593   : > { %5556 = vmatmul.bf16.gmra.mxu0 %v13254_v59  ;;  %v5428_v35 = vpop.f32.mrf.mxu3 }
 0x594   : > { %v5429_v30 = vadd.f32 %v5428_v35, %v5340_v22 }
 0x596   : > { %v12214_v48 = vadd.f32 %v5517_v55, %v5429_v30  ;;  %v6904_v30 = vld [vmem:[%s12535_s7 + $0x118] sm:$0xf0] }
 0x598   : > { %v5519_v49 = vpop.f32.mrf.mxu0 }
 0x599   : > { %v5341_v61 = vpop.f32.mrf.mxu2  ;;  %v5255_v26 = vpop.f32.mrf.mxu1 }
 0x59a   : > { %v5342_v63 = vadd.f32 %v5341_v61, %v5253_v23  ;;  %v5256_v14 = vadd.f32 %v5255_v26, %v12127_v8  ;;  %v7496_v23 = vld [vmem:[%s12535_s7 + $0x20c] sm:$0xf] }
 0x59b   : > { %v5430_v33 = vpop.f32.mrf.mxu3 }
 0x59c   : > { %v5431_v50 = vadd.f32 %v5430_v33, %v5342_v63  ;;  %5294 = vmatmul.bf16.gmra.mxu1 %v13186_v24  ;;  %v7464_v33 = vld [vmem:[%s12535_s7 + $0x10c] sm:$0xf]  ;;  %v7032_v63 = vld [vmem:[%s12535_s7 + $0x218] sm:$0xf0] }
 0x59d   : > { %v6907_v61 = vor.u32 %v7464_v33, %v6904_v30  ;;  %v7035_v26 = vor.u32 %v7496_v23, %v7032_v63  ;;  %v7528_v33 = vld [vmem:[%s12535_s7 + $0x30c] sm:$0xf] }
 0x59e   : > { %v12218_v46 = vadd.f32 %v5519_v49, %v5431_v50  ;;  %5383 = vmatmul.bf16.gmra.mxu2 %v11185_v6 }
 0x59f   : > { %5678 = vmatpush.bf16.msra.mxu2 %v6907_v61  ;;  %5767 = vmatpush.bf16.msra.mxu3 %v7035_v26 }
 0x5a0   : > { %v5522_v32 = vpop.f32.mrf.mxu0  ;;  %5472 = vmatmul.bf16.gmra.mxu3 %v11189_v25 }
 0x5a1   : > { %v5344_v22 = vpop.f32.mrf.mxu2  ;;  %v5257_v2 = vpop.f32.mrf.mxu1 }
 0x5a2   : > { %v5345_v55 = vadd.f32 %v5344_v22, %v5256_v14  ;;  %v7432_v14 = vld [vmem:[%s12535_s7 + $0xc] sm:$0xf]  ;;  %v6776_v22 = vld [vmem:[%s12535_s7 + $0x18] sm:$0xf0] }
 0x5a3   : > { %5561 = vmatmul.bf16.gmra.mxu0 %v11220_v15  ;;  %v5433_v35 = vpop.f32.mrf.mxu3  ;;  %v6779_v15 = vor.u32 %v7432_v14, %v6776_v22 }
 0x5a4   : > { %v5434_v49 = vadd.f32 %v5433_v35, %v5345_v55  ;;  %v5258_v55 = vadd.f32 %v5257_v2, %v12127_v8 }
 0x5a5   : > { %5589 = vmatpush.bf16.msra.mxu1 %v6779_v15 }
 0x5a6   : > { %v12236_v50 = vadd.f32 %v5522_v32, %v5434_v49  ;;  %v7160_v32 = vld [vmem:[%s12535_s7 + $0x318] sm:$0xf0] }
 0x5a7   : > { %v7163_v23 = vor.u32 %v7528_v33, %v7160_v32 }
 0x5a8   : > { %13255 = vst [vmem:[#allocation76_spill] sm:$0xff] %v12236_v50  ;;  %v5524_v35 = vpop.f32.mrf.mxu0 }
 0x5a9   : > { %v5346_v30 = vpop.f32.mrf.mxu2  ;;  %v5260_v61 = vpop.f32.mrf.mxu1  ;;  %5856 = vmatpush.bf16.msra.mxu0 %v7163_v23 }
 0x5aa   : > { %v5347_v49 = vadd.f32 %v5346_v30, %v5258_v55  ;;  %v5261_v14 = vadd.f32 %v5260_v61, %v12127_v8 }
 0x5ab   : > { %v5435_v63 = vpop.f32.mrf.mxu3 }
 0x5ac   : > { %v5436_v26 = vadd.f32 %v5435_v63, %v5347_v49  ;;  %5299 = vmatmul.bf16.gmra.mxu1 %v11317_v58 }
 0x5ae   : > { %v12252_v2 = vadd.f32 %v5524_v35, %v5436_v26  ;;  %5388 = vmatmul.bf16.gmra.mxu2 %v11326_v52 }
 0x5b0   : > { %v5527_v22 = vpop.f32.mrf.mxu0  ;;  %5477 = vmatmul.bf16.gmra.mxu3 %v11338_v1 }
 0x5b1   : > { %v5349_v50 = vpop.f32.mrf.mxu2  ;;  %v5262_v15 = vpop.f32.mrf.mxu1 }
 0x5b2   : > { %v5350_v25 = vadd.f32 %v5349_v50, %v5261_v14  ;;  %v5263_v30 = vadd.f32 %v5262_v15, %v12127_v8 }
 0x5b3   : > { %5566 = vmatmul.bf16.gmra.mxu0 %v11364_v17  ;;  %v5438_v55 = vpop.f32.mrf.mxu3 }
 0x5b4   : > { %v5439_v33 = vadd.f32 %v5438_v55, %v5350_v25 }
 0x5b6   : > { %v12258_v32 = vadd.f32 %v5527_v22, %v5439_v33 }
 0x5b8   : > { %v5529_v35 = vpop.f32.mrf.mxu0 }
 0x5b9   : > { %v5351_v23 = vpop.f32.mrf.mxu2  ;;  %v5265_v63 = vpop.f32.mrf.mxu1 }
 0x5ba   : > { %v5352_v49 = vadd.f32 %v5351_v23, %v5263_v30  ;;  %v5266_v50 = vadd.f32 %v5265_v63, %v12127_v8 }
 0x5bb   : > { %v5440_v26 = vpop.f32.mrf.mxu3 }
 0x5bc   : > { %v5441_v61 = vadd.f32 %v5440_v26, %v5352_v49  ;;  %5304 = vmatmul.bf16.gmra.mxu1 %v11423_v4 }
 0x5be   : > { %v12262_v1 = vadd.f32 %v5529_v35, %v5441_v61  ;;  %5393 = vmatmul.bf16.gmra.mxu2 %v11444_v29 }
 0x5c0   : > { %13256 = vst [vmem:[#allocation77_spill] sm:$0xff] %v12262_v1  ;;  %v5532_v14 = vpop.f32.mrf.mxu0  ;;  %5482 = vmatmul.bf16.gmra.mxu3 %v11457_v7 }
 0x5c1   : > { %v5354_v25 = vpop.f32.mrf.mxu2  ;;  %v5267_v15 = vpop.f32.mrf.mxu1 }
 0x5c2   : > { %v5355_v22 = vadd.f32 %v5354_v25, %v5266_v50  ;;  %v5268_v23 = vadd.f32 %v5267_v15, %v12127_v8 }
 0x5c3   : > { %5571 = vmatmul.bf16.gmra.mxu0 %v11474_v0  ;;  %v5443_v55 = vpop.f32.mrf.mxu3 }
 0x5c4   : > { %v5444_v33 = vadd.f32 %v5443_v55, %v5355_v22 }
 0x5c6   : > { %v12268_v30 = vadd.f32 %v5532_v14, %v5444_v33 }
 0x5c8   : > { %v5534_v35 = vpop.f32.mrf.mxu0 }
 0x5c9   : > { %v5356_v49 = vpop.f32.mrf.mxu2  ;;  %v5270_v61 = vpop.f32.mrf.mxu1 }
 0x5ca   : > { %v5357_v26 = vadd.f32 %v5356_v49, %v5268_v23  ;;  %v5271_v50 = vadd.f32 %v5270_v61, %v12127_v8 }
 0x5cb   : > { %v5445_v1 = vpop.f32.mrf.mxu3 }
 0x5cc   : > { %v5446_v63 = vadd.f32 %v5445_v1, %v5357_v26  ;;  %5309 = vmatmul.bf16.gmra.mxu1 %v11523_v19 }
 0x5ce   : > { %v12272_v7 = vadd.f32 %v5534_v35, %v5446_v63  ;;  %5398 = vmatmul.bf16.gmra.mxu2 %v11530_v5 }
 0x5d0   : > { %13257 = vst [vmem:[#allocation37_spill] sm:$0xff] %v12272_v7  ;;  %v5537_v25 = vpop.f32.mrf.mxu0  ;;  %5487 = vmatmul.bf16.gmra.mxu3 %v11536_v10 }
 0x5d1   : > { %v5359_v14 = vpop.f32.mrf.mxu2  ;;  %v5272_v15 = vpop.f32.mrf.mxu1 }
 0x5d2   : > { %v5360_v22 = vadd.f32 %v5359_v14, %v5271_v50  ;;  %v5273_v1 = vadd.f32 %v5272_v15, %v12127_v8 }
 0x5d3   : > { %5576 = vmatmul.bf16.gmra.mxu0 %v11543_v47  ;;  %v5448_v55 = vpop.f32.mrf.mxu3 }
 0x5d4   : > { %v5449_v33 = vadd.f32 %v5448_v55, %v5360_v22 }
 0x5d6   : > { %v12278_v23 = vadd.f32 %v5537_v25, %v5449_v33 }
 0x5d8   : > { %v5539_v35 = vpop.f32.mrf.mxu0 }
 0x5d9   : > { %v5361_v49 = vpop.f32.mrf.mxu2  ;;  %v5275_v63 = vpop.f32.mrf.mxu1 }
 0x5da   : > { %v5362_v26 = vadd.f32 %v5361_v49, %v5273_v1  ;;  %v5276_v50 = vadd.f32 %v5275_v63, %v12127_v8 }
 0x5db   : > { %v5450_v7 = vpop.f32.mrf.mxu3 }
 0x5dc   : > { %v5451_v61 = vadd.f32 %v5450_v7, %v5362_v26  ;;  %5590 = vmatmul.bf16.vlgmr.msra.gmra.mxu1 %v13105_v28 }
 0x5de   : > { %v12282_v10 = vadd.f32 %v5539_v35, %v5451_v61  ;;  %5679 = vmatmul.bf16.vlgmr.msra.gmra.mxu2 %v13106_v43 }
 0x5e0   : > { %v5542_v14 = vpop.f32.mrf.mxu0  ;;  %5768 = vmatmul.bf16.vlgmr.msra.gmra.mxu3 %v13107_v44 }
 0x5e1   : > { %v5364_v25 = vpop.f32.mrf.mxu2  ;;  %v5277_v15 = vpop.f32.mrf.mxu1 }
 0x5e2   : > { %v5365_v22 = vadd.f32 %v5364_v25, %v5276_v50  ;;  %v5278_v7 = vadd.f32 %v5277_v15, %v12127_v8 }
 0x5e3   : > { %5857 = vmatmul.bf16.vlgmr.msra.gmra.mxu0 %v13108_v53  ;;  %v5453_v55 = vpop.f32.mrf.mxu3 }
 0x5e4   : > { %v5454_v33 = vadd.f32 %v5453_v55, %v5365_v22 }
 0x5e6   : > { %v12288_v1 = vadd.f32 %v5542_v14, %v5454_v33 }
 0x5e8   : > { %v5544_v28 = vpop.f32.mrf.mxu0 }
 0x5e9   : > { %v5366_v35 = vpop.f32.mrf.mxu2  ;;  %v5280_v43 = vpop.f32.mrf.mxu1 }
 0x5ea   : > { %v5367_v49 = vadd.f32 %v5366_v35, %v5278_v7  ;;  %v5281_v53 = vadd.f32 %v5280_v43, %v12127_v8 }
 0x5eb   : > { %v5455_v26 = vpop.f32.mrf.mxu3 }
 0x5ec   : > { %v5456_v63 = vadd.f32 %v5455_v26, %v5367_v49  ;;  %5595 = vmatmul.bf16.gmra.mxu1 %v13110_v3 }
 0x5ee   : > { %v12292_v44 = vadd.f32 %v5544_v28, %v5456_v63  ;;  %5684 = vmatmul.bf16.gmra.mxu2 %v13111_v36 }
 0x5f0   : > { %v5547_v61 = vpop.f32.mrf.mxu0  ;;  %5773 = vmatmul.bf16.gmra.mxu3 %v13192_v42 }
 0x5f1   : > { %v5369_v50 = vpop.f32.mrf.mxu2  ;;  %v5282_v25 = vpop.f32.mrf.mxu1 }
 0x5f2   : > { %v5370_v14 = vadd.f32 %v5369_v50, %v5281_v53  ;;  %v5283_v3 = vadd.f32 %v5282_v25, %v12127_v8 }
 0x5f3   : > { %5862 = vmatmul.bf16.gmra.mxu0 %v13193_v62  ;;  %v5458_v22 = vpop.f32.mrf.mxu3 }
 0x5f4   : > { %v5459_v15 = vadd.f32 %v5458_v22, %v5370_v14 }
 0x5f6   : > { %v12298_v55 = vadd.f32 %v5547_v61, %v5459_v15 }
 0x5f8   : > { %v5549_v33 = vpop.f32.mrf.mxu0 }
 0x5f9   : > { %v5371_v7 = vpop.f32.mrf.mxu2  ;;  %v5285_v36 = vpop.f32.mrf.mxu1 }
 0x5fa   : > { %v5372_v28 = vadd.f32 %v5371_v7, %v5283_v3  ;;  %v5286_v62 = vadd.f32 %v5285_v36, %v12127_v8 }
 0x5fb   : > { %v5460_v35 = vpop.f32.mrf.mxu3 }
 0x5fc   : > { %v5461_v49 = vadd.f32 %v5460_v35, %v5372_v28  ;;  %5600 = vmatmul.bf16.gmra.mxu1 %v13195_v9 }
 0x5fe   : > { %v12302_v42 = vadd.f32 %v5549_v33, %v5461_v49  ;;  %5689 = vmatmul.bf16.gmra.mxu2 %v13196_v13 }
 0x600   : > { %v5552_v43 = vpop.f32.mrf.mxu0  ;;  %5778 = vmatmul.bf16.gmra.mxu3 %v13198_v56 }
 0x601   : > { %v5374_v26 = vpop.f32.mrf.mxu2  ;;  %v5287_v53 = vpop.f32.mrf.mxu1 }
 0x602   : > { %v5375_v63 = vadd.f32 %v5374_v26, %v5286_v62  ;;  %v5288_v9 = vadd.f32 %v5287_v53, %v12127_v8 }
 0x603   : > { %5867 = vmatmul.bf16.gmra.mxu0 %v13199_v60  ;;  %v5463_v61 = vpop.f32.mrf.mxu3 }
 0x604   : > { %v5464_v50 = vadd.f32 %v5463_v61, %v5375_v63 }
 0x606   : > { %v12308_v14 = vadd.f32 %v5552_v43, %v5464_v50 }
 0x608   : > { %v5554_v25 = vpop.f32.mrf.mxu0 }
 0x609   : > { %v5376_v22 = vpop.f32.mrf.mxu2  ;;  %v5290_v13 = vpop.f32.mrf.mxu1 }
 0x60a   : > { %v5377_v15 = vadd.f32 %v5376_v22, %v5288_v9  ;;  %v5291_v60 = vadd.f32 %v5290_v13, %v12127_v8 }
 0x60b   : > { %v5465_v3 = vpop.f32.mrf.mxu3 }
 0x60c   : > { %v5466_v33 = vadd.f32 %v5465_v3, %v5377_v15  ;;  %5605 = vmatmul.bf16.gmra.mxu1 %v13201_v12 }
 0x60e   : > { %v12312_v56 = vadd.f32 %v5554_v25, %v5466_v33  ;;  %5694 = vmatmul.bf16.gmra.mxu2 %v13202_v51 }
 0x610   : > { %v5557_v7 = vpop.f32.mrf.mxu0  ;;  %5783 = vmatmul.bf16.gmra.mxu3 %v13204_v37 }
 0x611   : > { %v5379_v28 = vpop.f32.mrf.mxu2  ;;  %v5292_v35 = vpop.f32.mrf.mxu1 }
 0x612   : > { %v5380_v36 = vadd.f32 %v5379_v28, %v5291_v60  ;;  %v5293_v12 = vadd.f32 %v5292_v35, %v12127_v8 }
 0x613   : > { %5872 = vmatmul.bf16.gmra.mxu0 %v13205_v27  ;;  %v5468_v49 = vpop.f32.mrf.mxu3 }
 0x614   : > { %v5469_v62 = vadd.f32 %v5468_v49, %v5380_v36 }
 0x616   : > { %v12318_v43 = vadd.f32 %v5557_v7, %v5469_v62 }
 0x618   : > { %v5559_v26 = vpop.f32.mrf.mxu0 }
 0x619   : > { %v5381_v63 = vpop.f32.mrf.mxu2  ;;  %v5295_v51 = vpop.f32.mrf.mxu1 }
 0x61a   : > { %v5382_v53 = vadd.f32 %v5381_v63, %v5293_v12  ;;  %v5296_v27 = vadd.f32 %v5295_v51, %v12127_v8 }
 0x61b   : > { %v5470_v61 = vpop.f32.mrf.mxu3 }
 0x61c   : > { %v5471_v50 = vadd.f32 %v5470_v61, %v5382_v53  ;;  %5610 = vmatmul.bf16.gmra.mxu1 %v13207_v45 }
 0x61e   : > { %v12322_v37 = vadd.f32 %v5559_v26, %v5471_v50  ;;  %5699 = vmatmul.bf16.gmra.mxu2 %v13208_v16 }
 0x620   : > { %v5562_v9 = vpop.f32.mrf.mxu0  ;;  %5788 = vmatmul.bf16.gmra.mxu3 %v13210_v20 }
 0x621   : > { %v5384_v25 = vpop.f32.mrf.mxu2  ;;  %v5297_v15 = vpop.f32.mrf.mxu1 }
 0x622   : > { %v5385_v22 = vadd.f32 %v5384_v25, %v5296_v27  ;;  %v5298_v45 = vadd.f32 %v5297_v15, %v12127_v8 }
 0x623   : > { %5877 = vmatmul.bf16.gmra.mxu0 %v13211_v31  ;;  %v5473_v13 = vpop.f32.mrf.mxu3 }
 0x624   : > { %v5474_v3 = vadd.f32 %v5473_v13, %v5385_v22 }
 0x626   : > { %v12328_v33 = vadd.f32 %v5562_v9, %v5474_v3 }
 0x628   : > { %v5564_v60 = vpop.f32.mrf.mxu0 }
 0x629   : > { %v5386_v7 = vpop.f32.mrf.mxu2  ;;  %v5300_v16 = vpop.f32.mrf.mxu1 }
 0x62a   : > { %v5387_v28 = vadd.f32 %v5386_v7, %v5298_v45  ;;  %v5301_v31 = vadd.f32 %v5300_v16, %v12127_v8 }
 0x62b   : > { %v5475_v36 = vpop.f32.mrf.mxu3 }
 0x62c   : > { %v5476_v35 = vadd.f32 %v5475_v36, %v5387_v28  ;;  %5615 = vmatmul.bf16.gmra.mxu1 %v13213_v21 }
 0x62e   : > { %v12332_v20 = vadd.f32 %v5564_v60, %v5476_v35  ;;  %5704 = vmatmul.bf16.gmra.mxu2 %v13214_v40 }
 0x630   : > { %v5567_v49 = vpop.f32.mrf.mxu0  ;;  %5793 = vmatmul.bf16.gmra.mxu3 %v13216_v34 }
 0x631   : > { %v5389_v62 = vpop.f32.mrf.mxu2  ;;  %v5302_v26 = vpop.f32.mrf.mxu1 }
 0x632   : > { %v5390_v12 = vadd.f32 %v5389_v62, %v5301_v31  ;;  %v5303_v21 = vadd.f32 %v5302_v26, %v12127_v8  ;;  %v13259_v62 = vld [vmem:[#allocation36_spill] sm:$0xff]  ;;  %v13260_v26 = vld [vmem:[#allocation38_spill] sm:$0xff] }
 0x633   : > { %5882 = vmatmul.bf16.gmra.mxu0 %v13217_v38  ;;  %v5478_v63 = vpop.f32.mrf.mxu3 }
 0x634   : > { %v5479_v53 = vadd.f32 %v5478_v63, %v5390_v12 }
 0x636   : > { %v12338_v51 = vadd.f32 %v5567_v49, %v5479_v53  ;;  %v13258_v49 = vld [vmem:[#allocation35_spill] sm:$0xff] }
 0x638   : > { %v5569_v61 = vpop.f32.mrf.mxu0 }
 0x639   : > { %v5391_v50 = vpop.f32.mrf.mxu2  ;;  %v5305_v40 = vpop.f32.mrf.mxu1 }
 0x63a   : > { %v5392_v27 = vadd.f32 %v5391_v50, %v5303_v21  ;;  %v5306_v38 = vadd.f32 %v5305_v40, %v12127_v8 }
 0x63b   : > { %v5480_v9 = vpop.f32.mrf.mxu3 }
 0x63c   : > { %v5481_v25 = vadd.f32 %v5480_v9, %v5392_v27  ;;  %5620 = vmatmul.bf16.gmra.mxu1 %v13219_v39 }
 0x63e   : > { %v12342_v34 = vadd.f32 %v5569_v61, %v5481_v25  ;;  %5709 = vmatmul.bf16.gmra.mxu2 %v13220_v18  ;;  %v13261_v61 = vld [vmem:[#allocation39_spill] sm:$0xff] }
 0x640   : > { %v5572_v22 = vpop.f32.mrf.mxu0  ;;  %5798 = vmatmul.bf16.gmra.mxu3 %v13222_v11 }
 0x641   : > { %v5394_v15 = vpop.f32.mrf.mxu2  ;;  %v5307_v3 = vpop.f32.mrf.mxu1 }
 0x642   : > { %v5395_v13 = vadd.f32 %v5394_v15, %v5306_v38  ;;  %v5308_v39 = vadd.f32 %v5307_v3, %v12127_v8 }
 0x643   : > { %5887 = vmatmul.bf16.gmra.mxu0 %v13223_v41  ;;  %v5483_v45 = vpop.f32.mrf.mxu3 }
 0x644   : > { %v5484_v60 = vadd.f32 %v5483_v45, %v5395_v13  ;;  %v13262_v45 = vld [vmem:[#allocation91_spill] sm:$0xff] }
 0x646   : > { %v12348_v7 = vadd.f32 %v5572_v22, %v5484_v60  ;;  %v12362_v60 = vperm.slane %v13262_v45, 3 }
 0x648   : > { %v5574_v28 = vpop.f32.mrf.mxu0 }
 0x649   : > { %v5396_v16 = vpop.f32.mrf.mxu2  ;;  %v5310_v18 = vpop.f32.mrf.mxu1 }
 0x64a   : > { %v5397_v36 = vadd.f32 %v5396_v16, %v5308_v39  ;;  %v5311_v41 = vadd.f32 %v5310_v18, %v12127_v8  ;;  %v13263_v39 = vld [vmem:[#allocation43_spill] sm:$0xff]  ;;  %v13264_v16 = vld [vmem:[#allocation44_spill] sm:$0xff] }
 0x64b   : > { %v5485_v35 = vpop.f32.mrf.mxu3 }
 0x64c   : > { %v5486_v31 = vadd.f32 %v5485_v35, %v5397_v36  ;;  %5625 = vmatmul.bf16.gmra.mxu1 %v13258_v49 }
 0x64e   : > { %v12352_v11 = vadd.f32 %v5574_v28, %v5486_v31  ;;  %5714 = vmatmul.bf16.gmra.mxu2 %v13259_v62  ;;  %v13266_v62 = vld [vmem:[#allocation49_spill] sm:$0xff] }
 0x650   : > { %v5577_v12 = vpop.f32.mrf.mxu0  ;;  %5803 = vmatmul.bf16.gmra.mxu3 %v13260_v26 }
 0x651   : > { %v5399_v63 = vpop.f32.mrf.mxu2  ;;  %v5312_v21 = vpop.f32.mrf.mxu1 }
 0x652   : > { %v5400_v53 = vadd.f32 %v5399_v63, %v5311_v41  ;;  %v5313_v9 = vadd.f32 %v5312_v21, %v12127_v8  ;;  %v13265_v8 = vld [vmem:[#allocation45_spill] sm:$0xff]  ;;  %v13267_v63 = vld [vmem:[#allocation99_spill] sm:$0xff] }
 0x653   : > { %5892 = vmatmul.bf16.gmra.mxu0 %v13261_v61  ;;  %v5488_v50 = vpop.f32.mrf.mxu3 }
 0x654   : > { %v5489_v27 = vadd.f32 %v5488_v50, %v5400_v53 }
 0x656   : > { %v12358_v40 = vadd.f32 %v5577_v12, %v5489_v27 }
 0x658   : > { %v5579_v25 = vpop.f32.mrf.mxu0 }
 0x659   : > { %v5401_v38 = vpop.f32.mrf.mxu2  ;;  %v5591_v15 = vpop.f32.mrf.mxu1 }
 0x65a   : > { %v5402_v22 = vadd.f32 %v5401_v38, %v5313_v9  ;;  %v5592_v36 = vadd.f32 %v5591_v15, %v12362_v60 }
 0x65b   : > { %v5490_v13 = vpop.f32.mrf.mxu3 }
 0x65c   : > { %v5491_v3 = vadd.f32 %v5490_v13, %v5402_v22  ;;  %5630 = vmatmul.bf16.gmra.mxu1 %v13263_v39  ;;  %v13268_v22 = vld [vmem:[#allocation52_spill] sm:$0xff]  ;;  %v13269_v13 = vld [vmem:[#allocation53_spill] sm:$0xff] }
 0x65e   : > { %v12365_v28 = vadd.f32 %v5579_v25, %v5491_v3  ;;  %5719 = vmatmul.bf16.gmra.mxu2 %v13264_v16  ;;  %v13270_v3 = vld [vmem:[#allocation30_spill] sm:$0xff] }
 0x660   : > { %v5858_v18 = vpop.f32.mrf.mxu0  ;;  %5808 = vmatmul.bf16.gmra.mxu3 %v13265_v8 }
 0x661   : > { %v5680_v35 = vpop.f32.mrf.mxu2  ;;  %v5593_v49 = vpop.f32.mrf.mxu1 }
 0x662   : > { %v5681_v31 = vadd.f32 %v5680_v35, %v5592_v36  ;;  %v5594_v21 = vadd.f32 %v5593_v49, %v12362_v60  ;;  %v13271_v36 = vld [vmem:[#allocation54_spill] sm:$0xff] }
 0x663   : > { %5897 = vmatmul.bf16.gmra.mxu0 %v13266_v62  ;;  %v5769_v41 = vpop.f32.mrf.mxu3 }
 0x664   : > { %v5770_v12 = vadd.f32 %v5769_v41, %v5681_v31  ;;  %v13272_v31 = vld [vmem:[#allocation56_spill] sm:$0xff] }
 0x666   : > { %v5859_v26 = vadd.f32 %v5858_v18, %v5770_v12  ;;  %v13273_v12 = vld [vmem:[#allocation62_spill] sm:$0xff] }
 0x668   : > { %v5939_v53 = vpack.c.bf16 %v5859_v26, %v13267_v63  ;;  %v5860_v61 = vpop.f32.mrf.mxu0 }
 0x669   : > { %v5682_v50 = vpop.f32.mrf.mxu2  ;;  %v5596_v9 = vpop.f32.mrf.mxu1 }
 0x66a   : > { %6003 = vst [vmem:[%s11759_s29 + $0x8] sm:$0xff] %v5939_v53  ;;  %v5683_v27 = vadd.f32 %v5682_v50, %v5594_v21  ;;  %v5597_v39 = vadd.f32 %v5596_v9, %v12362_v60 }
 0x66b   : > { %v5771_v25 = vpop.f32.mrf.mxu3 }
 0x66c   : > { %v5772_v38 = vadd.f32 %v5771_v25, %v5683_v27  ;;  %5635 = vmatmul.bf16.gmra.mxu1 %v13268_v22  ;;  %v13274_v25 = vld [vmem:[#allocation61_spill] sm:$0xff] }
 0x66d   : > { %v13275_v22 = vld [vmem:[#allocation65_spill] sm:$0xff] }
 0x66e   : > { %v5861_v15 = vadd.f32 %v5860_v61, %v5772_v38  ;;  %5724 = vmatmul.bf16.gmra.mxu2 %v13269_v13 }
 0x670   : > { %v5941_v45 = vpack.c.bf16 %v5861_v15, %v13270_v3  ;;  %v5863_v16 = vpop.f32.mrf.mxu0  ;;  %5813 = vmatmul.bf16.gmra.mxu3 %v13271_v36  ;;  %v13276_v15 = vld [vmem:[#allocation63_spill] sm:$0xff] }
 0x671   : > { %v5685_v18 = vpop.f32.mrf.mxu2  ;;  %v5598_v35 = vpop.f32.mrf.mxu1 }
 0x672   : > { %6005 = vst [vmem:[%s11759_s29 + $0x18] sm:$0xff] %v5941_v45  ;;  %v5686_v8 = vadd.f32 %v5685_v18, %v5597_v39  ;;  %v5599_v63 = vadd.f32 %v5598_v35, %v12362_v60  ;;  %v13277_v39 = vld [vmem:[#allocation69_spill] sm:$0xff] }
 0x673   : > { %5902 = vmatmul.bf16.gmra.mxu0 %v13272_v31  ;;  %v5774_v49 = vpop.f32.mrf.mxu3 }
 0x674   : > { %v5775_v62 = vadd.f32 %v5774_v49, %v5686_v8  ;;  %v13278_v8 = vld [vmem:[#allocation70_spill] sm:$0xff] }
 0x676   : > { %v5864_v41 = vadd.f32 %v5863_v16, %v5775_v62  ;;  %v13279_v62 = vld [vmem:[#allocation64_spill] sm:$0xff] }
 0x678   : > { %v5943_v26 = vpack.c.bf16 %v5864_v41, %v13273_v12  ;;  %v5865_v53 = vpop.f32.mrf.mxu0 }
 0x679   : > { %v5687_v21 = vpop.f32.mrf.mxu2  ;;  %v5601_v50 = vpop.f32.mrf.mxu1 }
 0x67a   : > { %6007 = vst [vmem:[%s11759_s29 + $0x28] sm:$0xff] %v5943_v26  ;;  %v5688_v61 = vadd.f32 %v5687_v21, %v5599_v63  ;;  %v5602_v3 = vadd.f32 %v5601_v50, %v12362_v60 }
 0x67b   : > { %v5776_v27 = vpop.f32.mrf.mxu3 }
 0x67c   : > { %v5777_v9 = vadd.f32 %v5776_v27, %v5688_v61  ;;  %5640 = vmatmul.bf16.gmra.mxu1 %v13274_v25 }
 0x67e   : > { %v5866_v38 = vadd.f32 %v5865_v53, %v5777_v9  ;;  %5729 = vmatmul.bf16.gmra.mxu2 %v13275_v22  ;;  %v13280_v9 = vld [vmem:[#allocation66_spill] sm:$0xff] }
 0x680   : > { %v5945_v13 = vpack.c.bf16 %v5866_v38, %v13276_v15  ;;  %v5868_v45 = vpop.f32.mrf.mxu0  ;;  %5818 = vmatmul.bf16.gmra.mxu3 %v13277_v39  ;;  %v13281_v15 = vld [vmem:[#allocation81_spill] sm:$0xff] }
 0x681   : > { %v5690_v16 = vpop.f32.mrf.mxu2  ;;  %v5603_v18 = vpop.f32.mrf.mxu1 }
 0x682   : > { %6009 = vst [vmem:[%s11759_s29 + $0x38] sm:$0xff] %v5945_v13  ;;  %v5691_v36 = vadd.f32 %v5690_v16, %v5602_v3  ;;  %v5604_v12 = vadd.f32 %v5603_v18, %v12362_v60 }
 0x683   : > { %5907 = vmatmul.bf16.gmra.mxu0 %v13278_v8  ;;  %v5779_v35 = vpop.f32.mrf.mxu3 }
 0x684   : > { %v5780_v31 = vadd.f32 %v5779_v35, %v5691_v36 }
 0x686   : > { %v5869_v49 = vadd.f32 %v5868_v45, %v5780_v31 }
 0x688   : > { %v5947_v41 = vpack.c.bf16 %v5869_v49, %v13279_v62  ;;  %v5870_v26 = vpop.f32.mrf.mxu0 }
 0x689   : > { %v5692_v63 = vpop.f32.mrf.mxu2  ;;  %v5606_v21 = vpop.f32.mrf.mxu1 }
 0x68a   : > { %6011 = vst [vmem:[%s11759_s29 + $0x48] sm:$0xff] %v5947_v41  ;;  %v5693_v53 = vadd.f32 %v5692_v63, %v5604_v12  ;;  %v5607_v38 = vadd.f32 %v5606_v21, %v12362_v60 }
 0x68b   : > { %v5781_v61 = vpop.f32.mrf.mxu3 }
 0x68c   : > { %v5782_v50 = vadd.f32 %v5781_v61, %v5693_v53  ;;  %5645 = vmatmul.bf16.gmra.mxu1 %v13250_v54  ;;  %v13283_v61 = vld [vmem:[#allocation12_spill] sm:$0xff] }
 0x68e   : > { %v5871_v27 = vadd.f32 %v5870_v26, %v5782_v50  ;;  %5734 = vmatmul.bf16.gmra.mxu2 %v13252_v57  ;;  %v13282_v26 = vld [vmem:[#allocation13_spill] sm:$0xff] }
 0x690   : > { %v5949_v25 = vpack.c.bf16 %v5871_v27, %v13280_v9  ;;  %v5873_v22 = vpop.f32.mrf.mxu0  ;;  %5823 = vmatmul.bf16.gmra.mxu3 %v13281_v15  ;;  %v13284_v9 = vld [vmem:[#allocation76_spill] sm:$0xff] }
 0x691   : > { %v5695_v13 = vpop.f32.mrf.mxu2  ;;  %v5608_v45 = vpop.f32.mrf.mxu1 }
 0x692   : > { %6013 = vst [vmem:[%s11759_s29 + $0x58] sm:$0xff] %v5949_v25  ;;  %v5696_v3 = vadd.f32 %v5695_v13, %v5607_v38  ;;  %v5609_v57 = vadd.f32 %v5608_v45, %v12362_v60 }
 0x693   : > { %5912 = vmatmul.bf16.gmra.mxu0 %v13254_v59  ;;  %v5784_v39 = vpop.f32.mrf.mxu3 }
 0x694   : > { %v5785_v16 = vadd.f32 %v5784_v39, %v5696_v3 }
 0x696   : > { %v5874_v54 = vadd.f32 %v5873_v22, %v5785_v16 }
 0x698   : > { %v5951_v36 = vpack.c.bf16 %v5874_v54, %v12214_v48  ;;  %v5875_v18 = vpop.f32.mrf.mxu0 }
 0x699   : > { %v5697_v8 = vpop.f32.mrf.mxu2  ;;  %v5611_v31 = vpop.f32.mrf.mxu1 }
 0x69a   : > { %6015 = vst [vmem:[%s11759_s29 + $0x68] sm:$0xff] %v5951_v36  ;;  %v5698_v35 = vadd.f32 %v5697_v8, %v5609_v57  ;;  %v5612_v48 = vadd.f32 %v5611_v31, %v12362_v60  ;;  %v13285_v36 = vld [vmem:[#allocation14_spill] sm:$0xff] }
 0x69b   : > { %v5786_v49 = vpop.f32.mrf.mxu3 }
 0x69c   : > { %v5787_v62 = vadd.f32 %v5786_v49, %v5698_v35  ;;  %5650 = vmatmul.bf16.gmra.mxu1 %v13186_v24 }
 0x69e   : > { %v5876_v41 = vadd.f32 %v5875_v18, %v5787_v62  ;;  %5739 = vmatmul.bf16.gmra.mxu2 %v11185_v6 }
 0x6a0   : > { %v5953_v59 = vpack.c.bf16 %v5876_v41, %v12218_v46  ;;  %v5878_v12 = vpop.f32.mrf.mxu0  ;;  %5828 = vmatmul.bf16.gmra.mxu3 %v13282_v26 }
 0x6a1   : > { %v5700_v63 = vpop.f32.mrf.mxu2  ;;  %v5613_v21 = vpop.f32.mrf.mxu1 }
 0x6a2   : > { %6017 = vst [vmem:[%s11759_s29 + $0x78] sm:$0xff] %v5953_v59  ;;  %v5701_v53 = vadd.f32 %v5700_v63, %v5612_v48  ;;  %v5614_v6 = vadd.f32 %v5613_v21, %v12362_v60  ;;  %v13287_v21 = vld [vmem:[#allocation15_spill] sm:$0xff] }
 0x6a3   : > { %5917 = vmatmul.bf16.gmra.mxu0 %v13283_v61  ;;  %v5789_v50 = vpop.f32.mrf.mxu3 }
 0x6a4   : > { %v5790_v27 = vadd.f32 %v5789_v50, %v5701_v53 }
 0x6a6   : > { %v5879_v24 = vadd.f32 %v5878_v12, %v5790_v27 }
 0x6a8   : > { %v5955_v25 = vpack.c.bf16 %v5879_v24, %v13284_v9  ;;  %v5880_v46 = vpop.f32.mrf.mxu0 }
 0x6a9   : > { %v5702_v38 = vpop.f32.mrf.mxu2  ;;  %v5616_v15 = vpop.f32.mrf.mxu1 }
 0x6aa   : > { %6019 = vst [vmem:[%s11759_s29 + $0x88] sm:$0xff] %v5955_v25  ;;  %v5703_v22 = vadd.f32 %v5702_v38, %v5614_v6  ;;  %v5617_v16 = vadd.f32 %v5616_v15, %v12362_v60 }
 0x6ab   : > { %v5791_v13 = vpop.f32.mrf.mxu3 }
 0x6ac   : > { %v5792_v3 = vadd.f32 %v5791_v13, %v5703_v22  ;;  %5655 = vmatmul.bf16.gmra.mxu1 %v11317_v58 }
 0x6ae   : > { %v5881_v45 = vadd.f32 %v5880_v46, %v5792_v3  ;;  %5744 = vmatmul.bf16.gmra.mxu2 %v11326_v52 }
 0x6b0   : > { %v5957_v39 = vpack.c.bf16 %v5881_v45, %v12252_v2  ;;  %v5883_v54 = vpop.f32.mrf.mxu0  ;;  %5833 = vmatmul.bf16.gmra.mxu3 %v13285_v36 }
 0x6b1   : > { %v5705_v57 = vpop.f32.mrf.mxu2  ;;  %v5618_v8 = vpop.f32.mrf.mxu1 }
 0x6b2   : > { %6021 = vst [vmem:[%s11759_s29 + $0x98] sm:$0xff] %v5957_v39  ;;  %v5706_v18 = vadd.f32 %v5705_v57, %v5617_v16  ;;  %v5619_v52 = vadd.f32 %v5618_v8, %v12362_v60  ;;  %v13289_v16 = vld [vmem:[#allocation16_spill] sm:$0xff] }
 0x6b3   : > { %5922 = vmatmul.bf16.gmra.mxu0 %v11364_v17  ;;  %v5794_v35 = vpop.f32.mrf.mxu3  ;;  %v13286_v17 = vld [vmem:[#allocation77_spill] sm:$0xff] }
 0x6b4   : > { %v5795_v31 = vadd.f32 %v5794_v35, %v5706_v18 }
 0x6b6   : > { %v5884_v58 = vadd.f32 %v5883_v54, %v5795_v31 }
 0x6b8   : > { %v5959_v49 = vpack.c.bf16 %v5884_v58, %v12258_v32  ;;  %v5885_v2 = vpop.f32.mrf.mxu0 }
 0x6b9   : > { %v5707_v62 = vpop.f32.mrf.mxu2  ;;  %v5621_v59 = vpop.f32.mrf.mxu1 }
 0x6ba   : > { %6023 = vst [vmem:[%s11759_s29 + $0xa8] sm:$0xff] %v5959_v49  ;;  %v5708_v41 = vadd.f32 %v5707_v62, %v5619_v52  ;;  %v5622_v32 = vadd.f32 %v5621_v59, %v12362_v60 }
 0x6bb   : > { %v5796_v48 = vpop.f32.mrf.mxu3 }
 0x6bc   : > { %v5797_v12 = vadd.f32 %v5796_v48, %v5708_v41  ;;  %5660 = vmatmul.bf16.gmra.mxu1 %v11423_v4 }
 0x6be   : > { %v5886_v26 = vadd.f32 %v5885_v2, %v5797_v12  ;;  %5749 = vmatmul.bf16.gmra.mxu2 %v11444_v29 }
 0x6c0   : > { %v5961_v63 = vpack.c.bf16 %v5886_v26, %v13286_v17  ;;  %v5888_v53 = vpop.f32.mrf.mxu0  ;;  %5838 = vmatmul.bf16.gmra.mxu3 %v13287_v21 }
 0x6c1   : > { %v5710_v61 = vpop.f32.mrf.mxu2  ;;  %v5623_v27 = vpop.f32.mrf.mxu1 }
 0x6c2   : > { %6025 = vst [vmem:[%s11759_s29 + $0xb8] sm:$0xff] %v5961_v63  ;;  %v5711_v50 = vadd.f32 %v5710_v61, %v5622_v32  ;;  %v5624_v29 = vadd.f32 %v5623_v27, %v12362_v60 }
 0x6c3   : > { %5927 = vmatmul.bf16.gmra.mxu0 %v11474_v0  ;;  %v5799_v24 = vpop.f32.mrf.mxu3  ;;  %v13288_v0 = vld [vmem:[#allocation37_spill] sm:$0xff] }
 0x6c4   : > { %v5800_v9 = vadd.f32 %v5799_v24, %v5711_v50 }
 0x6c6   : > { %v5889_v4 = vadd.f32 %v5888_v53, %v5800_v9 }
 0x6c8   : > { %v5963_v25 = vpack.c.bf16 %v5889_v4, %v12268_v30  ;;  %v5890_v6 = vpop.f32.mrf.mxu0 }
 0x6c9   : > { %v5712_v46 = vpop.f32.mrf.mxu2  ;;  %v5626_v22 = vpop.f32.mrf.mxu1 }
 0x6ca   : > { %6027 = vst [vmem:[%s11759_s29 + $0xc8] sm:$0xff] %v5963_v25  ;;  %v5713_v38 = vadd.f32 %v5712_v46, %v5624_v29  ;;  %v5627_v30 = vadd.f32 %v5626_v22, %v12362_v60 }
 0x6cb   : > { %v5801_v15 = vpop.f32.mrf.mxu3 }
 0x6cc   : > { %v5802_v13 = vadd.f32 %v5801_v15, %v5713_v38  ;;  %5665 = vmatmul.bf16.gmra.mxu1 %v11523_v19 }
 0x6ce   : > { %v5891_v3 = vadd.f32 %v5890_v6, %v5802_v13  ;;  %5754 = vmatmul.bf16.gmra.mxu2 %v11530_v5 }
 0x6d0   : > { %v5965_v45 = vpack.c.bf16 %v5891_v3, %v13288_v0  ;;  %v5893_v39 = vpop.f32.mrf.mxu0  ;;  %5843 = vmatmul.bf16.gmra.mxu3 %v13289_v16 }
 0x6d1   : > { %v5715_v54 = vpop.f32.mrf.mxu2  ;;  %v5628_v57 = vpop.f32.mrf.mxu1 }
 0x6d2   : > { %6029 = vst [vmem:[%s11759_s29 + $0xd8] sm:$0xff] %v5965_v45  ;;  %v5716_v36 = vadd.f32 %v5715_v54, %v5627_v30  ;;  %v5629_v35 = vadd.f32 %v5628_v57, %v12362_v60 }
 0x6d3   : > { %5932 = vmatmul.bf16.gmra.mxu0 %v11543_v47  ;;  %v5804_v18 = vpop.f32.mrf.mxu3 }
 0x6d4   : > { %v5805_v8 = vadd.f32 %v5804_v18, %v5716_v36 }
 0x6d6   : > { %v5894_v19 = vadd.f32 %v5893_v39, %v5805_v8 }
 0x6d8   : > { %v5967_v5 = vpack.c.bf16 %v5894_v19, %v12278_v23  ;;  %v5895_v31 = vpop.f32.mrf.mxu0 }
 0x6d9   : > { %v5717_v58 = vpop.f32.mrf.mxu2  ;;  %v5631_v52 = vpop.f32.mrf.mxu1 }
 0x6da   : > { %6031 = vst [vmem:[%s11759_s29 + $0xe8] sm:$0xff] %v5967_v5  ;;  %v5718_v49 = vadd.f32 %v5717_v58, %v5629_v35  ;;  %v5632_v47 = vadd.f32 %v5631_v52, %v12362_v60 }
 0x6db   : > { %v5806_v2 = vpop.f32.mrf.mxu3 }
 0x6dc   : > { %v5807_v62 = vadd.f32 %v5806_v2, %v5718_v49 }
 0x6de   : > { %v5896_v41 = vadd.f32 %v5895_v31, %v5807_v62 }
 0x6e0   : > { %v5969_v59 = vpack.c.bf16 %v5896_v41, %v12282_v10  ;;  %v5898_v48 = vpop.f32.mrf.mxu0 }
 0x6e1   : > { %v5720_v12 = vpop.f32.mrf.mxu2  ;;  %v5633_v23 = vpop.f32.mrf.mxu1 }
 0x6e2   : > { %6033 = vst [vmem:[%s11759_s29 + $0xf8] sm:$0xff] %v5969_v59  ;;  %v5721_v26 = vadd.f32 %v5720_v12, %v5632_v47  ;;  %v5634_v21 = vadd.f32 %v5633_v23, %v12362_v60 }
 0x6e3   : > { %v5809_v17 = vpop.f32.mrf.mxu3 }
 0x6e4   : > { %v5810_v63 = vadd.f32 %v5809_v17, %v5721_v26 }
 0x6e6   : > { %v5899_v32 = vadd.f32 %v5898_v48, %v5810_v63 }
 0x6e8   : > { %v5971_v53 = vpack.c.bf16 %v5899_v32, %v12288_v1  ;;  %v5900_v61 = vpop.f32.mrf.mxu0 }
 0x6e9   : > { %v5722_v50 = vpop.f32.mrf.mxu2  ;;  %v5636_v10 = vpop.f32.mrf.mxu1 }
 0x6ea   : > { %6035 = vst [vmem:[%s11759_s29 + $0x108] sm:$0xff] %v5971_v53  ;;  %v5723_v27 = vadd.f32 %v5722_v50, %v5634_v21  ;;  %v5637_v29 = vadd.f32 %v5636_v10, %v12362_v60 }
 0x6eb   : > { %v5811_v24 = vpop.f32.mrf.mxu3 }
 0x6ec   : > { %v5812_v9 = vadd.f32 %v5811_v24, %v5723_v27 }
 0x6ee   : > { %v5901_v4 = vadd.f32 %v5900_v61, %v5812_v9 }
 0x6f0   : > { %v5973_v25 = vpack.c.bf16 %v5901_v4, %v12292_v44  ;;  %v5903_v6 = vpop.f32.mrf.mxu0 }
 0x6f1   : > { %v5725_v46 = vpop.f32.mrf.mxu2  ;;  %v5638_v1 = vpop.f32.mrf.mxu1 }
 0x6f2   : > { %6037 = vst [vmem:[%s11759_s29 + $0x118] sm:$0xff] %v5973_v25  ;;  %v5726_v38 = vadd.f32 %v5725_v46, %v5637_v29  ;;  %v5639_v0 = vadd.f32 %v5638_v1, %v12362_v60 }
 0x6f3   : > { %v5814_v22 = vpop.f32.mrf.mxu3 }
 0x6f4   : > { %v5815_v15 = vadd.f32 %v5814_v22, %v5726_v38 }
 0x6f6   : > { %v5904_v13 = vadd.f32 %v5903_v6, %v5815_v15 }
 0x6f8   : > { %v5975_v3 = vpack.c.bf16 %v5904_v13, %v12298_v55  ;;  %v5905_v45 = vpop.f32.mrf.mxu0 }
 0x6f9   : > { %v5727_v30 = vpop.f32.mrf.mxu2  ;;  %v5641_v44 = vpop.f32.mrf.mxu1 }
 0x6fa   : > { %6039 = vst [vmem:[%s11759_s29 + $0x128] sm:$0xff] %v5975_v3  ;;  %v5728_v39 = vadd.f32 %v5727_v30, %v5639_v0  ;;  %v5642_v18 = vadd.f32 %v5641_v44, %v12362_v60 }
 0x6fb   : > { %v5816_v16 = vpop.f32.mrf.mxu3 }
 0x6fc   : > { %v5817_v54 = vadd.f32 %v5816_v16, %v5728_v39 }
 0x6fe   : > { %v5906_v36 = vadd.f32 %v5905_v45, %v5817_v54 }
 0x700   : > { %v5977_v57 = vpack.c.bf16 %v5906_v36, %v12302_v42  ;;  %v5908_v8 = vpop.f32.mrf.mxu0 }
 0x701   : > { %v5730_v19 = vpop.f32.mrf.mxu2  ;;  %v5643_v55 = vpop.f32.mrf.mxu1 }
 0x702   : > { %6041 = vst [vmem:[%s11759_s29 + $0x138] sm:$0xff] %v5977_v57  ;;  %v5731_v5 = vadd.f32 %v5730_v19, %v5642_v18  ;;  %v5644_v52 = vadd.f32 %v5643_v55, %v12362_v60 }
 0x703   : > { %v5819_v35 = vpop.f32.mrf.mxu3 }
 0x704   : > { %v5820_v31 = vadd.f32 %v5819_v35, %v5731_v5 }
 0x706   : > { %v5909_v58 = vadd.f32 %v5908_v8, %v5820_v31 }
 0x708   : > { %v5979_v49 = vpack.c.bf16 %v5909_v58, %v12308_v14  ;;  %v5910_v2 = vpop.f32.mrf.mxu0 }
 0x709   : > { %v5732_v62 = vpop.f32.mrf.mxu2  ;;  %v5646_v42 = vpop.f32.mrf.mxu1 }
 0x70a   : > { %6043 = vst [vmem:[%s11759_s29 + $0x148] sm:$0xff] %v5979_v49  ;;  %v5733_v41 = vadd.f32 %v5732_v62, %v5644_v52  ;;  %v5647_v26 = vadd.f32 %v5646_v42, %v12362_v60 }
 0x70b   : > { %v5821_v59 = vpop.f32.mrf.mxu3 }
 0x70c   : > { %v5822_v47 = vadd.f32 %v5821_v59, %v5733_v41 }
 0x70e   : > { %v5911_v48 = vadd.f32 %v5910_v2, %v5822_v47 }
 0x710   : > { %v5981_v12 = vpack.c.bf16 %v5911_v48, %v12312_v56  ;;  %v5913_v23 = vpop.f32.mrf.mxu0 }
 0x711   : > { %v5735_v17 = vpop.f32.mrf.mxu2  ;;  %v5648_v14 = vpop.f32.mrf.mxu1 }
 0x712   : > { %6045 = vst [vmem:[%s11759_s29 + $0x158] sm:$0xff] %v5981_v12  ;;  %v5736_v63 = vadd.f32 %v5735_v17, %v5647_v26  ;;  %v5649_v50 = vadd.f32 %v5648_v14, %v12362_v60 }
 0x713   : > { %v5824_v32 = vpop.f32.mrf.mxu3 }
 0x714   : > { %v5825_v53 = vadd.f32 %v5824_v32, %v5736_v63 }
 0x716   : > { %v5914_v21 = vadd.f32 %v5913_v23, %v5825_v53 }
 0x718   : > { %v5983_v61 = vpack.c.bf16 %v5914_v21, %v12318_v43  ;;  %v5915_v27 = vpop.f32.mrf.mxu0 }
 0x719   : > { %v5737_v10 = vpop.f32.mrf.mxu2  ;;  %v5651_v56 = vpop.f32.mrf.mxu1 }
 0x71a   : > { %6047 = vst [vmem:[%s11759_s29 + $0x168] sm:$0xff] %v5983_v61  ;;  %v5738_v24 = vadd.f32 %v5737_v10, %v5649_v50  ;;  %v5652_v6 = vadd.f32 %v5651_v56, %v12362_v60 }
 0x71b   : > { %v5826_v9 = vpop.f32.mrf.mxu3 }
 0x71c   : > { %v5827_v4 = vadd.f32 %v5826_v9, %v5738_v24 }
 0x71e   : > { %v5916_v25 = vadd.f32 %v5915_v27, %v5827_v4 }
 0x720   : > { %v5985_v29 = vpack.c.bf16 %v5916_v25, %v12322_v37  ;;  %v5918_v46 = vpop.f32.mrf.mxu0 }
 0x721   : > { %v5740_v38 = vpop.f32.mrf.mxu2  ;;  %v5653_v43 = vpop.f32.mrf.mxu1 }
 0x722   : > { %6049 = vst [vmem:[%s11759_s29 + $0x178] sm:$0xff] %v5985_v29  ;;  %v5741_v1 = vadd.f32 %v5740_v38, %v5652_v6  ;;  %v5654_v0 = vadd.f32 %v5653_v43, %v12362_v60 }
 0x723   : > { %v5829_v22 = vpop.f32.mrf.mxu3 }
 0x724   : > { %v5830_v15 = vadd.f32 %v5829_v22, %v5741_v1 }
 0x726   : > { %v5919_v13 = vadd.f32 %v5918_v46, %v5830_v15 }
 0x728   : > { %v5987_v3 = vpack.c.bf16 %v5919_v13, %v12328_v33  ;;  %v5920_v45 = vpop.f32.mrf.mxu0 }
 0x729   : > { %v5742_v30 = vpop.f32.mrf.mxu2  ;;  %v5656_v37 = vpop.f32.mrf.mxu1 }
 0x72a   : > { %6051 = vst [vmem:[%s11759_s29 + $0x188] sm:$0xff] %v5987_v3  ;;  %v5743_v39 = vadd.f32 %v5742_v30, %v5654_v0  ;;  %v5657_v57 = vadd.f32 %v5656_v37, %v12362_v60 }
 0x72b   : > { %v5831_v44 = vpop.f32.mrf.mxu3 }
 0x72c   : > { %v5832_v16 = vadd.f32 %v5831_v44, %v5743_v39 }
 0x72e   : > { %v5921_v54 = vadd.f32 %v5920_v45, %v5832_v16 }
 0x730   : > { %v5989_v36 = vpack.c.bf16 %v5921_v54, %v12332_v20  ;;  %v5923_v18 = vpop.f32.mrf.mxu0 }
 0x731   : > { %v5745_v8 = vpop.f32.mrf.mxu2  ;;  %v5658_v33 = vpop.f32.mrf.mxu1 }
 0x732   : > { %6053 = vst [vmem:[%s11759_s29 + $0x198] sm:$0xff] %v5989_v36  ;;  %v5746_v19 = vadd.f32 %v5745_v8, %v5657_v57  ;;  %v5659_v58 = vadd.f32 %v5658_v33, %v12362_v60 }
 0x733   : > { %v5834_v5 = vpop.f32.mrf.mxu3 }
 0x734   : > { %v5835_v55 = vadd.f32 %v5834_v5, %v5746_v19 }
 0x736   : > { %v5924_v35 = vadd.f32 %v5923_v18, %v5835_v55 }
 0x738   : > { %v5991_v31 = vpack.c.bf16 %v5924_v35, %v12338_v51  ;;  %v5925_v49 = vpop.f32.mrf.mxu0 }
 0x739   : > { %v5747_v52 = vpop.f32.mrf.mxu2  ;;  %v5661_v20 = vpop.f32.mrf.mxu1 }
 0x73a   : > { %6055 = vst [vmem:[%s11759_s29 + $0x1a8] sm:$0xff] %v5991_v31  ;;  %v5748_v2 = vadd.f32 %v5747_v52, %v5659_v58  ;;  %v5662_v47 = vadd.f32 %v5661_v20, %v12362_v60 }
 0x73b   : > { %v5836_v62 = vpop.f32.mrf.mxu3 }
 0x73c   : > { %v5837_v41 = vadd.f32 %v5836_v62, %v5748_v2 }
 0x73e   : > { %v5926_v42 = vadd.f32 %v5925_v49, %v5837_v41 }
 0x740   : > { %v5993_v59 = vpack.c.bf16 %v5926_v42, %v12342_v34  ;;  %v5928_v48 = vpop.f32.mrf.mxu0 }
 0x741   : > { %v5750_v12 = vpop.f32.mrf.mxu2  ;;  %v5663_v51 = vpop.f32.mrf.mxu1 }
 0x742   : > { %6057 = vst [vmem:[%s11759_s29 + $0x1b8] sm:$0xff] %v5993_v59  ;;  %v5751_v26 = vadd.f32 %v5750_v12, %v5662_v47  ;;  %v5664_v32 = vadd.f32 %v5663_v51, %v12362_v60 }
 0x743   : > { %v5839_v23 = vpop.f32.mrf.mxu3 }
 0x744   : > { %v5840_v17 = vadd.f32 %v5839_v23, %v5751_v26 }
 0x746   : > { %v5929_v63 = vadd.f32 %v5928_v48, %v5840_v17 }
 0x748   : > { %v5995_v14 = vpack.c.bf16 %v5929_v63, %v12348_v7  ;;  %v5930_v53 = vpop.f32.mrf.mxu0 }
 0x749   : > { %v5752_v21 = vpop.f32.mrf.mxu2  ;;  %v5666_v50 = vpop.f32.mrf.mxu1 }
 0x74a   : > { %6059 = vst [vmem:[%s11759_s29 + $0x1c8] sm:$0xff] %v5995_v14  ;;  %v5753_v34 = vadd.f32 %v5752_v21, %v5664_v32  ;;  %v5667_v56 = vadd.f32 %v5666_v50, %v12362_v60 }
 0x74b   : > { %v5841_v61 = vpop.f32.mrf.mxu3 }
 0x74c   : > { %v5842_v27 = vadd.f32 %v5841_v61, %v5753_v34 }
 0x74e   : > { %v5931_v10 = vadd.f32 %v5930_v53, %v5842_v27 }
 0x750   : > { %v5997_v24 = vpack.c.bf16 %v5931_v10, %v12352_v11  ;;  %v5933_v4 = vpop.f32.mrf.mxu0 }
 0x751   : > { %v5755_v9 = vpop.f32.mrf.mxu2  ;;  %v5668_v6 = vpop.f32.mrf.mxu1 }
 0x752   : > { %6061 = vst [vmem:[%s11759_s29 + $0x1d8] sm:$0xff] %v5997_v24  ;;  %v5756_v7 = vadd.f32 %v5755_v9, %v5667_v56  ;;  %v5669_v1 = vadd.f32 %v5668_v6, %v12362_v60 }
 0x753   : > { %v5844_v25 = vpop.f32.mrf.mxu3 }
 0x754   : > { %v5845_v29 = vadd.f32 %v5844_v25, %v5756_v7 }
 0x756   : > { %v5934_v46 = vadd.f32 %v5933_v4, %v5845_v29 }
 0x758   : > { %v5999_v38 = vpack.c.bf16 %v5934_v46, %v12358_v40  ;;  %v5935_v13 = vpop.f32.mrf.mxu0 }
 0x759   : > { %v5757_v43 = vpop.f32.mrf.mxu2 }
 0x75a   : > { %6063 = vst [vmem:[%s11759_s29 + $0x1e8] sm:$0xff] %v5999_v38  ;;  %v5758_v11 = vadd.f32 %v5757_v43, %v5669_v1 }
 0x75b   : > { %v5846_v22 = vpop.f32.mrf.mxu3 }
 0x75c   : > { %v5847_v15 = vadd.f32 %v5846_v22, %v5758_v11 }
 0x75e   : > { %v5936_v3 = vadd.f32 %v5935_v13, %v5847_v15 }
 0x760   : > { %v6001_v40 = vpack.c.bf16 %v5936_v3, %v12365_v28 }
 0x762   : > { %6065 = vst [vmem:[%s11759_s29 + $0x1f8] sm:$0xff] %v6001_v40 }
 0x763   : > { %7724 = shalt.err (!%p7721_p3)
}
 0x764   : > { %s7762_s16 = smov 256   ;;  %s7763_s29 = smov 16  }
 0x765   : > { %7586 = dma.vmem_to_hbm [thread:$0]  (%p7852_p5), %s6081_s22, 8192, %s6083_s23, %s6067_s13, %s7762_s16, %s7762_s16, %s7763_s29  }
 0x766 PF: > { %p7592_p4 = scmp.ge.s32.totalorder %s7759_s12, 2  ;;  %s6097_s21 = sand.u32 1, %s7747_s30  }
 0x767   : > { %s6098_s26 = scalar_lea.sflag [#allocation3], %s6097_s21 }
 0x768   : > { %p7589_p7 = pnand %p7592_p4, %p7856_p6 }
 0x76a   : > { %p7590_p8 = pneg %p7589_p7 }
 0x76c   : > { %7742 = dma.done.wait (%p7590_p8), %s6098_s26, 8192  }
 0x76d   : > { %7744 = vsyncadd (%p7590_p8), %s6098_s26, 4294959104  ;;  %p19_p9 = scmp.ge.s32.totalorder %s7839_s15, 4   ;;  %s13290_s30 = smov %s7751_s10 }
 0x76e   : > { %s13291_s10 = smov %s7755_s11  ;;  %s13292_s11 = smov %s7850_s18 }
 0x76f   : > { %s13293_s12 = smov %s7839_s15  ;;  %21 = sbr.rel (!%p19_p9) target bundleno = 3 (0x3), region = 91 }
 0x774   :  { %6104 = vsyncpa [#allocation3], 1 }
 0x775   :  { %6106 = vsyncpa [#allocation3 + $0x1], 1 }

</bundles_post_ra>
